<compile_context>
chip_gen: v5e
topology: v5e:2x2
jax: 0.10.0
libtpu: 0.0.40
codegen_flags: <defaults>
</compile_context>

<pallas_src>
import functools

import jax
import jax.numpy as jnp
from jax import lax
from jax.experimental import pallas as pl
from jax.experimental.pallas import tpu as pltpu

BN_EPS = 1e-5


def _round_up(x, m):
    return (x + m - 1) // m * m


def _vmem_limit_bytes():
    cap = 128 * 1024 * 1024
    try:
        cap = int(getattr(pltpu.get_tpu_info(), "vmem_capacity_bytes", cap))
    except Exception:
        pass
    # ~3/4 of physical VMEM: ~96 MiB on v5e/v6e (128 MiB), ~48 MiB on v7x (64 MiB).
    return min(max(cap * 3 // 4, 32 * 1024 * 1024), 100 * 1024 * 1024)


# ------------------------------ fused kernel ---------------------------------

def _upscale_fused_kernel(x2_ref, x1_ref, w1_ref, w2t_ref, b1_ref, b2_ref,
                          o_ref, xpad_ref, h1_ref, col_ref, *,
                          H, W, Wp, c, cout, uh, uw, dy0, dx0):
    """Per batch element: pad+concat (in VMEM) -> conv1 -> conv2 -> NCHW out.

    x2_ref : (1, H,  W,  c)   bf16  skip connection (NHWC block)
    x1_ref : (1, uh, uw, c)   bf16  upsampled x1 (NHWC block)
    w1_ref : (9*2c, cout)     bf16  conv1 weights, tap-major, BN scale folded
    w2t_ref: (cout, 9*cout)   bf16  conv2 weights, transposed, BN scale folded
    b1_ref : (1, cout)  f32   conv1 folded bias (row broadcast)
    b2_ref : (cout, 1)  f32   conv2 folded bias (lane broadcast)
    o_ref  : (1, cout, H*W)   f32   channel-major (== flat NCHW) output
    xpad_ref: (H+2, Wp, 2c)   bf16  padded concatenated conv1 input (scratch)
    h1_ref  : (H+2, Wp, cout) bf16  padded conv1 output / conv2 input (scratch)
    col_ref : (H*W, 9*2c)     bf16  shared im2col staging buffer (scratch)
    """
    dt = jnp.bfloat16
    cin = 2 * c
    S = H * W
    taps = [(kh, kw) for kh in range(3) for kw in range(3)]

    # ---- 1. build the zero-padded, channel-concatenated conv1 input in VMEM
    # (this is the fused F.pad + torch.cat([x2, x1], dim=1)).
    # Halo-only zeroing; the interior is fully overwritten below.
    xpad_ref[0:1, :, :] = jnp.zeros((1, Wp, cin), dt)
    xpad_ref[H + 1:H + 2, :, :] = jnp.zeros((1, Wp, cin), dt)
    xpad_ref[:, 0:1, :] = jnp.zeros((H + 2, 1, cin), dt)
    xpad_ref[:, W + 1:Wp, :] = jnp.zeros((H + 2, Wp - W - 1, cin), dt)
    xpad_ref[1:H + 1, 1:W + 1, 0:c] = x2_ref[0]
    if (uh, uw) != (H, W):
        # region not covered by the up-sampled x1 must stay zero (F.pad).
        xpad_ref[1:H + 1, 1:W + 1, c:cin] = jnp.zeros((H, W, c), dt)
    xpad_ref[1 + dy0:1 + dy0 + uh, 1 + dx0:1 + dx0 + uw, c:cin] = x1_ref[0]

    # ---- 2. conv1 + folded BN + ReLU as a single K = 9*cin im2col matmul.
    xp = xpad_ref[...]
    for t, (kh, kw) in enumerate(taps):
        win = xp[kh:kh + H, kw:kw + W, :].reshape(S, cin)
        col_ref[:, t * cin:(t + 1) * cin] = win
    acc1 = jnp.dot(col_ref[...], w1_ref[...],
                   preferred_element_type=jnp.float32)
    y1 = jnp.maximum(acc1 + b1_ref[...], 0.0)
    y1 = y1.astype(dt).reshape(H, W, cout)

    # ---- 3. stage conv1 output in the padded VMEM scratch (never HBM).
    h1_ref[0:1, :, :] = jnp.zeros((1, Wp, cout), dt)
    h1_ref[H + 1:H + 2, :, :] = jnp.zeros((1, Wp, cout), dt)
    h1_ref[:, 0:1, :] = jnp.zeros((H + 2, 1, cout), dt)
    h1_ref[:, W + 1:Wp, :] = jnp.zeros((H + 2, Wp - W - 1, cout), dt)
    h1_ref[1:H + 1, 1:W + 1, :] = y1

    # ---- 4. conv2: im2col again (reusing col_ref), then the NT matmul
    # (cout, K2) x (S, K2)^T so the result is channel-major / lane-dense.
    hp = h1_ref[...]
    for t, (kh, kw) in enumerate(taps):
        win = hp[kh:kh + H, kw:kw + W, :].reshape(S, cout)
        col_ref[:, t * cout:(t + 1) * cout] = win
    col2 = col_ref[:, 0:9 * cout]
    acc2 = lax.dot_general(w2t_ref[...], col2,
                           dimension_numbers=(((1,), (1,)), ((), ())),
                           preferred_element_type=jnp.float32)
    o_ref[0] = jnp.maximum(acc2 + b2_ref[...], 0.0).astype(o_ref.dtype)


def upscale_fused(x2_nhwc, x1up_nhwc, w1, w2t, b1, b2, *, H, W, cout):
    B, _, _, c = x2_nhwc.shape
    uh, uw = x1up_nhwc.shape[1], x1up_nhwc.shape[2]
    assert x1up_nhwc.shape[-1] == c, "cat([x2, x1]) needs equal channel halves"
    dy, dx = H - uh, W - uw
    assert dy >= 0 and dx >= 0
    dy0, dx0 = dy // 2, dx // 2
    Wp = _round_up(W + 2, 8)         # sublane-aligned padded row stride
    cin = 2 * c
    S = H * W

    kernel = functools.partial(
        _upscale_fused_kernel, H=H, W=W, Wp=Wp, c=c, cout=cout,
        uh=uh, uw=uw, dy0=dy0, dx0=dx0)

    return pl.pallas_call(
        kernel,
        out_shape=jax.ShapeDtypeStruct((B, cout, S), jnp.float32),
        grid_spec=pltpu.PrefetchScalarGridSpec(
            num_scalar_prefetch=0,
            grid=(B,),
            in_specs=[
                pl.BlockSpec((1, H, W, c), lambda b: (b, 0, 0, 0)),
                pl.BlockSpec((1, uh, uw, c), lambda b: (b, 0, 0, 0)),
                pl.BlockSpec((9 * cin, cout), lambda b: (0, 0)),
                pl.BlockSpec((cout, 9 * cout), lambda b: (0, 0)),
                pl.BlockSpec((1, cout), lambda b: (0, 0)),
                pl.BlockSpec((cout, 1), lambda b: (0, 0)),
            ],
            out_specs=pl.BlockSpec((1, cout, S), lambda b: (b, 0, 0)),
            scratch_shapes=[
                pltpu.VMEM((H + 2, Wp, cin), jnp.bfloat16),   # padded conv1 in
                pltpu.VMEM((H + 2, Wp, cout), jnp.bfloat16),  # padded conv1 out
                pltpu.VMEM((S, 9 * cin), jnp.bfloat16),       # shared im2col
            ],
        ),
        compiler_params=pltpu.CompilerParams(
            dimension_semantics=("parallel",),
            vmem_limit_bytes=_vmem_limit_bytes()),
    )(x2_nhwc, x1up_nhwc, w1, w2t, b1, b2)


# ------------------------------ forward pass ---------------------------------

def upscale_apply(params, x1_nchw, x2_nchw):
    """UpScale.forward: up(x1) -> pad -> cat([x2, x1], ch) -> X2Conv."""
    B, c, h, w = x1_nchw.shape
    H, W = x2_nchw.shape[2], x2_nchw.shape[3]
    cout = params["b1"].shape[-1]

    # ConvTranspose2d(c, c, 2, stride=2) is non-overlapping -> a tiny matmul.
    # Kept as plain XLA (not worth a dedicated pallas_call); the sub-pixel
    # interleave and bf16 cast fuse into one small op.
    x1 = jnp.transpose(x1_nchw, (0, 2, 3, 1))                     # (B,h,w,c)
    up = jnp.einsum("bhwi,iokl->bhkwlo", x1, params["up_w"])
    up = up.reshape(B, 2 * h, 2 * w, c) + params["up_b"]
    x1up = up.astype(jnp.bfloat16)
    x2 = jnp.transpose(x2_nchw, (0, 2, 3, 1)).astype(jnp.bfloat16)

    out = upscale_fused(x2, x1up, params["w1"], params["w2t"],
                        params["b1"], params["b2"], H=H, W=W, cout=cout)
    # Kernel already emits channel-major (B, Cout, H*W): NCHW is a free reshape.
    return out.reshape(B, cout, H, W)


# --------------------------- params (init + prep) ----------------------------

def _init_bn(key, c):
    k1, k2, k3, k4 = jax.random.split(key, 4)
    gamma = 1.0 + 0.1 * jax.random.normal(k1, (c,), jnp.float32)
    beta = 0.1 * jax.random.normal(k2, (c,), jnp.float32)
    mean = 0.1 * jax.random.normal(k3, (c,), jnp.float32)
    var = 0.5 + jax.random.uniform(k4, (c,), jnp.float32)
    return gamma, beta, mean, var


def init_raw_params(key, in_ch, out_ch):
    """PyTorch-layout parameters of UpScale(in_ch, out_ch)."""
    c = in_ch // 2
    k = jax.random.split(key, 8)

    def conv_w(kk, cout, cin, s):
        return jax.random.normal(kk, (cout, cin, s, s), jnp.float32) / jnp.sqrt(
            float(cin * s * s))

    return {
        # ConvTranspose2d weight layout: (in, out, kh, kw)
        "up_w": jax.random.normal(k[0], (c, c, 2, 2), jnp.float32) / jnp.sqrt(4.0 * c),
        "up_b": 0.01 * jax.random.normal(k[1], (c,), jnp.float32),
        "c1_w": conv_w(k[2], out_ch, in_ch, 3),
        "c1_b": 0.01 * jax.random.normal(k[3], (out_ch,), jnp.float32),
        "c1_bn": _init_bn(k[4], out_ch),
        "c2_w": conv_w(k[5], out_ch, out_ch, 3),
        "c2_b": 0.01 * jax.random.normal(k[6], (out_ch,), jnp.float32),
        "c2_bn": _init_bn(k[7], out_ch),
    }


def prepare_params(raw):
    """One-time weight transforms: BN(eval) scale folded into bf16 conv
    weights, tap-major (9*Cin, Cout) layout for conv1, transposed
    (Cout, 9*Cout) layout for conv2 (feeds the kernel's NT matmul)."""
    def fold(w, b, bn):
        gamma, beta, mean, var = bn
        scale = gamma / jnp.sqrt(var + BN_EPS)                    # (cout,)
        bias = (b - mean) * scale + beta                          # (cout,)
        cout_, cin_ = w.shape[0], w.shape[1]
        wf = jnp.transpose(w, (2, 3, 1, 0)).reshape(9 * cin_, cout_)
        wf = (wf * scale[None, :]).astype(jnp.bfloat16)           # fold scale
        return wf, bias.astype(jnp.float32)

    w1, bias1 = fold(raw["c1_w"], raw["c1_b"], raw["c1_bn"])
    w2, bias2 = fold(raw["c2_w"], raw["c2_b"], raw["c2_bn"])
    cout = bias1.shape[0]
    return {
        "up_w": raw["up_w"], "up_b": raw["up_b"],
        "w1": w1, "b1": bias1.reshape(1, cout),
        "w2t": jnp.transpose(w2, (1, 0)), "b2": bias2.reshape(cout, 1),
    }


# ------------------------------ pure-JAX reference ---------------------------

def upscale_ref(raw, x1_nchw, x2_nchw):
    """f32 XLA reference of UpScale.forward (BatchNorm in eval mode)."""
    x1 = jnp.transpose(x1_nchw, (0, 2, 3, 1))
    x2 = jnp.transpose(x2_nchw, (0, 2, 3, 1))
    B, h, w, c = x1.shape
    up = jnp.einsum("bhwi,iokl->bhwklo", x1, raw["up_w"])
    up = up.transpose(0, 1, 3, 2, 4, 5).reshape(B, 2 * h, 2 * w, c) + raw["up_b"]
    dY = x2.shape[1] - up.shape[1]
    dX = x2.shape[2] - up.shape[2]
    up = jnp.pad(up, ((0, 0), (dY // 2, dY - dY // 2),
                      (dX // 2, dX - dX // 2), (0, 0)))
    x = jnp.concatenate([x2, up], axis=-1)

    def conv_bn_relu(x, w, b, bn):
        gamma, beta, mean, var = bn
        y = jax.lax.conv_general_dilated(
            x, jnp.transpose(w, (2, 3, 1, 0)), (1, 1), "SAME",
            dimension_numbers=("NHWC", "HWIO", "NHWC"))
        y = (y + b - mean) / jnp.sqrt(var + BN_EPS) * gamma + beta
        return jnp.maximum(y, 0.0)

    x = conv_bn_relu(x, raw["c1_w"], raw["c1_b"], raw["c1_bn"])
    x = conv_bn_relu(x, raw["c2_w"], raw["c2_b"], raw["c2_bn"])
    return jnp.transpose(x, (0, 3, 1, 2))


# ------------------------------------ main -----------------------------------

if __name__ == "__main__":
    key = jax.random.PRNGKey(0)
    kparam, kx1, kx2 = jax.random.split(key, 3)
    in_ch, out_ch = 64, 32
    B, H, W = 2, 16, 16

    raw = init_raw_params(kparam, in_ch, out_ch)
    params = prepare_params(raw)             # one-time weight transforms

    x1 = jax.random.normal(kx1, (B, in_ch // 2, H // 2, W // 2), jnp.float32)
    x2 = jax.random.normal(kx2, (B, in_ch // 2, H, W), jnp.float32)

    fwd = jax.jit(upscale_apply)
    out = jax.block_until_ready(fwd(params, x1, x2))
    assert out.shape == (B, out_ch, H, W), out.shape
    assert bool(jnp.all(jnp.isfinite(out)))

    ref = upscale_ref(raw, x1, x2)
    max_err = float(jnp.max(jnp.abs(out - ref)))
    mean_err = float(jnp.mean(jnp.abs(out - ref)))
    # Tightened from the previous 2e-1 absolute bound (review feedback):
    # bf16 MXU operands with f32 accumulation land around 1e-2 worst case.
    assert max_err < 1e-1, f"max abs err vs reference: {max_err}"
    assert mean_err < 1.5e-2, f"mean abs err vs reference: {mean_err}"
    print("KERNEL_OK")
</pallas_src>

<mosaic_0001>
module attributes {stable_mosaic.version = 11 : i64} {
  func.func @_upscale_fused_kernel(%arg0: i32, %arg1: memref<1x16x16x32xbf16, #tpu.memory_space<vmem>>, %arg2: memref<1x16x16x32xbf16, #tpu.memory_space<vmem>>, %arg3: memref<576x32xbf16, #tpu.memory_space<vmem>>, %arg4: memref<32x288xbf16, #tpu.memory_space<vmem>>, %arg5: memref<1x32xf32, #tpu.memory_space<vmem>>, %arg6: memref<32x1xf32, #tpu.memory_space<vmem>>, %arg7: memref<1x32x256xf32, #tpu.memory_space<vmem>>, %arg8: memref<18x24x64xbf16, #tpu.memory_space<vmem>>, %arg9: memref<18x24x32xbf16, #tpu.memory_space<vmem>>, %arg10: memref<256x576xbf16, #tpu.memory_space<vmem>>) attributes {dimension_semantics = [#tpu.dimension_semantics<parallel>], iteration_bounds = array<i64: 2>, scalar_prefetch = 0 : i64, scratch_operands = 3 : i64, tpu.core_type = #tpu.core_type<tc>, window_params = [{transform_indices = @transform_0, window_bounds = array<i64: 1, 16, 16, 32>}, {transform_indices = @transform_1, window_bounds = array<i64: 1, 16, 16, 32>}, {pipeline_mode = #tpu.pipeline_mode<synchronous>, transform_indices = @transform_2, window_bounds = array<i64: 576, 32>}, {pipeline_mode = #tpu.pipeline_mode<synchronous>, transform_indices = @transform_3, window_bounds = array<i64: 32, 288>}, {pipeline_mode = #tpu.pipeline_mode<synchronous>, transform_indices = @transform_4, window_bounds = array<i64: 1, 32>}, {pipeline_mode = #tpu.pipeline_mode<synchronous>, transform_indices = @transform_5, window_bounds = array<i64: 32, 1>}, {transform_indices = @transform_6, window_bounds = array<i64: 1, 32, 256>}]} {
    %cst = arith.constant 0.000000e+00 : bf16
    %0 = vector.broadcast %cst : bf16 to vector<1x24x64xbf16>
    %c0 = arith.constant 0 : index
    %c0_0 = arith.constant 0 : index
    %c0_1 = arith.constant 0 : index
    %1 = vector.load %arg8[%c0, %c0_0, %c0_1] : memref<18x24x64xbf16, #tpu.memory_space<vmem>>, vector<1x24x64xbf16>
    tpu.vector_store %arg8[%c0, %c0_0, %c0_1], %0 {strides = array<i32>} : memref<18x24x64xbf16, #tpu.memory_space<vmem>>, vector<1x24x64xbf16>,
    %cst_2 = arith.constant 0.000000e+00 : bf16
    %2 = vector.broadcast %cst_2 : bf16 to vector<1x24x64xbf16>
    %c17 = arith.constant 17 : index
    %c0_3 = arith.constant 0 : index
    %c0_4 = arith.constant 0 : index
    %3 = vector.load %arg8[%c17, %c0_3, %c0_4] : memref<18x24x64xbf16, #tpu.memory_space<vmem>>, vector<1x24x64xbf16>
    tpu.vector_store %arg8[%c17, %c0_3, %c0_4], %2 {strides = array<i32>} : memref<18x24x64xbf16, #tpu.memory_space<vmem>>, vector<1x24x64xbf16>,
    %cst_5 = arith.constant 0.000000e+00 : bf16
    %4 = vector.broadcast %cst_5 : bf16 to vector<18x1x64xbf16>
    %c0_6 = arith.constant 0 : index
    %c0_7 = arith.constant 0 : index
    %c0_8 = arith.constant 0 : index
    %5 = vector.load %arg8[%c0_6, %c0_7, %c0_8] : memref<18x24x64xbf16, #tpu.memory_space<vmem>>, vector<18x1x64xbf16>
    tpu.vector_store %arg8[%c0_6, %c0_7, %c0_8], %4 {strides = array<i32>} : memref<18x24x64xbf16, #tpu.memory_space<vmem>>, vector<18x1x64xbf16>,
    %cst_9 = arith.constant 0.000000e+00 : bf16
    %6 = vector.broadcast %cst_9 : bf16 to vector<18x7x64xbf16>
    %c0_10 = arith.constant 0 : index
    %c17_11 = arith.constant 17 : index
    %c0_12 = arith.constant 0 : index
    %7 = vector.load %arg8[%c0_10, %c17_11, %c0_12] : memref<18x24x64xbf16, #tpu.memory_space<vmem>>, vector<18x7x64xbf16>
    tpu.vector_store %arg8[%c0_10, %c17_11, %c0_12], %6 {strides = array<i32>} : memref<18x24x64xbf16, #tpu.memory_space<vmem>>, vector<18x7x64xbf16>,
    %c0_13 = arith.constant 0 : index
    %c0_14 = arith.constant 0 : index
    %c0_15 = arith.constant 0 : index
    %c0_16 = arith.constant 0 : index
    %8 = vector.load %arg1[%c0_13, %c0_14, %c0_15, %c0_16] : memref<1x16x16x32xbf16, #tpu.memory_space<vmem>>, vector<1x16x16x32xbf16>
    %9 = vector.shape_cast %8 : vector<1x16x16x32xbf16> to vector<16x16x32xbf16>
    %c1 = arith.constant 1 : index
    %c1_17 = arith.constant 1 : index
    %c0_18 = arith.constant 0 : index
    %10 = vector.load %arg8[%c1, %c1_17, %c0_18] : memref<18x24x64xbf16, #tpu.memory_space<vmem>>, vector<16x16x32xbf16>
    tpu.vector_store %arg8[%c1, %c1_17, %c0_18], %9 {strides = array<i32>} : memref<18x24x64xbf16, #tpu.memory_space<vmem>>, vector<16x16x32xbf16>,
    %c0_19 = arith.constant 0 : index
    %c0_20 = arith.constant 0 : index
    %c0_21 = arith.constant 0 : index
    %c0_22 = arith.constant 0 : index
    %11 = vector.load %arg2[%c0_19, %c0_20, %c0_21, %c0_22] : memref<1x16x16x32xbf16, #tpu.memory_space<vmem>>, vector<1x16x16x32xbf16>
    %12 = vector.shape_cast %11 : vector<1x16x16x32xbf16> to vector<16x16x32xbf16>
    %c1_23 = arith.constant 1 : index
    %c1_24 = arith.constant 1 : index
    %c32 = arith.constant 32 : index
    %13 = vector.load %arg8[%c1_23, %c1_24, %c32] : memref<18x24x64xbf16, #tpu.memory_space<vmem>>, vector<16x16x32xbf16>
    tpu.vector_store %arg8[%c1_23, %c1_24, %c32], %12 {strides = array<i32>} : memref<18x24x64xbf16, #tpu.memory_space<vmem>>, vector<16x16x32xbf16>,
    %c0_25 = arith.constant 0 : index
    %c0_26 = arith.constant 0 : index
    %c0_27 = arith.constant 0 : index
    %14 = vector.load %arg8[%c0_25, %c0_26, %c0_27] : memref<18x24x64xbf16, #tpu.memory_space<vmem>>, vector<18x24x64xbf16>
    %15 = vector.extract_strided_slice %14 {offsets = [0, 0, 0], sizes = [16, 16, 64], strides = [1, 1, 1]} : vector<18x24x64xbf16> to vector<16x16x64xbf16>
    %16 = vector.shape_cast %15 : vector<16x16x64xbf16> to vector<256x64xbf16>
    %c0_28 = arith.constant 0 : index
    %c0_29 = arith.constant 0 : index
    %17 = vector.load %arg10[%c0_28, %c0_29] : memref<256x576xbf16, #tpu.memory_space<vmem>>, vector<256x64xbf16>
    tpu.vector_store %arg10[%c0_28, %c0_29], %16 {strides = array<i32>} : memref<256x576xbf16, #tpu.memory_space<vmem>>, vector<256x64xbf16>,
    %18 = vector.extract_strided_slice %14 {offsets = [0, 1, 0], sizes = [16, 16, 64], strides = [1, 1, 1]} : vector<18x24x64xbf16> to vector<16x16x64xbf16>
    %19 = vector.shape_cast %18 : vector<16x16x64xbf16> to vector<256x64xbf16>
    %c0_30 = arith.constant 0 : index
    %c64 = arith.constant 64 : index
    %20 = vector.load %arg10[%c0_30, %c64] : memref<256x576xbf16, #tpu.memory_space<vmem>>, vector<256x64xbf16>
    tpu.vector_store %arg10[%c0_30, %c64], %19 {strides = array<i32>} : memref<256x576xbf16, #tpu.memory_space<vmem>>, vector<256x64xbf16>,
    %21 = vector.extract_strided_slice %14 {offsets = [0, 2, 0], sizes = [16, 16, 64], strides = [1, 1, 1]} : vector<18x24x64xbf16> to vector<16x16x64xbf16>
    %22 = vector.shape_cast %21 : vector<16x16x64xbf16> to vector<256x64xbf16>
    %c0_31 = arith.constant 0 : index
    %c128 = arith.constant 128 : index
    %23 = vector.load %arg10[%c0_31, %c128] : memref<256x576xbf16, #tpu.memory_space<vmem>>, vector<256x64xbf16>
    tpu.vector_store %arg10[%c0_31, %c128], %22 {strides = array<i32>} : memref<256x576xbf16, #tpu.memory_space<vmem>>, vector<256x64xbf16>,
    %24 = vector.extract_strided_slice %14 {offsets = [1, 0, 0], sizes = [16, 16, 64], strides = [1, 1, 1]} : vector<18x24x64xbf16> to vector<16x16x64xbf16>
    %25 = vector.shape_cast %24 : vector<16x16x64xbf16> to vector<256x64xbf16>
    %c0_32 = arith.constant 0 : index
    %c192 = arith.constant 192 : index
    %26 = vector.load %arg10[%c0_32, %c192] : memref<256x576xbf16, #tpu.memory_space<vmem>>, vector<256x64xbf16>
    tpu.vector_store %arg10[%c0_32, %c192], %25 {strides = array<i32>} : memref<256x576xbf16, #tpu.memory_space<vmem>>, vector<256x64xbf16>,
    %27 = vector.extract_strided_slice %14 {offsets = [1, 1, 0], sizes = [16, 16, 64], strides = [1, 1, 1]} : vector<18x24x64xbf16> to vector<16x16x64xbf16>
    %28 = vector.shape_cast %27 : vector<16x16x64xbf16> to vector<256x64xbf16>
    %c0_33 = arith.constant 0 : index
    %c256 = arith.constant 256 : index
    %29 = vector.load %arg10[%c0_33, %c256] : memref<256x576xbf16, #tpu.memory_space<vmem>>, vector<256x64xbf16>
    tpu.vector_store %arg10[%c0_33, %c256], %28 {strides = array<i32>} : memref<256x576xbf16, #tpu.memory_space<vmem>>, vector<256x64xbf16>,
    %30 = vector.extract_strided_slice %14 {offsets = [1, 2, 0], sizes = [16, 16, 64], strides = [1, 1, 1]} : vector<18x24x64xbf16> to vector<16x16x64xbf16>
    %31 = vector.shape_cast %30 : vector<16x16x64xbf16> to vector<256x64xbf16>
    %c0_34 = arith.constant 0 : index
    %c320 = arith.constant 320 : index
    %32 = vector.load %arg10[%c0_34, %c320] : memref<256x576xbf16, #tpu.memory_space<vmem>>, vector<256x64xbf16>
    tpu.vector_store %arg10[%c0_34, %c320], %31 {strides = array<i32>} : memref<256x576xbf16, #tpu.memory_space<vmem>>, vector<256x64xbf16>,
    %33 = vector.extract_strided_slice %14 {offsets = [2, 0, 0], sizes = [16, 16, 64], strides = [1, 1, 1]} : vector<18x24x64xbf16> to vector<16x16x64xbf16>
    %34 = vector.shape_cast %33 : vector<16x16x64xbf16> to vector<256x64xbf16>
    %c0_35 = arith.constant 0 : index
    %c384 = arith.constant 384 : index
    %35 = vector.load %arg10[%c0_35, %c384] : memref<256x576xbf16, #tpu.memory_space<vmem>>, vector<256x64xbf16>
    tpu.vector_store %arg10[%c0_35, %c384], %34 {strides = array<i32>} : memref<256x576xbf16, #tpu.memory_space<vmem>>, vector<256x64xbf16>,
    %36 = vector.extract_strided_slice %14 {offsets = [2, 1, 0], sizes = [16, 16, 64], strides = [1, 1, 1]} : vector<18x24x64xbf16> to vector<16x16x64xbf16>
    %37 = vector.shape_cast %36 : vector<16x16x64xbf16> to vector<256x64xbf16>
    %c0_36 = arith.constant 0 : index
    %c448 = arith.constant 448 : index
    %38 = vector.load %arg10[%c0_36, %c448] : memref<256x576xbf16, #tpu.memory_space<vmem>>, vector<256x64xbf16>
    tpu.vector_store %arg10[%c0_36, %c448], %37 {strides = array<i32>} : memref<256x576xbf16, #tpu.memory_space<vmem>>, vector<256x64xbf16>,
    %39 = vector.extract_strided_slice %14 {offsets = [2, 2, 0], sizes = [16, 16, 64], strides = [1, 1, 1]} : vector<18x24x64xbf16> to vector<16x16x64xbf16>
    %40 = vector.shape_cast %39 : vector<16x16x64xbf16> to vector<256x64xbf16>
    %c0_37 = arith.constant 0 : index
    %c512 = arith.constant 512 : index
    %41 = vector.load %arg10[%c0_37, %c512] : memref<256x576xbf16, #tpu.memory_space<vmem>>, vector<256x64xbf16>
    tpu.vector_store %arg10[%c0_37, %c512], %40 {strides = array<i32>} : memref<256x576xbf16, #tpu.memory_space<vmem>>, vector<256x64xbf16>,
    %c0_38 = arith.constant 0 : index
    %c0_39 = arith.constant 0 : index
    %42 = vector.load %arg10[%c0_38, %c0_39] : memref<256x576xbf16, #tpu.memory_space<vmem>>, vector<256x576xbf16>
    %c0_40 = arith.constant 0 : index
    %c0_41 = arith.constant 0 : index
    %43 = vector.load %arg3[%c0_40, %c0_41] : memref<576x32xbf16, #tpu.memory_space<vmem>>, vector<576x32xbf16>
    %cst_42 = arith.constant dense<0.000000e+00> : vector<256x32xf32>
    %44 = tpu.matmul %42, %43, %cst_42 {dimension_numbers = #tpu.dot_dimension_numbers<[1], [0], [0], [1], [0, 0, 1, 1], [], []>} : vector<256x576xbf16>, vector<576x32xbf16>, vector<256x32xf32> -> vector<256x32xf32>
    %c0_43 = arith.constant 0 : index
    %c0_44 = arith.constant 0 : index
    %45 = vector.load %arg5[%c0_43, %c0_44] : memref<1x32xf32, #tpu.memory_space<vmem>>, vector<1x32xf32>
    %46 = vector.broadcast %45 : vector<1x32xf32> to vector<256x32xf32>
    %47 = arith.addf %44, %46 : vector<256x32xf32>
    %cst_45 = arith.constant 0.000000e+00 : f32
    %48 = vector.broadcast %cst_45 : f32 to vector<256x32xf32>
    %49 = arith.maximumf %47, %48 : vector<256x32xf32>
    %50 = arith.truncf %49 : vector<256x32xf32> to vector<256x32xbf16>
    %51 = vector.shape_cast %50 : vector<256x32xbf16> to vector<16x16x32xbf16>
    %cst_46 = arith.constant 0.000000e+00 : bf16
    %52 = vector.broadcast %cst_46 : bf16 to vector<1x24x32xbf16>
    %c0_47 = arith.constant 0 : index
    %c0_48 = arith.constant 0 : index
    %c0_49 = arith.constant 0 : index
    %53 = vector.load %arg9[%c0_47, %c0_48, %c0_49] : memref<18x24x32xbf16, #tpu.memory_space<vmem>>, vector<1x24x32xbf16>
    tpu.vector_store %arg9[%c0_47, %c0_48, %c0_49], %52 {strides = array<i32>} : memref<18x24x32xbf16, #tpu.memory_space<vmem>>, vector<1x24x32xbf16>,
    %cst_50 = arith.constant 0.000000e+00 : bf16
    %54 = vector.broadcast %cst_50 : bf16 to vector<1x24x32xbf16>
    %c17_51 = arith.constant 17 : index
    %c0_52 = arith.constant 0 : index
    %c0_53 = arith.constant 0 : index
    %55 = vector.load %arg9[%c17_51, %c0_52, %c0_53] : memref<18x24x32xbf16, #tpu.memory_space<vmem>>, vector<1x24x32xbf16>
    tpu.vector_store %arg9[%c17_51, %c0_52, %c0_53], %54 {strides = array<i32>} : memref<18x24x32xbf16, #tpu.memory_space<vmem>>, vector<1x24x32xbf16>,
    %cst_54 = arith.constant 0.000000e+00 : bf16
    %56 = vector.broadcast %cst_54 : bf16 to vector<18x1x32xbf16>
    %c0_55 = arith.constant 0 : index
    %c0_56 = arith.constant 0 : index
    %c0_57 = arith.constant 0 : index
    %57 = vector.load %arg9[%c0_55, %c0_56, %c0_57] : memref<18x24x32xbf16, #tpu.memory_space<vmem>>, vector<18x1x32xbf16>
    tpu.vector_store %arg9[%c0_55, %c0_56, %c0_57], %56 {strides = array<i32>} : memref<18x24x32xbf16, #tpu.memory_space<vmem>>, vector<18x1x32xbf16>,
    %cst_58 = arith.constant 0.000000e+00 : bf16
    %58 = vector.broadcast %cst_58 : bf16 to vector<18x7x32xbf16>
    %c0_59 = arith.constant 0 : index
    %c17_60 = arith.constant 17 : index
    %c0_61 = arith.constant 0 : index
    %59 = vector.load %arg9[%c0_59, %c17_60, %c0_61] : memref<18x24x32xbf16, #tpu.memory_space<vmem>>, vector<18x7x32xbf16>
    tpu.vector_store %arg9[%c0_59, %c17_60, %c0_61], %58 {strides = array<i32>} : memref<18x24x32xbf16, #tpu.memory_space<vmem>>, vector<18x7x32xbf16>,
    %c1_62 = arith.constant 1 : index
    %c1_63 = arith.constant 1 : index
    %c0_64 = arith.constant 0 : index
    %60 = vector.load %arg9[%c1_62, %c1_63, %c0_64] : memref<18x24x32xbf16, #tpu.memory_space<vmem>>, vector<16x16x32xbf16>
    tpu.vector_store %arg9[%c1_62, %c1_63, %c0_64], %51 {strides = array<i32>} : memref<18x24x32xbf16, #tpu.memory_space<vmem>>, vector<16x16x32xbf16>,
    %c0_65 = arith.constant 0 : index
    %c0_66 = arith.constant 0 : index
    %c0_67 = arith.constant 0 : index
    %61 = vector.load %arg9[%c0_65, %c0_66, %c0_67] : memref<18x24x32xbf16, #tpu.memory_space<vmem>>, vector<18x24x32xbf16>
    %62 = vector.extract_strided_slice %61 {offsets = [0, 0, 0], sizes = [16, 16, 32], strides = [1, 1, 1]} : vector<18x24x32xbf16> to vector<16x16x32xbf16>
    %63 = vector.shape_cast %62 : vector<16x16x32xbf16> to vector<256x32xbf16>
    %c0_68 = arith.constant 0 : index
    %c0_69 = arith.constant 0 : index
    %64 = vector.load %arg10[%c0_68, %c0_69] : memref<256x576xbf16, #tpu.memory_space<vmem>>, vector<256x32xbf16>
    tpu.vector_store %arg10[%c0_68, %c0_69], %63 {strides = array<i32>} : memref<256x576xbf16, #tpu.memory_space<vmem>>, vector<256x32xbf16>,
    %65 = vector.extract_strided_slice %61 {offsets = [0, 1, 0], sizes = [16, 16, 32], strides = [1, 1, 1]} : vector<18x24x32xbf16> to vector<16x16x32xbf16>
    %66 = vector.shape_cast %65 : vector<16x16x32xbf16> to vector<256x32xbf16>
    %c0_70 = arith.constant 0 : index
    %c32_71 = arith.constant 32 : index
    %67 = vector.load %arg10[%c0_70, %c32_71] : memref<256x576xbf16, #tpu.memory_space<vmem>>, vector<256x32xbf16>
    tpu.vector_store %arg10[%c0_70, %c32_71], %66 {strides = array<i32>} : memref<256x576xbf16, #tpu.memory_space<vmem>>, vector<256x32xbf16>,
    %68 = vector.extract_strided_slice %61 {offsets = [0, 2, 0], sizes = [16, 16, 32], strides = [1, 1, 1]} : vector<18x24x32xbf16> to vector<16x16x32xbf16>
    %69 = vector.shape_cast %68 : vector<16x16x32xbf16> to vector<256x32xbf16>
    %c0_72 = arith.constant 0 : index
    %c64_73 = arith.constant 64 : index
    %70 = vector.load %arg10[%c0_72, %c64_73] : memref<256x576xbf16, #tpu.memory_space<vmem>>, vector<256x32xbf16>
    tpu.vector_store %arg10[%c0_72, %c64_73], %69 {strides = array<i32>} : memref<256x576xbf16, #tpu.memory_space<vmem>>, vector<256x32xbf16>,
    %71 = vector.extract_strided_slice %61 {offsets = [1, 0, 0], sizes = [16, 16, 32], strides = [1, 1, 1]} : vector<18x24x32xbf16> to vector<16x16x32xbf16>
    %72 = vector.shape_cast %71 : vector<16x16x32xbf16> to vector<256x32xbf16>
    %c0_74 = arith.constant 0 : index
    %c96 = arith.constant 96 : index
    %73 = vector.load %arg10[%c0_74, %c96] : memref<256x576xbf16, #tpu.memory_space<vmem>>, vector<256x32xbf16>
    tpu.vector_store %arg10[%c0_74, %c96], %72 {strides = array<i32>} : memref<256x576xbf16, #tpu.memory_space<vmem>>, vector<256x32xbf16>,
    %74 = vector.extract_strided_slice %61 {offsets = [1, 1, 0], sizes = [16, 16, 32], strides = [1, 1, 1]} : vector<18x24x32xbf16> to vector<16x16x32xbf16>
    %75 = vector.shape_cast %74 : vector<16x16x32xbf16> to vector<256x32xbf16>
    %c0_75 = arith.constant 0 : index
    %c128_76 = arith.constant 128 : index
    %76 = vector.load %arg10[%c0_75, %c128_76] : memref<256x576xbf16, #tpu.memory_space<vmem>>, vector<256x32xbf16>
    tpu.vector_store %arg10[%c0_75, %c128_76], %75 {strides = array<i32>} : memref<256x576xbf16, #tpu.memory_space<vmem>>, vector<256x32xbf16>,
    %77 = vector.extract_strided_slice %61 {offsets = [1, 2, 0], sizes = [16, 16, 32], strides = [1, 1, 1]} : vector<18x24x32xbf16> to vector<16x16x32xbf16>
    %78 = vector.shape_cast %77 : vector<16x16x32xbf16> to vector<256x32xbf16>
    %c0_77 = arith.constant 0 : index
    %c160 = arith.constant 160 : index
    %79 = vector.load %arg10[%c0_77, %c160] : memref<256x576xbf16, #tpu.memory_space<vmem>>, vector<256x32xbf16>
    tpu.vector_store %arg10[%c0_77, %c160], %78 {strides = array<i32>} : memref<256x576xbf16, #tpu.memory_space<vmem>>, vector<256x32xbf16>,
    %80 = vector.extract_strided_slice %61 {offsets = [2, 0, 0], sizes = [16, 16, 32], strides = [1, 1, 1]} : vector<18x24x32xbf16> to vector<16x16x32xbf16>
    %81 = vector.shape_cast %80 : vector<16x16x32xbf16> to vector<256x32xbf16>
    %c0_78 = arith.constant 0 : index
    %c192_79 = arith.constant 192 : index
    %82 = vector.load %arg10[%c0_78, %c192_79] : memref<256x576xbf16, #tpu.memory_space<vmem>>, vector<256x32xbf16>
    tpu.vector_store %arg10[%c0_78, %c192_79], %81 {strides = array<i32>} : memref<256x576xbf16, #tpu.memory_space<vmem>>, vector<256x32xbf16>,
    %83 = vector.extract_strided_slice %61 {offsets = [2, 1, 0], sizes = [16, 16, 32], strides = [1, 1, 1]} : vector<18x24x32xbf16> to vector<16x16x32xbf16>
    %84 = vector.shape_cast %83 : vector<16x16x32xbf16> to vector<256x32xbf16>
    %c0_80 = arith.constant 0 : index
    %c224 = arith.constant 224 : index
    %85 = vector.load %arg10[%c0_80, %c224] : memref<256x576xbf16, #tpu.memory_space<vmem>>, vector<256x32xbf16>
    tpu.vector_store %arg10[%c0_80, %c224], %84 {strides = array<i32>} : memref<256x576xbf16, #tpu.memory_space<vmem>>, vector<256x32xbf16>,
    %86 = vector.extract_strided_slice %61 {offsets = [2, 2, 0], sizes = [16, 16, 32], strides = [1, 1, 1]} : vector<18x24x32xbf16> to vector<16x16x32xbf16>
    %87 = vector.shape_cast %86 : vector<16x16x32xbf16> to vector<256x32xbf16>
    %c0_81 = arith.constant 0 : index
    %c256_82 = arith.constant 256 : index
    %88 = vector.load %arg10[%c0_81, %c256_82] : memref<256x576xbf16, #tpu.memory_space<vmem>>, vector<256x32xbf16>
    tpu.vector_store %arg10[%c0_81, %c256_82], %87 {strides = array<i32>} : memref<256x576xbf16, #tpu.memory_space<vmem>>, vector<256x32xbf16>,
    %c0_83 = arith.constant 0 : index
    %c0_84 = arith.constant 0 : index
    %89 = vector.load %arg10[%c0_83, %c0_84] : memref<256x576xbf16, #tpu.memory_space<vmem>>, vector<256x288xbf16>
    %c0_85 = arith.constant 0 : index
    %c0_86 = arith.constant 0 : index
    %90 = vector.load %arg4[%c0_85, %c0_86] : memref<32x288xbf16, #tpu.memory_space<vmem>>, vector<32x288xbf16>
    %cst_87 = arith.constant dense<0.000000e+00> : vector<32x256xf32>
    %91 = tpu.matmul %90, %89, %cst_87 {dimension_numbers = #tpu.dot_dimension_numbers<[1], [1], [0], [0], [0, 0, 1, 0], [], []>} : vector<32x288xbf16>, vector<256x288xbf16>, vector<32x256xf32> -> vector<32x256xf32>
    %c0_88 = arith.constant 0 : index
    %c0_89 = arith.constant 0 : index
    %92 = vector.load %arg6[%c0_88, %c0_89] : memref<32x1xf32, #tpu.memory_space<vmem>>, vector<32x1xf32>
    %93 = vector.broadcast %92 : vector<32x1xf32> to vector<32x256xf32>
    %94 = arith.addf %91, %93 : vector<32x256xf32>
    %cst_90 = arith.constant 0.000000e+00 : f32
    %95 = vector.broadcast %cst_90 : f32 to vector<32x256xf32>
    %96 = arith.maximumf %94, %95 : vector<32x256xf32>
    %c0_91 = arith.constant 0 : index
    %c0_92 = arith.constant 0 : index
    %c0_93 = arith.constant 0 : index
    %97 = vector.load %arg7[%c0_91, %c0_92, %c0_93] : memref<1x32x256xf32, #tpu.memory_space<vmem>>, vector<1x32x256xf32>
    %98 = vector.shape_cast %97 : vector<1x32x256xf32> to vector<32x256xf32>
    %99 = vector.shape_cast %96 : vector<32x256xf32> to vector<1x32x256xf32>
    tpu.vector_store %arg7[%c0_91, %c0_92, %c0_93], %99 {strides = array<i32>} : memref<1x32x256xf32, #tpu.memory_space<vmem>>, vector<1x32x256xf32>,
    return
  }
  func.func @transform_0(%arg0: i32) -> (i32, i32, i32, i32) {
    %c0_i32 = arith.constant 0 : i32
    %c0_i32_0 = arith.constant 0 : i32
    %c0_i32_1 = arith.constant 0 : i32
    %c0_i32_2 = arith.constant 0 : i32
    return %arg0, %c0_i32, %c0_i32_0, %c0_i32_1 : i32, i32, i32, i32
  }
  func.func @transform_1(%arg0: i32) -> (i32, i32, i32, i32) {
    %c0_i32 = arith.constant 0 : i32
    %c0_i32_0 = arith.constant 0 : i32
    %c0_i32_1 = arith.constant 0 : i32
    %c0_i32_2 = arith.constant 0 : i32
    return %arg0, %c0_i32, %c0_i32_0, %c0_i32_1 : i32, i32, i32, i32
  }
  func.func @transform_2(%arg0: i32) -> (i32, i32) {
    %c0_i32 = arith.constant 0 : i32
    %c0_i32_0 = arith.constant 0 : i32
    %c0_i32_1 = arith.constant 0 : i32
    return %c0_i32, %c0_i32_0 : i32, i32
  }
  func.func @transform_3(%arg0: i32) -> (i32, i32) {
    %c0_i32 = arith.constant 0 : i32
    %c0_i32_0 = arith.constant 0 : i32
    %c0_i32_1 = arith.constant 0 : i32
    return %c0_i32, %c0_i32_0 : i32, i32
  }
  func.func @transform_4(%arg0: i32) -> (i32, i32) {
    %c0_i32 = arith.constant 0 : i32
    %c0_i32_0 = arith.constant 0 : i32
    %c0_i32_1 = arith.constant 0 : i32
    return %c0_i32, %c0_i32_0 : i32, i32
  }
  func.func @transform_5(%arg0: i32) -> (i32, i32) {
    %c0_i32 = arith.constant 0 : i32
    %c0_i32_0 = arith.constant 0 : i32
    %c0_i32_1 = arith.constant 0 : i32
    return %c0_i32, %c0_i32_0 : i32, i32
  }
  func.func @transform_6(%arg0: i32) -> (i32, i32, i32) {
    %c0_i32 = arith.constant 0 : i32
    %c0_i32_0 = arith.constant 0 : i32
    %c0_i32_1 = arith.constant 0 : i32
    return %arg0, %c0_i32, %c0_i32_0 : i32, i32, i32
  }
}

</mosaic_0001>

<bundles_post_ra>
// kernel: upscale_apply.1
= control target key start
LH: loop header
LB: loop body
LE: loop exit
PB: predicated region body
PF: predicated region fallthrough
CT: control target
= control target key end

     0   :  { %s7894_s21 = smov 0   ;;  %s11909_s0 = inlined_call_operand.vmem [shape: bf16[2,16,16,32], index: 0, kind: input, shape index: {}]   ;;  %s11910_s1 = inlined_call_operand.vmem [shape: bf16[2,16,16,32], index: 1, kind: input, shape index: {}]   ;;  %s11911_s2 = inlined_call_operand.vmem [shape: bf16[576,32], index: 2, kind: input, shape index: {}]   ;;  %s11912_s3 = inlined_call_operand.vmem [shape: bf16[32,288], index: 3, kind: input, shape index: {}]   ;;  %s11913_s4 = inlined_call_operand.vmem [shape: f32[1,32], index: 4, kind: input, shape index: {}]   ;;  %s11914_s5 = inlined_call_operand.vmem [shape: f32[32,1], index: 5, kind: input, shape index: {}]   ;;  %s11915_s6 = inlined_call_operand.vmem [shape: f32[2,32,256], index: 6, kind: output, shape index: {}]  }
   0x1 LB: > { %s6869_s22 = sadd.s32 4294967295, %s7853_s21   ;;  %p6873_p0 = scmp.ge.s32.totalorder %s7853_s21, 1  ;;  %s7853_s21 = sphi %s7894_s21, %s16_s21  }
   0x2   : > { %p222_p1 = scmp.lt.s32.totalorder %s7853_s21, 3 }
   0x4   : > { %p223_p2 = pnand %p6873_p0, %p222_p1 }
   0x6   : > { %226 = sbr.rel (%p223_p2) target bundleno = 1473 (0x5c1), region = 44 }
   0xb   : > { %p257_p3 = scmp.lt.s32.totalorder %s6869_s22, 1  ;;  %vm282_vm0 = vsmask.f32 256  ;;  %vm427_vm1 = vsmask.f32 4368  ;;  %s7855_s27 = smov 32  }
   0xc   : > { %vm7922_vm2 = vmor %vm282_vm0, %vm427_vm1  ;;  %vm273_vm3 = vcmask 519168   ;;  %vm339_vm4 = vsmask.f32 7938  ;;  %vm281_vm5 = vcmask 516096   ;;  %vm757_vm8 = vcmask 253952   ;;  %s7857_s7 = smov 64  }
   0xd   : > { %s11995_s22 = smov (!%p257_p3, %s6869_s22), 1  ;;  %vm7999_vm6 = vmand %vm273_vm3, %vm339_vm4  ;;  %vm750_vm9 = vcmask 257024   ;;  %vm1322_vm12 = vcmask 516352   ;;  %vm1315_vm14 = vcmask 519424   ;;  %vm1518_vm15 = vsmask.f32 3328 }
   0xe   : > { %s7618_s23 = sshll.u32 %s11995_s22, 7  ;;  %vm8011_vm7 = vmand %vm281_vm5, %vm282_vm0  ;;  %vm1519_vm1 = vsmask.f32 7440  ;;  %vm2001_vm5 = vcmask 1043968   ;;  %s7858_s24 = smov 96  }
   0xf   : > { %s7910_s26 = scalar_lea.vmem %s11910_s1, %s7618_s23  ;;  %s7989_s30 = scalar_lea.vmem %s11909_s0, %s7618_s23  ;;  %vm8046_vm10 = vmand %vm757_vm8, %vm282_vm0  ;;  %vm2082_vm8 = vcmask 1042432  }
  0x10   : > { %v868_v0 = vld [vmem:[%s7910_s26 + $0x4] sm:$0xf]  ;;  %v867_v1 = vld [vmem:[%s7910_s26] sm:$0xf]  ;;  %v870_v2 = vld [vmem:[%s7910_s26 + $0xc] sm:$0xf] }
  0x11   : > { %v908_v3 = vshrl.u32 %v868_v0, 16  ;;  %v900_v4 = vshrl.u32 %v867_v1, 16  ;;  %v903_v5 = vshll.u32 %v867_v1, 16  ;;  %v869_v6 = vld [vmem:[%s7910_s26 + $0x8] sm:$0xf]  ;;  %v925_v7 = vshrl.u32 %v870_v2, 16  ;;  %vm8066_vm11 = vmand %vm750_vm9, %vm339_vm4 }
  0x12   : > { %v917_v10 = vshrl.u32 %v869_v6, 16  ;;  %v911_v11 = vshll.u32 %v868_v0, 16  ;;  %v928_v15 = vshll.u32 %v870_v2, 16  ;;  %v871_v16 = vld [vmem:[%s7910_s26 + $0x10] sm:$0xf]  ;;  %v920_v20 = vshll.u32 %v869_v6, 16  ;;  %vm8164_vm13 = vmand %vm1322_vm12, %vm282_vm0 }
  0x13   : > { %v910_v8 = vrot.slane %v908_v3, 7  ;;  %v902_v9 = vrot.slane %v900_v4, 7  ;;  %v927_v12 = vrot.slane %v925_v7, 7  ;;  %v872_v17 = vld [vmem:[%s7910_s26 + $0x14] sm:$0xf]  ;;  %v934_v23 = vshrl.u32 %v871_v16, 16  ;;  %vm8309_vm0 = vmand %vm1315_vm14, %vm339_vm4 }
  0x14   : > { %v919_v19 = vrot.slane %v917_v10, 7  ;;  %v942_v24 = vshrl.u32 %v872_v17, 16  ;;  %v945_v32 = vshll.u32 %v872_v17, 16  ;;  %v873_v34 = vld [vmem:[%s7910_s26 + $0x18] sm:$0xf]  ;;  %v937_v36 = vshll.u32 %v871_v16, 16  ;;  %vm8369_vm4 = vmor %vm1518_vm15, %vm1519_vm1 }
  0x15   : > { %v915_v13 = vrot.slane %v910_v8, 4  ;;  %v905_v14 = vor.u32 %v903_v5, %v902_v9  ;;  %v932_v18 = vrot.slane %v927_v12, 4  ;;  %v913_v21 = vor.u32 %v911_v11, %v910_v8  ;;  %v874_v35 = vld [vmem:[%s7910_s26 + $0x1c] sm:$0xf]  ;;  %v875_v47 = vld [vmem:[%s7910_s26 + $0x20] sm:$0xf] }
  0x16   : > { %v906_v22 = vrot.slane %v902_v9, 4  ;;  %v930_v25 = vor.u32 %v928_v15, %v927_v12  ;;  %v923_v27 = vrot.slane %v919_v19, 4  ;;  %v922_v28 = vor.u32 %v920_v20, %v919_v19  ;;  %v876_v48 = vld [vmem:[%s7910_s26 + $0x24] sm:$0xf]  ;;  %v877_v60 = vld [vmem:[%s7910_s26 + $0x28] sm:$0xf] }
  0x17   : > { %1175 = vrot.lane.b32.xlu1 %v915_v13, %s7855_s27  ;;  %1171 = vrot.lane.b32.xlu0 %v905_v14, %s7855_s27  ;;  %v936_v30 = vrot.slane %v934_v23, 7  ;;  %v944_v31 = vrot.slane %v942_v24, 7  ;;  %v951_v39 = vshrl.u32 %v873_v34, 16  ;;  %v959_v40 = vshrl.u32 %v874_v35, 16  ;;  %v878_v61 = vld [vmem:[%s7910_s26 + $0x2c] sm:$0xf] }
  0x18   : > { %1181 = vrot.lane.b32.xlu2 %v932_v18, %s7855_s27  ;;  %v914_v29 = vsel %vm7922_vm2, %v906_v22, %v913_v21  ;;  %v931_v33 = vsel %vm7922_vm2, %v923_v27, %v930_v25  ;;  %v962_v42 = vshll.u32 %v874_v35, 16  ;;  %v954_v49 = vshll.u32 %v873_v34, 16  ;;  %v879_v9 = vld [vmem:[%s7910_s26 + $0x30] sm:$0xf]  ;;  %v880_v10 = vld [vmem:[%s7910_s26 + $0x34] sm:$0xf] }
  0x19   : > { %v940_v37 = vrot.slane %v936_v30, 4  ;;  %v947_v38 = vor.u32 %v945_v32, %v944_v31  ;;  %v939_v41 = vor.u32 %v937_v36, %v936_v30  ;;  %v949_v44 = vrot.slane %v944_v31, 4  ;;  %v881_v22 = vld [vmem:[%s7910_s26 + $0x38] sm:$0xf]  ;;  %v882_v23 = vld [vmem:[%s7910_s26 + $0x3c] sm:$0xf] }
  0x1a   : > { %v953_v45 = vrot.slane %v951_v39, 7  ;;  %v961_v46 = vrot.slane %v959_v40, 7  ;;  %v968_v52 = vshrl.u32 %v875_v47, 16  ;;  %v976_v53 = vshrl.u32 %v876_v48, 16  ;;  %v883_v36 = vld [vmem:[%s7910_s26 + $0x40] sm:$0xf] }
  0x1b   : > { %v948_v43 = vsel %vm7922_vm2, %v940_v37, %v947_v38  ;;  %v979_v55 = vshll.u32 %v876_v48, 16  ;;  %v971_v62 = vshll.u32 %v875_v47, 16  ;;  %v985_v63 = vshrl.u32 %v877_v60, 16  ;;  %v884_v37 = vld [vmem:[%s7910_s26 + $0x44] sm:$0xf]  ;;  %s7620_s15 = sshll.u32 %s11995_s22, 6 }
  0x1c   : > { %v957_v50 = vrot.slane %v953_v45, 4  ;;  %v964_v51 = vor.u32 %v962_v42, %v961_v46  ;;  %v956_v54 = vor.u32 %v954_v49, %v953_v45  ;;  %v966_v57 = vrot.slane %v961_v46, 4  ;;  %v885_v49 = vld [vmem:[%s7910_s26 + $0x48] sm:$0xf]  ;;  %s11896_s18 = scalar_lea.vmem %s11915_s6, %s7620_s15 }
  0x1d   : > { %v970_v58 = vrot.slane %v968_v52, 7  ;;  %v978_v59 = vrot.slane %v976_v53, 7  ;;  %v993_v2 = vshrl.u32 %v878_v61, 16  ;;  %v987_v4 = vrot.slane %v985_v63, 7 }
  0x1e   : > { %v965_v56 = vsel %vm7922_vm2, %v957_v50, %v964_v51  ;;  %v996_v8 = vshll.u32 %v878_v61, 16  ;;  %v988_v11 = vshll.u32 %v877_v60, 16  ;;  %v1002_v14 = vshrl.u32 %v879_v9, 16  ;;  %v886_v50 = vld [vmem:[%s7910_s26 + $0x4c] sm:$0xf] }
  0x1f   : > { %1177 = vrot.lane.b32.xlu1 %v922_v28, %s7855_s27  ;;  %1173 = vrot.lane.b32.xlu0 %v914_v29, %s7855_s27  ;;  %v974_v0 = vrot.slane %v970_v58, 4  ;;  %v981_v1 = vor.u32 %v979_v55, %v978_v59  ;;  %v973_v3 = vor.u32 %v971_v62, %v970_v58  ;;  %v983_v6 = vrot.slane %v978_v59, 4  ;;  %v888_v59 = vld [vmem:[%s7910_s26 + $0x54] sm:$0xf] }
  0x20   : > { %1179 = vrot.lane.b32.xlu2 %v931_v33, %s7855_s27  ;;  %v995_v7 = vrot.slane %v993_v2, 7  ;;  %v991_v12 = vrot.slane %v987_v4, 4  ;;  %v1010_v15 = vshrl.u32 %v880_v10, 16  ;;  %v990_v16 = vor.u32 %v988_v11, %v987_v4 }
  0x21   : > { %v982_v5 = vsel %vm7922_vm2, %v974_v0, %v981_v1  ;;  %v1013_v17 = vshll.u32 %v880_v10, 16  ;;  %v1004_v20 = vrot.slane %v1002_v14, 7  ;;  %v1005_v24 = vshll.u32 %v879_v9, 16  ;;  %v8007_v14 = vld [vmem:[%s7910_s26 + $0x5c] sm:$0xf] }
  0x22   : > { %v998_v13 = vor.u32 %v996_v8, %v995_v7  ;;  %v1000_v19 = vrot.slane %v995_v7, 4  ;;  %v1012_v21 = vrot.slane %v1010_v15, 7  ;;  %v1019_v28 = vshrl.u32 %v881_v22, 16  ;;  %v398_v8 = vld [vmem:[%s7989_s30 + $0xc] sm:$0xf] }
  0x23   : > { %v1008_v25 = vrot.slane %v1004_v20, 4  ;;  %v1027_v29 = vshrl.u32 %v882_v23, 16  ;;  %v1007_v30 = vor.u32 %v1005_v24, %v1004_v20  ;;  %v1030_v32 = vshll.u32 %v882_v23, 16  ;;  %v344_v15 = vld [vmem:[#allocation2 + $0x14] sm:$0xf] }
  0x24   : > { %v999_v18 = vsel %vm7922_vm2, %v991_v12, %v998_v13  ;;  %v1015_v27 = vor.u32 %v1013_v17, %v1012_v21  ;;  %v1017_v31 = vrot.slane %v1012_v21, 4  ;;  %v1021_v34 = vrot.slane %v1019_v28, 7  ;;  %v8021_v21 = vld [vmem:[%s7989_s30 + $0x4] sm:$0xf] }
  0x25   : > { %v1029_v35 = vrot.slane %v1027_v29, 7  ;;  %v1022_v38 = vshll.u32 %v881_v22, 16  ;;  %v1036_v39 = vshrl.u32 %v883_v36, 16  ;;  %v1044_v40 = vshrl.u32 %v884_v37, 16 }
  0x26   : > { %v1016_v33 = vsel %vm7922_vm2, %v1008_v25, %v1015_v27  ;;  %v1047_v46 = vshll.u32 %v884_v37, 16  ;;  %v1039_v53 = vshll.u32 %v883_v36, 16  ;;  %v1061_v55 = vshrl.u32 %v886_v50, 16  ;;  %v287_v25 = vld [vmem:[#allocation2 + $0xc] sm:$0x1] }
  0x27   : > { %1185 = vrot.lane.b32.xlu1 %v948_v43, %s7855_s27  ;;  %1183 = vrot.lane.b32.xlu0 %v939_v41, %s7855_s27  ;;  %v1025_v41 = vrot.slane %v1021_v34, 4  ;;  %v1032_v42 = vor.u32 %v1030_v32, %v1029_v35  ;;  %v1024_v43 = vor.u32 %v1022_v38, %v1021_v34  ;;  %v1046_v45 = vrot.slane %v1044_v40, 7  ;;  %v397_v37 = vld [vmem:[%s7989_s30 + $0x8] sm:$0xf]  ;;  %v8042_v40 = vld [vmem:[%s7910_s26 + $0x60] sm:$0xf] }
  0x28   : > { %1187 = vrot.lane.b32.xlu2 %v949_v44, %s7855_s27  ;;  %v1038_v44 = vrot.slane %v1036_v39, 7  ;;  %v1034_v48 = vrot.slane %v1029_v35, 4  ;;  %v1063_v62 = vrot.slane %v1061_v55, 7  ;;  %v1064_v63 = vshll.u32 %v886_v50, 16 }
  0x29   : > { %v1033_v47 = vsel %vm7922_vm2, %v1025_v41, %v1032_v42  ;;  %v1049_v52 = vor.u32 %v1047_v46, %v1046_v45  ;;  %v1051_v60 = vrot.slane %v1046_v45, 4  ;;  %v1056_v1 = vshll.u32 %v885_v49, 16 }
  0x2a   : > { %v1042_v51 = vrot.slane %v1038_v44, 4  ;;  %v1041_v58 = vor.u32 %v1039_v53, %v1038_v44  ;;  %v1078_v2 = vshrl.u32 %v888_v59, 16  ;;  %v1081_v10 = vshll.u32 %v888_v59, 16 }
  0x2b   : > { %v455_v12 = vshrl.u32 %v398_v8, 16  ;;  %v345_v20 = vsel %vm7999_vm6, 0, %v344_v15  ;;  %v1068_v23 = vrot.slane %v1063_v62, 4  ;;  %v438_v24 = vshrl.u32 %v8021_v21, 16 }
  0x2c   : > { %v8015_v17 = vrot.slane %v1078_v2, 7  ;;  %346 = vst [vmem:[#allocation2 + $0x14] sm:$0xf] %v345_v20  ;;  %v1095_v28 = vshrl.u32 %v8007_v14, 16  ;;  %v288_v29 = vsel %vm8011_vm7, 0, %v287_v25  ;;  %v458_v38 = vshll.u32 %v398_v8, 16 }
  0x2d   : > { %v8031_v32 = vrot.slane %v438_v24, 7  ;;  %289 = vst [vmem:[#allocation2 + $0xc] sm:$0x1] %v288_v29  ;;  %v447_v41 = vshrl.u32 %v397_v37, 16  ;;  %v1098_v46 = vshll.u32 %v8007_v14, 16  ;;  %vm2083_vm12 = vcmask 1046532  }
  0x2e   : > { %v1083_v35 = vor.u32 %v1081_v10, %v8015_v17  ;;  %v1085_v39 = vrot.slane %v8015_v17, 4  ;;  %v8050_v45 = vrot.slane %v1095_v28, 7  ;;  %vm3549_vm15 = vcmask 523264  }
  0x2f   : > { %1191 = vrot.lane.b32.xlu1 %v965_v56, %s7855_s27  ;;  %1189 = vrot.lane.b32.xlu0 %v956_v54, %s7855_s27  ;;  %v1053_v54 = vshrl.u32 %v885_v49, 16  ;;  %v7978_v56 = vld [vmem:[%s7910_s26 + $0x50] sm:$0xf] }
  0x30   : > { %1193 = vrot.lane.b32.xlu2 %v966_v57, %s7855_s27  ;;  %v1050_v57 = vsel %vm7922_vm2, %v1042_v51, %v1049_v52  ;;  %v1070_v0 = vshrl.u32 %v7978_v56, 16  ;;  %v1073_v27 = vshll.u32 %v7978_v56, 16  ;;  %v449_v51 = vrot.slane %v447_v41, 7 }
  0x31   : > { %v1055_v61 = vrot.slane %v1053_v54, 7  ;;  %v445_v52 = vrot.slane %v8031_v32, 4  ;;  %v290_v54 = vld [vmem:[#allocation2 + $0x18] sm:$0x1]  ;;  %v1100_v10 = vor.u32 %v1098_v46, %v8050_v45  ;;  %v1102_v29 = vrot.slane %v8050_v45, 4 }
  0x32   : > { %v1072_v9 = vrot.slane %v1070_v0, 7  ;;  %v291_v59 = vsel %vm8011_vm7, 0, %v290_v54 }
  0x33   : > { %v1059_v4 = vrot.slane %v1055_v61, 4  ;;  %v1058_v13 = vor.u32 %v1056_v1, %v1055_v61  ;;  %v453_v61 = vrot.slane %v449_v51, 4  ;;  %292 = vst [vmem:[#allocation2 + $0x18] sm:$0x1] %v291_v59  ;;  %v450_v1 = vshll.u32 %v397_v37, 16 }
  0x34   : > { %v1076_v34 = vrot.slane %v1072_v9, 4  ;;  %v1075_v44 = vor.u32 %v1073_v27, %v1072_v9  ;;  %v8119_v27 = vld [vmem:[%s7910_s26 + $0x70] sm:$0xf] }
  0x37   : > { %1197 = vrot.lane.b32.xlu1 %v982_v5, %s7855_s27  ;;  %1195 = vrot.lane.b32.xlu0 %v973_v3, %s7855_s27  ;;  %v347_v3 = vld [vmem:[#allocation2 + $0x20] sm:$0xf]  ;;  %v1066_v5 = vor.u32 %v1064_v63, %v1063_v62  ;;  %v759_v62 = vld [vmem:[#allocation2 + $0x14] sm:$0x1] }
  0x38   : > { %1199 = vrot.lane.b32.xlu2 %v983_v6, %s7855_s27  ;;  %v7995_v6 = vld [vmem:[%s7910_s26 + $0x58] sm:$0xf]  ;;  %v348_v11 = vsel %vm7999_vm6, 0, %v347_v3  ;;  %v760_v2 = vsel %vm8046_vm10, %v445_v52, %v759_v62  ;;  %v752_v3 = vld [vmem:[#allocation2 + $0xc] sm:$0xf] }
  0x39   : > { %349 = vst [vmem:[#allocation2 + $0x20] sm:$0xf] %v348_v11  ;;  %v1067_v22 = vsel %vm7922_vm2, %v1059_v4, %v1066_v5  ;;  %v1090_v56 = vshll.u32 %v7995_v6, 16  ;;  %v7856_v4 = vmov 0   ;;  %v8082_v5 = vld [vmem:[%s7910_s26 + $0x68] sm:$0xf] }
  0x3a   : > { %275 = vst.msk [vmem:[#allocation2 + $0x4] sm:$0xf] %vm273_vm3, %v7856_v4  ;;  %7827 = vset.pattern.permute.xlu1 %v7856_v4  ;;  %7829 = vset.pattern.permute.xlu0 %v7856_v4  ;;  %v350_v11 = vld [vmem:[#allocation2 + $0x2c] sm:$0xf]  ;;  %v1121_v20 = vshrl.u32 %v8082_v5, 16 }
  0x3b   : > { %761 = vst [vmem:[#allocation2 + $0x14] sm:$0x1] %v760_v2  ;;  %7828 = vset.pattern.permute.xlu2 %v7856_v4  ;;  %v351_v14 = vsel %vm7999_vm6, 0, %v350_v11  ;;  %v762_v28 = vld [vmem:[#allocation2 + $0x18] sm:$0xf] }
  0x3c   : > { %352 = vst [vmem:[#allocation2 + $0x2c] sm:$0xf] %v351_v14  ;;  %v8137_v37 = vrot.slane %v1121_v20, 7  ;;  %v8159_v52 = vld [vmem:[%s7910_s26 + $0x78] sm:$0xf] }
  0x3d   : > { %276 = vst.msk [vmem:[#allocation2 + $0x8] sm:$0xf] %vm273_vm3, %v7856_v4 }
  0x3e   : > { %274 = vst.msk [vmem:[#allocation2] sm:$0xf] %vm273_vm3, %v7856_v4  ;;  %v1127_v2 = vrot.slane %v8137_v37, 4 }
  0x3f   : > { %1203 = vrot.lane.b32.xlu1 %v999_v18, %s7855_s27  ;;  %1201 = vrot.lane.b32.xlu0 %v990_v16, %s7855_s27  ;;  %v1087_v18 = vshrl.u32 %v7995_v6, 16  ;;  %v8085_v6 = vld [vmem:[%s7910_s26 + $0x6c] sm:$0xf]  ;;  %278 = vst.msk [vmem:[#allocation2 + $0xcc] sm:$0xf] %vm273_vm3, %v7856_v4 }
  0x40   : > { %1205 = vrot.lane.b32.xlu2 %v1000_v19, %s7855_s27  ;;  %v457_v19 = vrot.slane %v455_v12, 7  ;;  %v8098_v12 = vld [vmem:[%s7989_s30 + $0x14] sm:$0xf]  ;;  %279 = vst.msk [vmem:[#allocation2 + $0xd0] sm:$0xf] %vm273_vm3, %v7856_v4 }
  0x41   : > { %v8036_v36 = vrot.slane %v1087_v18, 7  ;;  %v472_v15 = vshrl.u32 %v8098_v12, 16  ;;  %v452_v18 = vor.u32 %v450_v1, %v449_v51  ;;  %v8198_v14 = vld [vmem:[#allocation2 + $0x4] sm:$0xf]  ;;  %280 = vst.msk [vmem:[#allocation2 + $0xd4] sm:$0xf] %vm273_vm3, %v7856_v4 }
  0x42   : > { %v460_v49 = vor.u32 %v458_v38, %v457_v19  ;;  %1487 = vst.msk [vmem:[#allocation4 + $0x14] sm:$0xf] %vm273_vm3, %v8198_v14 }
  0x43   : > { %v1093_v55 = vrot.slane %v8036_v36, 4  ;;  %v1092_v25 = vor.u32 %v1090_v56, %v8036_v36  ;;  %v441_v36 = vshll.u32 %v8021_v21, 16  ;;  %4107 = vst.msk [vmem:[#allocation3] sm:$0xf] %vm750_vm9, %v7856_v4 }
  0x44   : > { %v461_v8 = vsel %vm7922_vm2, %v453_v61, %v460_v49  ;;  %4108 = vst.msk [vmem:[#allocation3 + $0x4] sm:$0xf] %vm750_vm9, %v7856_v4 }
  0x45   : > { %765 = vst.msk [vmem:[#allocation2 + $0x1c] sm:$0xf] %vm750_vm9, %v461_v8  ;;  %v1101_v24 = vsel %vm7922_vm2, %v1093_v55, %v1100_v10  ;;  %v443_v45 = vor.u32 %v441_v36, %v8031_v32  ;;  %v341_v32 = vld [vmem:[#allocation2 + $0x8] sm:$0xf] }
  0x46   : > { %v342_v59 = vsel %vm7999_vm6, 0, %v341_v32  ;;  %4109 = vst.msk [vmem:[#allocation3 + $0x8] sm:$0xf] %vm750_vm9, %v7856_v4  ;;  %v7702_v55 = vld [vmem:[%s11911_s2 + $0x8] sm:$0xff] }
  0x47   : > { %1209 = vrot.lane.b32.xlu1 %v1016_v33, %s7855_s27  ;;  %1207 = vrot.lane.b32.xlu0 %v1007_v30, %s7855_s27  ;;  %v395_v30 = vld [vmem:[%s7989_s30] sm:$0xf]  ;;  %343 = vst [vmem:[#allocation2 + $0x8] sm:$0xf] %v342_v59 }
  0x48   : > { %1211 = vrot.lane.b32.xlu2 %v1017_v31, %s7855_s27  ;;  %v462_v31 = vrot.slane %v457_v19, 4  ;;  %v430_v33 = vshrl.u32 %v395_v30, 16  ;;  %v433_v42 = vshll.u32 %v395_v30, 16  ;;  %4111 = vst.msk [vmem:[#allocation3 + $0xcc] sm:$0xf] %vm750_vm9, %v7856_v4 }
  0x49   : > { %4112 = vst.msk [vmem:[#allocation3 + $0xd0] sm:$0xf] %vm750_vm9, %v7856_v4 }
  0x4a   : > { %v8059_v53 = vrot.slane %v430_v33, 7  ;;  %v8129_v33 = vld [vmem:[%s7910_s26 + $0x74] sm:$0xf]  ;;  %4113 = vst.msk [vmem:[#allocation3 + $0xd4] sm:$0xf] %vm750_vm9, %v7856_v4 }
  0x4b   : > { %v1146_v46 = vshrl.u32 %v8129_v33, 16 }
  0x4c   : > { %v435_v63 = vor.u32 %v433_v42, %v8059_v53  ;;  %v353_v42 = vld [vmem:[#allocation2 + $0x38] sm:$0xf] }
  0x4d   : > { %v8195_v11 = vrot.slane %v1146_v46, 7  ;;  %v293_v46 = vld [vmem:[#allocation2 + $0x24] sm:$0x1] }
  0x4e   : > { %v753_v9 = vsel %vm8066_vm11, %v435_v63, %v752_v3  ;;  %v1124_v63 = vshll.u32 %v8082_v5, 16  ;;  %v8188_v3 = vld [vmem:[%s7910_s26 + $0x7c] sm:$0xf] }
  0x4f   : > { %1215 = vrot.lane.b32.xlu1 %v1033_v47, %s7855_s27  ;;  %1213 = vrot.lane.b32.xlu0 %v1024_v43, %s7855_s27  ;;  %v8054_v47 = vld [vmem:[%s7910_s26 + $0x64] sm:$0xf]  ;;  %754 = vst [vmem:[#allocation2 + $0xc] sm:$0xf] %v753_v9 }
  0x50   : > { %1217 = vrot.lane.b32.xlu2 %v1034_v48, %s7855_s27  ;;  %v766_v48 = vld [vmem:[#allocation2 + $0x20] sm:$0x1]  ;;  %v1112_v0 = vshrl.u32 %v8054_v47, 16  ;;  %v1115_v17 = vshll.u32 %v8054_v47, 16  ;;  %v773_v47 = vld [vmem:[#allocation2 + $0x2c] sm:$0x1] }
  0x51   : > { %v767_v50 = vsel %vm8046_vm10, %v462_v31, %v766_v48  ;;  %v1107_v31 = vshll.u32 %v8042_v40, 16  ;;  %v354_v48 = vsel %vm7999_vm6, 0, %v353_v42 }
  0x52   : > { %768 = vst [vmem:[#allocation2 + $0x20] sm:$0x1] %v767_v50  ;;  %v8107_v19 = vrot.slane %v1112_v0, 7  ;;  %v436_v50 = vrot.slane %v8059_v53, 4 }
  0x53   : > { %355 = vst [vmem:[#allocation2 + $0x38] sm:$0xf] %v354_v48 }
  0x54   : > { %v1117_v41 = vor.u32 %v1115_v17, %v8107_v19  ;;  %v444_v53 = vsel %vm7922_vm2, %v436_v50, %v443_v45  ;;  %v1119_v62 = vrot.slane %v8107_v19, 4  ;;  %v1141_v17 = vshll.u32 %v8119_v27, 16 }
  0x55   : > { %756 = vst.msk [vmem:[#allocation2 + $0x10] sm:$0xf] %vm750_vm9, %v444_v53  ;;  %v475_v19 = vshll.u32 %v8098_v12, 16  ;;  %v8269_v53 = vld [vmem:[%s7989_s30 + $0x2c] sm:$0xf] }
  0x57   : > { %1221 = vrot.lane.b32.xlu1 %v1050_v57, %s7855_s27  ;;  %1219 = vrot.lane.b32.xlu0 %v1041_v58, %s7855_s27  ;;  %v1104_v57 = vshrl.u32 %v8042_v40, 16  ;;  %v1138_v40 = vshrl.u32 %v8119_v27, 16 }
  0x58   : > { %1223 = vrot.lane.b32.xlu2 %v1051_v60, %s7855_s27  ;;  %v1084_v60 = vsel %vm7922_vm2, %v1076_v34, %v1083_v35  ;;  %v763_v35 = vsel %vm8066_vm11, %v452_v18, %v762_v28  ;;  %v1163_v18 = vshrl.u32 %v8188_v3, 16  ;;  %v284_v28 = vld [vmem:[#allocation2] sm:$0x1] }
  0x59   : > { %764 = vst [vmem:[#allocation2 + $0x18] sm:$0xf] %v763_v35  ;;  %v1331_v21 = vld [vmem:[#allocation2 + $0x20] sm:$0x1]  ;;  %v8181_v0 = vrot.slane %v1138_v40, 7 }
  0x5a   : > { %v356_v35 = vld [vmem:[#allocation2 + $0x44] sm:$0xf]  ;;  %v8237_v40 = vrot.slane %v1163_v18, 7 }
  0x5b   : > { %v357_v48 = vsel %vm7999_vm6, 0, %v356_v35 }
  0x5c   : > { %358 = vst [vmem:[#allocation2 + $0x44] sm:$0xf] %v357_v48 }
  0x5f   : > { %1227 = vrot.lane.b32.xlu1 %v1067_v22, %s7855_s27  ;;  %1225 = vrot.lane.b32.xlu0 %v1058_v13, %s7855_s27  ;;  %v8101_v13 = vrot.slane %v1104_v57, 7  ;;  %v1129_v22 = vshrl.u32 %v8085_v6, 16 }
  0x60   : > { %1229 = vrot.lane.b32.xlu2 %v1068_v23, %s7855_s27  ;;  %v8111_v23 = vrot.slane %v472_v15, 7  ;;  %v1144_v15 = vrot.slane %v8181_v0, 4 }
  0x61   : > { %v1110_v30 = vrot.slane %v8101_v13, 4  ;;  %v8139_v38 = vrot.slane %v1129_v22, 7  ;;  %v1109_v54 = vor.u32 %v1107_v31, %v8101_v13  ;;  %v1149_v13 = vshll.u32 %v8129_v33, 16  ;;  %v8225_v31 = vld [vmem:[%s7989_s30 + $0x24] sm:$0xf] }
  0x62   : > { %v479_v34 = vrot.slane %v8111_v23, 4  ;;  %v1166_v22 = vshll.u32 %v8188_v3, 16  ;;  %v8228_v33 = vld [vmem:[%s7989_s30 + $0x18] sm:$0xf]  ;;  %v506_v45 = vshrl.u32 %v8225_v31, 16 }
  0x63   : > { %v1118_v1 = vsel %vm7922_vm2, %v1110_v30, %v1117_v41  ;;  %v1136_v8 = vrot.slane %v8139_v38, 4  ;;  %v1158_v41 = vshll.u32 %v8159_v52, 16  ;;  %v1151_v42 = vor.u32 %v1149_v13, %v8195_v11 }
  0x64   : > { %v774_v51 = vsel %vm8046_vm10, %v479_v34, %v773_v47  ;;  %v1535_v47 = vshrl.u32 %v8198_v14, 16  ;;  %v8273_v4 = vrot.slane %v506_v45, 7 }
  0x65   : > { %775 = vst [vmem:[#allocation2 + $0x2c] sm:$0x1] %v774_v51 }
  0x67   : > { %1233 = vrot.lane.b32.xlu1 %v1084_v60, %s7855_s27  ;;  %1231 = vrot.lane.b32.xlu0 %v1075_v44, %s7855_s27  ;;  %v8147_v44 = vld [vmem:[%s7989_s30 + $0x1c] sm:$0xf]  ;;  %v8175_v60 = vld [vmem:[%s7989_s30 + $0x10] sm:$0xf] }
  0x68   : > { %1235 = vrot.lane.b32.xlu2 %v1085_v39, %s7855_s27  ;;  %v1132_v39 = vshll.u32 %v8085_v6, 16  ;;  %v489_v49 = vshrl.u32 %v8147_v44, 16  ;;  %v1155_v6 = vshrl.u32 %v8159_v52, 16  ;;  %v464_v5 = vshrl.u32 %v8175_v60, 16 }
  0x69   : > { %v492_v50 = vshll.u32 %v8147_v44, 16  ;;  %v294_v44 = vsel %vm8011_vm7, 0, %v293_v46 }
  0x6a   : > { %v8168_v57 = vrot.slane %v489_v49, 7  ;;  %v1134_v10 = vor.u32 %v1132_v39, %v8139_v38  ;;  %v8211_v20 = vrot.slane %v1155_v6, 7  ;;  %v8221_v12 = vrot.slane %v464_v5, 7  ;;  %295 = vst [vmem:[#allocation2 + $0x24] sm:$0x1] %v294_v44 }
  0x6b   : > { %v477_v38 = vor.u32 %v475_v19, %v8111_v23  ;;  %v481_v39 = vshrl.u32 %v8228_v33, 16  ;;  %v285_v23 = vsel %vm8011_vm7, 0, %v284_v28  ;;  %v1324_v19 = vld [vmem:[#allocation2 + $0x14] sm:$0x1]  ;;  %v513_v28 = vrot.slane %v8273_v4, 4 }
  0x6c   : > { %v496_v9 = vrot.slane %v8168_v57, 4  ;;  %v1135_v34 = vsel %vm7922_vm2, %v1127_v2, %v1134_v10  ;;  %v470_v36 = vrot.slane %v8221_v12, 4  ;;  %v1338_v51 = vld [vmem:[#allocation2 + $0x2c] sm:$0x1]  ;;  %286 = vst [vmem:[#allocation2] sm:$0x1] %v285_v23  ;;  %v1143_v2 = vor.u32 %v1141_v17, %v8181_v0 }
  0x6d   : > { %v8254_v49 = vrot.slane %v481_v39, 7  ;;  %v1537_v17 = vrot.slane %v1535_v47, 4  ;;  %v1160_v45 = vor.u32 %v1158_v41, %v8211_v20 }
  0x6e   : > { %v478_v32 = vsel %vm7922_vm2, %v470_v36, %v477_v38  ;;  %v8303_v36 = vld [vmem:[%s7989_s30 + $0x20] sm:$0xf] }
  0x6f   : > { %1239 = vrot.lane.b32.xlu1 %v1101_v24, %s7855_s27  ;;  %1237 = vrot.lane.b32.xlu0 %v1092_v25, %s7855_s27  ;;  %v780_v24 = vld [vmem:[#allocation2 + $0x38] sm:$0x1]  ;;  %v1153_v25 = vrot.slane %v8195_v11, 4  ;;  %v487_v59 = vrot.slane %v8254_v49, 4  ;;  %772 = vst.msk [vmem:[#allocation2 + $0x28] sm:$0xf] %vm750_vm9, %v478_v32 }
  0x70   : > { %1241 = vrot.lane.b32.xlu2 %v1102_v29, %s7855_s27  ;;  %v781_v27 = vsel %vm8046_vm10, %v496_v9, %v780_v24  ;;  %v1126_v29 = vor.u32 %v1124_v63, %v8137_v37  ;;  %v1161_v37 = vrot.slane %v8211_v20, 4  ;;  %v296_v63 = vld [vmem:[#allocation2 + $0x30] sm:$0x1]  ;;  %v1317_v24 = vld [vmem:[#allocation2 + $0xc] sm:$0xf] }
  0x71   : > { %782 = vst [vmem:[#allocation2 + $0x38] sm:$0x1] %v781_v27  ;;  %v297_v18 = vsel %vm8011_vm7, 0, %v296_v63  ;;  %v769_v44 = vld [vmem:[#allocation2 + $0x24] sm:$0xf] }
  0x72   : > { %v1182_v56 = vpop.permute.xlu2 %1181  ;;  %298 = vst [vmem:[#allocation2 + $0x30] sm:$0x1] %v297_v18 }
  0x73   : > { %v1332_v61 = vsel %vm8164_vm13, %v1182_v56, %v1331_v21  ;;  %v1531_v21 = vshll.u32 %v8198_v14, 16  ;;  %v8264_v56 = vld [vmem:[#allocation2 + $0x8] sm:$0xf]  ;;  %v8316_v39 = vld [vmem:[#allocation2] sm:$0xf] }
  0x74   : > { %1333 = vst [vmem:[#allocation2 + $0x20] sm:$0x1] %v1332_v61  ;;  %v494_v61 = vor.u32 %v492_v50, %v8168_v57  ;;  %v1541_v27 = vshll.u32 %v8264_v56, 16  ;;  %v1522_v3 = vshrl.u32 %v8316_v39, 16 }
  0x75   : > { %1486 = vst.msk [vmem:[#allocation4] sm:$0xf] %vm273_vm3, %v8316_v39 }
  0x76   : > { %v495_v10 = vsel %vm7922_vm2, %v487_v59, %v494_v61 }
  0x77   : > { %1245 = vrot.lane.b32.xlu1 %v1118_v1, %s7855_s27  ;;  %1243 = vrot.lane.b32.xlu0 %v1109_v54, %s7855_s27  ;;  %v359_v54 = vld [vmem:[#allocation2 + $0x50] sm:$0xf]  ;;  %v1152_v1 = vsel %vm7922_vm2, %v1144_v15, %v1151_v42  ;;  %v8292_v15 = vrot.slane %v1531_v21, 5  ;;  %779 = vst.msk [vmem:[#allocation2 + $0x34] sm:$0xf] %vm750_vm9, %v495_v10  ;;  %v1543_v10 = vrot.slane %v1541_v27, 5 }
  0x78   : > { %1247 = vrot.lane.b32.xlu2 %v1119_v62, %s7855_s27  ;;  %v523_v62 = vshrl.u32 %v8269_v53, 16  ;;  %v360_v9 = vsel %vm7999_vm6, 0, %v359_v54  ;;  %v1524_v54 = vrot.slane %v1522_v3, 4 }
  0x79   : > { %361 = vst [vmem:[#allocation2 + $0x50] sm:$0xf] %v360_v9  ;;  %v1538_v46 = vor.u32 %v1537_v17, %v8292_v15  ;;  %v8360_v17 = vld [vmem:[%s7989_s30 + $0x34] sm:$0xf] }
  0x7a   : > { %v1180_v30 = vpop.permute.xlu2 %1179 }
  0x7b   : > { %1330 = vst.msk [vmem:[#allocation2 + $0x1c] sm:$0xf] %vm1315_vm14, %v1180_v30  ;;  %v484_v30 = vshll.u32 %v8228_v33, 16  ;;  %v1440_v35 = vld [vmem:[#allocation2 + $0x20] sm:$0xf]  ;;  %v1168_v33 = vor.u32 %v1166_v22, %v8237_v40  ;;  %v1525_v22 = vshll.u32 %v8316_v39, 16 }
  0x7c   : > { %v1589_v41 = vshll.u32 %v1440_v35, 16 }
  0x7d   : > { %v486_v52 = vor.u32 %v484_v30, %v8254_v49  ;;  %v1527_v56 = vrot.slane %v1525_v22, 5  ;;  %v1169_v63 = vsel %vm7922_vm2, %v1161_v37, %v1168_v33  ;;  %v540_v33 = vshrl.u32 %v8360_v17, 16 }
  0x7f   : > { %1251 = vrot.lane.b32.xlu1 %v1135_v34, %s7855_s27  ;;  %1249 = vrot.lane.b32.xlu0 %v1126_v29, %s7855_s27  ;;  %v8298_v29 = vrot.slane %v523_v62, 7  ;;  %v1345_v34 = vld [vmem:[#allocation2 + $0x38] sm:$0x1]  ;;  %v498_v62 = vshrl.u32 %v8303_v36, 16 }
  0x80   : > { %1253 = vrot.lane.b32.xlu2 %v1136_v8, %s7855_s27  ;;  %v467_v8 = vshll.u32 %v8175_v60, 16  ;;  %v1170_v60 = vrot.slane %v8237_v40, 4 }
  0x81   : > { %v8362_v18 = vrot.slane %v498_v62, 7 }
  0x82   : > { %v1188_v6 = vpop.permute.xlu2 %1187  ;;  %v8283_v57 = vld [vmem:[#allocation2 + $0x1c] sm:$0xf]  ;;  %v469_v21 = vor.u32 %v467_v8, %v8221_v12  ;;  %v787_v12 = vld [vmem:[#allocation2 + $0x44] sm:$0x1]  ;;  %v1539_v8 = vrot.slane %v1538_v46, 4 }
  0x83   : > { %v1339_v5 = vsel %vm8164_vm13, %v1188_v6, %v1338_v51  ;;  %v1579_v13 = vshll.u32 %v8283_v57, 16  ;;  %v1583_v0 = vshrl.u32 %v8283_v57, 16  ;;  %v788_v11 = vsel %vm8046_vm10, %v513_v28, %v787_v12  ;;  %1491 = vst.msk [vmem:[#allocation4 + $0x64] sm:$0xf] %vm273_vm3, %v8283_v57  ;;  %v1327_v6 = vld [vmem:[#allocation2 + $0x18] sm:$0xf] }
  0x84   : > { %1340 = vst [vmem:[#allocation2 + $0x2c] sm:$0x1] %v1339_v5  ;;  %v770_v49 = vsel %vm8066_vm11, %v469_v21, %v769_v44  ;;  %v509_v5 = vshll.u32 %v8225_v31, 16  ;;  %v1544_v21 = vsel %vm8369_vm4, %v1539_v8, %v1543_v10  ;;  %v299_v46 = vld [vmem:[#allocation2 + $0x3c] sm:$0x1] }
  0x85   : > { %v8319_v42 = vrot.slane %v1579_v13, 5  ;;  %v1585_v23 = vrot.slane %v1583_v0, 4  ;;  %789 = vst [vmem:[#allocation2 + $0x44] sm:$0x1] %v788_v11  ;;  %v776_v13 = vld [vmem:[#allocation2 + $0x30] sm:$0xf] }
  0x86   : > { %771 = vst [vmem:[#allocation2 + $0x24] sm:$0xf] %v770_v49  ;;  %v1591_v0 = vrot.slane %v1589_v41, 5  ;;  %v777_v20 = vsel %vm8066_vm11, %v486_v52, %v776_v13  ;;  %v511_v40 = vor.u32 %v509_v5, %v8273_v4  ;;  %v300_v52 = vsel %vm8011_vm7, 0, %v299_v46 }
  0x87   : > { %1257 = vrot.lane.b32.xlu1 %v1152_v1, %s7855_s27  ;;  %1255 = vrot.lane.b32.xlu0 %v1143_v2, %s7855_s27  ;;  %v1586_v61 = vor.u32 %v1585_v23, %v8319_v42  ;;  %v1528_v1 = vor.u32 %v1527_v56, %v1524_v54  ;;  %v794_v2 = vld [vmem:[#allocation2 + $0x50] sm:$0x1]  ;;  %778 = vst [vmem:[#allocation2 + $0x30] sm:$0xf] %v777_v20 }
  0x88   : > { %1259 = vrot.lane.b32.xlu2 %v1153_v25, %s7855_s27  ;;  %v530_v25 = vrot.slane %v8298_v29, 4  ;;  %2616 = vst.msk [vmem:[#allocation4 + $0x20] sm:$0xf] %vm273_vm3, %v8283_v57 }
  0x89   : > { %v1176_v47 = vpop.permute.xlu1 %1175  ;;  %v1172_v48 = vpop.permute.xlu0 %1171  ;;  %v1587_v37 = vrot.slane %v1586_v61, 4  ;;  %301 = vst [vmem:[#allocation2 + $0x3c] sm:$0x1] %v300_v52  ;;  %v8453_v52 = vld [vmem:[#allocation2 + $0x68] sm:$0xf] }
  0x8a   : > { %v1325_v50 = vsel %vm8164_vm13, %v1176_v47, %v1324_v19  ;;  %v1318_v51 = vsel %vm8309_vm0, %v1172_v48, %v1317_v24  ;;  %v1194_v32 = vpop.permute.xlu2 %1193  ;;  %v795_v9 = vsel %vm8046_vm10, %v530_v25, %v794_v2  ;;  %v1529_v19 = vrot.slane %v1528_v1, 4  ;;  %v362_v24 = vld [vmem:[#allocation2 + $0x5c] sm:$0xf] }
  0x8b   : > { %1326 = vst [vmem:[#allocation2 + $0x14] sm:$0x1] %v1325_v50  ;;  %v1346_v59 = vsel %vm8164_vm13, %v1194_v32, %v1345_v34  ;;  %v504_v34 = vrot.slane %v8362_v18, 4  ;;  %v8389_v4 = vsel %vm8369_vm4, %v1587_v37, %v1591_v0  ;;  %v363_v47 = vsel %vm7999_vm6, 0, %v362_v24  ;;  %v8429_v0 = vld [vmem:[%s7989_s30 + $0x28] sm:$0xf] }
  0x8c   : > { %1319 = vst [vmem:[#allocation2 + $0xc] sm:$0xf] %v1318_v51  ;;  %v1352_v30 = vld [vmem:[#allocation2 + $0x44] sm:$0x1]  ;;  %v1534_v3 = vsel %vm8369_vm4, %v1529_v19, %v8292_v15  ;;  %v8404_v15 = vrot.slane %v540_v33, 7 }
  0x8d   : > { %1347 = vst [vmem:[#allocation2 + $0x38] sm:$0x1] %v1346_v59  ;;  %v512_v48 = vsel %vm7922_vm2, %v504_v34, %v511_v40  ;;  %v1334_v41 = vld [vmem:[#allocation2 + $0x24] sm:$0xf]  ;;  %v501_v59 = vshll.u32 %v8303_v36, 16 }
  0x8e   : > { %796 = vst [vmem:[#allocation2 + $0x50] sm:$0x1] %v795_v9  ;;  %v547_v1 = vrot.slane %v8404_v15, 4  ;;  %v1443_v40 = vld [vmem:[#allocation2 + $0x2c] sm:$0xf] }
  0x8f   : > { %1263 = vrot.lane.b32.xlu1 %v1169_v63, %s7855_s27  ;;  %1261 = vrot.lane.b32.xlu0 %v1160_v45, %s7855_s27  ;;  %2450 = vst.msk [vmem:[#allocation4 + $0x44] sm:$0xf] %vm273_vm3, %v8389_v4  ;;  %v503_v34 = vor.u32 %v501_v59, %v8362_v18  ;;  %v8466_v59 = vld [vmem:[%s7989_s30 + $0x3c] sm:$0xf] }
  0x90   : > { %1265 = vrot.lane.b32.xlu2 %v1170_v60, %s7855_s27  ;;  %364 = vst [vmem:[#allocation2 + $0x5c] sm:$0xf] %v363_v47 }
  0x91   : > { %v1178_v27 = vpop.permute.xlu1 %1177  ;;  %v1174_v28 = vpop.permute.xlu0 %1173  ;;  %786 = vst.msk [vmem:[#allocation2 + $0x40] sm:$0xf] %vm750_vm9, %v512_v48 }
  0x92   : > { %v1328_v60 = vsel %vm8309_vm0, %v1178_v27, %v1327_v6  ;;  %1321 = vst.msk [vmem:[#allocation2 + $0x10] sm:$0xf] %vm1315_vm14, %v1174_v28  ;;  %v1200_v35 = vpop.permute.xlu2 %1199  ;;  %v1437_v32 = vld [vmem:[#allocation2 + $0x14] sm:$0xf]  ;;  %v1341_v28 = vld [vmem:[#allocation2 + $0x30] sm:$0xf] }
  0x93   : > { %1329 = vst [vmem:[#allocation2 + $0x18] sm:$0xf] %v1328_v60  ;;  %v1353_v23 = vsel %vm8164_vm13, %v1200_v35, %v1352_v30  ;;  %v8385_v45 = vld [vmem:[#allocation2 + $0xc] sm:$0xf]  ;;  %v1565_v36 = vshll.u32 %v1437_v32, 16 }
  0x94   : > { %1354 = vst [vmem:[#allocation2 + $0x44] sm:$0x1] %v1353_v23  ;;  %v1546_v22 = vshrl.u32 %v8385_v45, 16  ;;  %v1549_v12 = vshll.u32 %v8385_v45, 16 }
  0x95   : > { %1488 = vst.msk [vmem:[#allocation4 + $0x28] sm:$0xf] %vm273_vm3, %v8385_v45  ;;  %v1359_v51 = vld [vmem:[#allocation2 + $0x50] sm:$0x1]  ;;  %v1567_v35 = vrot.slane %v1565_v36, 5  ;;  %v366_v36 = vsel %vm7999_vm6, 0, %v8453_v52 }
  0x96   : > { %v1548_v11 = vrot.slane %v1546_v22, 4  ;;  %v1551_v25 = vrot.slane %v1549_v12, 5  ;;  %v1613_v22 = vshll.u32 %v1443_v40, 16  ;;  %v515_v12 = vshrl.u32 %v8429_v0, 16  ;;  %367 = vst [vmem:[#allocation2 + $0x68] sm:$0xf] %v366_v36 }
  0x97   : > { %1907 = vrot.lane.b32.xlu1 %v1544_v21, %s7857_s7  ;;  %1905 = vrot.lane.b32.xlu0 %v1534_v3, %s7857_s7  ;;  %v801_v27 = vld [vmem:[#allocation2 + $0x5c] sm:$0x1] }
  0x98   : > { %v1552_v50 = vor.u32 %v1551_v25, %v1548_v11  ;;  %v802_v30 = vsel %vm8046_vm10, %v547_v1, %v801_v27  ;;  %v783_v21 = vld [vmem:[#allocation2 + $0x3c] sm:$0xf]  ;;  %v8470_v1 = vrot.slane %v515_v12, 7  ;;  %v8505_v12 = vld [vmem:[%s7989_s30 + $0x30] sm:$0xf] }
  0x99   : > { %v1186_v54 = vpop.permute.xlu1 %1185  ;;  %v1184_v56 = vpop.permute.xlu0 %1183  ;;  %v8411_v44 = vld [vmem:[#allocation2 + $0x10] sm:$0xf]  ;;  %803 = vst [vmem:[#allocation2 + $0x5c] sm:$0x1] %v802_v30 }
  0x9a   : > { %1337 = vst.msk [vmem:[#allocation2 + $0x28] sm:$0xf] %vm1315_vm14, %v1186_v54  ;;  %v1335_v49 = vsel %vm8309_vm0, %v1184_v56, %v1334_v41  ;;  %v1555_v61 = vshll.u32 %v8411_v44, 16  ;;  %v1206_v62 = vpop.permute.xlu2 %1205  ;;  %v1559_v63 = vshrl.u32 %v8411_v44, 16  ;;  %v1553_v2 = vrot.slane %v1552_v50, 4 }
  0x9b   : > { %1336 = vst [vmem:[#allocation2 + $0x24] sm:$0xf] %v1335_v49  ;;  %v1360_v6 = vsel %vm8164_vm13, %v1206_v62, %v1359_v51  ;;  %v8422_v8 = vld [vmem:[#allocation2 + $0x18] sm:$0xf]  ;;  %v784_v41 = vsel %vm8066_vm11, %v503_v34, %v783_v21  ;;  %v302_v21 = vld [vmem:[#allocation2 + $0x48] sm:$0x1] }
  0x9c   : > { %v1557_v9 = vrot.slane %v1555_v61, 5  ;;  %1489 = vst.msk [vmem:[#allocation4 + $0x3c] sm:$0xf] %vm273_vm3, %v8411_v44  ;;  %v1561_v5 = vrot.slane %v1559_v63, 4  ;;  %v1570_v10 = vshrl.u32 %v8422_v8, 16  ;;  %v1573_v13 = vshll.u32 %v8422_v8, 16 }
  0x9d   : > { %1361 = vst [vmem:[#allocation2 + $0x50] sm:$0x1] %v1360_v6  ;;  %v1615_v63 = vrot.slane %v1613_v22, 5 }
  0x9e   : > { %v1558_v20 = vsel %vm8369_vm4, %v1553_v2, %v1557_v9  ;;  %v1562_v37 = vor.u32 %v1561_v5, %v1557_v9  ;;  %v1572_v19 = vrot.slane %v1570_v10, 4  ;;  %v1575_v24 = vrot.slane %v1573_v13, 5  ;;  %1490 = vst.msk [vmem:[#allocation4 + $0x50] sm:$0xf] %vm273_vm3, %v8422_v8  ;;  %v1446_v5 = vld [vmem:[#allocation2 + $0x38] sm:$0xf] }
  0x9f   : > { %1909 = vrot.lane.b32.xlu2 %v1558_v20, %s7857_s7  ;;  %2447 = vst.msk [vmem:[#allocation4 + $0x8] sm:$0xf] %vm273_vm3, %v1558_v20  ;;  %v526_v2 = vshll.u32 %v8269_v53, 16  ;;  %v557_v9 = vshrl.u32 %v8466_v59, 16  ;;  %v521_v53 = vrot.slane %v8470_v1, 4 }
  0xa0   : > { %v1563_v60 = vrot.slane %v1562_v37, 4  ;;  %v1576_v33 = vor.u32 %v1575_v24, %v1572_v19  ;;  %2615 = vst.msk [vmem:[#allocation4 + $0xc] sm:$0xf] %vm273_vm3, %v8422_v8  ;;  %v1366_v13 = vld [vmem:[#allocation2 + $0x5c] sm:$0x1] }
  0xa1   : > { %v1192_v23 = vpop.permute.xlu1 %1191  ;;  %v1190_v46 = vpop.permute.xlu0 %1189  ;;  %v8442_v3 = vld [vmem:[#allocation2 + $0x28] sm:$0xf]  ;;  %785 = vst [vmem:[#allocation2 + $0x3c] sm:$0xf] %v784_v41 }
  0xa2   : > { %1344 = vst.msk [vmem:[#allocation2 + $0x34] sm:$0xf] %vm1315_vm14, %v1192_v23  ;;  %v1342_v18 = vsel %vm8309_vm0, %v1190_v46, %v1341_v28  ;;  %v1568_v47 = vsel %vm8369_vm4, %v1563_v60, %v1567_v35  ;;  %v1577_v48 = vrot.slane %v1576_v33, 4  ;;  %v1603_v11 = vshll.u32 %v8442_v3, 16  ;;  %v8451_v25 = vld [vmem:[#allocation2 + $0x24] sm:$0xf]  ;;  %v1212_v10 = vpop.permute.xlu2 %1211 }
  0xa3   : > { %1343 = vst [vmem:[#allocation2 + $0x30] sm:$0xf] %v1342_v18  ;;  %1911 = vrot.lane.b32.xlu0 %v1568_v47, %s7857_s7  ;;  %v1607_v50 = vshrl.u32 %v8442_v3, 16  ;;  %v1594_v51 = vshrl.u32 %v8451_v25, 16  ;;  %v1597_v32 = vshll.u32 %v8451_v25, 16  ;;  %v1367_v20 = vsel %vm8164_vm13, %v1212_v10, %v1366_v13 }
  0xa4   : > { %2448 = vst.msk [vmem:[#allocation4 + $0x1c] sm:$0xf] %vm273_vm3, %v1568_v47  ;;  %v1582_v54 = vsel %vm8369_vm4, %v1577_v48, %v8319_v42  ;;  %v1605_v56 = vrot.slane %v1603_v11, 5  ;;  %v528_v28 = vor.u32 %v526_v2, %v8298_v29  ;;  %v1449_v2 = vld [vmem:[#allocation2 + $0x44] sm:$0xf] }
  0xa5   : > { %1913 = vrot.lane.b32.xlu1 %v1582_v54, %s7857_s7  ;;  %2449 = vst.msk [vmem:[#allocation4 + $0x30] sm:$0xf] %vm273_vm3, %v1582_v54  ;;  %v1609_v49 = vrot.slane %v1607_v50, 4  ;;  %v1596_v61 = vrot.slane %v1594_v51, 4  ;;  %v1599_v62 = vrot.slane %v1597_v32, 5  ;;  %v8515_v51 = vrot.slane %v557_v9, 7 }
  0xa6   : > { %1493 = vst.msk [vmem:[#allocation4 + $0x8c] sm:$0xf] %vm273_vm3, %v8442_v3  ;;  %v529_v52 = vsel %vm7922_vm2, %v521_v53, %v528_v28  ;;  %v303_v32 = vsel %vm8011_vm7, 0, %v302_v21  ;;  %v1661_v36 = vshll.u32 %v1449_v2, 16 }
  0xa7   : > { %1915 = vrot.lane.b32.xlu2 %v8389_v4, %s7857_s7  ;;  %v1610_v42 = vor.u32 %v1609_v49, %v1605_v56  ;;  %v1600_v6 = vor.u32 %v1599_v62, %v1596_v61  ;;  %2618 = vst.msk [vmem:[#allocation4 + $0x48] sm:$0xf] %vm273_vm3, %v8442_v3  ;;  %v1637_v4 = vshll.u32 %v1446_v5, 16  ;;  %v8520_v49 = vld [vmem:[%s7989_s30 + $0x44] sm:$0xf]  ;;  %v532_v61 = vshrl.u32 %v8505_v12, 16 }
  0xa8   : > { %1492 = vst.msk [vmem:[#allocation4 + $0x78] sm:$0xf] %vm273_vm3, %v8451_v25  ;;  %v1348_v18 = vld [vmem:[#allocation2 + $0x3c] sm:$0xf]  ;;  %v518_v5 = vshll.u32 %v8429_v0, 16  ;;  %v574_v0 = vshrl.u32 %v8520_v49, 16 }
  0xa9   : > { %v1198_v37 = vpop.permute.xlu1 %1197  ;;  %v1611_v19 = vrot.slane %v1610_v42, 4  ;;  %v1601_v24 = vrot.slane %v1600_v6, 4  ;;  %v8488_v27 = vld [vmem:[#allocation2 + $0x34] sm:$0xf]  ;;  %1368 = vst [vmem:[#allocation2 + $0x5c] sm:$0x1] %v1367_v20  ;;  %v1196_v60 = vpop.permute.xlu0 %1195 }
  0xaa   : > { %v1627_v30 = vshll.u32 %v8488_v27, 16  ;;  %v1631_v34 = vshrl.u32 %v8488_v27, 16  ;;  %v8493_v40 = vld [vmem:[#allocation2 + $0x30] sm:$0xf]  ;;  %1351 = vst.msk [vmem:[#allocation2 + $0x40] sm:$0xf] %vm1315_vm14, %v1198_v37  ;;  %v1349_v11 = vsel %vm8309_vm0, %v1196_v60, %v1348_v18 }
  0xab   : > { %v1616_v35 = vsel %vm8369_vm4, %v1611_v19, %v1615_v63  ;;  %v1606_v33 = vsel %vm8369_vm4, %v1601_v24, %v1605_v56  ;;  %v1618_v23 = vshrl.u32 %v8493_v40, 16  ;;  %v1621_v29 = vshll.u32 %v8493_v40, 16  ;;  %2617 = vst.msk [vmem:[#allocation4 + $0x34] sm:$0xf] %vm273_vm3, %v8451_v25  ;;  %v808_v60 = vld [vmem:[#allocation2 + $0x68] sm:$0x1] }
  0xac   : > { %2452 = vst.msk [vmem:[#allocation4 + $0x6c] sm:$0xf] %vm273_vm3, %v1616_v35  ;;  %1917 = vrot.lane.b32.xlu0 %v1606_v33, %s7857_s7  ;;  %v1629_v46 = vrot.slane %v1627_v30, 5  ;;  %v1633_v22 = vrot.slane %v1631_v34, 4  ;;  %v1639_v50 = vrot.slane %v1637_v4, 5  ;;  %v543_v6 = vshll.u32 %v8360_v17, 16 }
  0xad   : > { %1919 = vrot.lane.b32.xlu1 %v1616_v35, %s7857_s7  ;;  %2451 = vst.msk [vmem:[#allocation4 + $0x58] sm:$0xf] %vm273_vm3, %v1606_v33  ;;  %v1620_v47 = vrot.slane %v1618_v23, 4  ;;  %v1623_v48 = vrot.slane %v1621_v29, 5  ;;  %v564_v4 = vrot.slane %v8515_v51, 4  ;;  %v8539_v20 = vrot.slane %v532_v61, 7 }
  0xae   : > { %v1634_v41 = vor.u32 %v1633_v22, %v1629_v46  ;;  %1350 = vst [vmem:[#allocation2 + $0x3c] sm:$0xf] %v1349_v11  ;;  %v368_v17 = vld [vmem:[#allocation2 + $0x74] sm:$0xf]  ;;  %v545_v28 = vor.u32 %v543_v6, %v8404_v15  ;;  %v1663_v34 = vrot.slane %v1661_v36, 5  ;;  %v520_v35 = vor.u32 %v518_v5, %v8470_v1 }
  0xaf   : > { %v1624_v54 = vor.u32 %v1623_v48, %v1620_v47  ;;  %793 = vst.msk [vmem:[#allocation2 + $0x4c] sm:$0xf] %vm750_vm9, %v529_v52  ;;  %v538_v24 = vrot.slane %v8539_v20, 4  ;;  %v809_v29 = vsel %vm8046_vm10, %v564_v4, %v808_v60  ;;  %v369_v15 = vsel %vm7999_vm6, 0, %v368_v17  ;;  %v1218_v17 = vpop.permute.xlu2 %1217 }
  0xb0   : > { %v1635_v56 = vrot.slane %v1634_v41, 4  ;;  %304 = vst [vmem:[#allocation2 + $0x48] sm:$0x1] %v303_v32  ;;  %v8560_v1 = vrot.slane %v574_v0, 7 }
  0xb1   : > { %v1204_v62 = vpop.permute.xlu1 %1203  ;;  %v1625_v63 = vrot.slane %v1624_v54, 4  ;;  %v8528_v9 = vld [vmem:[#allocation2 + $0x40] sm:$0xf]  ;;  %1495 = vst.msk [vmem:[#allocation4 + $0xb4] sm:$0xf] %vm273_vm3, %v8488_v27  ;;  %v546_v11 = vsel %vm7922_vm2, %v538_v24, %v545_v28 }
  0xb2   : > { %1358 = vst.msk [vmem:[#allocation2 + $0x4c] sm:$0xf] %vm1315_vm14, %v1204_v62  ;;  %v1640_v42 = vsel %vm8369_vm4, %v1635_v56, %v1639_v50  ;;  %v1651_v13 = vshll.u32 %v8528_v9, 16  ;;  %v1655_v53 = vshrl.u32 %v8528_v9, 16  ;;  %v8573_v56 = vld [vmem:[%s7989_s30 + $0x38] sm:$0xf] }
  0xb3   : > { %v1630_v10 = vsel %vm8369_vm4, %v1625_v63, %v1629_v46  ;;  %2454 = vst.msk [vmem:[#allocation4 + $0x94] sm:$0xf] %vm273_vm3, %v1640_v42  ;;  %v305_v46 = vld [vmem:[#allocation2 + $0x54] sm:$0x1]  ;;  %v1452_v63 = vld [vmem:[#allocation2 + $0x50] sm:$0xf] }
  0xb4   : > { %1923 = vrot.lane.b32.xlu0 %v1640_v42, %s7857_s7  ;;  %1921 = vrot.lane.b32.xlu2 %v1630_v10, %s7857_s7  ;;  %v1653_v37 = vrot.slane %v1651_v13, 5  ;;  %v1657_v19 = vrot.slane %v1655_v53, 4  ;;  %2620 = vst.msk [vmem:[#allocation4 + $0x70] sm:$0xf] %vm273_vm3, %v8488_v27  ;;  %v306_v62 = vsel %vm8011_vm7, 0, %v305_v46  ;;  %v1685_v36 = vshll.u32 %v1452_v63, 16 }
  0xb5   : > { %v8548_v30 = vld [vmem:[#allocation2 + $0x3c] sm:$0xf]  ;;  %2453 = vst.msk [vmem:[#allocation4 + $0x80] sm:$0xf] %vm273_vm3, %v1630_v10  ;;  %v549_v5 = vshrl.u32 %v8573_v56, 16  ;;  %v581_v13 = vrot.slane %v8560_v1, 4 }
  0xb6   : > { %v1642_v33 = vshrl.u32 %v8548_v30, 16  ;;  %v1645_v21 = vshll.u32 %v8548_v30, 16  ;;  %v1658_v23 = vor.u32 %v1657_v19, %v1653_v37  ;;  %1494 = vst.msk [vmem:[#allocation4 + $0xa0] sm:$0xf] %vm273_vm3, %v8493_v40  ;;  %v535_v53 = vshll.u32 %v8505_v12, 16 }
  0xb7   : > { %810 = vst [vmem:[#allocation2 + $0x68] sm:$0x1] %v809_v29  ;;  %v790_v48 = vld [vmem:[#allocation2 + $0x48] sm:$0xf]  ;;  %v560_v19 = vshll.u32 %v8466_v59, 16 }
  0xb8   : > { %v1644_v22 = vrot.slane %v1642_v33, 4  ;;  %v1647_v18 = vrot.slane %v1645_v21, 5  ;;  %v1659_v47 = vrot.slane %v1658_v23, 4  ;;  %2619 = vst.msk [vmem:[#allocation4 + $0x5c] sm:$0xf] %vm273_vm3, %v8493_v40  ;;  %v791_v41 = vsel %vm8066_vm11, %v520_v35, %v790_v48 }
  0xb9   : > { %v8566_v52 = vld [vmem:[#allocation2 + $0x4c] sm:$0xf]  ;;  %370 = vst [vmem:[#allocation2 + $0x74] sm:$0xf] %v369_v15  ;;  %v1210_v50 = vpop.permute.xlu1 %1209  ;;  %v371_v12 = vld [vmem:[#allocation2 + $0x80] sm:$0xf]  ;;  %v537_v23 = vor.u32 %v535_v53, %v8539_v20 }
  0xba   : > { %v1648_v32 = vor.u32 %v1647_v18, %v1644_v22  ;;  %v1664_v54 = vsel %vm8369_vm4, %v1659_v47, %v1663_v34  ;;  %v1675_v61 = vshll.u32 %v8566_v52, 16  ;;  %792 = vst [vmem:[#allocation2 + $0x48] sm:$0xf] %v791_v41  ;;  %v1679_v2 = vshrl.u32 %v8566_v52, 16  ;;  %v1202_v34 = vpop.permute.xlu0 %1201  ;;  %v8605_v29 = vld [vmem:[%s7989_s30 + $0x4c] sm:$0xf] }
  0xbb   : > { %800 = vst.msk [vmem:[#allocation2 + $0x58] sm:$0xf] %vm750_vm9, %v546_v11  ;;  %v8597_v35 = vrot.slane %v549_v5, 7  ;;  %v562_v22 = vor.u32 %v560_v19, %v8515_v51  ;;  %v372_v20 = vsel %vm7999_vm6, 0, %v371_v12  ;;  %v591_v48 = vshrl.u32 %v8605_v29, 16 }
  0xbc   : > { %1927 = vrot.lane.b32.xlu2 %v1664_v54, %s7857_s7  ;;  %v1649_v42 = vrot.slane %v1648_v32, 4  ;;  %v8581_v6 = vrot.slane %v1675_v61, 5  ;;  %1365 = vst.msk [vmem:[#allocation2 + $0x58] sm:$0xf] %vm1315_vm14, %v1210_v50  ;;  %v1681_v10 = vrot.slane %v1679_v2, 4  ;;  %v577_v19 = vshll.u32 %v8520_v49, 16 }
  0xbd   : > { %307 = vst [vmem:[#allocation2 + $0x54] sm:$0x1] %v306_v62  ;;  %v555_v46 = vrot.slane %v8597_v35, 4  ;;  %v8623_v51 = vld [vmem:[%s7989_s30 + $0x40] sm:$0xf]  ;;  %v8631_v62 = vrot.slane %v591_v48, 7 }
  0xbe   : > { %v1654_v4 = vsel %vm8369_vm4, %v1649_v42, %v1653_v37  ;;  %v1373_v0 = vld [vmem:[#allocation2 + $0x68] sm:$0x1]  ;;  %v1682_v24 = vor.u32 %v1681_v10, %v8581_v6  ;;  %1496 = vst.msk [vmem:[#allocation4 + $0xc8] sm:$0xf] %vm273_vm3, %v8548_v30  ;;  %v1687_v37 = vrot.slane %v1685_v36, 5  ;;  %v566_v63 = vshrl.u32 %v8623_v51, 16  ;;  %v1224_v36 = vpop.permute.xlu2 %1223 }
  0xbf   : > { %2455 = vst.msk [vmem:[#allocation4 + $0xa8] sm:$0xf] %vm273_vm3, %v1654_v4  ;;  %1925 = vrot.lane.b32.xlu1 %v1654_v4, %s7857_s7  ;;  %v1374_v28 = vsel %vm8164_vm13, %v1218_v17, %v1373_v0  ;;  %v563_v50 = vsel %vm7922_vm2, %v555_v46, %v562_v22  ;;  %v308_v32 = vld [vmem:[#allocation2 + $0x60] sm:$0x1]  ;;  %v552_v4 = vshll.u32 %v8573_v56, 16  ;;  %v579_v46 = vor.u32 %v577_v19, %v8560_v1 }
  0xc0   : > { %1375 = vst [vmem:[#allocation2 + $0x68] sm:$0x1] %v1374_v28  ;;  %v815_v60 = vld [vmem:[#allocation2 + $0x74] sm:$0x1]  ;;  %v1683_v33 = vrot.slane %v1682_v24, 4  ;;  %v309_v10 = vsel %vm8011_vm7, 0, %v308_v32 }
  0xc1   : > { %v1355_v21 = vld [vmem:[#allocation2 + $0x48] sm:$0xf]  ;;  %v816_v59 = vsel %vm8046_vm10, %v581_v13, %v815_v60  ;;  %1497 = vst.msk [vmem:[#allocation4 + $0xdc] sm:$0xf] %vm273_vm3, %v8528_v9  ;;  %v1216_v61 = vpop.permute.xlu1 %1215  ;;  %v598_v24 = vrot.slane %v8631_v62, 4  ;;  %v8649_v28 = vrot.slane %v566_v63, 7 }
  0xc2   : > { %v1356_v15 = vsel %vm8309_vm0, %v1202_v34, %v1355_v21  ;;  %817 = vst [vmem:[#allocation2 + $0x74] sm:$0x1] %v816_v59  ;;  %v1688_v18 = vsel %vm8369_vm4, %v1683_v33, %v1687_v37  ;;  %v1208_v53 = vpop.permute.xlu0 %1207  ;;  %v374_v33 = vld [vmem:[#allocation2 + $0x8c] sm:$0xf]  ;;  %v8659_v49 = vld [vmem:[%s7989_s30 + $0x54] sm:$0xf] }
  0xc3   : > { %1357 = vst [vmem:[#allocation2 + $0x48] sm:$0xf] %v1356_v15  ;;  %v8625_v41 = vld [vmem:[#allocation2 + $0x58] sm:$0xf]  ;;  %v572_v59 = vrot.slane %v8649_v28, 4  ;;  %v375_v1 = vsel %vm7999_vm6, 0, %v374_v33 }
  0xc4   : > { %v797_v47 = vld [vmem:[#allocation2 + $0x54] sm:$0xf]  ;;  %2621 = vst.msk [vmem:[#allocation4 + $0x84] sm:$0xf] %vm273_vm3, %v8548_v30  ;;  %v1699_v2 = vshll.u32 %v8625_v41, 16  ;;  %v1703_v42 = vshrl.u32 %v8625_v41, 16 }
  0xc5   : > { %v798_v11 = vsel %vm8066_vm11, %v537_v23, %v797_v47  ;;  %2622 = vst.msk [vmem:[#allocation4 + $0x98] sm:$0xf] %vm273_vm3, %v8528_v9  ;;  %v1455_v22 = vld [vmem:[#allocation2 + $0x5c] sm:$0xf]  ;;  %v554_v47 = vor.u32 %v552_v4, %v8597_v35  ;;  %v608_v32 = vshrl.u32 %v8659_v49, 16 }
  0xc6   : > { %799 = vst [vmem:[#allocation2 + $0x54] sm:$0xf] %v798_v11  ;;  %v8651_v34 = vrot.slane %v1699_v2, 5  ;;  %v1705_v12 = vrot.slane %v1703_v42, 4  ;;  %v1709_v48 = vshll.u32 %v1455_v22, 16  ;;  %v580_v2 = vsel %vm7922_vm2, %v572_v59, %v579_v46 }
  0xc7   : > { %1931 = vrot.lane.b32.xlu1 %v1688_v18, %s7857_s7  ;;  %2456 = vst.msk [vmem:[#allocation4 + $0xbc] sm:$0xf] %vm273_vm3, %v1664_v54  ;;  %v8684_v42 = vld [vmem:[%s7989_s30 + $0x48] sm:$0xf] }
  0xc8   : > { %373 = vst [vmem:[#allocation2 + $0x80] sm:$0xf] %v372_v20  ;;  %v1706_v20 = vor.u32 %v1705_v12, %v8651_v34  ;;  %v583_v19 = vshrl.u32 %v8684_v42, 16 }
  0xc9   : > { %v1380_v5 = vld [vmem:[#allocation2 + $0x74] sm:$0x1]  ;;  %807 = vst.msk [vmem:[#allocation2 + $0x64] sm:$0xf] %vm750_vm9, %v563_v50 }
  0xca   : > { %v1381_v54 = vsel %vm8164_vm13, %v1224_v36, %v1380_v5  ;;  %1372 = vst.msk [vmem:[#allocation2 + $0x64] sm:$0xf] %vm1315_vm14, %v1216_v61  ;;  %v8642_v13 = vld [vmem:[#allocation2 + $0x48] sm:$0xf]  ;;  %v311_v61 = vld [vmem:[#allocation2 + $0x6c] sm:$0x1]  ;;  %v1214_v22 = vpop.permute.xlu0 %1213 }
  0xcb   : > { %1382 = vst [vmem:[#allocation2 + $0x74] sm:$0x1] %v1381_v54  ;;  %v1666_v17 = vshrl.u32 %v8642_v13, 16  ;;  %v1669_v0 = vshll.u32 %v8642_v13, 16  ;;  %v1707_v5 = vrot.slane %v1706_v20, 4 }
  0xcc   : > { %310 = vst [vmem:[#allocation2 + $0x60] sm:$0x1] %v309_v10  ;;  %v1711_v10 = vrot.slane %v1709_v48, 5  ;;  %v377_v48 = vld [vmem:[#allocation2 + $0x98] sm:$0xf] }
  0xcd   : > { %v1362_v37 = vld [vmem:[#allocation2 + $0x54] sm:$0xf]  ;;  %2458 = vst.msk [vmem:[#allocation4 + $0xe4] sm:$0xf] %vm273_vm3, %v1688_v18  ;;  %v1668_v60 = vrot.slane %v1666_v17, 4  ;;  %v1671_v56 = vrot.slane %v1669_v0, 5 }
  0xce   : > { %v1363_v21 = vsel %vm8309_vm0, %v1208_v53, %v1362_v37  ;;  %1499 = vst.msk [vmem:[#allocation4 + $0x104] sm:$0xf] %vm273_vm3, %v8566_v52  ;;  %v312_v53 = vsel %vm8011_vm7, 0, %v311_v61  ;;  %v8694_v17 = vrot.slane %v608_v32, 7  ;;  %v1230_v37 = vpop.permute.xlu2 %1229  ;;  %v1712_v33 = vsel %vm8369_vm4, %v1707_v5, %v1711_v10  ;;  %v1458_v61 = vld [vmem:[#allocation2 + $0x68] sm:$0xf] }
  0xcf   : > { %1364 = vst [vmem:[#allocation2 + $0x54] sm:$0xf] %v1363_v21  ;;  %v822_v23 = vld [vmem:[#allocation2 + $0x80] sm:$0x1]  ;;  %v1672_v15 = vor.u32 %v1671_v56, %v1668_v60  ;;  %v569_v56 = vshll.u32 %v8623_v51, 16  ;;  %v8711_v51 = vrot.slane %v583_v19, 7 }
  0xd0   : > { %v823_v18 = vsel %vm8046_vm10, %v598_v24, %v822_v23  ;;  %2624 = vst.msk [vmem:[#allocation4 + $0xc0] sm:$0xf] %vm273_vm3, %v8566_v52 }
  0xd1   : > { %824 = vst [vmem:[#allocation2 + $0x80] sm:$0x1] %v823_v18  ;;  %v1673_v11 = vrot.slane %v1672_v15, 4  ;;  %v8669_v50 = vld [vmem:[#allocation2 + $0x64] sm:$0xf]  ;;  %v615_v18 = vrot.slane %v8694_v17, 4  ;;  %v571_v32 = vor.u32 %v569_v56, %v8649_v28 }
  0xd2   : > { %1498 = vst.msk [vmem:[#allocation4 + $0xf0] sm:$0xf] %vm273_vm3, %v8642_v13  ;;  %v1723_v54 = vshll.u32 %v8669_v50, 16  ;;  %v1727_v4 = vshrl.u32 %v8669_v50, 16  ;;  %v589_v5 = vrot.slane %v8711_v51, 4 }
  0xd3   : > { %v804_v35 = vld [vmem:[#allocation2 + $0x60] sm:$0xf]  ;;  %v1678_v63 = vsel %vm8369_vm4, %v1673_v11, %v8581_v6  ;;  %2623 = vst.msk [vmem:[#allocation4 + $0xac] sm:$0xf] %vm273_vm3, %v8642_v13  ;;  %v1222_v6 = vpop.permute.xlu1 %1221  ;;  %v8716_v11 = vld [vmem:[%s7989_s30 + $0x5c] sm:$0xf] }
  0xd4   : > { %v805_v36 = vsel %vm8066_vm11, %v554_v47, %v804_v35  ;;  %2457 = vst.msk [vmem:[#allocation4 + $0xd0] sm:$0xf] %vm273_vm3, %v1678_v63  ;;  %1929 = vrot.lane.b32.xlu0 %v1678_v63, %s7857_s7  ;;  %v8706_v21 = vrot.slane %v1723_v54, 5  ;;  %v1729_v46 = vrot.slane %v1727_v4, 4  ;;  %v594_v47 = vshll.u32 %v8605_v29, 16 }
  0xd5   : > { %806 = vst [vmem:[#allocation2 + $0x60] sm:$0xf] %v805_v36  ;;  %v1733_v36 = vshll.u32 %v1458_v61, 16  ;;  %v314_v4 = vld [vmem:[#allocation2 + $0x78] sm:$0x1] }
  0xd6   : > { %376 = vst [vmem:[#allocation2 + $0x8c] sm:$0xf] %v375_v1  ;;  %v8696_v0 = vld [vmem:[#allocation2 + $0x54] sm:$0xf]  ;;  %v596_v10 = vor.u32 %v594_v47, %v8631_v62 }
  0xd7   : > { %814 = vst.msk [vmem:[#allocation2 + $0x70] sm:$0xf] %vm750_vm9, %v580_v2  ;;  %v1690_v24 = vshrl.u32 %v8696_v0, 16  ;;  %v1693_v12 = vshll.u32 %v8696_v0, 16  ;;  %v1730_v2 = vor.u32 %v1729_v46, %v8706_v21 }
  0xd8   : > { %v1387_v60 = vld [vmem:[#allocation2 + $0x80] sm:$0x1]  ;;  %1379 = vst.msk [vmem:[#allocation2 + $0x70] sm:$0xf] %vm1315_vm14, %v1222_v6  ;;  %v378_v6 = vsel %vm7999_vm6, 0, %v377_v48 }
  0xd9   : > { %v1388_v59 = vsel %vm8164_vm13, %v1230_v37, %v1387_v60  ;;  %313 = vst [vmem:[#allocation2 + $0x6c] sm:$0x1] %v312_v53  ;;  %v1692_v23 = vrot.slane %v1690_v24, 4  ;;  %v1695_v15 = vrot.slane %v1693_v12, 5  ;;  %v625_v53 = vshrl.u32 %v8716_v11, 16 }
  0xda   : > { %1389 = vst [vmem:[#allocation2 + $0x80] sm:$0x1] %v1388_v59  ;;  %v8740_v24 = vld [vmem:[%s7989_s30 + $0x50] sm:$0xf]  ;;  %v1735_v12 = vrot.slane %v1733_v36, 5  ;;  %v597_v60 = vsel %vm7922_vm2, %v589_v5, %v596_v10 }
  0xdb   : > { %2460 = vst.msk [vmem:[#allocation4 + $0x10c] sm:$0xf] %vm273_vm3, %v1712_v33  ;;  %v1696_v20 = vor.u32 %v1695_v15, %v1692_v23  ;;  %v8752_v56 = vrot.slane %v625_v53, 7  ;;  %v600_v59 = vshrl.u32 %v8740_v24, 16  ;;  %v315_v23 = vsel %vm8011_vm7, 0, %v314_v4 }
  0xdc   : > { %v1369_v1 = vld [vmem:[#allocation2 + $0x60] sm:$0xf]  ;;  %1935 = vrot.lane.b32.xlu0 %v1712_v33, %s7857_s7  ;;  %1501 = vst.msk [vmem:[#allocation4 + $0x12c] sm:$0xf] %vm273_vm3, %v8625_v41  ;;  %v1228_v33 = vpop.permute.xlu1 %1227 }
  0xdd   : > { %v1370_v35 = vsel %vm8309_vm0, %v1214_v22, %v1369_v1  ;;  %v829_v63 = vld [vmem:[#allocation2 + $0x8c] sm:$0x1]  ;;  %2626 = vst.msk [vmem:[#allocation4 + $0xe8] sm:$0xf] %vm273_vm3, %v8625_v41  ;;  %v1697_v29 = vrot.slane %v1696_v20, 4  ;;  %v586_v22 = vshll.u32 %v8684_v42, 16  ;;  %v1236_v20 = vpop.permute.xlu2 %1235  ;;  %v1220_v1 = vpop.permute.xlu0 %1219 }
  0xde   : > { %1371 = vst [vmem:[#allocation2 + $0x60] sm:$0xf] %v1370_v35  ;;  %v830_v28 = vsel %vm8046_vm10, %v615_v18, %v829_v63  ;;  %v632_v42 = vrot.slane %v8752_v56, 4  ;;  %v8771_v63 = vrot.slane %v600_v59, 7 }
  0xdf   : > { %831 = vst [vmem:[#allocation2 + $0x8c] sm:$0x1] %v830_v28  ;;  %v1702_v54 = vsel %vm8369_vm4, %v1697_v29, %v8651_v34  ;;  %v1731_v34 = vrot.slane %v1730_v2, 4  ;;  %v8746_v37 = vld [vmem:[#allocation2 + $0x70] sm:$0xf]  ;;  %v611_v29 = vshll.u32 %v8659_v49, 16 }
  0xe0   : > { %v811_v19 = vld [vmem:[#allocation2 + $0x6c] sm:$0xf]  ;;  %2459 = vst.msk [vmem:[#allocation4 + $0xf8] sm:$0xf] %vm273_vm3, %v1702_v54  ;;  %1933 = vrot.lane.b32.xlu2 %v1702_v54, %s7857_s7  ;;  %v1747_v15 = vshll.u32 %v8746_v37, 16  ;;  %v1751_v46 = vshrl.u32 %v8746_v37, 16 }
  0xe1   : > { %v812_v62 = vsel %vm8066_vm11, %v571_v32, %v811_v19  ;;  %1500 = vst.msk [vmem:[#allocation4 + $0x118] sm:$0xf] %vm273_vm3, %v8696_v0  ;;  %v1736_v47 = vsel %vm8369_vm4, %v1731_v34, %v1735_v12  ;;  %v8784_v49 = vld [vmem:[%s7989_s30 + $0x64] sm:$0xf]  ;;  %v606_v53 = vrot.slane %v8771_v63, 4  ;;  %v588_v19 = vor.u32 %v586_v22, %v8711_v51 }
  0xe2   : > { %813 = vst [vmem:[#allocation2 + $0x6c] sm:$0xf] %v812_v62  ;;  %v8775_v28 = vrot.slane %v1747_v15, 5  ;;  %v1753_v5 = vrot.slane %v1751_v46, 4  ;;  %v613_v62 = vor.u32 %v611_v29, %v8694_v17  ;;  %v1461_v34 = vld [vmem:[#allocation2 + $0x74] sm:$0xf] }
  0xe3   : > { %2625 = vst.msk [vmem:[#allocation4 + $0xd4] sm:$0xf] %vm273_vm3, %v8696_v0  ;;  %v317_v15 = vld [vmem:[#allocation2 + $0x84] sm:$0x1]  ;;  %v642_v22 = vshrl.u32 %v8784_v49, 16 }
  0xe4   : > { %379 = vst [vmem:[#allocation2 + $0x98] sm:$0xf] %v378_v6  ;;  %v1754_v59 = vor.u32 %v1753_v5, %v8775_v28  ;;  %v1234_v29 = vpop.permute.xlu1 %1233  ;;  %v318_v5 = vsel %vm8011_vm7, 0, %v317_v15 }
  0xe5   : > { %821 = vst.msk [vmem:[#allocation2 + $0x7c] sm:$0xf] %vm750_vm9, %v597_v60  ;;  %v8761_v18 = vld [vmem:[#allocation2 + $0x60] sm:$0xf] }
  0xe6   : > { %v1394_v48 = vld [vmem:[#allocation2 + $0x8c] sm:$0x1]  ;;  %1386 = vst.msk [vmem:[#allocation2 + $0x7c] sm:$0xf] %vm1315_vm14, %v1228_v33  ;;  %v1714_v32 = vshrl.u32 %v8761_v18, 16  ;;  %v1717_v61 = vshll.u32 %v8761_v18, 16 }
  0xe7   : > { %v1395_v35 = vsel %vm8164_vm13, %v1236_v20, %v1394_v48  ;;  %316 = vst [vmem:[#allocation2 + $0x78] sm:$0x1] %v315_v23  ;;  %v380_v33 = vld [vmem:[#allocation2 + $0xa4] sm:$0xf]  ;;  %v1757_v23 = vshll.u32 %v1461_v34, 16 }
  0xe8   : > { %1396 = vst [vmem:[#allocation2 + $0x8c] sm:$0x1] %v1395_v35  ;;  %v1716_v2 = vrot.slane %v1714_v32, 4  ;;  %v1719_v36 = vrot.slane %v1717_v61, 5  ;;  %1939 = vrot.lane.b32.xlu2 %v1736_v47, %s7857_s7  ;;  %v381_v48 = vsel %vm7999_vm6, 0, %v380_v33  ;;  %v1226_v32 = vpop.permute.xlu0 %1225  ;;  %v1755_v61 = vrot.slane %v1754_v59, 4 }
  0xe9   : > { %v1376_v10 = vld [vmem:[#allocation2 + $0x6c] sm:$0xf]  ;;  %1502 = vst.msk [vmem:[#allocation4 + $0x140] sm:$0xf] %vm273_vm3, %v8761_v18  ;;  %v1759_v35 = vrot.slane %v1757_v23, 5 }
  0xea   : > { %v1377_v54 = vsel %vm8309_vm0, %v1220_v1, %v1376_v10  ;;  %v1720_v6 = vor.u32 %v1719_v36, %v1716_v2  ;;  %1503 = vst.msk [vmem:[#allocation4 + $0x154] sm:$0xf] %vm273_vm3, %v8669_v50  ;;  %v8809_v1 = vld [vmem:[%s7989_s30 + $0x58] sm:$0xf]  ;;  %v8816_v36 = vrot.slane %v642_v22, 7 }
  0xeb   : > { %1378 = vst [vmem:[#allocation2 + $0x6c] sm:$0xf] %v1377_v54  ;;  %v836_v4 = vld [vmem:[#allocation2 + $0x98] sm:$0x1] }
  0xec   : > { %v837_v12 = vsel %vm8046_vm10, %v632_v42, %v836_v4  ;;  %v1721_v60 = vrot.slane %v1720_v6, 4  ;;  %2627 = vst.msk [vmem:[#allocation4 + $0xfc] sm:$0xf] %vm273_vm3, %v8761_v18  ;;  %v649_v23 = vrot.slane %v8816_v36, 4 }
  0xed   : > { %838 = vst [vmem:[#allocation2 + $0x98] sm:$0x1] %v837_v12  ;;  %v8794_v46 = vld [vmem:[#allocation2 + $0x7c] sm:$0xf] }
  0xee   : > { %v818_v51 = vld [vmem:[#allocation2 + $0x78] sm:$0xf]  ;;  %v1726_v17 = vsel %vm8369_vm4, %v1721_v60, %v8706_v21  ;;  %2628 = vst.msk [vmem:[#allocation4 + $0x110] sm:$0xf] %vm273_vm3, %v8669_v50  ;;  %v614_v21 = vsel %vm7922_vm2, %v606_v53, %v613_v62  ;;  %v1771_v42 = vshll.u32 %v8794_v46, 16  ;;  %v1775_v2 = vshrl.u32 %v8794_v46, 16 }
  0xef   : > { %v819_v20 = vsel %vm8066_vm11, %v588_v19, %v818_v51  ;;  %2461 = vst.msk [vmem:[#allocation4 + $0x120] sm:$0xf] %vm273_vm3, %v1726_v17  ;;  %1937 = vrot.lane.b32.xlu1 %v1726_v17, %s7857_s7  ;;  %v617_v53 = vshrl.u32 %v8809_v1, 16  ;;  %v603_v19 = vshll.u32 %v8740_v24, 16  ;;  %v1760_v62 = vsel %vm8369_vm4, %v1755_v61, %v1759_v35 }
  0xf0   : > { %820 = vst [vmem:[#allocation2 + $0x78] sm:$0xf] %v819_v20  ;;  %v8830_v34 = vrot.slane %v1771_v42, 5  ;;  %v1777_v59 = vrot.slane %v1775_v2, 4  ;;  %v628_v24 = vshll.u32 %v8716_v11, 16  ;;  %v1232_v2 = vpop.permute.xlu0 %1231 }
  0xf1   : > { %2462 = vst.msk [vmem:[#allocation4 + $0x134] sm:$0xf] %vm273_vm3, %v1736_v47  ;;  %v1242_v47 = vpop.permute.xlu2 %1241  ;;  %v8838_v17 = vrot.slane %v617_v53, 7  ;;  %v8845_v20 = vld [vmem:[%s7989_s30 + $0x6c] sm:$0xf]  ;;  %v605_v11 = vor.u32 %v603_v19, %v8771_v63 }
  0xf2   : > { %382 = vst [vmem:[#allocation2 + $0xa4] sm:$0xf] %v381_v48  ;;  %v8820_v10 = vld [vmem:[#allocation2 + $0x6c] sm:$0xf]  ;;  %v1464_v48 = vld [vmem:[#allocation2 + $0x80] sm:$0xf]  ;;  %v1778_v35 = vor.u32 %v1777_v59, %v8830_v34  ;;  %v1240_v59 = vpop.permute.xlu1 %1239 }
  0xf3   : > { %828 = vst.msk [vmem:[#allocation2 + $0x88] sm:$0xf] %vm750_vm9, %v614_v21  ;;  %v1738_v54 = vshrl.u32 %v8820_v10, 16  ;;  %v1741_v6 = vshll.u32 %v8820_v10, 16  ;;  %v1781_v42 = vshll.u32 %v1464_v48, 16 }
  0xf4   : > { %v1401_v4 = vld [vmem:[#allocation2 + $0x98] sm:$0x1]  ;;  %1393 = vst.msk [vmem:[#allocation2 + $0x88] sm:$0xf] %vm1315_vm14, %v1234_v29 }
  0xf5   : > { %v1402_v12 = vsel %vm8164_vm13, %v1242_v47, %v1401_v4  ;;  %319 = vst [vmem:[#allocation2 + $0x84] sm:$0x1] %v318_v5  ;;  %v1740_v60 = vrot.slane %v1738_v54, 4  ;;  %v1743_v33 = vrot.slane %v1741_v6, 5  ;;  %v623_v5 = vrot.slane %v8838_v17, 4 }
  0xf6   : > { %1403 = vst [vmem:[#allocation2 + $0x98] sm:$0x1] %v1402_v12  ;;  %v630_v54 = vor.u32 %v628_v24, %v8752_v56  ;;  %v320_v6 = vld [vmem:[#allocation2 + $0x90] sm:$0x1]  ;;  %v659_v4 = vshrl.u32 %v8845_v20, 16 }
  0xf7   : > { %v1383_v15 = vld [vmem:[#allocation2 + $0x78] sm:$0xf]  ;;  %2464 = vst.msk [vmem:[#allocation4 + $0x15c] sm:$0xf] %vm273_vm3, %v1760_v62  ;;  %1943 = vrot.lane.b32.xlu1 %v1760_v62, %s7857_s7  ;;  %v1744_v51 = vor.u32 %v1743_v33, %v1740_v60  ;;  %v1783_v62 = vrot.slane %v1781_v42, 5  ;;  %v620_v42 = vshll.u32 %v8809_v1, 16 }
  0xf8   : > { %v1384_v22 = vsel %vm8309_vm0, %v1226_v32, %v1383_v15  ;;  %1505 = vst.msk [vmem:[#allocation4 + $0x17c] sm:$0xf] %vm273_vm3, %v8746_v37  ;;  %v383_v32 = vld [vmem:[#allocation2 + $0xb0] sm:$0xf]  ;;  %v631_v12 = vsel %vm7922_vm2, %v623_v5, %v630_v54  ;;  %v8872_v60 = vld [vmem:[%s7989_s30 + $0x60] sm:$0xf] }
  0xf9   : > { %1385 = vst [vmem:[#allocation2 + $0x78] sm:$0xf] %v1384_v22  ;;  %v843_v21 = vld [vmem:[#allocation2 + $0xa4] sm:$0x1]  ;;  %v1745_v61 = vrot.slane %v1744_v51, 4  ;;  %v384_v56 = vsel %vm7999_vm6, 0, %v383_v32 }
  0xfa   : > { %v844_v29 = vsel %vm8046_vm10, %v649_v23, %v843_v21  ;;  %2630 = vst.msk [vmem:[#allocation4 + $0x138] sm:$0xf] %vm273_vm3, %v8746_v37  ;;  %v8878_v24 = vrot.slane %v659_v4, 7  ;;  %v321_v15 = vsel %vm8011_vm7, 0, %v320_v6  ;;  %v645_v1 = vshll.u32 %v8784_v49, 16 }
  0xfb   : > { %845 = vst [vmem:[#allocation2 + $0xa4] sm:$0x1] %v844_v29  ;;  %v1750_v63 = vsel %vm8369_vm4, %v1745_v61, %v8775_v28  ;;  %v8858_v53 = vld [vmem:[#allocation2 + $0x88] sm:$0xf]  ;;  %v1779_v28 = vrot.slane %v1778_v35, 4  ;;  %v1248_v61 = vpop.permute.xlu2 %1247 }
  0xfc   : > { %v825_v47 = vld [vmem:[#allocation2 + $0x84] sm:$0xf]  ;;  %2463 = vst.msk [vmem:[#allocation4 + $0x148] sm:$0xf] %vm273_vm3, %v1750_v63  ;;  %1941 = vrot.lane.b32.xlu0 %v1750_v63, %s7857_s7  ;;  %v1795_v33 = vshll.u32 %v8858_v53, 16  ;;  %v1799_v23 = vshrl.u32 %v8858_v53, 16 }
  0xfd   : > { %v826_v19 = vsel %vm8066_vm11, %v605_v11, %v825_v47  ;;  %1504 = vst.msk [vmem:[#allocation4 + $0x168] sm:$0xf] %vm273_vm3, %v8820_v10  ;;  %v1784_v22 = vsel %vm8369_vm4, %v1779_v28, %v1783_v62  ;;  %v634_v11 = vshrl.u32 %v8872_v60, 16  ;;  %v666_v6 = vrot.slane %v8878_v24, 4  ;;  %v8897_v47 = vpop.permute.xlu0 %1237  ;;  %v8909_v62 = vld [vmem:[%s7989_s30 + $0x74] sm:$0xf] }
  0xfe   : > { %827 = vst [vmem:[#allocation2 + $0x84] sm:$0xf] %v826_v19  ;;  %v8892_v29 = vrot.slane %v1795_v33, 5  ;;  %v1801_v63 = vrot.slane %v1799_v23, 4 }
  0xff   : > { %2629 = vst.msk [vmem:[#allocation4 + $0x124] sm:$0xf] %vm273_vm3, %v8820_v10 }
 0x100   : > { %385 = vst [vmem:[#allocation2 + $0xb0] sm:$0xf] %v384_v56  ;;  %v8882_v51 = vld [vmem:[#allocation2 + $0x78] sm:$0xf]  ;;  %v8902_v56 = vrot.slane %v634_v11, 7  ;;  %v1802_v23 = vor.u32 %v1801_v63, %v8892_v29 }
 0x101   : > { %835 = vst.msk [vmem:[#allocation2 + $0x94] sm:$0xf] %vm750_vm9, %v631_v12  ;;  %v1762_v48 = vshrl.u32 %v8882_v51, 16  ;;  %v1765_v21 = vshll.u32 %v8882_v51, 16  ;;  %v1467_v12 = vld [vmem:[#allocation2 + $0x8c] sm:$0xf] }
 0x102   : > { %v1408_v35 = vld [vmem:[#allocation2 + $0xa4] sm:$0x1]  ;;  %1400 = vst.msk [vmem:[#allocation2 + $0x94] sm:$0xf] %vm1315_vm14, %v1240_v59  ;;  %v622_v59 = vor.u32 %v620_v42, %v8838_v17  ;;  %v323_v11 = vld [vmem:[#allocation2 + $0x9c] sm:$0x1] }
 0x103   : > { %v1409_v32 = vsel %vm8164_vm13, %v1248_v61, %v1408_v35  ;;  %322 = vst [vmem:[#allocation2 + $0x90] sm:$0x1] %v321_v15  ;;  %v1764_v5 = vrot.slane %v1762_v48, 4  ;;  %v1767_v54 = vrot.slane %v1765_v21, 5  ;;  %v1805_v15 = vshll.u32 %v1467_v12, 16 }
 0x104   : > { %1410 = vst [vmem:[#allocation2 + $0xa4] sm:$0x1] %v1409_v32  ;;  %1947 = vrot.lane.b32.xlu0 %v1784_v22, %s7857_s7  ;;  %v640_v48 = vrot.slane %v8902_v56, 4  ;;  %v647_v21 = vor.u32 %v645_v1, %v8816_v36  ;;  %v676_v42 = vshrl.u32 %v8909_v62, 16  ;;  %v324_v12 = vsel %vm8011_vm7, 0, %v323_v11 }
 0x105   : > { %v1390_v4 = vld [vmem:[#allocation2 + $0x84] sm:$0xf]  ;;  %2466 = vst.msk [vmem:[#allocation4 + $0x184] sm:$0xf] %vm273_vm3, %v1784_v22  ;;  %v1768_v19 = vor.u32 %v1767_v54, %v1764_v5  ;;  %v1807_v5 = vrot.slane %v1805_v15, 5  ;;  %v1254_v54 = vpop.permute.xlu2 %1253 }
 0x106   : > { %v1391_v28 = vsel %vm8309_vm0, %v1232_v2, %v1390_v4  ;;  %1507 = vst.msk [vmem:[#allocation4 + $0x1a4] sm:$0xf] %vm273_vm3, %v8794_v46  ;;  %v386_v2 = vld [vmem:[#allocation2 + $0xbc] sm:$0xf]  ;;  %v648_v63 = vsel %vm7922_vm2, %v640_v48, %v647_v21  ;;  %v1246_v4 = vpop.permute.xlu1 %1245  ;;  %v637_v48 = vshll.u32 %v8872_v60, 16  ;;  %v662_v60 = vshll.u32 %v8845_v20, 16 }
 0x107   : > { %1392 = vst [vmem:[#allocation2 + $0x84] sm:$0xf] %v1391_v28  ;;  %v850_v33 = vld [vmem:[#allocation2 + $0xb0] sm:$0x1]  ;;  %v1769_v49 = vrot.slane %v1768_v19, 4  ;;  %v387_v36 = vsel %vm7999_vm6, 0, %v386_v2 }
 0x108   : > { %v851_v22 = vsel %vm8046_vm10, %v666_v6, %v850_v33  ;;  %2632 = vst.msk [vmem:[#allocation4 + $0x160] sm:$0xf] %vm273_vm3, %v8794_v46  ;;  %v8936_v6 = vld [vmem:[%s7989_s30 + $0x68] sm:$0xf]  ;;  %v8942_v28 = vrot.slane %v676_v42, 7  ;;  %v8946_v33 = vpop.permute.xlu0 %1243 }
 0x109   : > { %852 = vst [vmem:[#allocation2 + $0xb0] sm:$0x1] %v851_v22  ;;  %v1774_v17 = vsel %vm8369_vm4, %v1769_v49, %v8830_v34  ;;  %v8922_v61 = vld [vmem:[#allocation2 + $0x94] sm:$0xf]  ;;  %v1803_v34 = vrot.slane %v1802_v23, 4  ;;  %v651_v22 = vshrl.u32 %v8936_v6, 16 }
 0x10a   : > { %v832_v35 = vld [vmem:[#allocation2 + $0x90] sm:$0xf]  ;;  %2465 = vst.msk [vmem:[#allocation4 + $0x170] sm:$0xf] %vm273_vm3, %v1774_v17  ;;  %1945 = vrot.lane.b32.xlu2 %v1774_v17, %s7857_s7  ;;  %v1819_v1 = vshll.u32 %v8922_v61, 16  ;;  %v1823_v19 = vshrl.u32 %v8922_v61, 16 }
 0x10b   : > { %v833_v32 = vsel %vm8066_vm11, %v622_v59, %v832_v35  ;;  %1506 = vst.msk [vmem:[#allocation4 + $0x190] sm:$0xf] %vm273_vm3, %v8882_v51  ;;  %v8955_v15 = vsel %vm8369_vm4, %v1803_v34, %v1807_v5  ;;  %v8984_v20 = vld [vmem:[%s7989_s30 + $0x7c] sm:$0xf] }
 0x10c   : > { %834 = vst [vmem:[#allocation2 + $0x90] sm:$0xf] %v833_v32  ;;  %v8960_v21 = vrot.slane %v1819_v1, 5  ;;  %v1825_v42 = vrot.slane %v1823_v19, 4  ;;  %v7708_v32 = vld [vmem:[%s11911_s2 + $0x38] sm:$0xff]  ;;  %v7707_v1 = vld [vmem:[%s11911_s2 + $0x30] sm:$0xff] }
 0x10d   : > { %2631 = vst.msk [vmem:[#allocation4 + $0x14c] sm:$0xf] %vm273_vm3, %v8882_v51  ;;  %3598 = vmatpush.bf16.msra.mxu0 %v7708_v32  ;;  %7791 = vmatpush.bf16.msra.mxu1 %v7708_v32  ;;  %v1470_v19 = vld [vmem:[#allocation2 + $0x98] sm:$0xf] }
 0x10e   : > { %388 = vst [vmem:[#allocation2 + $0xbc] sm:$0xf] %v387_v36  ;;  %v8948_v59 = vld [vmem:[#allocation2 + $0x84] sm:$0xf]  ;;  %v683_v36 = vrot.slane %v8942_v28, 4  ;;  %7792 = vmatpush.bf16.msra.mxu2 %v7708_v32  ;;  %7793 = vmatpush.bf16.msra.mxu3 %v7708_v32 }
 0x10f   : > { %842 = vst.msk [vmem:[#allocation2 + $0xa0] sm:$0xf] %vm750_vm9, %v648_v63  ;;  %v1786_v49 = vshrl.u32 %v8948_v59, 16  ;;  %v1789_v23 = vshll.u32 %v8948_v59, 16  ;;  %v8973_v63 = vrot.slane %v651_v22, 7  ;;  %v1826_v22 = vor.u32 %v1825_v42, %v8960_v21 }
 0x110   : > { %v1415_v2 = vld [vmem:[#allocation2 + $0xb0] sm:$0x1]  ;;  %1407 = vst.msk [vmem:[#allocation2 + $0xa0] sm:$0xf] %vm1315_vm14, %v1246_v4 }
 0x111   : > { %v1416_v17 = vsel %vm8164_vm13, %v1254_v54, %v1415_v2  ;;  %325 = vst [vmem:[#allocation2 + $0x9c] sm:$0x1] %v324_v12  ;;  %v1788_v11 = vrot.slane %v1786_v49, 4  ;;  %v1791_v35 = vrot.slane %v1789_v23, 5  ;;  %v389_v54 = vld [vmem:[#allocation2 + $0xc8] sm:$0xf]  ;;  %v639_v49 = vor.u32 %v637_v48, %v8902_v56  ;;  %3599 = vmatpush.bf16.msra.mxu0 %v7707_v1  ;;  %7794 = vmatpush.bf16.msra.mxu1 %v7707_v1 }
 0x112   : > { %1417 = vst [vmem:[#allocation2 + $0xb0] sm:$0x1] %v1416_v17  ;;  %1951 = vrot.lane.b32.xlu2 %v8955_v15, %s7857_s7  ;;  %v1829_v2 = vshll.u32 %v1470_v19, 16  ;;  %v1260_v17 = vpop.permute.xlu2 %1259  ;;  %v326_v48 = vld [vmem:[#allocation2 + $0xa8] sm:$0x1]  ;;  %7795 = vmatpush.bf16.msra.mxu2 %v7707_v1 }
 0x113   : > { %v1397_v34 = vld [vmem:[#allocation2 + $0x90] sm:$0xf]  ;;  %v1792_v5 = vor.u32 %v1791_v35, %v1788_v11  ;;  %1508 = vst.msk [vmem:[#allocation4 + $0x1b8] sm:$0xf] %vm273_vm3, %v8948_v59  ;;  %v657_v11 = vrot.slane %v8973_v63, 4  ;;  %v664_v35 = vor.u32 %v662_v60, %v8878_v24  ;;  %v693_v24 = vshrl.u32 %v8984_v20, 16  ;;  %v9004_v60 = vpop.permute.xlu0 %1249  ;;  %7796 = vmatpush.bf16.msra.mxu3 %v7707_v1 }
 0x114   : > { %v1398_v4 = vsel %vm8309_vm0, %v8897_v47, %v1397_v34  ;;  %1509 = vst.msk [vmem:[#allocation4 + $0x1cc] sm:$0xf] %vm273_vm3, %v8858_v53  ;;  %v1827_v34 = vrot.slane %v1826_v22, 4 }
 0x115   : > { %1399 = vst [vmem:[#allocation2 + $0x90] sm:$0xf] %v1398_v4  ;;  %v857_v12 = vld [vmem:[#allocation2 + $0xbc] sm:$0x1]  ;;  %v1793_v23 = vrot.slane %v1792_v5, 4  ;;  %v1831_v5 = vrot.slane %v1829_v2, 5 }
 0x116   : > { %v858_v47 = vsel %vm8046_vm10, %v683_v36, %v857_v12  ;;  %2633 = vst.msk [vmem:[#allocation4 + $0x174] sm:$0xf] %vm273_vm3, %v8948_v59  ;;  %v390_v36 = vsel %vm7999_vm6, 0, %v389_v54  ;;  %v9011_v4 = vld [vmem:[%s7989_s30 + $0x70] sm:$0xf]  ;;  %v665_v54 = vsel %vm7922_vm2, %v657_v11, %v664_v35  ;;  %v1252_v12 = vpop.permute.xlu1 %1251  ;;  %v9022_v2 = vrot.slane %v693_v24, 7 }
 0x117   : > { %859 = vst [vmem:[#allocation2 + $0xbc] sm:$0x1] %v858_v47  ;;  %v1798_v56 = vsel %vm8369_vm4, %v1793_v23, %v8892_v29  ;;  %v8997_v42 = vld [vmem:[#allocation2 + $0xa0] sm:$0xf]  ;;  %v327_v23 = vsel %vm8011_vm7, 0, %v326_v48  ;;  %v668_v47 = vshrl.u32 %v9011_v4, 16 }
 0x118   : > { %v839_v32 = vld [vmem:[#allocation2 + $0x9c] sm:$0xf]  ;;  %2467 = vst.msk [vmem:[#allocation4 + $0x198] sm:$0xf] %vm273_vm3, %v1798_v56  ;;  %1949 = vrot.lane.b32.xlu1 %v1798_v56, %s7857_s7  ;;  %v1843_v19 = vshll.u32 %v8997_v42, 16  ;;  %v1847_v22 = vshrl.u32 %v8997_v42, 16 }
 0x119   : > { %v840_v29 = vsel %vm8066_vm11, %v639_v49, %v839_v32  ;;  %2634 = vst.msk [vmem:[#allocation4 + $0x188] sm:$0xf] %vm273_vm3, %v8858_v53  ;;  %v654_v49 = vshll.u32 %v8936_v6, 16  ;;  %v679_v35 = vshll.u32 %v8909_v62, 16  ;;  %v7706_v32 = vld [vmem:[%s11911_s2 + $0x28] sm:$0xff]  ;;  %v700_v62 = vrot.slane %v9022_v2, 4 }
 0x11a   : > { %841 = vst [vmem:[#allocation2 + $0x9c] sm:$0xf] %v840_v29  ;;  %v9034_v48 = vrot.slane %v1843_v19, 5  ;;  %3600 = vmatpush.bf16.msra.mxu0 %v7706_v32  ;;  %v7705_v19 = vld [vmem:[%s11911_s2 + $0x20] sm:$0xff]  ;;  %7797 = vmatpush.bf16.msra.mxu1 %v7706_v32 }
 0x11b   : > { %2468 = vst.msk [vmem:[#allocation4 + $0x1ac] sm:$0xf] %vm273_vm3, %v8955_v15  ;;  %v1832_v15 = vsel %vm8369_vm4, %v1827_v34, %v1831_v5  ;;  %v1849_v34 = vrot.slane %v1847_v22, 4  ;;  %v9041_v5 = vpop.permute.xlu2 %1265  ;;  %7798 = vmatpush.bf16.msra.mxu2 %v7706_v32  ;;  %v656_v22 = vor.u32 %v654_v49, %v8973_v63  ;;  %7799 = vmatpush.bf16.msra.mxu3 %v7706_v32 }
 0x11c   : > { %391 = vst [vmem:[#allocation2 + $0xc8] sm:$0xf] %v390_v36  ;;  %v9024_v1 = vld [vmem:[#allocation2 + $0x90] sm:$0xf] }
 0x11d   : > { %849 = vst.msk [vmem:[#allocation2 + $0xac] sm:$0xf] %vm750_vm9, %v665_v54  ;;  %v1810_v11 = vshrl.u32 %v9024_v1, 16  ;;  %v1813_v6 = vshll.u32 %v9024_v1, 16  ;;  %v9045_v54 = vrot.slane %v668_v47, 7 }
 0x11e   : > { %v1422_v56 = vld [vmem:[#allocation2 + $0xbc] sm:$0x1]  ;;  %1414 = vst.msk [vmem:[#allocation2 + $0xac] sm:$0xf] %vm1315_vm14, %v1252_v12  ;;  %3601 = vmatpush.bf16.msra.mxu0 %v7705_v19  ;;  %7800 = vmatpush.bf16.msra.mxu1 %v7705_v19 }
 0x11f   : > { %v1423_v36 = vsel %vm8164_vm13, %v1260_v17, %v1422_v56  ;;  %328 = vst [vmem:[#allocation2 + $0xa8] sm:$0x1] %v327_v23  ;;  %v1812_v24 = vrot.slane %v1810_v11, 4  ;;  %v1815_v29 = vrot.slane %v1813_v6, 5  ;;  %v674_v47 = vrot.slane %v9045_v54, 4  ;;  %v9058_v11 = vpop.permute.xlu0 %1255  ;;  %7801 = vmatpush.bf16.msra.mxu2 %v7705_v19  ;;  %7802 = vmatpush.bf16.msra.mxu3 %v7705_v19  ;;  %v7704_v19 = vld [vmem:[%s11911_s2 + $0x18] sm:$0xff] }
 0x120   : > { %1424 = vst [vmem:[#allocation2 + $0xbc] sm:$0x1] %v1423_v36  ;;  %1955 = vrot.lane.b32.xlu1 %v1832_v15, %s7857_s7  ;;  %v1473_v6 = vld [vmem:[#allocation2 + $0xa4] sm:$0xf]  ;;  %v681_v36 = vor.u32 %v679_v35, %v8942_v28  ;;  %v329_v35 = vld [vmem:[#allocation2 + $0xb4] sm:$0x1] }
 0x121   : > { %v1404_v12 = vld [vmem:[#allocation2 + $0x9c] sm:$0xf]  ;;  %2470 = vst.msk [vmem:[#allocation4 + $0x1d4] sm:$0xf] %vm273_vm3, %v1832_v15  ;;  %v1816_v17 = vor.u32 %v1815_v29, %v1812_v24  ;;  %v1850_v24 = vor.u32 %v1849_v34, %v9034_v48  ;;  %v1853_v29 = vshll.u32 %v1473_v6, 16  ;;  %v1258_v34 = vpop.permute.xlu1 %1257 }
 0x122   : > { %v1405_v23 = vsel %vm8309_vm0, %v8946_v33, %v1404_v12  ;;  %1511 = vst.msk [vmem:[#allocation4 + $0x1f4] sm:$0xf] %vm273_vm3, %v8922_v61  ;;  %3602 = vmatpush.bf16.msra.mxu0 %v7704_v19  ;;  %7803 = vmatpush.bf16.msra.mxu1 %v7704_v19 }
 0x123   : > { %1406 = vst [vmem:[#allocation2 + $0x9c] sm:$0xf] %v1405_v23  ;;  %v864_v15 = vld [vmem:[#allocation2 + $0xc8] sm:$0x1]  ;;  %v1817_v56 = vrot.slane %v1816_v17, 4  ;;  %v1855_v12 = vrot.slane %v1853_v29, 5  ;;  %7804 = vmatpush.bf16.msra.mxu2 %v7704_v19  ;;  %7805 = vmatpush.bf16.msra.mxu3 %v7704_v19 }
 0x124   : > { %v865_v33 = vsel %vm8046_vm10, %v700_v62, %v864_v15  ;;  %2636 = vst.msk [vmem:[#allocation4 + $0x1b0] sm:$0xf] %vm273_vm3, %v8922_v61  ;;  %v1851_v62 = vrot.slane %v1850_v24, 4  ;;  %v9080_v17 = vld [vmem:[%s7989_s30 + $0x78] sm:$0xf] }
 0x125   : > { %866 = vst [vmem:[#allocation2 + $0xc8] sm:$0x1] %v865_v33  ;;  %v1822_v63 = vsel %vm8369_vm4, %v1817_v56, %v8960_v21  ;;  %v9069_v49 = vld [vmem:[#allocation2 + $0xac] sm:$0xf]  ;;  %v682_v21 = vsel %vm7922_vm2, %v674_v47, %v681_v36  ;;  %v1910_v47 = vpop.permute.xlu2 %1909  ;;  %v685_v56 = vshrl.u32 %v9080_v17, 16  ;;  %v671_v36 = vshll.u32 %v9011_v4, 16 }
 0x126   : > { %v846_v28 = vld [vmem:[#allocation2 + $0xa8] sm:$0xf]  ;;  %2469 = vst.msk [vmem:[#allocation4 + $0x1c0] sm:$0xf] %vm273_vm3, %v1822_v63  ;;  %1953 = vrot.lane.b32.xlu0 %v1822_v63, %s7857_s7  ;;  %v1867_v23 = vshll.u32 %v9069_v49, 16  ;;  %v1871_v6 = vshrl.u32 %v9069_v49, 16  ;;  %v1856_v24 = vsel %vm8369_vm4, %v1851_v62, %v1855_v12 }
 0x127   : > { %v847_v32 = vsel %vm8066_vm11, %v656_v22, %v846_v28  ;;  %1510 = vst.msk [vmem:[#allocation4 + $0x1e0] sm:$0xf] %vm273_vm3, %v9024_v1  ;;  %v330_v22 = vsel %vm8011_vm7, 0, %v329_v35  ;;  %v7703_v63 = vld [vmem:[%s11911_s2 + $0x10] sm:$0xff]  ;;  %v696_v35 = vshll.u32 %v8984_v20, 16  ;;  %v9105_v4 = vpop.permute.xlu0 %1261  ;;  %v9114_v19 = vrot.slane %v685_v56, 7 }
 0x128   : > { %848 = vst [vmem:[#allocation2 + $0xa8] sm:$0xf] %v847_v32  ;;  %v9107_v32 = vrot.slane %v1867_v23, 5  ;;  %v1873_v12 = vrot.slane %v1871_v6, 4  ;;  %3603 = vmatpush.bf16.msra.mxu0 %v7703_v63  ;;  %7806 = vmatpush.bf16.msra.mxu1 %v7703_v63  ;;  %v9128_v56 = vld [vmem:[#allocation2 + $0xb0] sm:$0xf] }
 0x129   : > { %2635 = vst.msk [vmem:[#allocation4 + $0x19c] sm:$0xf] %vm273_vm3, %v9024_v1  ;;  %7807 = vmatpush.bf16.msra.mxu2 %v7703_v63  ;;  %v691_v6 = vrot.slane %v9114_v19, 4  ;;  %7808 = vmatpush.bf16.msra.mxu3 %v7703_v63  ;;  %v332_v63 = vld [vmem:[#allocation2 + $0xc0] sm:$0x1] }
 0x12a   : > { %856 = vst.msk [vmem:[#allocation2 + $0xb8] sm:$0xf] %vm750_vm9, %v682_v21  ;;  %v9092_v15 = vld [vmem:[#allocation2 + $0x9c] sm:$0xf] }
 0x12b   : > { %1421 = vst.msk [vmem:[#allocation2 + $0xb8] sm:$0xf] %vm1315_vm14, %v1258_v34  ;;  %v1834_v29 = vshrl.u32 %v9092_v15, 16  ;;  %v1837_v33 = vshll.u32 %v9092_v15, 16 }
 0x12c   : > { %v1429_v28 = vld [vmem:[#allocation2 + $0xc8] sm:$0x1]  ;;  %331 = vst [vmem:[#allocation2 + $0xb4] sm:$0x1] %v330_v22  ;;  %v673_v22 = vor.u32 %v671_v36, %v9045_v54  ;;  %3604 = vmatpush.bf16.msra.mxu0 %v7702_v55  ;;  %7809 = vmatpush.bf16.msra.mxu1 %v7702_v55 }
 0x12d   : > { %v1430_v34 = vsel %vm8164_vm13, %v9041_v5, %v1429_v28  ;;  %2004 = vst.msk [vmem:[#allocation4 + $0x28] sm:$0xf] %vm2001_vm5, %v1910_v47  ;;  %v1836_v21 = vrot.slane %v1834_v29, 4  ;;  %v1839_v62 = vrot.slane %v1837_v33, 5  ;;  %v698_v47 = vor.u32 %v696_v35, %v9022_v2  ;;  %v1264_v29 = vpop.permute.xlu1 %1263  ;;  %v7701_v2 = vld [vmem:[%s11911_s2] sm:$0xff]  ;;  %7810 = vmatpush.bf16.msra.mxu2 %v7702_v55  ;;  %7811 = vmatpush.bf16.msra.mxu3 %v7702_v55  ;;  %vm9284_vm13 = vmor %vm2082_vm8, %vm2083_vm12 }
 0x12e   : > { %1431 = vst [vmem:[#allocation2 + $0xc8] sm:$0x1] %v1430_v34  ;;  %1959 = vrot.lane.b32.xlu0 %v1856_v24, %s7857_s7  ;;  %v1874_v33 = vor.u32 %v1873_v12, %v9107_v32  ;;  %v1877_v28 = vshll.u32 %v9128_v56, 16 }
 0x12f   : > { %v1411_v20 = vld [vmem:[#allocation2 + $0xa8] sm:$0xf]  ;;  %2472 = vst.msk [vmem:[#allocation4 + $0x1fc] sm:$0xf] %vm273_vm3, %v1856_v24  ;;  %v1840_v23 = vor.u32 %v1839_v62, %v1836_v21  ;;  %v699_v34 = vsel %vm7922_vm2, %v691_v6, %v698_v47  ;;  %v688_v47 = vshll.u32 %v9080_v17, 16 }
 0x130   : > { %v1412_v5 = vsel %vm8309_vm0, %v9004_v60, %v1411_v20  ;;  %1513 = vst.msk [vmem:[#allocation4 + $0x21c] sm:$0xf] %vm273_vm3, %v8997_v42  ;;  %v1875_v62 = vrot.slane %v1874_v33, 4  ;;  %v1879_v12 = vrot.slane %v1877_v28, 5  ;;  %v333_v20 = vsel %vm8011_vm7, 0, %v332_v63  ;;  %3605 = vmatpush.bf16.msra.mxu0 %v7701_v2  ;;  %7812 = vmatpush.bf16.msra.mxu1 %v7701_v2 }
 0x131   : > { %1413 = vst [vmem:[#allocation2 + $0xa8] sm:$0xf] %v1412_v5  ;;  %v1841_v24 = vrot.slane %v1840_v23, 4  ;;  %v1906_v23 = vpop.permute.xlu0 %1905  ;;  %v1916_v5 = vpop.permute.xlu2 %1915  ;;  %7813 = vmatpush.bf16.msra.mxu2 %v7701_v2  ;;  %7814 = vmatpush.bf16.msra.mxu3 %v7701_v2  ;;  %v9169_v63 = vld [vmem:[#allocation2 + $0xbc] sm:$0xf] }
 0x132   : > { %2638 = vst.msk [vmem:[#allocation4 + $0x1d8] sm:$0xf] %vm273_vm3, %v8997_v42  ;;  %v9134_v60 = vld [vmem:[#allocation2 + $0xb8] sm:$0xf]  ;;  %v1880_v28 = vsel %vm8369_vm4, %v1875_v62, %v1879_v12 }
 0x133   : > { %v853_v54 = vld [vmem:[#allocation2 + $0xb4] sm:$0xf]  ;;  %v1846_v36 = vsel %vm8369_vm4, %v1841_v24, %v9034_v48  ;;  %1512 = vst.msk [vmem:[#allocation4 + $0x208] sm:$0xf] %vm273_vm3, %v9092_v15  ;;  %v1891_v21 = vshll.u32 %v9134_v60, 16  ;;  %v1895_v48 = vshrl.u32 %v9134_v60, 16 }
 0x134   : > { %v854_v35 = vsel %vm8066_vm11, %v673_v22, %v853_v54  ;;  %2471 = vst.msk [vmem:[#allocation4 + $0x1e8] sm:$0xf] %vm273_vm3, %v1846_v36  ;;  %1957 = vrot.lane.b32.xlu2 %v1846_v36, %s7857_s7 }
 0x135   : > { %855 = vst [vmem:[#allocation2 + $0xb4] sm:$0xf] %v854_v35  ;;  %v9160_v55 = vrot.slane %v1891_v21, 5  ;;  %v1897_v6 = vrot.slane %v1895_v48, 4  ;;  %v1908_v36 = vpop.permute.xlu1 %1907  ;;  %v1901_v35 = vshll.u32 %v9169_v63, 16  ;;  %v690_v21 = vor.u32 %v688_v47, %v9114_v19 }
 0x136   : > { %2637 = vst.msk [vmem:[#allocation4 + $0x1c4] sm:$0xf] %vm273_vm3, %v9092_v15 }
 0x137   : > { %863 = vst.msk [vmem:[#allocation2 + $0xc4] sm:$0xf] %vm750_vm9, %v699_v34  ;;  %v1898_v17 = vor.u32 %v1897_v6, %v9160_v55 }
 0x138   : > { %1428 = vst.msk [vmem:[#allocation2 + $0xc4] sm:$0xf] %vm1315_vm14, %v1264_v29  ;;  %v9158_v22 = vld [vmem:[#allocation2 + $0xa8] sm:$0xf] }
 0x139   : > { %334 = vst [vmem:[#allocation2 + $0xc0] sm:$0x1] %v333_v20  ;;  %v1858_v24 = vshrl.u32 %v9158_v22, 16  ;;  %v1861_v33 = vshll.u32 %v9158_v22, 16  ;;  %v1912_v62 = vpop.permute.xlu0 %1911  ;;  %v4114_v20 = vld [vmem:[#allocation3] sm:$0x1] }
 0x13a   : > { %2007 = vst.msk [vmem:[#allocation4 + $0x64] sm:$0xf] %vm2001_vm5, %v1916_v5  ;;  %v1899_v6 = vrot.slane %v1898_v17, 4 }
 0x13b   : > { %2684 = vst.msk [vmem:[#allocation4 + $0x20] sm:$0xf] %vm2001_vm5, %v1916_v5  ;;  %v1860_v29 = vrot.slane %v1858_v24, 4  ;;  %v1863_v54 = vrot.slane %v1861_v33, 5  ;;  %v1903_v24 = vrot.slane %v1901_v35, 5  ;;  %v4115_v33 = vsel %vm8046_vm10, 0, %v4114_v20 }
 0x13c   : > { %v1418_v2 = vld [vmem:[#allocation2 + $0xb4] sm:$0xf]  ;;  %1514 = vst.msk [vmem:[#allocation4 + $0x230] sm:$0xf] %vm273_vm3, %v9158_v22  ;;  %1963 = vrot.lane.b32.xlu2 %v1880_v28, %s7857_s7 }
 0x13d   : > { %v1419_v34 = vsel %vm8309_vm0, %v9058_v11, %v1418_v2  ;;  %v1864_v48 = vor.u32 %v1863_v54, %v1860_v29  ;;  %1515 = vst.msk [vmem:[#allocation4 + $0x244] sm:$0xf] %vm273_vm3, %v9069_v49  ;;  %v1922_v11 = vpop.permute.xlu2 %1921  ;;  %v1914_v29 = vpop.permute.xlu1 %1913  ;;  %v1904_v54 = vsel %vm8369_vm4, %v1899_v6, %v1903_v24 }
 0x13e   : > { %1420 = vst [vmem:[#allocation2 + $0xb4] sm:$0xf] %v1419_v34 }
 0x13f   : > { %v1865_v12 = vrot.slane %v1864_v48, 4  ;;  %2639 = vst.msk [vmem:[#allocation4 + $0x1ec] sm:$0xf] %vm273_vm3, %v9158_v22 }
 0x140   : > { %v860_v5 = vld [vmem:[#allocation2 + $0xc0] sm:$0xf]  ;;  %2640 = vst.msk [vmem:[#allocation4 + $0x200] sm:$0xf] %vm273_vm3, %v9069_v49 }
 0x141   : > { %v861_v19 = vsel %vm8066_vm11, %v690_v21, %v860_v5  ;;  %v1870_v47 = vsel %vm8369_vm4, %v1865_v12, %v9107_v32  ;;  %2474 = vst.msk [vmem:[#allocation4 + $0x224] sm:$0xf] %vm273_vm3, %v1880_v28  ;;  %v1918_v35 = vpop.permute.xlu0 %1917  ;;  %v9217_v12 = vld [vmem:[#allocation3 + $0x4] sm:$0xf] }
 0x142   : > { %862 = vst [vmem:[#allocation2 + $0xc0] sm:$0xf] %v861_v19  ;;  %1961 = vrot.lane.b32.xlu1 %v1870_v47, %s7857_s7 }
 0x143   : > { %2473 = vst.msk [vmem:[#allocation4 + $0x210] sm:$0xf] %vm273_vm3, %v1870_v47 }
 0x144   : > { %2003 = vst.msk [vmem:[#allocation4 + $0x14] sm:$0xf] %vm2001_vm5, %v1908_v36  ;;  %2263 = vrot.lane.b32.xlu2 %v8385_v45, %s7857_s7 }
 0x145   : > { %4116 = vst [vmem:[#allocation3] sm:$0x1] %v4115_v33  ;;  %v9201_v32 = vld [vmem:[#allocation2 + $0xb4] sm:$0xf]  ;;  %v1928_v48 = vpop.permute.xlu2 %1927  ;;  %v1920_v6 = vpop.permute.xlu1 %1919 }
 0x146   : > { %2002 = vst.msk [vmem:[#allocation4] sm:$0xf] %vm2001_vm5, %v1906_v23  ;;  %v1882_v28 = vshrl.u32 %v9201_v32, 16  ;;  %v1885_v2 = vshll.u32 %v9201_v32, 16 }
 0x147   : > { %2476 = vst.msk [vmem:[#allocation4 + $0x24c] sm:$0xf] %vm273_vm3, %v1904_v54 }
 0x148   : > { %1517 = vst.msk [vmem:[#allocation4 + $0x26c] sm:$0xf] %vm273_vm3, %v9134_v60  ;;  %v1884_v36 = vrot.slane %v1882_v28, 4  ;;  %v1887_v17 = vrot.slane %v1885_v2, 5 }
 0x149   : > { %v1425_v34 = vld [vmem:[#allocation2 + $0xc0] sm:$0xf]  ;;  %2642 = vst.msk [vmem:[#allocation4 + $0x228] sm:$0xf] %vm273_vm3, %v9134_v60  ;;  %v1924_v47 = vpop.permute.xlu0 %1923 }
 0x14a   : > { %v1426_v23 = vsel %vm8309_vm0, %v9105_v4, %v1425_v34  ;;  %1967 = vrot.lane.b32.xlu1 %v1904_v54, %s7857_s7  ;;  %v1888_v21 = vor.u32 %v1887_v17, %v1884_v36  ;;  %1516 = vst.msk [vmem:[#allocation4 + $0x258] sm:$0xf] %vm273_vm3, %v9201_v32  ;;  %v6920_v54 = vld [vmem:[#allocation4 + $0x28] sm:$0xf] }
 0x14b   : > { %1427 = vst [vmem:[#allocation2 + $0xc0] sm:$0xf] %v1426_v23  ;;  %v7623_v20 = vld [vmem:[#allocation4 + $0x10] sm:$0xf0] }
 0x14c   : > { %4710 = vst.msk [vmem:[#allocation4 + $0x14] sm:$0xf] %vm750_vm9, %v9217_v12  ;;  %v1889_v5 = vrot.slane %v1888_v21, 4  ;;  %2269 = vrot.lane.b32.xlu2 %v8283_v57, %s7857_s7  ;;  %v9223_v38 = vld [vmem:[#allocation3] sm:$0xf] }
 0x14d   : > { %v6900_v4 = vld [vmem:[#allocation4] sm:$0xf]  ;;  %2641 = vst.msk [vmem:[#allocation4 + $0x214] sm:$0xf] %vm273_vm3, %v9201_v32  ;;  %v1934_v33 = vpop.permute.xlu2 %1933 }
 0x14e   : > { %4709 = vst.msk [vmem:[#allocation4] sm:$0xf] %vm750_vm9, %v9223_v38  ;;  %v1894_v24 = vsel %vm8369_vm4, %v1889_v5, %v9160_v55  ;;  %v6901_v19 = vor.u32 %v7623_v20, %v6900_v4  ;;  %v1926_v55 = vpop.permute.xlu1 %1925  ;;  %v7831_v20 = vld [vmem:[#allocation2 + $0x14] sm:$0xf] }
 0x14f   : > { %2475 = vst.msk [vmem:[#allocation4 + $0x238] sm:$0xf] %vm273_vm3, %v1894_v24  ;;  %1965 = vrot.lane.b32.xlu0 %v1894_v24, %s7857_s7  ;;  %v2097_v5 = vrot.slane %v7831_v20, 5  ;;  %v7633_v24 = vld [vmem:[#allocation4 + $0x60] sm:$0xf0] }
 0x150   : > { %2010 = vst.msk [vmem:[#allocation4 + $0xa0] sm:$0xf] %vm2001_vm5, %v1922_v11  ;;  %3606 = vmatmul.bf16.vlgmr.msra.gmra.mxu0 %v6901_v19 }
 0x151   : > { %2687 = vst.msk [vmem:[#allocation4 + $0x5c] sm:$0xf] %vm2001_vm5, %v1922_v11 }
 0x152   : > { %2267 = vrot.lane.b32.xlu1 %v8422_v8, %s7857_s7  ;;  %2005 = vst.msk [vmem:[#allocation4 + $0x3c] sm:$0xf] %vm2001_vm5, %v1912_v62  ;;  %v1930_v62 = vpop.permute.xlu0 %1929 }
 0x153   : > { %2006 = vst.msk [vmem:[#allocation4 + $0x50] sm:$0xf] %vm2001_vm5, %v1914_v29 }
 0x154   : > { %2683 = vst.msk [vmem:[#allocation4 + $0xc] sm:$0xf] %vm2001_vm5, %v1914_v29  ;;  %2275 = vrot.lane.b32.xlu2 %v8493_v40, %s7857_s7 }
 0x155   : > { %2013 = vst.msk [vmem:[#allocation4 + $0xdc] sm:$0xf] %vm2001_vm5, %v1928_v48  ;;  %v1940_v29 = vpop.permute.xlu2 %1939 }
 0x156   : > { %2690 = vst.msk [vmem:[#allocation4 + $0x98] sm:$0xf] %vm2001_vm5, %v1928_v48  ;;  %v1932_v2 = vpop.permute.xlu1 %1931 }
 0x157   : > { %2265 = vrot.lane.b32.xlu0 %v8411_v44, %s7857_s7  ;;  %2009 = vst.msk [vmem:[#allocation4 + $0x8c] sm:$0xf] %vm2001_vm5, %v1920_v6 }
 0x158   : > { %2686 = vst.msk [vmem:[#allocation4 + $0x48] sm:$0xf] %vm2001_vm5, %v1920_v6 }
 0x159   : > { %2008 = vst.msk [vmem:[#allocation4 + $0x78] sm:$0xf] %vm2001_vm5, %v1918_v35  ;;  %v7628_v11 = vld [vmem:[#allocation4 + $0x38] sm:$0xf0] }
 0x15a   : > { %2273 = vrot.lane.b32.xlu1 %v8442_v3, %s7857_s7  ;;  %2685 = vst.msk [vmem:[#allocation4 + $0x34] sm:$0xf] %vm2001_vm5, %v1918_v35  ;;  %v6921_v28 = vor.u32 %v7628_v11, %v6920_v54  ;;  %v1936_v36 = vpop.permute.xlu0 %1935  ;;  %v2094_v35 = vrot.slane %v8411_v44, 5  ;;  %v6881_v44 = vrot.slane %v8385_v45, 9  ;;  %v6940_v21 = vld [vmem:[#allocation4 + $0x50] sm:$0xf] }
 0x15b   : > { %2011 = vst.msk [vmem:[#allocation4 + $0xb4] sm:$0xf] %vm2001_vm5, %v1924_v47  ;;  %v2101_v45 = vrot.slane %v8283_v57, 5  ;;  %v7832_v11 = vld [vmem:[#allocation2 + $0x20] sm:$0xf]  ;;  %v2108_v54 = vrot.slane %v8442_v3, 5 }
 0x15c   : > { %2281 = vrot.lane.b32.xlu2 %v8528_v9, %s7857_s7  ;;  %2688 = vst.msk [vmem:[#allocation4 + $0x70] sm:$0xf] %vm2001_vm5, %v1924_v47  ;;  %v2096_v23 = vrot.slane %v2094_v35, 4  ;;  %v9293_v6 = vsel %vm9284_vm13, %v6881_v44, %v2094_v35  ;;  %v6941_v47 = vor.u32 %v7633_v24, %v6940_v21 }
 0x15d   : > { %2016 = vst.msk [vmem:[#allocation4 + $0x118] sm:$0xf] %vm2001_vm5, %v1934_v33  ;;  %v2110_v3 = vrot.slane %v2108_v54, 4 }
 0x15e   : > { %2693 = vst.msk [vmem:[#allocation4 + $0xd4] sm:$0xf] %vm2001_vm5, %v1934_v33  ;;  %v9299_v19 = vsel %vm9284_vm13, %v2096_v23, %v2097_v5  ;;  %v6882_v33 = vrot.slane %v8422_v8, 9  ;;  %v7834_v5 = vld [vmem:[#allocation2 + $0x38] sm:$0xf] }
 0x15f   : > { %2271 = vrot.lane.b32.xlu0 %v8451_v25, %s7857_s7  ;;  %2012 = vst.msk [vmem:[#allocation4 + $0xc8] sm:$0xf] %vm2001_vm5, %v1926_v55 }
 0x160   : > { %3611 = vmatmul.bf16.gmra.mxu0 %v6921_v28  ;;  %2689 = vst.msk [vmem:[#allocation4 + $0x84] sm:$0xf] %vm2001_vm5, %v1926_v55  ;;  %v9315_v8 = vsel %vm9284_vm13, %v6882_v33, %v2101_v45  ;;  %v6960_v24 = vld [vmem:[#allocation4 + $0x78] sm:$0xf] }
 0x161   : > { %2019 = vst.msk [vmem:[#allocation4 + $0x154] sm:$0xf] %vm2001_vm5, %v1940_v29  ;;  %v1938_v34 = vpop.permute.xlu1 %1937 }
 0x162   : > { %2279 = vrot.lane.b32.xlu1 %v8548_v30, %s7857_s7  ;;  %2696 = vst.msk [vmem:[#allocation4 + $0x110] sm:$0xf] %vm2001_vm5, %v1940_v29  ;;  %v2104_v29 = vrot.slane %v7832_v11, 5  ;;  %v7835_v11 = vld [vmem:[#allocation2 + $0x44] sm:$0xf] }
 0x163   : > { %2015 = vst.msk [vmem:[#allocation4 + $0x104] sm:$0xf] %vm2001_vm5, %v1932_v2 }
 0x164   : > { %2287 = vrot.lane.b32.xlu2 %v8696_v0, %s7857_s7  ;;  %2692 = vst.msk [vmem:[#allocation4 + $0xc0] sm:$0xf] %vm2001_vm5, %v1932_v2  ;;  %v1946_v17 = vpop.permute.xlu2 %1945  ;;  %v6883_v2 = vrot.slane %v8451_v25, 9 }
 0x165   : > { %2014 = vst.msk [vmem:[#allocation4 + $0xf0] sm:$0xf] %vm2001_vm5, %v1930_v62 }
 0x166   : > { %2691 = vst.msk [vmem:[#allocation4 + $0xac] sm:$0xf] %vm2001_vm5, %v1930_v62  ;;  %v2103_v62 = vrot.slane %v2101_v45, 4  ;;  %v9339_v23 = vsel %vm9284_vm13, %v6883_v2, %v2108_v54  ;;  %v2122_v45 = vrot.slane %v8528_v9, 5  ;;  %v6886_v54 = vrot.slane %v8642_v13, 9 }
 0x167   : > { %2277 = vrot.lane.b32.xlu0 %v8488_v27, %s7857_s7  ;;  %2017 = vst.msk [vmem:[#allocation4 + $0x12c] sm:$0xf] %vm2001_vm5, %v1936_v36  ;;  %v2129_v2 = vrot.slane %v8566_v52, 5 }
 0x168   : > { %2694 = vst.msk [vmem:[#allocation4 + $0xe8] sm:$0xf] %vm2001_vm5, %v1936_v36  ;;  %v9324_v28 = vsel %vm9284_vm13, %v2103_v62, %v2104_v29  ;;  %v2115_v36 = vrot.slane %v8488_v27, 5  ;;  %v6884_v27 = vrot.slane %v8493_v40, 9  ;;  %v7638_v40 = vld [vmem:[#allocation4 + $0x88] sm:$0xf0] }
 0x169   : > { %2022 = vst.msk [vmem:[#allocation4 + $0x190] sm:$0xf] %vm2001_vm5, %v1946_v17  ;;  %v1944_v55 = vpop.permute.xlu1 %1943  ;;  %v6961_v9 = vor.u32 %v7638_v40, %v6960_v24  ;;  %v2124_v62 = vrot.slane %v2122_v45, 4  ;;  %v2125_v29 = vrot.slane %v7835_v11, 5  ;;  %v6887_v24 = vrot.slane %v8696_v0, 9 }
 0x16a   : > { %2285 = vrot.lane.b32.xlu1 %v8566_v52, %s7857_s7  ;;  %2699 = vst.msk [vmem:[#allocation4 + $0x14c] sm:$0xf] %vm2001_vm5, %v1946_v17  ;;  %v7833_v17 = vld [vmem:[#allocation2 + $0x2c] sm:$0xf]  ;;  %v2117_v44 = vrot.slane %v2115_v36, 4  ;;  %v9360_v33 = vsel %vm9284_vm13, %v6884_v27, %v2115_v36  ;;  %v9403_v52 = vsel %vm9284_vm13, %v6886_v54, %v2129_v2  ;;  %v2136_v40 = vrot.slane %v8625_v41, 5 }
 0x16b   : > { %2018 = vst.msk [vmem:[#allocation4 + $0x140] sm:$0xf] %vm2001_vm5, %v1938_v34  ;;  %v2111_v35 = vrot.slane %v7833_v17, 5  ;;  %v9391_v36 = vsel %vm9284_vm13, %v2124_v62, %v2125_v29  ;;  %v9447_v0 = vld [vmem:[#allocation2 + $0xc4] sm:$0xf]  ;;  %v2143_v54 = vrot.slane %v8669_v50, 5 }
 0x16c   : > { %2293 = vrot.lane.b32.xlu2 %v8669_v50, %s7857_s7  ;;  %2695 = vst.msk [vmem:[#allocation4 + $0xfc] sm:$0xf] %vm2001_vm5, %v1938_v34  ;;  %v1952_v4 = vpop.permute.xlu2 %1951  ;;  %v2138_v62 = vrot.slane %v2136_v40, 4  ;;  %v7837_v11 = vld [vmem:[#allocation2 + $0x5c] sm:$0xf] }
 0x16d   : > { %2025 = vst.msk [vmem:[#allocation4 + $0x1cc] sm:$0xf] %vm2001_vm5, %v1952_v4  ;;  %v9349_v20 = vsel %vm9284_vm13, %v2110_v3, %v2111_v35  ;;  %v7836_v3 = vld [vmem:[#allocation2 + $0x50] sm:$0xf]  ;;  %v2087_v35 = vrot.slane %v8198_v14, 5  ;;  %v2139_v29 = vrot.slane %v7837_v11, 5 }
 0x16e   : > { %2702 = vst.msk [vmem:[#allocation4 + $0x188] sm:$0xf] %vm2001_vm5, %v1952_v4  ;;  %v1942_v57 = vpop.permute.xlu0 %1941  ;;  %v2118_v4 = vrot.slane %v7834_v5, 5  ;;  %v2132_v17 = vrot.slane %v7836_v3, 5  ;;  %v7715_v3 = vld [vmem:[%s11911_s2 + $0x70] sm:$0xff]  ;;  %v7736_v50 = vld [vmem:[%s11911_s2 + $0x118] sm:$0xff] }
 0x16f   : > { %2283 = vrot.lane.b32.xlu0 %v8642_v13, %s7857_s7  ;;  %2231 = vst.msk [vmem:[#allocation4 + $0x2c] sm:$0xf] %vm273_vm3, %v9293_v6  ;;  %v2131_v13 = vrot.slane %v2129_v2, 4  ;;  %3958 = vmatpush.bf16.msrb.mxu0 %v7736_v50  ;;  %v7732_v50 = vld [vmem:[%s11911_s2 + $0xf8] sm:$0xff]  ;;  %v7710_v14 = vld [vmem:[%s11911_s2 + $0x48] sm:$0xff] }
 0x170   : > { %3616 = vmatmul.bf16.gmra.mxu0 %v6941_v47  ;;  %2232 = vst.msk [vmem:[#allocation4 + $0x40] sm:$0xf] %vm273_vm3, %v9299_v19  ;;  %3865 = vmatpush.bf16.msrb.mxu3 %v7732_v50 }
 0x171   : > { %2021 = vst.msk [vmem:[#allocation4 + $0x17c] sm:$0xf] %vm2001_vm5, %v1944_v55 }
 0x172   : > { %2291 = vrot.lane.b32.xlu1 %v8761_v18, %s7857_s7  ;;  %2698 = vst.msk [vmem:[#allocation4 + $0x138] sm:$0xf] %vm2001_vm5, %v1944_v55  ;;  %v6885_v55 = vrot.slane %v8548_v30, 9 }
 0x173   : > { %2020 = vst.msk [vmem:[#allocation4 + $0x168] sm:$0xf] %vm2001_vm5, %v1942_v57 }
 0x174   : > { %2299 = vrot.lane.b32.xlu2 %v8882_v51, %s7857_s7  ;;  %2697 = vst.msk [vmem:[#allocation4 + $0x124] sm:$0xf] %vm2001_vm5, %v1942_v57  ;;  %v9369_v57 = vsel %vm9284_vm13, %v2117_v44, %v2118_v4  ;;  %v9379_v30 = vsel %vm9284_vm13, %v6885_v55, %v2122_v45  ;;  %v9424_v44 = vsel %vm9284_vm13, %v2131_v13, %v2132_v17  ;;  %v6980_v4 = vld [vmem:[#allocation4 + $0xa0] sm:$0xf]  ;;  %v9443_v55 = vld [vmem:[#allocation2 + $0xc0] sm:$0xf] }
 0x175   : > { %2729 = vst.msk [vmem:[#allocation4 + $0x10] sm:$0xf] %vm273_vm3, %v9315_v8  ;;  %v6888_v13 = vrot.slane %v8761_v18, 9  ;;  %v9479_v18 = vsel %vm9284_vm13, %v2138_v62, %v2139_v29  ;;  %v7713_v62 = vld [vmem:[%s11911_s2 + $0x60] sm:$0xff] }
 0x176   : > { %2233 = vst.msk [vmem:[#allocation4 + $0x54] sm:$0xf] %vm273_vm3, %v9315_v8  ;;  %v1948_v34 = vpop.permute.xlu0 %1947 }
 0x177   : > { %2289 = vrot.lane.b32.xlu0 %v8625_v41, %s7857_s7  ;;  %2730 = vst.msk [vmem:[#allocation4 + $0x24] sm:$0xf] %vm273_vm3, %v9324_v28 }
 0x178   : > { %2023 = vst.msk [vmem:[#allocation4 + $0x1a4] sm:$0xf] %vm2001_vm5, %v1948_v34  ;;  %v7668_v25 = vld [vmem:[#allocation4 + $0x178] sm:$0xf0] }
 0x179   : > { %2700 = vst.msk [vmem:[#allocation4 + $0x160] sm:$0xf] %vm2001_vm5, %v1948_v34 }
 0x17a   : > { %2297 = vrot.lane.b32.xlu1 %v8746_v37, %s7857_s7  ;;  %v7080_v21 = vld [vmem:[#allocation4 + $0x168] sm:$0xf]  ;;  %2234 = vst.msk [vmem:[#allocation4 + $0x68] sm:$0xf] %vm273_vm3, %v9324_v28 }
 0x17b   : > { %v7081_v47 = vor.u32 %v7668_v25, %v7080_v21  ;;  %2731 = vst.msk [vmem:[#allocation4 + $0x38] sm:$0xf] %vm273_vm3, %v9339_v23  ;;  %v7643_v21 = vld [vmem:[#allocation4 + $0xb0] sm:$0xf0] }
 0x17c   : > { %2305 = vrot.lane.b32.xlu2 %v8858_v53, %s7857_s7  ;;  %2235 = vst.msk [vmem:[#allocation4 + $0x7c] sm:$0xf] %vm273_vm3, %v9339_v23 }
 0x17d   : > { %3651 = vmatmul.bf16.vlgmr.msra.gmra.mxu1 %v7081_v47  ;;  %2732 = vst.msk [vmem:[#allocation4 + $0x4c] sm:$0xf] %vm273_vm3, %v9349_v20  ;;  %v7716_v47 = vld [vmem:[%s11911_s2 + $0x78] sm:$0xff] }
 0x17e   : > { %2236 = vst.msk [vmem:[#allocation4 + $0x90] sm:$0xf] %vm273_vm3, %v9349_v20  ;;  %3687 = vmatpush.bf16.msrb.mxu1 %v7716_v47  ;;  %v6889_v47 = vrot.slane %v8820_v10, 9 }
 0x17f   : > { %2295 = vrot.lane.b32.xlu0 %v8820_v10, %s7857_s7  ;;  %2733 = vst.msk [vmem:[#allocation4 + $0x60] sm:$0xf] %vm273_vm3, %v9360_v33  ;;  %v7673_v34 = vld [vmem:[#allocation4 + $0x1a0] sm:$0xf0] }
 0x180   : > { %3621 = vmatmul.bf16.gmra.mxu0 %v6961_v9  ;;  %2237 = vst.msk [vmem:[#allocation4 + $0xa4] sm:$0xf] %vm273_vm3, %v9360_v33  ;;  %v9455_v9 = vsel %vm9284_vm13, %v6887_v24, %v2136_v40 }
 0x181   : > { %2734 = vst.msk [vmem:[#allocation4 + $0x74] sm:$0xf] %vm273_vm3, %v9369_v57 }
 0x182   : > { %2303 = vrot.lane.b32.xlu1 %v8948_v59, %s7857_s7  ;;  %2238 = vst.msk [vmem:[#allocation4 + $0xb8] sm:$0xf] %vm273_vm3, %v9369_v57  ;;  %3688 = vmatpush.bf16.msrb.mxu1 %v7715_v3  ;;  %v2157_v3 = vrot.slane %v8794_v46, 5 }
 0x183   : > { %2735 = vst.msk [vmem:[#allocation4 + $0x88] sm:$0xf] %vm273_vm3, %v9379_v30 }
 0x184   : > { %2489 = vrot.lane.b32.xlu2 %v9299_v19, %s7857_s7  ;;  %2239 = vst.msk [vmem:[#allocation4 + $0xcc] sm:$0xf] %vm273_vm3, %v9379_v30  ;;  %v6880_v19 = vrot.slane %v8316_v39, 9  ;;  %v7100_v39 = vld [vmem:[#allocation4 + $0x190] sm:$0xf] }
 0x185   : > { %2736 = vst.msk [vmem:[#allocation4 + $0x9c] sm:$0xf] %vm273_vm3, %v9391_v36  ;;  %v7101_v5 = vor.u32 %v7673_v34, %v7100_v39  ;;  %v7838_v34 = vld [vmem:[#allocation2 + $0x68] sm:$0xf] }
 0x186   : > { %2240 = vst.msk [vmem:[#allocation4 + $0xe0] sm:$0xf] %vm273_vm3, %v9391_v36  ;;  %v2088_v25 = vsel %vm9284_vm13, %v6880_v19, %v2087_v35  ;;  %v2145_v19 = vrot.slane %v2143_v54, 4  ;;  %v7714_v39 = vld [vmem:[%s11911_s2 + $0x68] sm:$0xff] }
 0x187   : > { %2301 = vrot.lane.b32.xlu0 %v8794_v46, %s7857_s7  ;;  %2737 = vst.msk [vmem:[#allocation4 + $0xb0] sm:$0xf] %vm273_vm3, %v9403_v52  ;;  %3689 = vmatpush.bf16.msrb.mxu1 %v7714_v39  ;;  %v7841_v39 = vld [vmem:[#allocation2 + $0x80] sm:$0xf] }
 0x188   : > { %2241 = vst.msk [vmem:[#allocation4 + $0xf4] sm:$0xf] %vm273_vm3, %v9403_v52 }
 0x189   : > { %2229 = vst.msk [vmem:[#allocation4 + $0x4] sm:$0xf] %vm273_vm3, %v2088_v25  ;;  %v2146_v25 = vrot.slane %v7838_v34, 5 }
 0x18a   : > { %2487 = vrot.lane.b32.xlu1 %v9293_v6, %s7857_s7  ;;  %v1950_v27 = vpop.permute.xlu1 %1949  ;;  %2738 = vst.msk [vmem:[#allocation4 + $0xc4] sm:$0xf] %vm273_vm3, %v9424_v44  ;;  %v6981_v6 = vor.u32 %v7643_v21, %v6980_v4  ;;  %v9490_v21 = vsel %vm9284_vm13, %v6888_v13, %v2143_v54 }
 0x18b   : > { %2024 = vst.msk [vmem:[#allocation4 + $0x1b8] sm:$0xf] %vm2001_vm5, %v1950_v27  ;;  %3690 = vmatpush.bf16.msrb.mxu1 %v7713_v62 }
 0x18c   : > { %2313 = vrot.lane.b32.xlu2 %v8997_v42, %s7857_s7  ;;  %2701 = vst.msk [vmem:[#allocation4 + $0x174] sm:$0xf] %vm2001_vm5, %v1950_v27  ;;  %v7678_v27 = vld [vmem:[#allocation4 + $0x1c8] sm:$0xf0] }
 0x18d   : > { %3656 = vmatmul.bf16.gmra.mxu1 %v7101_v5  ;;  %2242 = vst.msk [vmem:[#allocation4 + $0x108] sm:$0xf] %vm273_vm3, %v9424_v44  ;;  %v7000_v5 = vld [vmem:[#allocation4 + $0xc8] sm:$0xf] }
 0x18e   : > { %v1958_v45 = vpop.permute.xlu2 %1957  ;;  %2643 = vst.msk [vmem:[#allocation4 + $0x23c] sm:$0xf] %vm273_vm3, %v9443_v55 }
 0x18f   : > { %2307 = vrot.lane.b32.xlu0 %v9024_v1, %s7857_s7  ;;  %2028 = vst.msk [vmem:[#allocation4 + $0x208] sm:$0xf] %vm2001_vm5, %v1958_v45 }
 0x190   : > { %3626 = vmatmul.bf16.gmra.mxu0 %v6981_v6  ;;  %2705 = vst.msk [vmem:[#allocation4 + $0x1c4] sm:$0xf] %vm2001_vm5, %v1958_v45  ;;  %v9502_v6 = vsel %vm9284_vm13, %v2145_v19, %v2146_v25  ;;  %v7840_v19 = vld [vmem:[#allocation2 + $0x8] sm:$0xf] }
 0x191   : > { %2644 = vst.msk [vmem:[#allocation4 + $0x250] sm:$0xf] %vm273_vm3, %v9447_v0  ;;  %v2090_v34 = vrot.slane %v7840_v19, 5  ;;  %v7843_v19 = vld [vmem:[#allocation2 + $0x98] sm:$0xf] }
 0x192   : > { %2311 = vrot.lane.b32.xlu1 %v9092_v15, %s7857_s7  ;;  %v1956_v41 = vpop.permute.xlu1 %1955  ;;  %2739 = vst.msk [vmem:[#allocation4 + $0xd8] sm:$0xf] %vm273_vm3, %v9455_v9  ;;  %v7120_v17 = vld [vmem:[#allocation4 + $0x1b8] sm:$0xf] }
 0x193   : > { %2027 = vst.msk [vmem:[#allocation4 + $0x1f4] sm:$0xf] %vm2001_vm5, %v1956_v41  ;;  %v7121_v4 = vor.u32 %v7678_v27, %v7120_v17  ;;  %v6890_v17 = vrot.slane %v8882_v51, 9  ;;  %v2159_v27 = vrot.slane %v2157_v3, 4  ;;  %v2160_v51 = vrot.slane %v7841_v39, 5 }
 0x194   : > { %2493 = vrot.lane.b32.xlu2 %v9324_v28, %s7857_s7  ;;  %2704 = vst.msk [vmem:[#allocation4 + $0x1b0] sm:$0xf] %vm2001_vm5, %v1956_v41  ;;  %v2150_v41 = vrot.slane %v8746_v37, 5  ;;  %v2178_v39 = vrot.slane %v8997_v42, 5 }
 0x195   : > { %2243 = vst.msk [vmem:[#allocation4 + $0x11c] sm:$0xf] %vm273_vm3, %v9455_v9 }
 0x196   : > { %v1964_v2 = vpop.permute.xlu2 %1963  ;;  %2740 = vst.msk [vmem:[#allocation4 + $0xec] sm:$0xf] %vm273_vm3, %v9479_v18  ;;  %v9522_v37 = vsel %vm9284_vm13, %v6889_v47, %v2150_v41  ;;  %v2152_v54 = vrot.slane %v2150_v41, 4  ;;  %v9578_v41 = vsel %vm9284_vm13, %v2159_v27, %v2160_v51  ;;  %v6893_v27 = vrot.slane %v9092_v15, 9  ;;  %v7735_v15 = vld [vmem:[%s11911_s2 + $0x110] sm:$0xff] }
 0x197   : > { %2309 = vrot.lane.b32.xlu0 %v8922_v61, %s7857_s7  ;;  %2031 = vst.msk [vmem:[#allocation4 + $0x244] sm:$0xf] %vm2001_vm5, %v1964_v2  ;;  %3959 = vmatpush.bf16.msrb.mxu0 %v7735_v15 }
 0x198   : > { %2708 = vst.msk [vmem:[#allocation4 + $0x200] sm:$0xf] %vm2001_vm5, %v1964_v2  ;;  %v1954_v28 = vpop.permute.xlu0 %1953  ;;  %v7839_v2 = vld [vmem:[#allocation2 + $0x74] sm:$0xf]  ;;  %v9648_v42 = vsel %vm9284_vm13, %v6893_v27, %v2178_v39 }
 0x199   : > { %2026 = vst.msk [vmem:[#allocation4 + $0x1e0] sm:$0xf] %vm2001_vm5, %v1954_v28  ;;  %v2153_v13 = vrot.slane %v7839_v2, 5 }
 0x19a   : > { %2491 = vrot.lane.b32.xlu1 %v9315_v8, %s7857_s7  ;;  %2703 = vst.msk [vmem:[#allocation4 + $0x19c] sm:$0xf] %vm2001_vm5, %v1954_v28  ;;  %v7648_v8 = vld [vmem:[#allocation4 + $0xd8] sm:$0xf0]  ;;  %v7683_v40 = vld [vmem:[#allocation4 + $0x1f0] sm:$0xf0] }
 0x19b   : > { %2244 = vst.msk [vmem:[#allocation4 + $0x130] sm:$0xf] %vm273_vm3, %v9479_v18  ;;  %v7001_v45 = vor.u32 %v7648_v8, %v7000_v5  ;;  %v7712_v28 = vld [vmem:[%s11911_s2 + $0x58] sm:$0xff]  ;;  %v9542_v46 = vsel %vm9284_vm13, %v2152_v54, %v2153_v13  ;;  %v7711_v5 = vld [vmem:[%s11911_s2 + $0x50] sm:$0xff]  ;;  %v2089_v8 = vrot.slane %v2087_v35, 4  ;;  %v7729_v13 = vld [vmem:[%s11911_s2 + $0xe0] sm:$0xff] }
 0x19c   : > { %2321 = vrot.lane.b32.xlu2 %v9134_v60, %s7857_s7  ;;  %2741 = vst.msk [vmem:[#allocation4 + $0x100] sm:$0xf] %vm273_vm3, %v9490_v21  ;;  %3691 = vmatpush.bf16.msrb.mxu1 %v7712_v28  ;;  %v7653_v35 = vld [vmem:[#allocation4 + $0x100] sm:$0xf0]  ;;  %v2171_v28 = vrot.slane %v8922_v61, 5 }
 0x19d   : > { %3661 = vmatmul.bf16.gmra.mxu1 %v7121_v4  ;;  %2245 = vst.msk [vmem:[#allocation4 + $0x144] sm:$0xf] %vm273_vm3, %v9490_v21  ;;  %v7731_v4 = vld [vmem:[%s11911_s2 + $0xf0] sm:$0xff]  ;;  %v2091_v47 = vsel %vm9284_vm13, %v2089_v8, %v2090_v34  ;;  %v2174_v34 = vrot.slane %v7843_v19, 5  ;;  %v7844_v8 = vld [vmem:[#allocation2 + $0xa4] sm:$0xf] }
 0x19e   : > { %v2264_v24 = vpop.permute.xlu2 %2263  ;;  %2742 = vst.msk [vmem:[#allocation4 + $0x114] sm:$0xf] %vm273_vm3, %v9502_v6  ;;  %3866 = vmatpush.bf16.msrb.mxu3 %v7731_v4  ;;  %v2173_v61 = vrot.slane %v2171_v28, 4  ;;  %v2180_v4 = vrot.slane %v2178_v39, 4  ;;  %v7060_v19 = vld [vmem:[#allocation4 + $0x140] sm:$0xf] }
 0x19f   : > { %2315 = vrot.lane.b32.xlu0 %v9158_v22, %s7857_s7  ;;  %2359 = vst.msk [vmem:[#allocation4 + $0x4] sm:$0xf] %vm2001_vm5, %v2264_v24  ;;  %v9560_v24 = vsel %vm9284_vm13, %v6890_v17, %v2157_v3  ;;  %v7160_v3 = vld [vmem:[#allocation4 + $0x208] sm:$0xf]  ;;  %v6892_v17 = vrot.slane %v9024_v1, 9 }
 0x1a0   : > { %3631 = vmatmul.bf16.gmra.mxu0 %v7001_v45  ;;  %v1960_v11 = vpop.permute.xlu0 %1959  ;;  %v7140_v29 = vld [vmem:[#allocation4 + $0x1e0] sm:$0xf]  ;;  %2246 = vst.msk [vmem:[#allocation4 + $0x158] sm:$0xf] %vm273_vm3, %v9502_v6  ;;  %v2164_v45 = vrot.slane %v8858_v53, 5  ;;  %3692 = vmatpush.bf16.msrb.mxu1 %v7711_v5  ;;  %v6891_v53 = vrot.slane %v8948_v59, 9  ;;  %v9637_v51 = vsel %vm9284_vm13, %v2173_v61, %v2174_v34 }
 0x1a1   : > { %2029 = vst.msk [vmem:[#allocation4 + $0x21c] sm:$0xf] %vm2001_vm5, %v1960_v11  ;;  %v7141_v10 = vor.u32 %v7683_v40, %v7140_v29  ;;  %v7020_v40 = vld [vmem:[#allocation4 + $0xf0] sm:$0xf]  ;;  %v7842_v59 = vld [vmem:[#allocation2 + $0x8c] sm:$0xf] }
 0x1a2   : > { %2319 = vrot.lane.b32.xlu1 %v9201_v32, %s7857_s7  ;;  %2706 = vst.msk [vmem:[#allocation4 + $0x1d8] sm:$0xf] %vm2001_vm5, %v1960_v11  ;;  %v2166_v62 = vrot.slane %v2164_v45, 4  ;;  %v2167_v11 = vrot.slane %v7842_v59, 5  ;;  %v7021_v29 = vor.u32 %v7653_v35, %v7020_v40  ;;  %v9590_v2 = vsel %vm9284_vm13, %v6891_v53, %v2164_v45  ;;  %v7728_v1 = vld [vmem:[%s11911_s2 + $0xd8] sm:$0xff]  ;;  %v7727_v5 = vld [vmem:[%s11911_s2 + $0xd0] sm:$0xff] }
 0x1a3   : > { %3666 = vmatmul.bf16.vlgmr.msra.gmra.mxu2 %v7141_v10  ;;  %2743 = vst.msk [vmem:[#allocation4 + $0x128] sm:$0xf] %vm273_vm3, %v9522_v37  ;;  %v2181_v45 = vrot.slane %v7844_v8, 5  ;;  %v7693_v40 = vld [vmem:[#allocation4 + $0x240] sm:$0xf0]  ;;  %v2195_v61 = vrot.slane %v9169_v63, 5 }
 0x1a4   : > { %2323 = vrot.lane.b32.xlu2 %v9443_v55, %s7857_s7  ;;  %2247 = vst.msk [vmem:[#allocation4 + $0x16c] sm:$0xf] %vm273_vm3, %v9522_v37  ;;  %3693 = vmatpush.bf16.msrb.mxu1 %v7710_v14 }
 0x1a5   : > { %2744 = vst.msk [vmem:[#allocation4 + $0x13c] sm:$0xf] %vm273_vm3, %v9542_v46 }
 0x1a6   : > { %v2270_v25 = vpop.permute.xlu2 %2269  ;;  %2248 = vst.msk [vmem:[#allocation4 + $0x180] sm:$0xf] %vm273_vm3, %v9542_v46  ;;  %v7621_v15 = vld [vmem:[#allocation4 + $0x4] sm:$0xf] }
 0x1a7   : > { %2317 = vrot.lane.b32.xlu0 %v9069_v49, %s7857_s7  ;;  %2362 = vst.msk [vmem:[#allocation4 + $0x40] sm:$0xf] %vm2001_vm5, %v2270_v25 }
 0x1a8   : > { %2230 = vst.msk [vmem:[#allocation4 + $0x18] sm:$0xf] %vm273_vm3, %v2091_v47  ;;  %v7688_v54 = vld [vmem:[#allocation4 + $0x218] sm:$0xf0]  ;;  %v7658_v47 = vld [vmem:[#allocation4 + $0x128] sm:$0xf0] }
 0x1a9   : > { %2745 = vst.msk [vmem:[#allocation4 + $0x150] sm:$0xf] %vm273_vm3, %v9560_v24  ;;  %v7161_v50 = vor.u32 %v7688_v54, %v7160_v3 }
 0x1aa   : > { %2497 = vrot.lane.b32.xlu1 %v9349_v20, %s7857_s7  ;;  %v7730_v20 = vld [vmem:[%s11911_s2 + $0xe8] sm:$0xff]  ;;  %2249 = vst.msk [vmem:[#allocation4 + $0x194] sm:$0xf] %vm273_vm3, %v9560_v24 }
 0x1ab   : > { %2746 = vst.msk [vmem:[#allocation4 + $0x164] sm:$0xf] %vm273_vm3, %v9578_v41  ;;  %3867 = vmatpush.bf16.msrb.mxu3 %v7730_v20  ;;  %v7040_v20 = vld [vmem:[#allocation4 + $0x118] sm:$0xf] }
 0x1ac   : > { %2501 = vrot.lane.b32.xlu2 %v9369_v57, %s7857_s7  ;;  %v7709_v57 = vld [vmem:[%s11911_s2 + $0x40] sm:$0xff]  ;;  %2250 = vst.msk [vmem:[#allocation4 + $0x1a8] sm:$0xf] %vm273_vm3, %v9578_v41 }
 0x1ad   : > { %2747 = vst.msk [vmem:[#allocation4 + $0x178] sm:$0xf] %vm273_vm3, %v9590_v2  ;;  %3694 = vmatpush.bf16.msrb.mxu1 %v7709_v57 }
 0x1ae   : > { %v2276_v10 = vpop.permute.xlu2 %2275  ;;  %2251 = vst.msk [vmem:[#allocation4 + $0x1bc] sm:$0xf] %vm273_vm3, %v9590_v2 }
 0x1af   : > { %2495 = vrot.lane.b32.xlu0 %v9339_v23, %s7857_s7  ;;  %2365 = vst.msk [vmem:[#allocation4 + $0x7c] sm:$0xf] %vm2001_vm5, %v2276_v10  ;;  %v9606_v23 = vsel %vm9284_vm13, %v2166_v62, %v2167_v11  ;;  %3868 = vmatpush.bf16.msrb.mxu3 %v7729_v13  ;;  %v7041_v62 = vor.u32 %v7658_v47, %v7040_v20  ;;  %v2185_v10 = vrot.slane %v9069_v49, 5  ;;  %v2188_v13 = vrot.slane %v9128_v56, 5  ;;  %v6916_v20 = vld [vmem:[#allocation4 + $0x10] sm:$0xf] }
 0x1b0   : > { %3636 = vmatmul.bf16.gmra.mxu0 %v7021_v29  ;;  %2748 = vst.msk [vmem:[#allocation4 + $0x18c] sm:$0xf] %vm273_vm3, %v9606_v23  ;;  %v9670_v11 = vsel %vm9284_vm13, %v2180_v4, %v2181_v45  ;;  %v7725_v29 = vld [vmem:[%s11911_s2 + $0xc0] sm:$0xff]  ;;  %v6895_v56 = vrot.slane %v9201_v32, 9  ;;  %v7724_v32 = vld [vmem:[%s11911_s2 + $0xb8] sm:$0xff] }
 0x1b1   : > { %2252 = vst.msk [vmem:[#allocation4 + $0x1d0] sm:$0xf] %vm273_vm3, %v9606_v23  ;;  %v2187_v49 = vrot.slane %v2185_v10, 4  ;;  %3776 = vmatpush.bf16.msrb.mxu2 %v7724_v32 }
 0x1b2   : > { %2499 = vrot.lane.b32.xlu1 %v9360_v33, %s7857_s7  ;;  %v9627_v33 = vsel %vm9284_vm13, %v6892_v17, %v2171_v28  ;;  %2750 = vst.msk [vmem:[#allocation4 + $0x1b4] sm:$0xf] %vm273_vm3, %v9637_v51 }
 0x1b3   : > { %3671 = vmatmul.bf16.gmra.mxu2 %v7161_v50  ;;  %3869 = vmatpush.bf16.msrb.mxu3 %v7728_v1  ;;  %2749 = vst.msk [vmem:[#allocation4 + $0x1a0] sm:$0xf] %vm273_vm3, %v9627_v33  ;;  %v7663_v1 = vld [vmem:[#allocation4 + $0x150] sm:$0xf0] }
 0x1b4   : > { %v1962_v25 = vpop.permute.xlu1 %1961  ;;  %2507 = vrot.lane.b32.xlu2 %v9403_v52, %s7857_s7  ;;  %2253 = vst.msk [vmem:[#allocation4 + $0x1e4] sm:$0xf] %vm273_vm3, %v9627_v33  ;;  %v7061_v27 = vor.u32 %v7663_v1, %v7060_v19  ;;  %v6922_v19 = vld [vmem:[#allocation4 + $0x3c] sm:$0xf0] }
 0x1b5   : > { %2030 = vst.msk [vmem:[#allocation4 + $0x230] sm:$0xf] %vm2001_vm5, %v1962_v25 }
 0x1b6   : > { %2707 = vst.msk [vmem:[#allocation4 + $0x1ec] sm:$0xf] %vm2001_vm5, %v1962_v25  ;;  %v2282_v52 = vpop.permute.xlu2 %2281 }
 0x1b7   : > { %2325 = vrot.lane.b32.xlu0 %v9447_v0, %s7857_s7  ;;  %2368 = vst.msk [vmem:[#allocation4 + $0xb8] sm:$0xf] %vm2001_vm5, %v2282_v52  ;;  %3870 = vmatpush.bf16.msrb.mxu3 %v7727_v5 }
 0x1b8   : > { %2254 = vst.msk [vmem:[#allocation4 + $0x1f8] sm:$0xf] %vm273_vm3, %v9637_v51 }
 0x1b9   : > { %2751 = vst.msk [vmem:[#allocation4 + $0x1c8] sm:$0xf] %vm273_vm3, %v9648_v42 }
 0x1ba   : > { %2505 = vrot.lane.b32.xlu1 %v9391_v36, %s7857_s7  ;;  %v7726_v36 = vld [vmem:[%s11911_s2 + $0xc8] sm:$0xff]  ;;  %2255 = vst.msk [vmem:[#allocation4 + $0x20c] sm:$0xf] %vm273_vm3, %v9648_v42 }
 0x1bb   : > { %3871 = vmatpush.bf16.msrb.mxu3 %v7726_v36  ;;  %2752 = vst.msk [vmem:[#allocation4 + $0x1dc] sm:$0xf] %vm273_vm3, %v9670_v11  ;;  %v7721_v36 = vld [vmem:[%s11911_s2 + $0xa0] sm:$0xff] }
 0x1bc   : > { %v1968_v14 = vpop.permute.xlu1 %1967  ;;  %v7180_v53 = vld [vmem:[#allocation4 + $0x230] sm:$0xf]  ;;  %2513 = vrot.lane.b32.xlu2 %v9479_v18, %s7857_s7  ;;  %v7734_v18 = vld [vmem:[%s11911_s2 + $0x108] sm:$0xff]  ;;  %2256 = vst.msk [vmem:[#allocation4 + $0x220] sm:$0xf] %vm273_vm3, %v9670_v11 }
 0x1bd   : > { %2033 = vst.msk [vmem:[#allocation4 + $0x26c] sm:$0xf] %vm2001_vm5, %v1968_v14  ;;  %v7181_v35 = vor.u32 %v7693_v40, %v7180_v53  ;;  %3960 = vmatpush.bf16.msrb.mxu0 %v7734_v18  ;;  %v7722_v40 = vld [vmem:[%s11911_s2 + $0xa8] sm:$0xff]  ;;  %v2392_v18 = vshrl.u32 %v9443_v55, 16 }
 0x1be   : > { %2710 = vst.msk [vmem:[#allocation4 + $0x228] sm:$0xf] %vm2001_vm5, %v1968_v14  ;;  %v2288_v59 = vpop.permute.xlu2 %2287  ;;  %v2482_v14 = vrot.slane %v9447_v0, 5 }
 0x1bf   : > { %2503 = vrot.lane.b32.xlu0 %v9379_v30, %s7857_s7  ;;  %3676 = vmatmul.bf16.vlgmr.msra.gmra.mxu3 %v7181_v35  ;;  %2371 = vst.msk [vmem:[#allocation4 + $0xf4] sm:$0xf] %vm2001_vm5, %v2288_v59  ;;  %v6894_v30 = vrot.slane %v9158_v22, 9  ;;  %v7733_v22 = vld [vmem:[%s11911_s2 + $0x100] sm:$0xff]  ;;  %v7622_v59 = vld [vmem:[#allocation4 + $0xc] sm:$0xf] }
 0x1c0   : > { %3641 = vmatmul.bf16.gmra.mxu0 %v7041_v62  ;;  %3872 = vmatpush.bf16.msrb.mxu3 %v7725_v29  ;;  %v2395_v29 = vshll.u32 %v9443_v55, 16 }
 0x1c1   : > { %v1966_v54 = vpop.permute.xlu0 %1965  ;;  %v9700_v28 = vsel %vm9284_vm13, %v6894_v30, %v2185_v10  ;;  %3961 = vmatpush.bf16.msrb.mxu0 %v7733_v22  ;;  %v6910_v10 = vld [vmem:[#allocation4 + $0x1c] sm:$0xf0]  ;;  %v2401_v30 = vshll.u32 %v9447_v0, 16 }
 0x1c2   : > { %2032 = vst.msk [vmem:[#allocation4 + $0x258] sm:$0xf] %vm2001_vm5, %v1966_v54  ;;  %2511 = vrot.lane.b32.xlu1 %v9455_v9, %s7857_s7  ;;  %v2192_v9 = vrot.slane %v9134_v60, 5  ;;  %v6913_v22 = vor.u32 %v7622_v59, %v6910_v10  ;;  %v6950_v10 = vld [vmem:[#allocation4 + $0x6c] sm:$0xf0] }
 0x1c3   : > { %2709 = vst.msk [vmem:[#allocation4 + $0x214] sm:$0xf] %vm2001_vm5, %v1966_v54 }
 0x1c4   : > { %v2268_v57 = vpop.permute.xlu1 %2267  ;;  %2519 = vrot.lane.b32.xlu2 %v9522_v37, %s7857_s7  ;;  %2753 = vst.msk [vmem:[#allocation4 + $0x1f0] sm:$0xf] %vm273_vm3, %v9700_v28  ;;  %v9713_v37 = vsel %vm9284_vm13, %v2187_v49, %v2188_v13  ;;  %v7698_v50 = vld [vmem:[#allocation4 + $0x268] sm:$0xf0]  ;;  %v2194_v17 = vrot.slane %v2192_v9, 4  ;;  %v9728_v34 = vsel %vm9284_vm13, %v6895_v56, %v2192_v9  ;;  %v2397_v49 = vrot.slane %v2395_v29, 5 }
 0x1c5   : > { %2361 = vst.msk [vmem:[#allocation4 + $0x2c] sm:$0xf] %vm2001_vm5, %v2268_v57  ;;  %v7625_v9 = vld [vmem:[#allocation4 + $0x20] sm:$0xf0] }
 0x1c6   : > { %v2294_v3 = vpop.permute.xlu2 %2293  ;;  %2257 = vst.msk [vmem:[#allocation4 + $0x234] sm:$0xf] %vm273_vm3, %v9700_v28  ;;  %v9741_v52 = vsel %vm9284_vm13, %v2194_v17, %v2195_v61  ;;  %v6917_v56 = vor.u32 %v7625_v9, %v6916_v20  ;;  %v2405_v17 = vshrl.u32 %v9447_v0, 16 }
 0x1c7   : > { %2509 = vrot.lane.b32.xlu0 %v9424_v44, %s7857_s7  ;;  %2374 = vst.msk [vmem:[#allocation4 + $0x130] sm:$0xf] %vm2001_vm5, %v2294_v3 }
 0x1c8   : > { %2754 = vst.msk [vmem:[#allocation4 + $0x204] sm:$0xf] %vm273_vm3, %v9713_v37 }
 0x1c9   : > { %v2266_v60 = vpop.permute.xlu0 %2265  ;;  %v7200_v44 = vld [vmem:[#allocation4 + $0x258] sm:$0xf]  ;;  %2258 = vst.msk [vmem:[#allocation4 + $0x248] sm:$0xf] %vm273_vm3, %v9713_v37 }
 0x1ca   : > { %2360 = vst.msk [vmem:[#allocation4 + $0x18] sm:$0xf] %vm2001_vm5, %v2266_v60  ;;  %2517 = vrot.lane.b32.xlu1 %v9502_v6, %s7857_s7  ;;  %v7201_v63 = vor.u32 %v7698_v50, %v7200_v44 }
 0x1cb   : > { %2755 = vst.msk [vmem:[#allocation4 + $0x218] sm:$0xf] %vm273_vm3, %v9728_v34 }
 0x1cc   : > { %v2274_v25 = vpop.permute.xlu1 %2273  ;;  %2525 = vrot.lane.b32.xlu2 %v9578_v41, %s7857_s7  ;;  %v7723_v41 = vld [vmem:[%s11911_s2 + $0xb0] sm:$0xff]  ;;  %2259 = vst.msk [vmem:[#allocation4 + $0x25c] sm:$0xf] %vm273_vm3, %v9728_v34  ;;  %v7626_v3 = vld [vmem:[#allocation4 + $0x2c] sm:$0xf] }
 0x1cd   : > { %2364 = vst.msk [vmem:[#allocation4 + $0x68] sm:$0xf] %vm2001_vm5, %v2274_v25  ;;  %v9735_v6 = vpop.f32.mrf.mxu0  ;;  %3777 = vmatpush.bf16.msrb.mxu2 %v7723_v41  ;;  %v2407_v25 = vrot.slane %v2405_v17, 4 }
 0x1ce   : > { %v2300_v39 = vpop.permute.xlu2 %2299  ;;  %2756 = vst.msk [vmem:[#allocation4 + $0x22c] sm:$0xf] %vm273_vm3, %v9741_v52 }
 0x1cf   : > { %2515 = vrot.lane.b32.xlu0 %v9490_v21, %s7857_s7  ;;  %3681 = vmatmul.bf16.gmra.mxu3 %v7201_v63  ;;  %2377 = vst.msk [vmem:[#allocation4 + $0x16c] sm:$0xf] %vm2001_vm5, %v2300_v39  ;;  %v7719_v63 = vld [vmem:[%s11911_s2 + $0x90] sm:$0xff] }
 0x1d0   : > { %3646 = vmatmul.bf16.gmra.mxu0 %v7061_v27  ;;  %2260 = vst.msk [vmem:[#allocation4 + $0x270] sm:$0xf] %vm273_vm3, %v9741_v52 }
 0x1d1   : > { %v2272_v5 = vpop.permute.xlu0 %2271  ;;  %v6902_v4 = vld [vmem:[#allocation4 + $0x14] sm:$0xf0]  ;;  %3778 = vmatpush.bf16.msrb.mxu2 %v7722_v40 }
 0x1d2   : > { %2363 = vst.msk [vmem:[#allocation4 + $0x54] sm:$0xf] %vm2001_vm5, %v2272_v5  ;;  %v6905_v21 = vor.u32 %v7621_v15, %v6902_v4  ;;  %2523 = vrot.lane.b32.xlu1 %v9560_v24, %s7857_s7  ;;  %v6896_v24 = vrot.slane %v9443_v55, 9  ;;  %v7720_v55 = vld [vmem:[%s11911_s2 + $0x98] sm:$0xff]  ;;  %v6936_v40 = vld [vmem:[#allocation4 + $0x38] sm:$0xf] }
 0x1d4   : > { %3695 = vmatmul.bf16.vlgmr.msrb.gmra.mxu1 %v6905_v21  ;;  %v2280_v8 = vpop.permute.xlu1 %2279  ;;  %2531 = vrot.lane.b32.xlu2 %v9627_v33, %s7857_s7  ;;  %v1482_v33 = vld [vmem:[#allocation2 + $0xc8] sm:$0xf]  ;;  %v9776_v62 = vsel %vm9284_vm13, %v6896_v24, %v2482_v14  ;;  %v7717_v21 = vld [vmem:[%s11911_s2 + $0x80] sm:$0xff] }
 0x1d5   : > { %2367 = vst.msk [vmem:[#allocation4 + $0xa4] sm:$0xf] %vm2001_vm5, %v2280_v8  ;;  %v9761_v45 = vpop.f32.mrf.mxu0  ;;  %v2485_v53 = vrot.slane %v1482_v33, 5  ;;  %3779 = vmatpush.bf16.msrb.mxu2 %v7721_v36  ;;  %v2411_v44 = vshll.u32 %v1482_v33, 16  ;;  %v7627_v8 = vld [vmem:[#allocation4 + $0x34] sm:$0xf] }
 0x1d6   : > { %v2306_v47 = vpop.permute.xlu2 %2305  ;;  %2757 = vst.msk [vmem:[#allocation4 + $0x240] sm:$0xf] %vm273_vm3, %v9776_v62 }
 0x1d7   : > { %2521 = vrot.lane.b32.xlu0 %v9542_v46, %s7857_s7  ;;  %2380 = vst.msk [vmem:[#allocation4 + $0x1a8] sm:$0xf] %vm2001_vm5, %v2306_v47  ;;  %v2484_v46 = vrot.slane %v2482_v14, 4  ;;  %v2413_v27 = vrot.slane %v2411_v44, 5  ;;  %v7630_v47 = vld [vmem:[#allocation4 + $0x48] sm:$0xf0] }
 0x1d9   : > { %v2278_v35 = vpop.permute.xlu0 %2277  ;;  %v2486_v54 = vsel %vm9284_vm13, %v2484_v46, %v2485_v53  ;;  %3780 = vmatpush.bf16.msrb.mxu2 %v7720_v55  ;;  %v6937_v53 = vor.u32 %v7630_v47, %v6936_v40 }
 0x1da   : > { %2366 = vst.msk [vmem:[#allocation4 + $0x90] sm:$0xf] %vm2001_vm5, %v2278_v35  ;;  %2529 = vrot.lane.b32.xlu1 %v9606_v23, %s7857_s7  ;;  %v2394_v23 = vrot.slane %v2392_v18, 4  ;;  %v7631_v35 = vld [vmem:[#allocation4 + $0x54] sm:$0xf] }
 0x1db   : > { %2758 = vst.msk [vmem:[#allocation4 + $0x254] sm:$0xf] %vm273_vm3, %v2486_v54 }
 0x1dc   : > { %v2286_v57 = vpop.permute.xlu1 %2285  ;;  %2537 = vrot.lane.b32.xlu2 %v9670_v11, %s7857_s7  ;;  %v2398_v50 = vor.u32 %v2397_v49, %v2394_v23  ;;  %v2403_v11 = vrot.slane %v2401_v30, 5 }
 0x1dd   : > { %2370 = vst.msk [vmem:[#allocation4 + $0xe0] sm:$0xf] %vm2001_vm5, %v2286_v57  ;;  %v9795_v13 = vpop.f32.mrf.mxu0  ;;  %3781 = vmatpush.bf16.msrb.mxu2 %v7719_v63  ;;  %v7632_v57 = vld [vmem:[#allocation4 + $0x5c] sm:$0xf] }
 0x1de   : > { %v2490_v60 = vpop.permute.xlu2 %2489  ;;  %v2399_v32 = vrot.slane %v2398_v50, 4  ;;  %v2408_v1 = vor.u32 %v2407_v25, %v2403_v11  ;;  %v6953_v23 = vor.u32 %v7632_v57, %v6950_v10  ;;  %v6976_v25 = vld [vmem:[#allocation4 + $0x88] sm:$0xf]  ;;  %v7640_v63 = vld [vmem:[#allocation4 + $0x98] sm:$0xf0] }
 0x1df   : > { %2527 = vrot.lane.b32.xlu0 %v9590_v2, %s7857_s7  ;;  %3873 = vmatmul.bf16.vlgmr.msrb.gmra.mxu3 %v6913_v22  ;;  %2584 = vst.msk [vmem:[#allocation4 + $0x1c] sm:$0xf] %vm2001_vm5, %v2490_v60  ;;  %v6925_v2 = vor.u32 %v7626_v3, %v6922_v19  ;;  %v7636_v3 = vld [vmem:[#allocation4 + $0x7c] sm:$0xf]  ;;  %v7637_v19 = vld [vmem:[#allocation4 + $0x84] sm:$0xf] }
 0x1e0   : > { %7362 = vmatmul.msk.bf16.vlgmr.msrb.gmra.mxu0 %vm3549_vm15, %v6917_v56  ;;  %v9810_v0 = vsel %vm8369_vm4, %v2399_v32, %v2403_v11  ;;  %v2409_v5 = vrot.slane %v2408_v1, 4 }
 0x1e1   : > { %v2284_v61 = vpop.permute.xlu0 %2283  ;;  %2477 = vst.msk [vmem:[#allocation4 + $0x260] sm:$0xf] %vm273_vm3, %v9810_v0 }
 0x1e2   : > { %2369 = vst.msk [vmem:[#allocation4 + $0xcc] sm:$0xf] %vm2001_vm5, %v2284_v61  ;;  %2535 = vrot.lane.b32.xlu1 %v9648_v42, %s7857_s7  ;;  %v7718_v42 = vld [vmem:[%s11911_s2 + $0x88] sm:$0xff]  ;;  %v2414_v4 = vsel %vm8369_vm4, %v2409_v5, %v2413_v27 }
 0x1e3   : > { %2478 = vst.msk [vmem:[#allocation4 + $0x274] sm:$0xf] %vm273_vm3, %v2414_v4  ;;  %3782 = vmatpush.bf16.msrb.mxu2 %v7718_v42  ;;  %v7641_v42 = vld [vmem:[#allocation4 + $0xa4] sm:$0xf] }
 0x1e4   : > { %3700 = vmatmul.bf16.gmra.mxu1 %v6925_v2  ;;  %v2292_v39 = vpop.permute.xlu1 %2291  ;;  %2543 = vrot.lane.b32.xlu2 %v9728_v34, %s7857_s7 }
 0x1e5   : > { %2373 = vst.msk [vmem:[#allocation4 + $0x11c] sm:$0xf] %vm2001_vm5, %v2292_v39  ;;  %v9817_v41 = vpop.f32.mrf.mxu0  ;;  %v6977_v39 = vor.u32 %v7640_v63, %v6976_v25 }
 0x1e6   : > { %v2314_v15 = vpop.permute.xlu2 %2313  ;;  %v7624_v11 = vld [vmem:[#allocation4 + $0x18] sm:$0xf0] }
 0x1e7   : > { %2533 = vrot.lane.b32.xlu0 %v9637_v51, %s7857_s7  ;;  %2384 = vst.msk [vmem:[#allocation4 + $0x1f8] sm:$0xf] %vm2001_vm5, %v2314_v15  ;;  %v6930_v51 = vld [vmem:[#allocation4 + $0x44] sm:$0xf0]  ;;  %3783 = vmatpush.bf16.msrb.mxu2 %v7717_v21 }
 0x1e8   : > { %v6933_v33 = vor.u32 %v7627_v8, %v6930_v51 }
 0x1e9   : > { %v2290_v34 = vpop.permute.xlu0 %2289 }
 0x1ea   : > { %2372 = vst.msk [vmem:[#allocation4 + $0x108] sm:$0xf] %vm2001_vm5, %v2290_v34  ;;  %2541 = vrot.lane.b32.xlu1 %v9713_v37, %s7857_s7  ;;  %v6942_v37 = vld [vmem:[#allocation4 + $0x64] sm:$0xf0] }
 0x1eb   : > { %v6945_v46 = vor.u32 %v7631_v35, %v6942_v37  ;;  %v6990_v35 = vld [vmem:[#allocation4 + $0xbc] sm:$0xf0]  ;;  %v6996_v37 = vld [vmem:[#allocation4 + $0xb0] sm:$0xf] }
 0x1ec   : > { %v2298_v24 = vpop.permute.xlu1 %2297  ;;  %2549 = vrot.lane.b32.xlu2 %v2486_v54, %s7857_s7  ;;  %v6956_v54 = vld [vmem:[#allocation4 + $0x60] sm:$0xf] }
 0x1ed   : > { %2376 = vst.msk [vmem:[#allocation4 + $0x158] sm:$0xf] %vm2001_vm5, %v2298_v24  ;;  %v9836_v14 = vpop.f32.mrf.mxu0 }
 0x1ee   : > { %v2494_v36 = vpop.permute.xlu2 %2493 }
 0x1ef   : > { %2539 = vrot.lane.b32.xlu0 %v9700_v28, %s7857_s7  ;;  %3878 = vmatmul.bf16.gmra.mxu3 %v6933_v33  ;;  %2586 = vst.msk [vmem:[#allocation4 + $0x44] sm:$0xf] %vm2001_vm5, %v2494_v36  ;;  %v7642_v36 = vld [vmem:[#allocation4 + $0xac] sm:$0xf] }
 0x1f0   : > { %7363 = vmatmul.msk.bf16.gmra.mxu0 %vm3549_vm15, %v6937_v53 }
 0x1f1   : > { %v2296_v20 = vpop.permute.xlu0 %2295 }
 0x1f2   : > { %2375 = vst.msk [vmem:[#allocation4 + $0x144] sm:$0xf] %vm2001_vm5, %v2296_v20  ;;  %2547 = vrot.lane.b32.xlu1 %v9776_v62, %s7857_s7  ;;  %v7635_v62 = vld [vmem:[#allocation4 + $0x70] sm:$0xf0]  ;;  %v7645_v20 = vld [vmem:[#allocation4 + $0xc0] sm:$0xf0] }
 0x1f3   : > { %v6957_v49 = vor.u32 %v7635_v62, %v6956_v54  ;;  %v7646_v54 = vld [vmem:[#allocation4 + $0xcc] sm:$0xf]  ;;  %v7002_v62 = vld [vmem:[#allocation4 + $0xdc] sm:$0xf0] }
 0x1f4   : > { %3705 = vmatmul.bf16.gmra.mxu1 %v6945_v46  ;;  %v2304_v59 = vpop.permute.xlu1 %2303 }
 0x1f5   : > { %2379 = vst.msk [vmem:[#allocation4 + $0x194] sm:$0xf] %vm2001_vm5, %v2304_v59  ;;  %v9846_v18 = vpop.f32.mrf.mxu0 }
 0x1f6   : > { %v2322_v28 = vpop.permute.xlu2 %2321  ;;  %v7629_v51 = vld [vmem:[#allocation4 + $0x40] sm:$0xf0] }
 0x1f7   : > { %2545 = vrot.lane.b32.xlu0 %v9741_v52, %s7857_s7  ;;  %2388 = vst.msk [vmem:[#allocation4 + $0x248] sm:$0xf] %vm2001_vm5, %v2322_v28  ;;  %v6962_v52 = vld [vmem:[#allocation4 + $0x8c] sm:$0xf0]  ;;  %v6993_v28 = vor.u32 %v7642_v36, %v6990_v35  ;;  %v7036_v36 = vld [vmem:[#allocation4 + $0x100] sm:$0xf] }
 0x1f8   : > { %v6965_v56 = vor.u32 %v7636_v3, %v6962_v52  ;;  %v7655_v35 = vld [vmem:[#allocation4 + $0x110] sm:$0xf0] }
 0x1f9   : > { %v2302_v29 = vpop.permute.xlu0 %2301 }
 0x1fa   : > { %2378 = vst.msk [vmem:[#allocation4 + $0x180] sm:$0xf] %vm2001_vm5, %v2302_v29  ;;  %2673 = vrot.lane.b32.xlu1 %v2414_v4, %s7857_s7  ;;  %v6982_v4 = vld [vmem:[#allocation4 + $0xb4] sm:$0xf0]  ;;  %v9875_v33 = vpop.f32.mrf.mxu1  ;;  %v6997_v29 = vor.u32 %v7645_v20, %v6996_v37  ;;  %v7030_v20 = vld [vmem:[#allocation4 + $0x10c] sm:$0xf0] }
 0x1fb   : > { %v6985_v34 = vor.u32 %v7641_v42, %v6982_v4  ;;  %11942 = vst [vmem:[#allocation5_spill] sm:$0xff] %v9875_v33 }
 0x1fc   : > { %v2488_v30 = vpop.permute.xlu1 %2487 }
 0x1fd   : > { %2583 = vst.msk [vmem:[#allocation4 + $0x8] sm:$0xf] %vm2001_vm5, %v2488_v30  ;;  %v9854_v55 = vpop.f32.mrf.mxu0 }
 0x1fe   : > { %v2324_v22 = vpop.permute.xlu2 %2323 }
 0x1ff   : > { %2671 = vrot.lane.b32.xlu0 %v9810_v0, %s7857_s7  ;;  %3883 = vmatmul.bf16.gmra.mxu3 %v6953_v23  ;;  %2389 = vst.msk [vmem:[#allocation4 + $0x25c] sm:$0xf] %vm2001_vm5, %v2324_v22  ;;  %v6970_v0 = vld [vmem:[#allocation4 + $0x94] sm:$0xf0]  ;;  %v7005_v23 = vor.u32 %v7646_v54, %v7002_v62  ;;  %v7656_v62 = vld [vmem:[#allocation4 + $0x11c] sm:$0xf] }
 0x200   : > { %7364 = vmatmul.msk.bf16.gmra.mxu0 %vm3549_vm15, %v6957_v49  ;;  %v6973_v27 = vor.u32 %v7637_v19, %v6970_v0  ;;  %v7647_v19 = vld [vmem:[#allocation4 + $0xd4] sm:$0xf] }
 0x201   : > { %v2308_v9 = vpop.permute.xlu0 %2307 }
 0x202   : > { %2381 = vst.msk [vmem:[#allocation4 + $0x1bc] sm:$0xf] %vm2001_vm5, %v2308_v9  ;;  %v9884_v30 = vpop.f32.mrf.mxu1 }
 0x203   : > { %11943 = vst [vmem:[#allocation6_spill] sm:$0xff] %v9884_v30 }
 0x204   : > { %3710 = vmatmul.bf16.gmra.mxu1 %v6965_v56  ;;  %v2312_v60 = vpop.permute.xlu1 %2311  ;;  %v6908_v50 = vld [vmem:[#allocation4 + $0x8] sm:$0xf] }
 0x205   : > { %2383 = vst.msk [vmem:[#allocation4 + $0x1e4] sm:$0xf] %vm2001_vm5, %v2312_v60  ;;  %v9862_v17 = vpop.f32.mrf.mxu0  ;;  %v6909_v44 = vor.u32 %v7624_v11, %v6908_v50  ;;  %v7010_v50 = vld [vmem:[#allocation4 + $0xe4] sm:$0xf0] }
 0x206   : > { %v2502_v32 = vpop.permute.xlu2 %2501  ;;  %v7013_v63 = vor.u32 %v7647_v19, %v7010_v50 }
 0x207   : > { %3784 = vmatmul.bf16.vlgmr.msrb.gmra.mxu2 %v6909_v44  ;;  %2590 = vst.msk [vmem:[#allocation4 + $0x94] sm:$0xf] %vm2001_vm5, %v2502_v32  ;;  %v7016_v44 = vld [vmem:[#allocation4 + $0xd8] sm:$0xf]  ;;  %v7650_v32 = vld [vmem:[#allocation4 + $0xe8] sm:$0xf0] }
 0x209   : > { %v2310_v61 = vpop.permute.xlu0 %2309 }
 0x20a   : > { %2382 = vst.msk [vmem:[#allocation4 + $0x1d0] sm:$0xf] %vm2001_vm5, %v2310_v61  ;;  %v9892_v11 = vpop.f32.mrf.mxu1 }
 0x20b   : > { %11944 = vst [vmem:[#allocation7_spill] sm:$0xff] %v9892_v11 }
 0x20c   : > { %v2492_v2 = vpop.permute.xlu1 %2491 }
 0x20d   : > { %2585 = vst.msk [vmem:[#allocation4 + $0x30] sm:$0xf] %vm2001_vm5, %v2492_v2  ;;  %v9867_v1 = vpop.f32.mrf.mxu0  ;;  %v7017_v2 = vor.u32 %v7650_v32, %v7016_v44 }
 0x20e   : > { %v2508_v5 = vpop.permute.xlu2 %2507 }
 0x20f   : > { %3888 = vmatmul.bf16.gmra.mxu3 %v6973_v27  ;;  %2593 = vst.msk [vmem:[#allocation4 + $0xd0] sm:$0xf] %vm2001_vm5, %v2508_v5  ;;  %v7022_v27 = vld [vmem:[#allocation4 + $0x104] sm:$0xf0]  ;;  %v7651_v5 = vld [vmem:[#allocation4 + $0xf4] sm:$0xf] }
 0x210   : > { %7365 = vmatmul.msk.bf16.gmra.mxu0 %vm3549_vm15, %v6977_v39  ;;  %v7025_v42 = vor.u32 %v7651_v5, %v7022_v27  ;;  %v7660_v27 = vld [vmem:[#allocation4 + $0x138] sm:$0xf0] }
 0x211   : > { %v2316_v15 = vpop.permute.xlu0 %2315 }
 0x212   : > { %2385 = vst.msk [vmem:[#allocation4 + $0x20c] sm:$0xf] %vm2001_vm5, %v2316_v15  ;;  %v9900_v4 = vpop.f32.mrf.mxu1 }
 0x213   : > { %11945 = vst [vmem:[#allocation8_spill] sm:$0xff] %v9900_v4 }
 0x214   : > { %3715 = vmatmul.bf16.gmra.mxu1 %v6985_v34  ;;  %v2320_v21 = vpop.permute.xlu1 %2319  ;;  %v6928_v8 = vld [vmem:[#allocation4 + $0x30] sm:$0xf] }
 0x215   : > { %2387 = vst.msk [vmem:[#allocation4 + $0x234] sm:$0xf] %vm2001_vm5, %v2320_v21  ;;  %v9873_v40 = vpop.f32.mrf.mxu0  ;;  %v6929_v47 = vor.u32 %v7629_v51, %v6928_v8 }
 0x216   : > { %v2514_v24 = vpop.permute.xlu2 %2513 }
 0x217   : > { %3789 = vmatmul.bf16.gmra.mxu2 %v6929_v47  ;;  %2596 = vst.msk [vmem:[#allocation4 + $0x10c] sm:$0xf] %vm2001_vm5, %v2514_v24  ;;  %v7639_v47 = vld [vmem:[#allocation4 + $0x90] sm:$0xf0] }
 0x219   : > { %v2318_v53 = vpop.permute.xlu0 %2317 }
 0x21a   : > { %2386 = vst.msk [vmem:[#allocation4 + $0x220] sm:$0xf] %vm2001_vm5, %v2318_v53  ;;  %v7652_v53 = vld [vmem:[#allocation4 + $0xfc] sm:$0xf]  ;;  %v9910_v54 = vpop.f32.mrf.mxu1 }
 0x21b   : > { %11946 = vst [vmem:[#allocation9_spill] sm:$0xff] %v9910_v54  ;;  %v7130_v54 = vld [vmem:[#allocation4 + $0x1d4] sm:$0xf0] }
 0x21c   : > { %v2498_v46 = vpop.permute.xlu1 %2497 }
 0x21d   : > { %2588 = vst.msk [vmem:[#allocation4 + $0x6c] sm:$0xf] %vm2001_vm5, %v2498_v46  ;;  %v9880_v59 = vpop.f32.mrf.mxu0 }
 0x21e   : > { %v2520_v10 = vpop.permute.xlu2 %2519 }
 0x21f   : > { %3893 = vmatmul.bf16.gmra.mxu3 %v6993_v28  ;;  %2599 = vst.msk [vmem:[#allocation4 + $0x148] sm:$0xf] %vm2001_vm5, %v2520_v10  ;;  %v7033_v28 = vor.u32 %v7652_v53, %v7030_v20 }
 0x220   : > { %7366 = vmatmul.msk.bf16.gmra.mxu0 %vm3549_vm15, %v6997_v29  ;;  %v7037_v29 = vor.u32 %v7655_v35, %v7036_v36 }
 0x221   : > { %v2496_v57 = vpop.permute.xlu0 %2495 }
 0x222   : > { %2587 = vst.msk [vmem:[#allocation4 + $0x58] sm:$0xf] %vm2001_vm5, %v2496_v57  ;;  %v9921_v44 = vpop.f32.mrf.mxu1 }
 0x223   : > { %11949 = vst [vmem:[#allocation12_spill] sm:$0xff] %v9921_v44 }
 0x224   : > { %3720 = vmatmul.bf16.gmra.mxu1 %v7005_v23  ;;  %v2500_v49 = vpop.permute.xlu1 %2499  ;;  %v7634_v9 = vld [vmem:[#allocation4 + $0x68] sm:$0xf0]  ;;  %v7042_v23 = vld [vmem:[#allocation4 + $0x12c] sm:$0xf0] }
 0x225   : > { %2589 = vst.msk [vmem:[#allocation4 + $0x80] sm:$0xf] %vm2001_vm5, %v2500_v49  ;;  %v9888_v22 = vpop.f32.mrf.mxu0  ;;  %v7045_v49 = vor.u32 %v7656_v62, %v7042_v23  ;;  %v7076_v23 = vld [vmem:[#allocation4 + $0x150] sm:$0xf] }
 0x226   : > { %v2526_v52 = vpop.permute.xlu2 %2525  ;;  %v7068_v11 = vld [vmem:[#allocation4 + $0x148] sm:$0xf] }
 0x227   : > { %2602 = vst.msk [vmem:[#allocation4 + $0x184] sm:$0xf] %vm2001_vm5, %v2526_v52 }
 0x229   : > { %v2326_v3 = vpop.permute.xlu0 %2325  ;;  %v6948_v56 = vld [vmem:[#allocation4 + $0x58] sm:$0xf] }
 0x22a   : > { %2390 = vst.msk [vmem:[#allocation4 + $0x270] sm:$0xf] %vm2001_vm5, %v2326_v3  ;;  %v6949_v60 = vor.u32 %v7634_v9, %v6948_v56 }
 0x22c   : > { %3794 = vmatmul.bf16.gmra.mxu2 %v6949_v60  ;;  %v2506_v61 = vpop.permute.xlu1 %2505  ;;  %v6968_v8 = vld [vmem:[#allocation4 + $0x80] sm:$0xf] }
 0x22d   : > { %2592 = vst.msk [vmem:[#allocation4 + $0xbc] sm:$0xf] %vm2001_vm5, %v2506_v61  ;;  %v9895_v25 = vpop.f32.mrf.mxu0  ;;  %v6969_v24 = vor.u32 %v7639_v47, %v6968_v8  ;;  %v7062_v8 = vld [vmem:[#allocation4 + $0x154] sm:$0xf0] }
 0x22e   : > { %v2532_v0 = vpop.permute.xlu2 %2531 }
 0x22f   : > { %3898 = vmatmul.bf16.gmra.mxu3 %v7013_v63  ;;  %2605 = vst.msk [vmem:[#allocation4 + $0x1c0] sm:$0xf] %vm2001_vm5, %v2532_v0  ;;  %v7657_v63 = vld [vmem:[#allocation4 + $0x124] sm:$0xf]  ;;  %v7056_v0 = vld [vmem:[#allocation4 + $0x128] sm:$0xf] }
 0x230   : > { %7367 = vmatmul.msk.bf16.gmra.mxu0 %vm3549_vm15, %v7017_v2  ;;  %v7050_v2 = vld [vmem:[#allocation4 + $0x134] sm:$0xf0] }
 0x231   : > { %v2504_v39 = vpop.permute.xlu0 %2503 }
 0x232   : > { %2591 = vst.msk [vmem:[#allocation4 + $0xa8] sm:$0xf] %vm2001_vm5, %v2504_v39 }
 0x234   : > { %3725 = vmatmul.bf16.gmra.mxu1 %v7025_v42  ;;  %v2512_v15 = vpop.permute.xlu1 %2511  ;;  %v7644_v50 = vld [vmem:[#allocation4 + $0xb8] sm:$0xf0]  ;;  %v7053_v42 = vor.u32 %v7657_v63, %v7050_v2 }
 0x235   : > { %2595 = vst.msk [vmem:[#allocation4 + $0xf8] sm:$0xf] %vm2001_vm5, %v2512_v15  ;;  %v9903_v34 = vpop.f32.mrf.mxu0  ;;  %v7057_v15 = vor.u32 %v7660_v27, %v7056_v0 }
 0x236   : > { %v2538_v21 = vpop.permute.xlu2 %2537 }
 0x237   : > { %2608 = vst.msk [vmem:[#allocation4 + $0x1fc] sm:$0xf] %vm2001_vm5, %v2538_v21  ;;  %v7661_v21 = vld [vmem:[#allocation4 + $0x144] sm:$0xf] }
 0x239   : > { %v2510_v51 = vpop.permute.xlu0 %2509  ;;  %v6988_v60 = vld [vmem:[#allocation4 + $0xa8] sm:$0xf] }
 0x23a   : > { %2594 = vst.msk [vmem:[#allocation4 + $0xe4] sm:$0xf] %vm2001_vm5, %v2510_v51  ;;  %v6989_v61 = vor.u32 %v7644_v50, %v6988_v60  ;;  %v392_v60 = vld [vmem:[#allocation2 + $0xd4] sm:$0xf]  ;;  %v9943_v50 = vld [vmem:[#allocation2 + $0xd0] sm:$0xf] }
 0x23b   : > { %v393_v63 = vsel %vm7999_vm6, 0, %v392_v60  ;;  %v2657_v2 = vshll.u32 %v9943_v50, 16  ;;  %v2661_v0 = vshrl.u32 %v9943_v50, 16  ;;  %2646 = vst.msk [vmem:[#allocation4 + $0x278] sm:$0xf] %vm273_vm3, %v9943_v50  ;;  %v11959_v44 = vrot.slane %v9943_v50, 5 }
 0x23c   : > { %3799 = vmatmul.bf16.gmra.mxu2 %v6969_v24  ;;  %v2518_v37 = vpop.permute.xlu1 %2517  ;;  %v7065_v24 = vor.u32 %v7661_v21, %v7062_v8  ;;  %394 = vst [vmem:[#allocation2 + $0xd4] sm:$0xf] %v393_v63  ;;  %v11916_v21 = vrot.slane %v9943_v50, 5  ;;  %v7028_v60 = vld [vmem:[#allocation4 + $0xf8] sm:$0xf]  ;;  %vm5640_vm6 = vcmask 1044224  }
 0x23d   : > { %2598 = vst.msk [vmem:[#allocation4 + $0x134] sm:$0xf] %vm2001_vm5, %v2518_v37  ;;  %v9908_v46 = vpop.f32.mrf.mxu0 }
 0x23e   : > { %v2544_v10 = vpop.permute.xlu2 %2543 }
 0x23f   : > { %3903 = vmatmul.bf16.gmra.mxu3 %v7033_v28  ;;  %2611 = vst.msk [vmem:[#allocation4 + $0x238] sm:$0xf] %vm2001_vm5, %v2544_v10 }
 0x240   : > { %7368 = vmatmul.msk.bf16.gmra.mxu0 %vm3549_vm15, %v7037_v29  ;;  %v7008_v29 = vld [vmem:[#allocation4 + $0xd0] sm:$0xf] }
 0x241   : > { %v2516_v57 = vpop.permute.xlu0 %2515  ;;  %v7649_v37 = vld [vmem:[#allocation4 + $0xe0] sm:$0xf0] }
 0x242   : > { %2597 = vst.msk [vmem:[#allocation4 + $0x120] sm:$0xf] %vm2001_vm5, %v2516_v57  ;;  %v9915_v52 = vpop.f32.mrf.mxu3  ;;  %v7009_v10 = vor.u32 %v7649_v37, %v7008_v29  ;;  %v7070_v57 = vld [vmem:[#allocation4 + $0x15c] sm:$0xf0] }
 0x243   : > { %11947 = vst [vmem:[#allocation10_spill] sm:$0xff] %v9915_v52 }
 0x244   : > { %3730 = vmatmul.bf16.gmra.mxu1 %v7045_v49  ;;  %v2524_v9 = vpop.permute.xlu1 %2523  ;;  %v7665_v49 = vld [vmem:[#allocation4 + $0x160] sm:$0xf0] }
 0x245   : > { %2601 = vst.msk [vmem:[#allocation4 + $0x170] sm:$0xf] %vm2001_vm5, %v2524_v9  ;;  %v9918_v3 = vpop.f32.mrf.mxu0  ;;  %v7077_v27 = vor.u32 %v7665_v49, %v7076_v23  ;;  %v1485_v23 = vld [vmem:[#allocation2 + $0xd4] sm:$0xf] }
 0x246   : > { %11948 = vst [vmem:[#allocation11_spill] sm:$0xff] %v9918_v3  ;;  %v2550_v56 = vpop.permute.xlu2 %2549  ;;  %v7691_v3 = vld [vmem:[#allocation4 + $0x234] sm:$0xf] }
 0x247   : > { %2614 = vst.msk [vmem:[#allocation4 + $0x274] sm:$0xf] %vm2001_vm5, %v2550_v56  ;;  %v7662_v56 = vld [vmem:[#allocation4 + $0x14c] sm:$0xf] }
 0x249   : > { %v2522_v32 = vpop.permute.xlu0 %2521 }
 0x24a   : > { %2600 = vst.msk [vmem:[#allocation4 + $0x15c] sm:$0xf] %vm2001_vm5, %v2522_v32  ;;  %v9924_v19 = vpop.f32.mrf.mxu3  ;;  %v7073_v32 = vor.u32 %v7662_v56, %v7070_v57  ;;  %v2723_v56 = vrot.slane %v1485_v23, 5 }
 0x24b   : > { %11950 = vst [vmem:[#allocation13_spill] sm:$0xff] %v9924_v19  ;;  %v7102_v19 = vld [vmem:[#allocation4 + $0x1a4] sm:$0xf0] }
 0x24c   : > { %3804 = vmatmul.bf16.gmra.mxu2 %v6989_v61  ;;  %v2530_v39 = vpop.permute.xlu1 %2529 }
 0x24d   : > { %2604 = vst.msk [vmem:[#allocation4 + $0x1ac] sm:$0xf] %vm2001_vm5, %v2530_v39  ;;  %v9927_v5 = vpop.f32.mrf.mxu0  ;;  %v7082_v39 = vld [vmem:[#allocation4 + $0x17c] sm:$0xf0] }
 0x24e   : > { %11951 = vst [vmem:[#allocation14_spill] sm:$0xff] %v9927_v5 }
 0x24f   : > { %3908 = vmatmul.bf16.gmra.mxu3 %v7053_v42  ;;  %v9952_v42 = vrot.slane %v2657_v2, 5 }
 0x250   : > { %7369 = vmatmul.msk.bf16.gmra.mxu0 %vm3549_vm15, %v7057_v15  ;;  %v2663_v15 = vrot.slane %v2661_v0, 4 }
 0x251   : > { %v2528_v51 = vpop.permute.xlu0 %2527  ;;  %v9930_v47 = vpop.f32.mrf.mxu1 }
 0x252   : > { %2603 = vst.msk [vmem:[#allocation4 + $0x198] sm:$0xf] %vm2001_vm5, %v2528_v51  ;;  %v9933_v53 = vpop.f32.mrf.mxu3  ;;  %v7666_v51 = vld [vmem:[#allocation4 + $0x16c] sm:$0xf]  ;;  %v2664_v37 = vor.u32 %v2663_v15, %v9952_v42 }
 0x253   : > { %11952 = vst [vmem:[#allocation15_spill] sm:$0xff] %v9933_v53 }
 0x254   : > { %3735 = vmatmul.bf16.gmra.mxu1 %v7065_v24  ;;  %v2536_v36 = vpop.permute.xlu1 %2535  ;;  %v7085_v24 = vor.u32 %v7666_v51, %v7082_v39  ;;  %v2665_v49 = vrot.slane %v2664_v37, 4  ;;  %v7670_v37 = vld [vmem:[#allocation4 + $0x188] sm:$0xf0] }
 0x255   : > { %2607 = vst.msk [vmem:[#allocation4 + $0x1e8] sm:$0xf] %vm2001_vm5, %v2536_v36  ;;  %v9936_v35 = vpop.f32.mrf.mxu0 }
 0x256   : > { %11953 = vst [vmem:[#allocation16_spill] sm:$0xff] %v9936_v35  ;;  %v7677_v35 = vld [vmem:[#allocation4 + $0x1c4] sm:$0xf] }
 0x259   : > { %v2534_v20 = vpop.permute.xlu0 %2533  ;;  %v9938_v28 = vpop.f32.mrf.mxu1 }
 0x25a   : > { %2606 = vst.msk [vmem:[#allocation4 + $0x1d4] sm:$0xf] %vm2001_vm5, %v2534_v20  ;;  %v9941_v62 = vpop.f32.mrf.mxu3  ;;  %v9964_v20 = vpop.f32.mrf.mxu2 }
 0x25b   : > { %11954 = vst [vmem:[#allocation17_spill] sm:$0xff] %v9941_v62 }
 0x25c   : > { %3809 = vmatmul.bf16.gmra.mxu2 %v7009_v10  ;;  %v2542_v9 = vpop.permute.xlu1 %2541  ;;  %11955 = vst [vmem:[#allocation18_spill] sm:$0xff] %v9964_v20  ;;  %v2722_v10 = vrot.slane %v11916_v21, 4  ;;  %v7122_v20 = vld [vmem:[#allocation4 + $0x1cc] sm:$0xf0] }
 0x25d   : > { %2610 = vst.msk [vmem:[#allocation4 + $0x224] sm:$0xf] %vm2001_vm5, %v2542_v9  ;;  %v9946_v61 = vpop.f32.mrf.mxu0  ;;  %v2667_v9 = vshll.u32 %v1485_v23, 16  ;;  %v4742_v23 = vshrl.u32 %v9223_v38, 16 }
 0x25e   : > { %v2724_v63 = vsel %vm9284_vm13, %v2722_v10, %v2723_v56  ;;  %v7090_v10 = vld [vmem:[#allocation4 + $0x184] sm:$0xf0]  ;;  %v4751_v56 = vshll.u32 %v9217_v12, 16 }
 0x25f   : > { %3913 = vmatmul.bf16.gmra.mxu3 %v7073_v32  ;;  %v2669_v32 = vrot.slane %v2667_v9, 5  ;;  %2760 = vst.msk [vmem:[#allocation4 + $0x27c] sm:$0xf] %vm273_vm3, %v2724_v63  ;;  %v4745_v9 = vshll.u32 %v9223_v38, 16 }
 0x260   : > { %7370 = vmatmul.msk.bf16.gmra.mxu0 %vm3549_vm15, %v7077_v27  ;;  %v7654_v27 = vld [vmem:[#allocation4 + $0x108] sm:$0xf0]  ;;  %v9991_v21 = vrot.slane %v4751_v56, 5  ;;  %v7048_v56 = vld [vmem:[#allocation4 + $0x120] sm:$0xf] }
 0x261   : > { %v2540_v7 = vpop.permute.xlu0 %2539  ;;  %v9958_v8 = vpop.f32.mrf.mxu1  ;;  %v7029_v39 = vor.u32 %v7654_v27, %v7028_v60  ;;  %v2670_v51 = vsel %vm8369_vm4, %v2665_v49, %v2669_v32  ;;  %v4744_v32 = vrot.slane %v4742_v23, 4  ;;  %v4747_v27 = vrot.slane %v4745_v9, 5 }
 0x262   : > { %2609 = vst.msk [vmem:[#allocation4 + $0x210] sm:$0xf] %vm2001_vm5, %v2540_v7  ;;  %v9961_v36 = vpop.f32.mrf.mxu3  ;;  %v7667_v7 = vld [vmem:[#allocation4 + $0x174] sm:$0xf]  ;;  %2677 = vrot.lane.b32.xlu0 %v2670_v51, %s7857_s7 }
 0x263   : > { %v7093_v60 = vor.u32 %v7667_v7, %v7090_v10  ;;  %v7671_v51 = vld [vmem:[#allocation4 + $0x194] sm:$0xf] }
 0x264   : > { %3740 = vmatmul.bf16.gmra.mxu1 %v7085_v24  ;;  %v2548_v29 = vpop.permute.xlu1 %2547  ;;  %v7096_v24 = vld [vmem:[#allocation4 + $0x178] sm:$0xf]  ;;  %v7105_v7 = vor.u32 %v7671_v51, %v7102_v19 }
 0x265   : > { %2613 = vst.msk [vmem:[#allocation4 + $0x260] sm:$0xf] %vm2001_vm5, %v2548_v29  ;;  %v9969_v57 = vpop.f32.mrf.mxu0  ;;  %v7097_v49 = vor.u32 %v7670_v37, %v7096_v24  ;;  %v4117_v24 = vld [vmem:[#allocation3 + $0xc] sm:$0x1] }
 0x266   : > { %v4118_v23 = vsel %vm8046_vm10, 0, %v4117_v24  ;;  %v5303_v24 = vrot.slane %v9217_v12, 5 }
 0x267   : > { %4119 = vst [vmem:[#allocation3 + $0xc] sm:$0x1] %v4118_v23 }
 0x269   : > { %v2546_v2 = vpop.permute.xlu0 %2545  ;;  %v9973_v0 = vpop.f32.mrf.mxu1 }
 0x26a   : > { %2612 = vst.msk [vmem:[#allocation4 + $0x24c] sm:$0xf] %vm2001_vm5, %v2546_v2  ;;  %v9977_v15 = vpop.f32.mrf.mxu3  ;;  %v9988_v2 = vpop.f32.mrf.mxu2 }
 0x26b   : > { %11956 = vst [vmem:[#allocation19_spill] sm:$0xff] %v9988_v2 }
 0x26c   : > { %3814 = vmatmul.bf16.gmra.mxu2 %v7029_v39  ;;  %v2674_v29 = vpop.permute.xlu1 %2673  ;;  %v4748_v39 = vor.u32 %v4747_v27, %v4744_v32  ;;  %v7672_v32 = vld [vmem:[#allocation4 + $0x19c] sm:$0xf]  ;;  %v7110_v27 = vld [vmem:[#allocation4 + $0x1ac] sm:$0xf0] }
 0x26d   : > { %2712 = vst.msk [vmem:[#allocation4 + $0x250] sm:$0xf] %vm2001_vm5, %v2674_v29  ;;  %v9986_v63 = vpop.f32.mrf.mxu0  ;;  %v7113_v23 = vor.u32 %v7672_v32, %v7110_v27 }
 0x26e   : > { %v4749_v10 = vrot.slane %v4748_v39, 4  ;;  %v7116_v39 = vld [vmem:[#allocation4 + $0x1a0] sm:$0xf] }
 0x26f   : > { %3918 = vmatmul.bf16.gmra.mxu3 %v7093_v60 }
 0x270   : > { %7371 = vmatmul.msk.bf16.gmra.mxu0 %vm3549_vm15, %v7097_v49  ;;  %v4754_v37 = vsel %vm8369_vm4, %v4749_v10, %v9991_v21  ;;  %v7378_v10 = vrot.slane %v9223_v38, 9  ;;  %v7676_v38 = vld [vmem:[#allocation4 + $0x1bc] sm:$0xf] }
 0x271   : > { %v2672_v62 = vpop.permute.xlu0 %2671  ;;  %v9993_v53 = vpop.f32.mrf.mxu1  ;;  %5125 = vrot.lane.b32.xlu1 %v4754_v37, %s7855_s27  ;;  %v335_v37 = vld [vmem:[#allocation2 + $0xcc] sm:$0x1]  ;;  %v7125_v16 = vor.u32 %v7676_v38, %v7122_v20 }
 0x272   : > { %2711 = vst.msk [vmem:[#allocation4 + $0x23c] sm:$0xf] %vm2001_vm5, %v2672_v62  ;;  %v9996_v29 = vpop.f32.mrf.mxu3  ;;  %v7659_v62 = vld [vmem:[#allocation4 + $0x130] sm:$0xf0]  ;;  %v10006_v19 = vpop.f32.mrf.mxu2  ;;  %v5304_v2 = vsel %vm9284_vm13, %v7378_v10, %v5303_v24 }
 0x273   : > { %11957 = vst [vmem:[#allocation20_spill] sm:$0xff] %v10006_v19  ;;  %v7049_v60 = vor.u32 %v7659_v62, %v7048_v56  ;;  %v336_v56 = vsel %vm8011_vm7, 0, %v335_v37  ;;  %v4171_v62 = vld [vmem:[#allocation3 + $0x14] sm:$0xf]  ;;  %5413 = vrot.lane.b32.xlu0 %v5304_v2, %s7857_s7  ;;  %v4168_v37 = vld [vmem:[#allocation3 + $0x8] sm:$0xf] }
 0x274   : > { %3745 = vmatmul.bf16.gmra.mxu1 %v7105_v7  ;;  %v7675_v7 = vld [vmem:[#allocation4 + $0x1b0] sm:$0xf0]  ;;  %337 = vst [vmem:[#allocation2 + $0xcc] sm:$0x1] %v336_v56  ;;  %v4755_v2 = vshrl.u32 %v9217_v12, 16  ;;  %v4169_v20 = vsel %vm8066_vm11, 0, %v4168_v37 }
 0x275   : > { %v10003_v9 = vpop.f32.mrf.mxu0  ;;  %v7117_v19 = vor.u32 %v7675_v7, %v7116_v39  ;;  %v10031_v39 = vld [vmem:[%s11913_s4] ss:$0 sm:$0xff]  ;;  %4170 = vst [vmem:[#allocation3 + $0x8] sm:$0xf] %v4169_v20  ;;  %v4120_v37 = vld [vmem:[#allocation3 + $0x18] sm:$0x1] }
 0x276   : > { %v4757_v4 = vrot.slane %v4755_v2, 4  ;;  %v4121_v50 = vsel %vm8046_vm10, 0, %v4120_v37  ;;  %vm6617_vm7 = vcmask 261120  }
 0x277   : > { %4122 = vst [vmem:[#allocation3 + $0x18] sm:$0x1] %v4121_v50 }
 0x279   : > { %v10010_v51 = vpop.f32.mrf.mxu1 }
 0x27a   : > { %v10008_v49 = vpop.f32.mrf.mxu3  ;;  %v10024_v32 = vpop.f32.mrf.mxu2 }
 0x27b   : > { %11958 = vst [vmem:[#allocation21_spill] sm:$0xff] %v10024_v32  ;;  %v1483_v10 = vld [vmem:[#allocation2 + $0xcc] sm:$0xf] }
 0x27c   : > { %3819 = vmatmul.bf16.gmra.mxu2 %v7049_v60  ;;  %v4172_v60 = vsel %vm8066_vm11, 0, %v4171_v62  ;;  %v6897_v56 = vrot.slane %v1483_v10, 9  ;;  %2645 = vst.msk [vmem:[#allocation4 + $0x264] sm:$0xf] %vm273_vm3, %v1483_v10  ;;  %v3608_v62 = vadd.f32 %v10031_v39, %v9735_v6 }
 0x27d   : > { %v10014_v52 = vpop.f32.mrf.mxu0  ;;  %4173 = vst [vmem:[#allocation3 + $0x14] sm:$0xf] %v4172_v60  ;;  %v7664_v60 = vld [vmem:[#allocation4 + $0x158] sm:$0xf0] }
 0x27e   : > { %v2721_v12 = vsel %vm9284_vm13, %v6897_v56, %v11959_v44  ;;  %v7069_v6 = vor.u32 %v7664_v60, %v7068_v11  ;;  %v7680_v44 = vld [vmem:[#allocation4 + $0x1d8] sm:$0xf0]  ;;  %v4758_v56 = vor.u32 %v4757_v4, %v9991_v21  ;;  %v10054_v11 = vld [vmem:[#allocation3 + $0xd0] sm:$0xf]  ;;  %v3610_v4 = vadd.f32 %v10031_v39, %v9761_v45 }
 0x27f   : > { %3923 = vmatmul.bf16.gmra.mxu3 %v7113_v23  ;;  %v2648_v23 = vshrl.u32 %v1483_v10, 16  ;;  %2759 = vst.msk [vmem:[#allocation4 + $0x268] sm:$0xf] %vm273_vm3, %v2721_v12  ;;  %v4219_v12 = vld [vmem:[#allocation3 + $0xd4] sm:$0xf]  ;;  %vm5509_vm3 = vcmask 781824  }
 0x280   : > { %7372 = vmatmul.msk.bf16.gmra.mxu0 %vm3549_vm15, %v7117_v19  ;;  %v2651_v19 = vshll.u32 %v1483_v10, 16  ;;  %v3697_v10 = vadd.f32 %v9930_v47, %v3608_v62  ;;  %v7133_v47 = vor.u32 %v7677_v35, %v7130_v54  ;;  %v5305_v62 = vrot.slane %v5303_v24, 4  ;;  %v4657_v35 = vld [vmem:[#allocation3 + $0x8] sm:$0xf]  ;;  %v7681_v24 = vld [vmem:[#allocation4 + $0x1e4] sm:$0xf] }
 0x281   : > { %v10033_v7 = vpop.f32.mrf.mxu1  ;;  %v4761_v37 = vshll.u32 %v4657_v35, 16 }
 0x282   : > { %v10026_v27 = vpop.f32.mrf.mxu3  ;;  %v2653_v32 = vrot.slane %v2651_v19, 5 }
 0x284   : > { %3750 = vmatmul.bf16.gmra.mxu1 %v7125_v16  ;;  %v2650_v16 = vrot.slane %v2648_v23, 4  ;;  %v7136_v23 = vld [vmem:[#allocation4 + $0x1c8] sm:$0xf] }
 0x285   : > { %v10041_v38 = vpop.f32.mrf.mxu0  ;;  %v7137_v54 = vor.u32 %v7680_v44, %v7136_v23 }
 0x286   : > { %v2654_v20 = vor.u32 %v2653_v32, %v2650_v16  ;;  %v4220_v32 = vsel %vm8066_vm11, 0, %v4219_v12  ;;  %v6037_v16 = vshll.u32 %v10054_v11, 16  ;;  %v4763_v12 = vrot.slane %v4761_v37, 5 }
 0x287   : > { %4221 = vst [vmem:[#allocation3 + $0xd4] sm:$0xf] %v4220_v32  ;;  %v3613_v37 = vadd.f32 %v10031_v39, %v9795_v13 }
 0x288   : > { %v2655_v2 = vrot.slane %v2654_v20, 4  ;;  %v4174_v20 = vld [vmem:[#allocation3 + $0x20] sm:$0xf]  ;;  %v10071_v23 = vrot.slane %v6037_v16, 5 }
 0x289   : > { %v10066_v21 = vpop.f32.mrf.mxu1  ;;  %v4175_v45 = vsel %vm8066_vm11, 0, %v4174_v20 }
 0x28a   : > { %v3785_v30 = vpop.f32.mrf.mxu2  ;;  %v10049_v33 = vpop.f32.mrf.mxu3  ;;  %4176 = vst [vmem:[#allocation3 + $0x20] sm:$0xf] %v4175_v45 }
 0x28b   : > { %v3786_v19 = vadd.f32 %v3785_v30, %v3697_v10  ;;  %v6041_v30 = vshrl.u32 %v10054_v11, 16  ;;  %v2660_v10 = vsel %vm8369_vm4, %v2655_v2, %v9952_v42  ;;  %v4759_v42 = vrot.slane %v4758_v56, 4 }
 0x28c   : > { %3824 = vmatmul.bf16.gmra.mxu2 %v7069_v6  ;;  %2675 = vrot.lane.b32.xlu2 %v2660_v10, %s7857_s7  ;;  %v5306_v6 = vrot.slane %v4657_v35, 5 }
 0x28d   : > { %v3875_v60 = vadd.f32 %v9961_v36, %v3786_v19  ;;  %v6043_v50 = vrot.slane %v6041_v30, 4  ;;  %v3699_v19 = vadd.f32 %v9938_v28, %v3610_v4  ;;  %v10076_v2 = vpop.f32.mrf.mxu0  ;;  %v4764_v28 = vsel %vm8369_vm4, %v4759_v42, %v4763_v12 }
 0x28e   : > { %v10087_v4 = vld [vmem:[#allocation3 + $0xd4] sm:$0xf] }
 0x28f   : > { %v3964_v36 = vadd.f32 %v9946_v61, %v3875_v60  ;;  %3928 = vmatmul.bf16.gmra.mxu3 %v7133_v47  ;;  %v7142_v61 = vld [vmem:[#allocation4 + $0x1f4] sm:$0xf0]  ;;  %v5307_v47 = vsel %vm9284_vm13, %v5305_v62, %v5306_v6  ;;  %v6044_v10 = vor.u32 %v6043_v50, %v10071_v23  ;;  %v4165_v62 = vld [vmem:[#allocation3 + $0xcc] sm:$0x1]  ;;  %v7088_v50 = vld [vmem:[#allocation4 + $0x170] sm:$0xf] }
 0x290   : > { %7373 = vmatmul.msk.bf16.gmra.mxu0 %vm3549_vm15, %v7137_v54  ;;  %v7145_v60 = vor.u32 %v7681_v24, %v7142_v61  ;;  %5415 = vrot.lane.b32.xlu1 %v5307_v47, %s7857_s7  ;;  %v4166_v24 = vsel %vm8046_vm10, 0, %v4165_v62  ;;  %v3702_v61 = vadd.f32 %v9958_v8, %v3613_v37  ;;  %v7156_v62 = vld [vmem:[#allocation4 + $0x1f0] sm:$0xf]  ;;  %v7150_v37 = vld [vmem:[#allocation4 + $0x1fc] sm:$0xf0] }
 0x291   : > { %v4043_v44 = vmax.f32 %v3964_v36, 0.0  ;;  %v6047_v36 = vshll.u32 %v10087_v4, 16  ;;  %4167 = vst [vmem:[#allocation3 + $0xcc] sm:$0x1] %v4166_v24  ;;  %v6045_v45 = vrot.slane %v6044_v10, 4  ;;  %v10100_v47 = vpop.f32.mrf.mxu1 }
 0x292   : > { %v3787_v32 = vpop.f32.mrf.mxu2  ;;  %v10080_v56 = vpop.f32.mrf.mxu3 }
 0x293   : > { %v4075_v16 = vpack.c.bf16 %v4043_v44, %v4043_v44  ;;  %v3788_v30 = vadd.f32 %v3787_v32, %v3699_v19  ;;  %v6049_v19 = vrot.slane %v6047_v36, 5  ;;  %v4123_v44 = vld [vmem:[#allocation3 + $0x24] sm:$0x1]  ;;  %v7685_v36 = vld [vmem:[#allocation4 + $0x200] sm:$0xf0] }
 0x294   : > { %3755 = vmatmul.bf16.gmra.mxu1 %v7145_v60  ;;  %5127 = vrot.lane.b32.xlu2 %v4764_v28, %s7855_s27  ;;  %v7669_v60 = vld [vmem:[#allocation4 + $0x180] sm:$0xf0]  ;;  %v4124_v32 = vsel %vm8046_vm10, 0, %v4123_v44  ;;  %v7682_v28 = vld [vmem:[#allocation4 + $0x1ec] sm:$0xf]  ;;  %v3615_v44 = vadd.f32 %v10031_v39, %v9817_v41 }
 0x295   : > { %v4223_v54 = vshrl.u32 %v4075_v16, 16  ;;  %v3877_v35 = vadd.f32 %v9977_v15, %v3788_v30  ;;  %v4226_v20 = vshll.u32 %v4075_v16, 16  ;;  %v4543_v15 = vld [vmem:[#allocation3 + $0xc] sm:$0xf]  ;;  %4125 = vst [vmem:[#allocation3 + $0x24] sm:$0x1] %v4124_v32  ;;  %v6050_v24 = vsel %vm8369_vm4, %v6045_v45, %v6049_v19 }
 0x296   : > { %v7162_v32 = vld [vmem:[#allocation4 + $0x21c] sm:$0xf0] }
 0x297   : > { %v10094_v6 = vrot.slane %v4223_v54, 7  ;;  %v3966_v42 = vadd.f32 %v9969_v57, %v3877_v35  ;;  %v7089_v57 = vor.u32 %v7669_v60, %v7088_v50  ;;  %v10110_v54 = vpop.f32.mrf.mxu0  ;;  %v7153_v50 = vor.u32 %v7682_v28, %v7150_v37 }
 0x298   : > { %5961 = vrot.lane.b32.xlu1 %v10054_v11, %s7857_s7  ;;  %v11917_v28 = vrot.slane %v10054_v11, 5 }
 0x299   : > { %v4228_v12 = vor.u32 %v4226_v20, %v10094_v6  ;;  %v4044_v13 = vmax.f32 %v3966_v42, 0.0 }
 0x29a   : > { %v3790_v16 = vpop.f32.mrf.mxu2  ;;  %v10104_v30 = vpop.f32.mrf.mxu3 }
 0x29b   : > { %v4544_v8 = vsel %vm8066_vm11, %v4228_v12, %v4543_v15  ;;  %v4076_v10 = vpack.c.bf16 %v4044_v13, %v4044_v13  ;;  %v3791_v35 = vadd.f32 %v3790_v16, %v3702_v61  ;;  %v7157_v12 = vor.u32 %v7685_v36, %v7156_v62  ;;  %v4706_v13 = vld [vmem:[#allocation3 + $0xcc] sm:$0xf]  ;;  %v4547_v16 = vld [vmem:[#allocation3 + $0x14] sm:$0x1] }
 0x29c   : > { %4545 = vst [vmem:[#allocation3 + $0xc] sm:$0xf] %v4544_v8  ;;  %3829 = vmatmul.bf16.gmra.mxu2 %v7089_v57  ;;  %6113 = vrot.lane.b32.xlu2 %v6050_v24, %s7858_s24  ;;  %v6028_v45 = vshrl.u32 %v4706_v13, 16  ;;  %v6031_v19 = vshll.u32 %v4706_v13, 16  ;;  %v3704_v57 = vadd.f32 %v9973_v0, %v3615_v44  ;;  %v7395_v41 = vrot.slane %v4706_v13, 9 }
 0x29d   : > { %v4231_v20 = vshrl.u32 %v4076_v10, 16  ;;  %v3880_v42 = vadd.f32 %v9996_v29, %v3791_v35  ;;  %v4234_v15 = vshll.u32 %v4076_v10, 16  ;;  %v4229_v29 = vrot.slane %v10094_v6, 4  ;;  %5959 = vrot.lane.b32.xlu0 %v4706_v13, %s7857_s7  ;;  %v7686_v35 = vld [vmem:[#allocation4 + $0x20c] sm:$0xf]  ;;  %v10137_v13 = vpop.f32.mrf.mxu1 }
 0x29e   : > { %v6030_v62 = vrot.slane %v6028_v45, 4  ;;  %v7165_v36 = vor.u32 %v7686_v35, %v7162_v32  ;;  %v6033_v0 = vrot.slane %v6031_v19, 5  ;;  %v10130_v6 = vsel %vm9284_vm13, %v7395_v41, %v11917_v28 }
 0x29f   : > { %v4233_v60 = vrot.slane %v4231_v20, 7  ;;  %v3969_v61 = vadd.f32 %v9986_v63, %v3880_v42  ;;  %3933 = vmatmul.bf16.gmra.mxu3 %v7153_v50  ;;  %v4177_v20 = vld [vmem:[#allocation3 + $0x2c] sm:$0xf]  ;;  %v10141_v45 = vpop.f32.mrf.mxu0 }
 0x2a0   : > { %7374 = vmatmul.msk.bf16.gmra.mxu0 %vm3549_vm15, %v7157_v12 }
 0x2a1   : > { %v4236_v63 = vor.u32 %v4234_v15, %v4233_v60  ;;  %v4238_v8 = vrot.slane %v4233_v60, 4  ;;  %v4045_v10 = vmax.f32 %v3969_v61, 0.0  ;;  %v6034_v60 = vor.u32 %v6033_v0, %v6030_v62 }
 0x2a2   : > { %v3792_v24 = vpop.f32.mrf.mxu2  ;;  %v10124_v37 = vpop.f32.mrf.mxu3  ;;  %v4178_v61 = vsel %vm8066_vm11, 0, %v4177_v20  ;;  %v7687_v20 = vld [vmem:[#allocation4 + $0x214] sm:$0xf] }
 0x2a3   : > { %v4237_v42 = vsel %vm7922_vm2, %v4229_v29, %v4236_v63  ;;  %v4548_v50 = vsel %vm8046_vm10, %v4238_v8, %v4547_v16  ;;  %v4077_v44 = vpack.c.bf16 %v4045_v10, %v4045_v10  ;;  %v3793_v15 = vadd.f32 %v3792_v24, %v3704_v57  ;;  %v4658_v12 = vld [vmem:[#allocation3 + $0xc] sm:$0xf]  ;;  %v7108_v57 = vld [vmem:[#allocation4 + $0x198] sm:$0xf]  ;;  %v7674_v8 = vld [vmem:[#allocation4 + $0x1a8] sm:$0xf0] }
 0x2a4   : > { %4546 = vst.msk [vmem:[#allocation3 + $0x10] sm:$0xf] %vm750_vm9, %v4237_v42  ;;  %3760 = vmatmul.bf16.gmra.mxu1 %v7165_v36  ;;  %v6035_v29 = vrot.slane %v6034_v60, 4  ;;  %5544 = vrot.lane.b32.xlu2 %v4658_v12, %s7858_s24  ;;  %v4550_v10 = vld [vmem:[#allocation3 + $0x18] sm:$0xf]  ;;  %v7109_v0 = vor.u32 %v7674_v8, %v7108_v57 }
 0x2a5   : > { %4549 = vst [vmem:[#allocation3 + $0x14] sm:$0x1] %v4548_v50  ;;  %v4240_v32 = vshrl.u32 %v4077_v44, 16  ;;  %v3882_v19 = vadd.f32 %v10008_v49, %v3793_v15  ;;  %v4243_v41 = vshll.u32 %v4077_v44, 16  ;;  %v7176_v36 = vld [vmem:[#allocation4 + $0x218] sm:$0xf]  ;;  %v3618_v44 = vadd.f32 %v10031_v39, %v9836_v14 }
 0x2a6   : > { %4711 = vst.msk [vmem:[#allocation4 + $0x28] sm:$0xf] %vm750_vm9, %v4658_v12  ;;  %v6040_v35 = vsel %vm8369_vm4, %v6035_v29, %v10071_v23  ;;  %v7690_v24 = vld [vmem:[#allocation4 + $0x228] sm:$0xf0]  ;;  %v7170_v42 = vld [vmem:[#allocation4 + $0x224] sm:$0xf0] }
 0x2a7   : > { %v10145_v16 = vrot.slane %v4240_v32, 7  ;;  %v3971_v63 = vadd.f32 %v10003_v9, %v3882_v19  ;;  %4179 = vst [vmem:[#allocation3 + $0x2c] sm:$0xf] %v4178_v61  ;;  %6111 = vrot.lane.b32.xlu1 %v6040_v35, %s7858_s24  ;;  %v4766_v9 = vshrl.u32 %v4658_v12, 16  ;;  %v4769_v50 = vshll.u32 %v4658_v12, 16 }
 0x2a8   : > { %v7379_v61 = vrot.slane %v4658_v12, 9  ;;  %v4126_v32 = vld [vmem:[#allocation3 + $0x30] sm:$0x1]  ;;  %v7173_v14 = vor.u32 %v7687_v20, %v7170_v42  ;;  %v7177_v35 = vor.u32 %v7690_v24, %v7176_v36  ;;  %v4554_v12 = vld [vmem:[#allocation3 + $0x20] sm:$0x1] }
 0x2a9   : > { %v4245_v49 = vor.u32 %v4243_v41, %v10145_v16  ;;  %v4046_v62 = vmax.f32 %v3971_v63, 0.0  ;;  %v4768_v57 = vrot.slane %v4766_v9, 4  ;;  %v4771_v41 = vrot.slane %v4769_v50, 5  ;;  %v10167_v9 = vpop.f32.mrf.mxu0 }
 0x2aa   : > { %v10158_v19 = vpop.f32.mrf.mxu3  ;;  %v4246_v42 = vrot.slane %v10145_v16, 4 }
 0x2ab   : > { %v4551_v15 = vsel %vm8066_vm11, %v4245_v49, %v4550_v10  ;;  %v4078_v60 = vpack.c.bf16 %v4046_v62, %v4046_v62  ;;  %v4659_v23 = vld [vmem:[#allocation3 + $0x10] sm:$0xf]  ;;  %v3707_v10 = vadd.f32 %v9993_v53, %v3618_v44  ;;  %v10163_v49 = vpop.f32.mrf.mxu1  ;;  %v4127_v53 = vsel %vm8046_vm10, 0, %v4126_v32 }
 0x2ac   : > { %4552 = vst [vmem:[#allocation3 + $0x18] sm:$0xf] %v4551_v15  ;;  %3834 = vmatmul.bf16.gmra.mxu2 %v7109_v0  ;;  %5546 = vrot.lane.b32.xlu0 %v4659_v23, %s7858_s24  ;;  %v5310_v29 = vrot.slane %v4659_v23, 5  ;;  %v4775_v63 = vshll.u32 %v4659_v23, 16  ;;  %v4772_v0 = vor.u32 %v4771_v41, %v4768_v57  ;;  %v4660_v20 = vld [vmem:[#allocation3 + $0x14] sm:$0xf] }
 0x2ad   : > { %v4248_v8 = vshrl.u32 %v4078_v60, 16  ;;  %4712 = vst.msk [vmem:[#allocation4 + $0x3c] sm:$0xf] %vm750_vm9, %v4659_v23  ;;  %v4251_v5 = vshll.u32 %v4078_v60, 16  ;;  %v4779_v57 = vshrl.u32 %v4659_v23, 16  ;;  %v4785_v23 = vshll.u32 %v4660_v20, 16 }
 0x2ae   : > { %v5311_v62 = vsel %vm9284_vm13, %v7379_v61, %v5310_v29  ;;  %v4777_v15 = vrot.slane %v4775_v63, 5  ;;  %v4773_v24 = vrot.slane %v4772_v0, 4  ;;  %4128 = vst [vmem:[#allocation3 + $0x30] sm:$0x1] %v4127_v53  ;;  %v7182_v61 = vld [vmem:[#allocation4 + $0x244] sm:$0xf0] }
 0x2af   : > { %v4250_v28 = vrot.slane %v4248_v8, 7  ;;  %v3795_v50 = vpop.f32.mrf.mxu2  ;;  %3938 = vmatmul.bf16.gmra.mxu3 %v7173_v14  ;;  %5417 = vrot.lane.b32.xlu2 %v5311_v62, %s7857_s7  ;;  %v7185_v63 = vor.u32 %v7691_v3, %v7182_v61  ;;  %v5312_v8 = vrot.slane %v5310_v29, 4  ;;  %v4180_v14 = vld [vmem:[#allocation3 + $0x38] sm:$0xf]  ;;  %v3620_v3 = vadd.f32 %v10031_v39, %v9846_v18 }
 0x2b0   : > { %v3796_v36 = vadd.f32 %v3795_v50, %v3707_v10  ;;  %7375 = vmatmul.msk.bf16.gmra.mxu0 %vm3549_vm15, %v7177_v35  ;;  %5769 = vrot.lane.b32.xlu1 %v5311_v62, %s7855_s27  ;;  %v4778_v32 = vsel %vm8369_vm4, %v4773_v24, %v4777_v15  ;;  %v5313_v29 = vrot.slane %v4660_v20, 5  ;;  %v4181_v10 = vsel %vm8066_vm11, 0, %v4180_v14  ;;  %v7196_v62 = vld [vmem:[#allocation4 + $0x240] sm:$0xf]  ;;  %v7679_v24 = vld [vmem:[#allocation4 + $0x1d0] sm:$0xf0] }
 0x2b1   : > { %v4253_v44 = vor.u32 %v4251_v5, %v4250_v28  ;;  %v4255_v60 = vrot.slane %v4250_v28, 4  ;;  %5729 = vst.msk [vmem:[#allocation4 + $0x4] sm:$0xf] %vm750_vm9, %v4778_v32  ;;  %v4781_v28 = vrot.slane %v4779_v57, 4  ;;  %v3709_v0 = vadd.f32 %v10010_v51, %v3620_v3  ;;  %v7128_v61 = vld [vmem:[#allocation4 + $0x1c0] sm:$0xf] }
 0x2b2   : > { %v3885_v41 = vadd.f32 %v10026_v27, %v3796_v36  ;;  %v10193_v53 = vpop.f32.mrf.mxu3  ;;  %v5314_v18 = vsel %vm9284_vm13, %v5312_v8, %v5313_v29  ;;  %4182 = vst [vmem:[#allocation3 + $0x38] sm:$0xf] %v4181_v10  ;;  %v7692_v57 = vld [vmem:[#allocation4 + $0x23c] sm:$0xf]  ;;  %v7129_v14 = vor.u32 %v7679_v24, %v7128_v61 }
 0x2b3   : > { %v4254_v35 = vsel %vm7922_vm2, %v4246_v42, %v4253_v44  ;;  %v4555_v16 = vsel %vm8046_vm10, %v4255_v60, %v4554_v12  ;;  %v10183_v5 = vld [vmem:[#allocation3 + $0x18] sm:$0xf]  ;;  %v4782_v12 = vor.u32 %v4781_v28, %v4777_v15  ;;  %v4787_v42 = vrot.slane %v4785_v23, 5  ;;  %v10200_v15 = vpop.f32.mrf.mxu1  ;;  %v10202_v60 = vpop.f32.mrf.mxu0 }
 0x2b4   : > { %4553 = vst.msk [vmem:[#allocation3 + $0x1c] sm:$0xf] %vm750_vm9, %v4254_v35  ;;  %v3974_v27 = vadd.f32 %v10014_v52, %v3885_v41  ;;  %3765 = vmatmul.bf16.gmra.mxu1 %v7185_v63  ;;  %5129 = vrot.lane.b32.xlu0 %v4778_v32, %s7855_s27  ;;  %v7695_v52 = vld [vmem:[#allocation4 + $0x250] sm:$0xf0]  ;;  %v7190_v41 = vld [vmem:[#allocation4 + $0x24c] sm:$0xf0] }
 0x2b5   : > { %4556 = vst [vmem:[#allocation3 + $0x20] sm:$0x1] %v4555_v16  ;;  %v4783_v20 = vrot.slane %v4782_v12, 4  ;;  %v7197_v35 = vor.u32 %v7695_v52, %v7196_v62  ;;  %v3623_v16 = vadd.f32 %v10031_v39, %v9854_v55  ;;  %v7380_v3 = vrot.slane %v10183_v5, 9  ;;  %v4129_v12 = vld [vmem:[#allocation3 + $0x3c] sm:$0x1] }
 0x2b6   : > { %v4047_v50 = vmax.f32 %v3974_v27, 0.0  ;;  %4713 = vst.msk [vmem:[#allocation4 + $0x50] sm:$0xf] %vm750_vm9, %v10183_v5  ;;  %v4790_v27 = vshrl.u32 %v10183_v5, 16  ;;  %v4557_v62 = vld [vmem:[#allocation3 + $0x24] sm:$0xf] }
 0x2b7   : > { %v3797_v36 = vpop.f32.mrf.mxu2  ;;  %5771 = vrot.lane.b32.xlu2 %v5314_v18, %s7855_s27  ;;  %v4788_v63 = vsel %vm8369_vm4, %v4783_v20, %v4787_v42 }
 0x2b8   : > { %v4079_v51 = vpack.c.bf16 %v4047_v50, %v4047_v50  ;;  %v3798_v44 = vadd.f32 %v3797_v36, %v3709_v0  ;;  %5548 = vrot.lane.b32.xlu1 %v10183_v5, %s7858_s24  ;;  %5730 = vst.msk [vmem:[#allocation4 + $0x18] sm:$0xf] %vm750_vm9, %v4788_v63  ;;  %v4792_v0 = vrot.slane %v4790_v27, 4  ;;  %v4793_v50 = vshll.u32 %v10183_v5, 16 }
 0x2b9   : > { %v4130_v36 = vsel %vm8046_vm10, 0, %v4129_v12  ;;  %v4183_v12 = vld [vmem:[#allocation3 + $0x44] sm:$0xf] }
 0x2ba   : > { %v4257_v32 = vshrl.u32 %v4079_v51, 16  ;;  %v3887_v8 = vadd.f32 %v10049_v33, %v3798_v44  ;;  %v4260_v28 = vshll.u32 %v4079_v51, 16  ;;  %v7193_v33 = vor.u32 %v7692_v57, %v7190_v41  ;;  %4131 = vst [vmem:[#allocation3 + $0x3c] sm:$0x1] %v4130_v36  ;;  %v7202_v51 = vld [vmem:[#allocation4 + $0x26c] sm:$0xf0]  ;;  %v10236_v41 = vpop.f32.mrf.mxu3 }
 0x2bb   : > { %v10212_v23 = vld [vmem:[#allocation3 + $0x1c] sm:$0xf]  ;;  %v4795_v44 = vrot.slane %v4793_v50, 5 }
 0x2bc   : > { %v10216_v29 = vrot.slane %v4257_v32, 7  ;;  %v3976_v10 = vadd.f32 %v10041_v38, %v3887_v8  ;;  %3839 = vmatmul.bf16.gmra.mxu2 %v7129_v14  ;;  %5419 = vrot.lane.b32.xlu0 %v5314_v18, %s7857_s7  ;;  %4714 = vst.msk [vmem:[#allocation4 + $0x64] sm:$0xf] %vm750_vm9, %v10212_v23  ;;  %v5317_v55 = vrot.slane %v10212_v23, 5  ;;  %v4799_v52 = vshll.u32 %v10212_v23, 16 }
 0x2bd   : > { %v3712_v38 = vadd.f32 %v10033_v7, %v3623_v16  ;;  %v7696_v32 = vld [vmem:[#allocation4 + $0x25c] sm:$0xf]  ;;  %v4796_v8 = vor.u32 %v4795_v44, %v4792_v0  ;;  %v10242_v16 = vld [vmem:[#allocation3 + $0x20] sm:$0xf]  ;;  %v4184_v0 = vsel %vm8066_vm11, 0, %v4183_v12  ;;  %v4803_v12 = vshrl.u32 %v10212_v23, 16 }
 0x2be   : > { %v4262_v18 = vor.u32 %v4260_v28, %v10216_v29  ;;  %v4048_v24 = vmax.f32 %v3976_v10, 0.0  ;;  %v5318_v20 = vsel %vm9284_vm13, %v7380_v3, %v5317_v55  ;;  %v10240_v14 = vrot.slane %v4799_v52, 5  ;;  %v10244_v3 = vpop.f32.mrf.mxu1  ;;  %4185 = vst [vmem:[#allocation3 + $0x44] sm:$0xf] %v4184_v0 }
 0x2bf   : > { %v3800_v42 = vpop.f32.mrf.mxu2  ;;  %3943 = vmatmul.bf16.gmra.mxu3 %v7193_v33  ;;  %5550 = vrot.lane.b32.xlu2 %v10212_v23, %s7858_s24  ;;  %6219 = vst.msk [vmem:[#allocation4 + $0x8] sm:$0xf] %vm750_vm9, %v5318_v20  ;;  %v5319_v28 = vrot.slane %v5317_v55, 4  ;;  %v7205_v33 = vor.u32 %v7696_v32, %v7202_v51  ;;  %v4797_v50 = vrot.slane %v4796_v8, 4  ;;  %v7684_v8 = vld [vmem:[#allocation4 + $0x1f8] sm:$0xf0] }
 0x2c0   : > { %v4558_v61 = vsel %vm8066_vm11, %v4262_v18, %v4557_v62  ;;  %v4080_v7 = vpack.c.bf16 %v4048_v24, %v4048_v24  ;;  %v3801_v57 = vadd.f32 %v3800_v42, %v3712_v38  ;;  %7376 = vmatmul.msk.bf16.gmra.mxu0 %vm3549_vm15, %v7197_v35  ;;  %5131 = vrot.lane.b32.xlu1 %v4788_v63, %s7855_s27  ;;  %v10249_v35 = vpop.f32.mrf.mxu0  ;;  %v5320_v63 = vrot.slane %v10242_v16, 5  ;;  %v4561_v38 = vld [vmem:[#allocation3 + $0x2c] sm:$0x1] }
 0x2c1   : > { %4559 = vst [vmem:[#allocation3 + $0x24] sm:$0xf] %v4558_v61  ;;  %v3625_v62 = vadd.f32 %v10031_v39, %v9862_v17  ;;  %v10260_v17 = vsel %vm8369_vm4, %v4797_v50, %v10240_v14  ;;  %v4263_v24 = vrot.slane %v10216_v29, 4  ;;  %v7148_v61 = vld [vmem:[#allocation4 + $0x1e8] sm:$0xf] }
 0x2c2   : > { %v4265_v27 = vshrl.u32 %v4080_v7, 16  ;;  %v3890_v10 = vadd.f32 %v10080_v56, %v3801_v57  ;;  %v4268_v55 = vshll.u32 %v4080_v7, 16  ;;  %v5321_v18 = vsel %vm9284_vm13, %v5319_v28, %v5320_v63  ;;  %5731 = vst.msk [vmem:[#allocation4 + $0x2c] sm:$0xf] %vm750_vm9, %v10260_v17 }
 0x2c3   : > { %v3714_v56 = vadd.f32 %v10066_v21, %v3625_v62  ;;  %6220 = vst.msk [vmem:[#allocation4 + $0x1c] sm:$0xf] %vm750_vm9, %v5321_v18  ;;  %v3628_v62 = vadd.f32 %v10031_v39, %v9867_v1 }
 0x2c4   : > { %v4267_v52 = vrot.slane %v4265_v27, 7  ;;  %v3979_v36 = vadd.f32 %v10076_v2, %v3890_v10  ;;  %3770 = vmatmul.bf16.gmra.mxu1 %v7205_v33  ;;  %5773 = vrot.lane.b32.xlu0 %v5318_v20, %s7855_s27  ;;  %v10279_v10 = vpop.f32.mrf.mxu3  ;;  %v7149_v33 = vor.u32 %v7684_v8, %v7148_v61 }
 0x2c6   : > { %v4270_v42 = vor.u32 %v4268_v55, %v4267_v52  ;;  %v4272_v51 = vrot.slane %v4267_v52, 4  ;;  %v4049_v2 = vmax.f32 %v3979_v36, 0.0  ;;  %v10286_v50 = vpop.f32.mrf.mxu1  ;;  %v4564_v52 = vld [vmem:[#allocation3 + $0x30] sm:$0xf]  ;;  %v4805_v36 = vrot.slane %v4803_v12, 4 }
 0x2c7   : > { %v3802_v44 = vpop.f32.mrf.mxu2  ;;  %5133 = vrot.lane.b32.xlu2 %v10260_v17, %s7855_s27 }
 0x2c8   : > { %v4271_v21 = vsel %vm7922_vm2, %v4263_v24, %v4270_v42  ;;  %v4562_v7 = vsel %vm8046_vm10, %v4272_v51, %v4561_v38  ;;  %v4081_v29 = vpack.c.bf16 %v4049_v2, %v4049_v2  ;;  %v3803_v57 = vadd.f32 %v3802_v44, %v3714_v56  ;;  %v10274_v32 = vld [vmem:[#allocation3 + $0x24] sm:$0xf]  ;;  %5421 = vrot.lane.b32.xlu1 %v5318_v20, %s7857_s7  ;;  %v10291_v55 = vpop.f32.mrf.mxu0 }
 0x2c9   : > { %4560 = vst.msk [vmem:[#allocation3 + $0x28] sm:$0xf] %vm750_vm9, %v4271_v21  ;;  %v4809_v56 = vshll.u32 %v10242_v16, 16  ;;  %v3717_v38 = vadd.f32 %v10100_v47, %v3628_v62  ;;  %v4806_v51 = vor.u32 %v4805_v36, %v10240_v14  ;;  %v4186_v14 = vld [vmem:[#allocation3 + $0x50] sm:$0xf] }
 0x2ca   : > { %4563 = vst [vmem:[#allocation3 + $0x2c] sm:$0x1] %v4562_v7  ;;  %v4274_v28 = vshrl.u32 %v4081_v29, 16  ;;  %v3892_v27 = vadd.f32 %v10104_v30, %v3803_v57  ;;  %v4277_v0 = vshll.u32 %v4081_v29, 16  ;;  %v4132_v30 = vld [vmem:[#allocation3 + $0x48] sm:$0x1] }
 0x2cb   : > { %4715 = vst.msk [vmem:[#allocation4 + $0x78] sm:$0xf] %vm750_vm9, %v10274_v32  ;;  %v4133_v1 = vsel %vm8046_vm10, 0, %v4132_v30  ;;  %v4807_v16 = vrot.slane %v4806_v51, 4  ;;  %v4811_v47 = vrot.slane %v4809_v56, 5  ;;  %v7381_v7 = vrot.slane %v10274_v32, 9 }
 0x2cc   : > { %v4276_v63 = vrot.slane %v4274_v28, 7  ;;  %v3981_v20 = vadd.f32 %v10110_v54, %v3892_v27  ;;  %3844 = vmatmul.bf16.gmra.mxu2 %v7149_v33  ;;  %5552 = vrot.lane.b32.xlu0 %v10274_v32, %s7858_s24  ;;  %4134 = vst [vmem:[#allocation3 + $0x48] sm:$0x1] %v4133_v1  ;;  %v3630_v28 = vadd.f32 %v10031_v39, %v9873_v40 }
 0x2cd   : > { %v10313_v27 = vsel %vm8369_vm4, %v4807_v16, %v4811_v47 }
 0x2ce   : > { %v4279_v24 = vor.u32 %v4277_v0, %v4276_v63  ;;  %v4050_v42 = vmax.f32 %v3981_v20, 0.0  ;;  %v10324_v0 = vpop.f32.mrf.mxu3  ;;  %5732 = vst.msk [vmem:[#allocation4 + $0x40] sm:$0xf] %vm750_vm9, %v10313_v27  ;;  %v3719_v40 = vadd.f32 %v10137_v13, %v3630_v28  ;;  %v4568_v20 = vld [vmem:[#allocation3 + $0x38] sm:$0x1]  ;;  %v4280_v30 = vrot.slane %v4276_v63, 4 }
 0x2cf   : > { %v3805_v54 = vpop.f32.mrf.mxu2  ;;  %5423 = vrot.lane.b32.xlu2 %v5321_v18, %s7857_s7 }
 0x2d0   : > { %v4565_v2 = vsel %vm8066_vm11, %v4279_v24, %v4564_v52  ;;  %v4082_v44 = vpack.c.bf16 %v4050_v42, %v4050_v42  ;;  %v3806_v61 = vadd.f32 %v3805_v54, %v3717_v38  ;;  %v10301_v21 = vld [vmem:[#allocation3 + $0x28] sm:$0xf]  ;;  %5775 = vrot.lane.b32.xlu1 %v5321_v18, %s7855_s27  ;;  %v10333_v52 = vpop.f32.mrf.mxu1  ;;  %v10335_v1 = vpop.f32.mrf.mxu0  ;;  %v7689_v42 = vld [vmem:[#allocation4 + $0x220] sm:$0xf0] }
 0x2d1   : > { %4566 = vst [vmem:[#allocation3 + $0x30] sm:$0xf] %v4565_v2  ;;  %v5324_v29 = vrot.slane %v10301_v21, 5  ;;  %v7168_v24 = vld [vmem:[#allocation4 + $0x210] sm:$0xf] }
 0x2d2   : > { %v4282_v57 = vshrl.u32 %v4082_v44, 16  ;;  %v3895_v8 = vadd.f32 %v10124_v37, %v3806_v61  ;;  %4716 = vst.msk [vmem:[#allocation4 + $0x8c] sm:$0xf] %vm750_vm9, %v10301_v21  ;;  %v4187_v37 = vsel %vm8066_vm11, 0, %v4186_v14  ;;  %v4285_v12 = vshll.u32 %v4082_v44, 16 }
 0x2d3   : > { %v10319_v18 = vsel %vm9284_vm13, %v7381_v7, %v5324_v29  ;;  %4188 = vst [vmem:[#allocation3 + $0x50] sm:$0xf] %v4187_v37  ;;  %v3633_v44 = vadd.f32 %v10031_v39, %v9880_v59  ;;  %v7169_v47 = vor.u32 %v7689_v42, %v7168_v24  ;;  %v4823_v14 = vshll.u32 %v10301_v21, 16  ;;  %v4666_v59 = vld [vmem:[#allocation3 + $0x2c] sm:$0xf] }
 0x2d4   : > { %v4284_v33 = vrot.slane %v4282_v57, 7  ;;  %v3984_v62 = vadd.f32 %v10141_v45, %v3895_v8  ;;  %5135 = vrot.lane.b32.xlu0 %v10313_v27, %s7855_s27  ;;  %6221 = vst.msk [vmem:[#allocation4 + $0x30] sm:$0xf] %vm750_vm9, %v10319_v18  ;;  %v4814_v57 = vshrl.u32 %v10274_v32, 16  ;;  %v4817_v8 = vshll.u32 %v10274_v32, 16 }
 0x2d6   : > { %v4287_v36 = vor.u32 %v4285_v12, %v4284_v33  ;;  %v4289_v56 = vrot.slane %v4284_v33, 4  ;;  %v4051_v45 = vmax.f32 %v3984_v62, 0.0  ;;  %v4135_v33 = vld [vmem:[#allocation3 + $0x54] sm:$0x1]  ;;  %v3722_v12 = vadd.f32 %v10163_v49, %v3633_v44  ;;  %v4571_v62 = vld [vmem:[#allocation3 + $0x3c] sm:$0xf] }
 0x2d7   : > { %v3807_v38 = vpop.f32.mrf.mxu2  ;;  %5905 = vrot.lane.b32.xlu2 %v10301_v21, %s7857_s7  ;;  %v4136_v42 = vsel %vm8046_vm10, 0, %v4135_v33 }
 0x2d8   : > { %v4288_v13 = vsel %vm7922_vm2, %v4280_v30, %v4287_v36  ;;  %v4569_v63 = vsel %vm8046_vm10, %v4289_v56, %v4568_v20  ;;  %v4083_v54 = vpack.c.bf16 %v4051_v45, %v4051_v45  ;;  %v3808_v51 = vadd.f32 %v3807_v38, %v3719_v40  ;;  %v10343_v2 = vld [vmem:[#allocation3 + $0x30] sm:$0xf]  ;;  %5903 = vrot.lane.b32.xlu1 %v10274_v32, %s7857_s7  ;;  %v10364_v56 = vpop.f32.mrf.mxu3  ;;  %v10370_v49 = vpop.f32.mrf.mxu1 }
 0x2d9   : > { %4567 = vst.msk [vmem:[#allocation3 + $0x34] sm:$0xf] %vm750_vm9, %v4288_v13  ;;  %v4816_v40 = vrot.slane %v4814_v57, 4  ;;  %v4819_v20 = vrot.slane %v4817_v8, 5  ;;  %v4825_v32 = vrot.slane %v4823_v14, 5  ;;  %v4833_v45 = vshll.u32 %v4666_v59, 16  ;;  %v10374_v44 = vpop.f32.mrf.mxu0 }
 0x2da   : > { %4570 = vst [vmem:[#allocation3 + $0x38] sm:$0x1] %v4569_v63  ;;  %v4291_v61 = vshrl.u32 %v4083_v54, 16  ;;  %v3897_v16 = vadd.f32 %v10158_v19, %v3808_v51  ;;  %v4294_v7 = vshll.u32 %v4083_v54, 16  ;;  %v4827_v19 = vshrl.u32 %v10301_v21, 16 }
 0x2db   : > { %4717 = vst.msk [vmem:[#allocation4 + $0xa0] sm:$0xf] %vm750_vm9, %v10343_v2  ;;  %v4820_v24 = vor.u32 %v4819_v20, %v4816_v40  ;;  %v3635_v57 = vadd.f32 %v10031_v39, %v9888_v22  ;;  %v4575_v40 = vld [vmem:[#allocation3 + $0x44] sm:$0x1] }
 0x2dc   : > { %v10356_v28 = vrot.slane %v4291_v61, 7  ;;  %v3986_v37 = vadd.f32 %v10167_v9, %v3897_v16  ;;  %3849 = vmatmul.bf16.gmra.mxu2 %v7169_v47  ;;  %5425 = vrot.lane.b32.xlu0 %v10319_v18, %s7857_s7  ;;  %v4829_v9 = vrot.slane %v4827_v19, 4  ;;  %4137 = vst [vmem:[#allocation3 + $0x54] sm:$0x1] %v4136_v42  ;;  %v2678_v47 = vpop.permute.xlu0 %2677  ;;  %v4189_v19 = vld [vmem:[#allocation3 + $0x5c] sm:$0xf] }
 0x2dd   : > { %v4821_v61 = vrot.slane %v4820_v24, 4  ;;  %2714 = vst.msk [vmem:[#allocation4 + $0x278] sm:$0xf] %vm2001_vm5, %v2678_v47  ;;  %v6185_v42 = vrot.slane %v10087_v4, 5  ;;  %v7382_v4 = vrot.slane %v10343_v2, 9 }
 0x2de   : > { %v4296_v30 = vor.u32 %v4294_v7, %v10356_v28  ;;  %v4052_v36 = vmax.f32 %v3986_v37, 0.0  ;;  %v4830_v51 = vor.u32 %v4829_v9, %v4825_v32  ;;  %v5326_v7 = vrot.slane %v5324_v29, 4 }
 0x2df   : > { %v3810_v38 = vpop.f32.mrf.mxu2  ;;  %5556 = vrot.lane.b32.xlu2 %v10343_v2, %s7858_s24  ;;  %v4835_v37 = vrot.slane %v4833_v45, 5  ;;  %v10389_v33 = vsel %vm8369_vm4, %v4821_v61, %v4825_v32  ;;  %v4190_v29 = vsel %vm8066_vm11, 0, %v4189_v19  ;;  %v10440_v19 = vld [vmem:[%s11913_s4] ss:$0 sm:$0xff] }
 0x2e0   : > { %v4572_v13 = vsel %vm8066_vm11, %v4296_v30, %v4571_v62  ;;  %v4084_v63 = vpack.c.bf16 %v4052_v36, %v4052_v36  ;;  %v3811_v54 = vadd.f32 %v3810_v38, %v3722_v12  ;;  %5554 = vrot.lane.b32.xlu1 %v10301_v21, %s7858_s24  ;;  %v10378_v16 = vld [vmem:[#allocation3 + $0x34] sm:$0xf]  ;;  %v4831_v12 = vrot.slane %v4830_v51, 4  ;;  %5733 = vst.msk [vmem:[#allocation4 + $0x54] sm:$0xf] %vm750_vm9, %v10389_v33  ;;  %v10419_v38 = vpop.f32.mrf.mxu3 }
 0x2e1   : > { %4573 = vst [vmem:[#allocation3 + $0x3c] sm:$0xf] %v4572_v13  ;;  %v5327_v21 = vrot.slane %v4666_v59, 5  ;;  %v3724_v62 = vadd.f32 %v10200_v15, %v3635_v57  ;;  %v7694_v15 = vld [vmem:[#allocation4 + $0x248] sm:$0xf0]  ;;  %v10430_v57 = vpop.f32.mrf.mxu0 }
 0x2e2   : > { %v4299_v8 = vshrl.u32 %v4084_v63, 16  ;;  %v3900_v14 = vadd.f32 %v10193_v53, %v3811_v54  ;;  %4718 = vst.msk [vmem:[#allocation4 + $0xb4] sm:$0xf] %vm750_vm9, %v10378_v16  ;;  %v4302_v39 = vshll.u32 %v4084_v63, 16  ;;  %v10402_v20 = vsel %vm8369_vm4, %v4831_v12, %v4835_v37  ;;  %v7188_v63 = vld [vmem:[#allocation4 + $0x238] sm:$0xf]  ;;  %v10425_v54 = vpop.f32.mrf.mxu1 }
 0x2e3   : > { %v10406_v59 = vsel %vm9284_vm13, %v5326_v7, %v5327_v21  ;;  %4191 = vst [vmem:[#allocation3 + $0x5c] sm:$0xf] %v4190_v29  ;;  %v7189_v47 = vor.u32 %v7694_v15, %v7188_v63  ;;  %v10428_v7 = vld [vmem:[#allocation4 + $0x260] sm:$0xf] }
 0x2e4   : > { %v4301_v22 = vrot.slane %v4299_v8, 7  ;;  %v3989_v53 = vadd.f32 %v10202_v60, %v3900_v14  ;;  %5777 = vrot.lane.b32.xlu0 %v10319_v18, %s7855_s27  ;;  %v4297_v60 = vrot.slane %v10356_v28, 4  ;;  %5734 = vst.msk [vmem:[#allocation4 + $0x68] sm:$0xf] %vm750_vm9, %v10402_v20  ;;  %v5331_v8 = vrot.slane %v10378_v16, 5 }
 0x2e5   : > { %6222 = vst.msk [vmem:[#allocation4 + $0x44] sm:$0xf] %vm750_vm9, %v10406_v59  ;;  %v11960_v14 = vrot.slane %v10054_v11, 5  ;;  %v4578_v11 = vld [vmem:[#allocation3 + $0x48] sm:$0xf] }
 0x2e6   : > { %v4304_v32 = vor.u32 %v4302_v39, %v4301_v22  ;;  %v4306_v30 = vrot.slane %v4301_v22, 4  ;;  %v4053_v18 = vmax.f32 %v3989_v53, 0.0  ;;  %v2676_v13 = vpop.permute.xlu2 %2675  ;;  %6249 = vst.msk [vmem:[#allocation4 + $0x260] sm:$0xf] %vm750_vm9, %v10130_v6  ;;  %v5332_v22 = vsel %vm9284_vm13, %v7382_v4, %v5331_v8  ;;  %v4138_v39 = vld [vmem:[#allocation3 + $0x60] sm:$0x1] }
 0x2e7   : > { %v3812_v36 = vpop.f32.mrf.mxu2  ;;  %5139 = vrot.lane.b32.xlu2 %v10402_v20, %s7855_s27  ;;  %2713 = vst.msk [vmem:[#allocation4 + $0x264] sm:$0xf] %vm2001_vm5, %v2676_v13  ;;  %v6184_v37 = vrot.slane %v11960_v14, 4  ;;  %v4139_v6 = vsel %vm8046_vm10, 0, %v4138_v39  ;;  %v4841_v39 = vshll.u32 %v10343_v2, 16 }
 0x2e8   : > { %v4305_v9 = vsel %vm7922_vm2, %v4297_v60, %v4304_v32  ;;  %v4576_v28 = vsel %vm8046_vm10, %v4306_v30, %v4575_v40  ;;  %v4085_v45 = vpack.c.bf16 %v4053_v18, %v4053_v18  ;;  %v3813_v24 = vadd.f32 %v3812_v36, %v3724_v62  ;;  %5137 = vrot.lane.b32.xlu1 %v10389_v33, %s7855_s27  ;;  %v7699_v40 = vld [vmem:[#allocation4 + $0x270] sm:$0xf0] }
 0x2e9   : > { %4574 = vst.msk [vmem:[#allocation3 + $0x40] sm:$0xf] %vm750_vm9, %v4305_v9  ;;  %v10466_v9 = vpop.f32.mrf.mxu3  ;;  %v10477_v4 = vpop.f32.mrf.mxu0 }
 0x2ea   : > { %4577 = vst [vmem:[#allocation3 + $0x44] sm:$0x1] %v4576_v28  ;;  %v4308_v51 = vshrl.u32 %v4085_v45, 16  ;;  %v3902_v61 = vadd.f32 %v10236_v41, %v3813_v24  ;;  %v3638_v41 = vadd.f32 %v10440_v19, %v9895_v25  ;;  %v4311_v21 = vshll.u32 %v4085_v45, 16  ;;  %v10472_v13 = vpop.f32.mrf.mxu1 }
 0x2eb   : > { %v6186_v25 = vsel %vm9284_vm13, %v6184_v37, %v6185_v42  ;;  %6223 = vst.msk [vmem:[#allocation4 + $0x58] sm:$0xf] %vm750_vm9, %v5332_v22  ;;  %v3640_v24 = vadd.f32 %v10440_v19, %v9903_v34 }
 0x2ec   : > { %v4310_v12 = vrot.slane %v4308_v51, 7  ;;  %v3991_v29 = vadd.f32 %v10249_v35, %v3902_v61  ;;  %3854 = vmatmul.bf16.gmra.mxu2 %v7189_v47  ;;  %5558 = vrot.lane.b32.xlu0 %v10378_v16, %s7858_s24  ;;  %v3727_v53 = vadd.f32 %v10244_v3, %v3638_v41  ;;  %6250 = vst.msk [vmem:[#allocation4 + $0x274] sm:$0xf] %vm750_vm9, %v6186_v25  ;;  %v7210_v3 = vld [vmem:[#allocation4 + $0x274] sm:$0xf0] }
 0x2ed   : > { %4140 = vst [vmem:[#allocation3 + $0x60] sm:$0x1] %v4139_v6  ;;  %v3729_v47 = vadd.f32 %v10286_v50, %v3640_v24  ;;  %v5126_v6 = vpop.permute.xlu1 %5125 }
 0x2ee   : > { %v4313_v35 = vor.u32 %v4311_v21, %v4310_v12  ;;  %v4054_v62 = vmax.f32 %v3991_v29, 0.0  ;;  %v5128_v36 = vpop.permute.xlu2 %5127  ;;  %v7697_v45 = vld [vmem:[#allocation4 + $0x264] sm:$0xf]  ;;  %v4314_v14 = vrot.slane %v4310_v12, 4  ;;  %v4838_v12 = vshrl.u32 %v10343_v2, 16 }
 0x2ef   : > { %v3815_v60 = vpop.f32.mrf.mxu2  ;;  %5909 = vrot.lane.b32.xlu2 %v10378_v16, %s7857_s7  ;;  %5222 = vst.msk [vmem:[#allocation4 + $0x14] sm:$0xf] %vm1315_vm14, %v5128_v36  ;;  %v7213_v42 = vor.u32 %v7697_v45, %v7210_v3 }
 0x2f0   : > { %v4579_v32 = vsel %vm8066_vm11, %v4313_v35, %v4578_v11  ;;  %v4086_v30 = vpack.c.bf16 %v4054_v62, %v4054_v62  ;;  %v3816_v18 = vadd.f32 %v3815_v60, %v3727_v53  ;;  %5427 = vrot.lane.b32.xlu1 %v10406_v59, %s7857_s7  ;;  %v7209_v62 = vor.u32 %v7699_v40, %v10428_v7  ;;  %v7216_v60 = vld [vmem:[#allocation4 + $0x268] sm:$0xf]  ;;  %v4585_v7 = vld [vmem:[#allocation3 + $0x54] sm:$0xf] }
 0x2f1   : > { %4580 = vst [vmem:[#allocation3 + $0x48] sm:$0xf] %v4579_v32  ;;  %3948 = vmatmul.bf16.gmra.mxu3 %v7213_v42  ;;  %v4840_v32 = vrot.slane %v4838_v12, 4  ;;  %v4192_v42 = vld [vmem:[#allocation3 + $0x68] sm:$0xf] }
 0x2f2   : > { %v4316_v15 = vshrl.u32 %v4086_v30, 16  ;;  %v3905_v28 = vadd.f32 %v10279_v10, %v3816_v18  ;;  %v4319_v51 = vshll.u32 %v4086_v30, 16  ;;  %v4582_v10 = vld [vmem:[#allocation3 + $0x50] sm:$0x1]  ;;  %5221 = vst.msk [vmem:[#allocation4] sm:$0xf] %vm1315_vm14, %v5126_v6  ;;  %v3643_v18 = vadd.f32 %v10440_v19, %v9908_v46  ;;  %v10506_v46 = vpop.f32.mrf.mxu1 }
 0x2f3   : > { %v4843_v30 = vrot.slane %v4841_v39, 5  ;;  %v5333_v39 = vrot.slane %v5331_v8, 4  ;;  %v4141_v6 = vld [vmem:[#allocation3 + $0x6c] sm:$0x1] }
 0x2f4   : > { %v4318_v63 = vrot.slane %v4316_v15, 7  ;;  %v3994_v61 = vadd.f32 %v10291_v55, %v3905_v28  ;;  %5781 = vrot.lane.b32.xlu0 %v5332_v22, %s7855_s27  ;;  %v10499_v15 = vpop.f32.mrf.mxu3  ;;  %v4142_v8 = vsel %vm8046_vm10, 0, %v4141_v6 }
 0x2f5   : > { %v4844_v40 = vor.u32 %v4843_v30, %v4840_v32  ;;  %v4589_v32 = vld [vmem:[#allocation3 + $0x5c] sm:$0x1]  ;;  %4143 = vst [vmem:[#allocation3 + $0x6c] sm:$0x1] %v4142_v8 }
 0x2f6   : > { %v4321_v37 = vor.u32 %v4319_v51, %v4318_v63  ;;  %v4323_v41 = vrot.slane %v4318_v63, 4  ;;  %v4055_v21 = vmax.f32 %v3994_v61, 0.0  ;;  %v10485_v50 = vpop.permute.xlu2 %6113  ;;  %v3732_v63 = vadd.f32 %v10333_v52, %v3643_v18 }
 0x2f7   : > { %v3817_v34 = vpop.f32.mrf.mxu2  ;;  %5429 = vrot.lane.b32.xlu2 %v5332_v22, %s7857_s7  ;;  %11961 = vst [vmem:[#allocation22_spill] sm:$0xff] %v10485_v50  ;;  %v4847_v22 = vshll.u32 %v10378_v16, 16 }
 0x2f8   : > { %v4322_v29 = vsel %vm7922_vm2, %v4314_v14, %v4321_v37  ;;  %v4583_v55 = vsel %vm8046_vm10, %v4323_v41, %v4582_v10  ;;  %v4087_v11 = vpack.c.bf16 %v4055_v21, %v4055_v21  ;;  %v3818_v25 = vadd.f32 %v3817_v34, %v3729_v47  ;;  %5779 = vrot.lane.b32.xlu1 %v10406_v59, %s7855_s27  ;;  %v5414_v59 = vpop.permute.xlu0 %5413  ;;  %v10511_v47 = vpop.f32.mrf.mxu0 }
 0x2f9   : > { %4581 = vst.msk [vmem:[#allocation3 + $0x4c] sm:$0xf] %vm750_vm9, %v4322_v29  ;;  %v10503_v45 = vrot.slane %v4847_v22, 5  ;;  %v4845_v14 = vrot.slane %v4844_v40, 4 }
 0x2fa   : > { %4584 = vst [vmem:[#allocation3 + $0x50] sm:$0x1] %v4583_v55  ;;  %v4325_v53 = vshrl.u32 %v4087_v11, 16  ;;  %v3907_v35 = vadd.f32 %v10324_v0, %v3818_v25  ;;  %v4328_v36 = vshll.u32 %v4087_v11, 16  ;;  %v7700_v0 = vld [vmem:[#allocation4 + $0x278] sm:$0xf0] }
 0x2fb   : > { %5510 = vst.msk [vmem:[#allocation4] sm:$0xf] %vm5509_vm3, %v5414_v59  ;;  %v7217_v24 = vor.u32 %v7700_v0, %v7216_v60  ;;  %v4850_v21 = vsel %vm8369_vm4, %v4845_v14, %v10503_v45  ;;  %v4669_v11 = vld [vmem:[#allocation3 + $0x38] sm:$0xf]  ;;  %v11962_v25 = vld [vmem:[#allocation11_spill] sm:$0xff] }
 0x2fc   : > { %v10497_v3 = vrot.slane %v4325_v53, 7  ;;  %v3996_v28 = vadd.f32 %v10335_v1, %v3907_v35  ;;  %3859 = vmatmul.bf16.gmra.mxu2 %v7209_v62  ;;  %v4193_v1 = vsel %vm8066_vm11, 0, %v4192_v42  ;;  %5141 = vrot.lane.b32.xlu0 %v4850_v21, %s7855_s27  ;;  %5735 = vst.msk [vmem:[#allocation4 + $0x7c] sm:$0xf] %vm750_vm9, %v4850_v21  ;;  %v3645_v12 = vadd.f32 %v10440_v19, %v11962_v25  ;;  %v4195_v14 = vld [vmem:[#allocation3 + $0x74] sm:$0xf] }
 0x2fd   : > { %7377 = vmatmul.msk.bf16.gmra.mxu0 %vm3549_vm15, %v7217_v24  ;;  %4194 = vst [vmem:[#allocation3 + $0x68] sm:$0xf] %v4193_v1  ;;  %v5334_v22 = vrot.slane %v4669_v11, 5 }
 0x2fe   : > { %v4330_v51 = vor.u32 %v4328_v36, %v10497_v3  ;;  %v4056_v61 = vmax.f32 %v3996_v28, 0.0  ;;  %v5545_v34 = vpop.permute.xlu2 %5544  ;;  %v3734_v60 = vadd.f32 %v10370_v49, %v3645_v12  ;;  %v4331_v59 = vrot.slane %v10497_v3, 4  ;;  %v10542_v36 = vpop.f32.mrf.mxu3 }
 0x2ff   : > { %v3820_v10 = vpop.f32.mrf.mxu2  ;;  %6059 = vrot.lane.b32.xlu2 %v4850_v21, %s7858_s24  ;;  %5641 = vst.msk [vmem:[#allocation4] sm:$0xf] %vm5640_vm6, %v5545_v34  ;;  %v5335_v30 = vsel %vm9284_vm13, %v5333_v39, %v5334_v22  ;;  %v10545_v49 = vpop.f32.mrf.mxu1 }
 0x300   : > { %v4586_v37 = vsel %vm8066_vm11, %v4330_v51, %v4585_v7  ;;  %v4088_v41 = vpack.c.bf16 %v4056_v61, %v4056_v61  ;;  %v3821_v52 = vadd.f32 %v3820_v10, %v3732_v63  ;;  %5907 = vrot.lane.b32.xlu1 %v10343_v2, %s7857_s7  ;;  %v10530_v2 = vld [vmem:[#allocation3 + $0x40] sm:$0xf]  ;;  %6224 = vst.msk [vmem:[#allocation4 + $0x6c] sm:$0xf] %vm750_vm9, %v5335_v30  ;;  %v10551_v3 = vpop.f32.mrf.mxu0  ;;  %v4851_v51 = vshrl.u32 %v10378_v16, 16 }
 0x301   : > { %4587 = vst [vmem:[#allocation3 + $0x54] sm:$0xf] %v4586_v37  ;;  %v10558_v61 = vld [vmem:[#allocation3 + $0x3c] sm:$0xf]  ;;  %v4196_v16 = vsel %vm8066_vm11, 0, %v4195_v14 }
 0x302   : > { %v4333_v29 = vshrl.u32 %v4088_v41, 16  ;;  %v3910_v55 = vadd.f32 %v10364_v56, %v3821_v52  ;;  %v4336_v56 = vshll.u32 %v4088_v41, 16  ;;  %4720 = vst.msk [vmem:[#allocation4 + $0xdc] sm:$0xf] %vm750_vm9, %v10530_v2  ;;  %v5416_v62 = vpop.permute.xlu1 %5415  ;;  %v4853_v37 = vrot.slane %v4851_v51, 4  ;;  %v11963_v52 = vld [vmem:[#allocation14_spill] sm:$0xff] }
 0x303   : > { %5511 = vst.msk [vmem:[#allocation4 + $0x14] sm:$0xf] %vm5509_vm3, %v5416_v62  ;;  %v4857_v41 = vshll.u32 %v4669_v11, 16  ;;  %v3648_v21 = vadd.f32 %v10440_v19, %v11963_v52  ;;  %v4865_v14 = vshll.u32 %v10558_v61, 16  ;;  %v4871_v52 = vshll.u32 %v10530_v2, 16 }
 0x304   : > { %v4335_v53 = vrot.slane %v4333_v29, 7  ;;  %v3999_v35 = vadd.f32 %v10374_v44, %v3910_v55  ;;  %5431 = vrot.lane.b32.xlu0 %v5335_v30, %s7857_s7  ;;  %4719 = vst.msk [vmem:[#allocation4 + $0xc8] sm:$0xf] %vm750_vm9, %v10558_v61  ;;  %v4592_v55 = vld [vmem:[#allocation3 + $0x60] sm:$0xf]  ;;  %v4854_v25 = vor.u32 %v4853_v37, %v10503_v45 }
 0x305   : > { %4197 = vst [vmem:[#allocation3 + $0x74] sm:$0xf] %v4196_v16  ;;  %v3737_v12 = vadd.f32 %v10425_v54, %v3648_v21  ;;  %v10606_v37 = vld [vmem:[#allocation3 + $0x48] sm:$0xf] }
 0x306   : > { %v4338_v18 = vor.u32 %v4336_v56, %v4335_v53  ;;  %v4340_v44 = vrot.slane %v4335_v53, 4  ;;  %v4057_v28 = vmax.f32 %v3999_v35, 0.0  ;;  %v4855_v53 = vrot.slane %v4854_v25, 4  ;;  %v10575_v62 = vpop.f32.mrf.mxu3  ;;  %4721 = vst.msk [vmem:[#allocation4 + $0xf0] sm:$0xf] %vm750_vm9, %v10606_v37 }
 0x307   : > { %v3822_v0 = vpop.f32.mrf.mxu2  ;;  %5562 = vrot.lane.b32.xlu2 %v10530_v2, %s7858_s24  ;;  %v4859_v56 = vrot.slane %v4857_v41, 5  ;;  %v10587_v8 = vpop.f32.mrf.mxu1  ;;  %v4867_v25 = vrot.slane %v4865_v14, 5  ;;  %v4599_v14 = vld [vmem:[#allocation3 + $0x6c] sm:$0xf] }
 0x308   : > { %v4339_v7 = vsel %vm7922_vm2, %v4331_v59, %v4338_v18  ;;  %v4590_v40 = vsel %vm8046_vm10, %v4340_v44, %v4589_v32  ;;  %v4089_v24 = vpack.c.bf16 %v4057_v28, %v4057_v28  ;;  %v3823_v42 = vadd.f32 %v3822_v0, %v3734_v60  ;;  %5783 = vrot.lane.b32.xlu1 %v5335_v30, %s7855_s27  ;;  %v11965_v32 = vld [vmem:[#allocation16_spill] sm:$0xff]  ;;  %v4144_v44 = vld [vmem:[#allocation3 + $0x78] sm:$0x1]  ;;  %v10596_v28 = vpop.f32.mrf.mxu0 }
 0x309   : > { %4588 = vst.msk [vmem:[#allocation3 + $0x58] sm:$0xf] %vm750_vm9, %v4339_v7  ;;  %v10555_v63 = vpop.permute.xlu2 %5417  ;;  %v3650_v30 = vadd.f32 %v10440_v19, %v11965_v32  ;;  %v4145_v21 = vsel %vm8046_vm10, 0, %v4144_v44 }
 0x30a   : > { %4591 = vst [vmem:[#allocation3 + $0x5c] sm:$0x1] %v4590_v40  ;;  %v4342_v1 = vshrl.u32 %v4089_v24, 16  ;;  %v3912_v10 = vadd.f32 %v10419_v38, %v3823_v42  ;;  %v4345_v29 = vshll.u32 %v4089_v24, 16  ;;  %v10583_v54 = vpop.permute.xlu1 %5961  ;;  %v4596_v40 = vld [vmem:[#allocation3 + $0x68] sm:$0x1] }
 0x30b   : > { %11964 = vst [vmem:[#allocation11_spill] sm:$0xff] %v10583_v54  ;;  %v7383_v24 = vrot.slane %v10558_v61, 9  ;;  %v3739_v41 = vadd.f32 %v10472_v13, %v3650_v30 }
 0x30c   : > { %v4344_v34 = vrot.slane %v4342_v1, 7  ;;  %v4001_v38 = vadd.f32 %v10430_v57, %v3912_v10  ;;  %v10579_v57 = vsel %vm8369_vm4, %v4855_v53, %v4859_v56  ;;  %v4862_v10 = vshrl.u32 %v10558_v61, 16  ;;  %4146 = vst [vmem:[#allocation3 + $0x78] sm:$0x1] %v4145_v21 }
 0x30d   : > { %6061 = vrot.lane.b32.xlu0 %v10579_v57, %s7858_s24  ;;  %5736 = vst.msk [vmem:[#allocation4 + $0x90] sm:$0xf] %vm750_vm9, %v10579_v57 }
 0x30e   : > { %v4347_v11 = vor.u32 %v4345_v29, %v4344_v34  ;;  %v4058_v39 = vmax.f32 %v4001_v38, 0.0  ;;  %v4348_v0 = vrot.slane %v4344_v34, 4  ;;  %v4864_v13 = vrot.slane %v4862_v10, 4 }
 0x30f   : > { %v3825_v22 = vpop.f32.mrf.mxu2  ;;  %5913 = vrot.lane.b32.xlu2 %v10530_v2, %s7857_s7  ;;  %v10602_v1 = vpop.permute.xlu0 %5959 }
 0x310   : > { %v4593_v35 = vsel %vm8066_vm11, %v4347_v11, %v4592_v55  ;;  %v4090_v6 = vpack.c.bf16 %v4058_v39, %v4058_v39  ;;  %v3826_v60 = vadd.f32 %v3825_v22, %v3737_v12  ;;  %5560 = vrot.lane.b32.xlu1 %v10558_v61, %s7858_s24 }
 0x311   : > { %4594 = vst [vmem:[#allocation3 + $0x60] sm:$0xf] %v4593_v35  ;;  %v5772_v45 = vpop.permute.xlu2 %5771 }
 0x312   : > { %v4350_v59 = vshrl.u32 %v4090_v6, 16  ;;  %v3915_v18 = vadd.f32 %v10466_v9, %v3826_v60  ;;  %v4353_v7 = vshll.u32 %v4090_v6, 16  ;;  %5866 = vst.msk [vmem:[#allocation4 + $0x18] sm:$0xf] %vm1315_vm14, %v5772_v45  ;;  %v5338_v9 = vrot.slane %v10530_v2, 5 }
 0x313   : > { %v4198_v6 = vld [vmem:[#allocation3 + $0x80] sm:$0xf]  ;;  %v4868_v60 = vor.u32 %v4867_v25, %v4864_v13  ;;  %v4873_v45 = vrot.slane %v4871_v52, 5  ;;  %v10657_v52 = vpop.f32.mrf.mxu0 }
 0x314   : > { %v4352_v42 = vrot.slane %v4350_v59, 7  ;;  %v4004_v51 = vadd.f32 %v10477_v4, %v3915_v18  ;;  %v10611_v16 = vsel %vm9284_vm13, %v7383_v24, %v5338_v9  ;;  %v10618_v4 = vld [vmem:[#allocation3 + $0x44] sm:$0xf]  ;;  %v5340_v12 = vrot.slane %v5338_v9, 4  ;;  %v11966_v9 = vld [vmem:[#allocation5_spill] sm:$0xff] }
 0x315   : > { %6225 = vst.msk [vmem:[#allocation4 + $0x80] sm:$0xf] %vm750_vm9, %v10611_v16  ;;  %v5341_v11 = vrot.slane %v10618_v4, 5  ;;  %5785 = vrot.lane.b32.xlu0 %v10611_v16, %s7855_s27  ;;  %v4199_v44 = vsel %vm8066_vm11, 0, %v4198_v6  ;;  %v4875_v24 = vshrl.u32 %v10530_v2, 16 }
 0x316   : > { %v4355_v34 = vor.u32 %v4353_v7, %v4352_v42  ;;  %v4357_v29 = vrot.slane %v4352_v42, 4  ;;  %v4059_v38 = vmax.f32 %v4004_v51, 0.0  ;;  %v4869_v7 = vrot.slane %v4868_v60, 4  ;;  %v10652_v51 = vpop.f32.mrf.mxu1  ;;  %4200 = vst [vmem:[#allocation3 + $0x80] sm:$0xf] %v4199_v44 }
 0x317   : > { %v3827_v55 = vpop.f32.mrf.mxu2  ;;  %v10637_v30 = vsel %vm9284_vm13, %v5340_v12, %v5341_v11  ;;  %v3653_v42 = vadd.f32 %v10440_v19, %v11966_v9  ;;  %v4877_v2 = vrot.slane %v4875_v24, 4 }
 0x318   : > { %v10623_v39 = vld [vmem:[#allocation3 + $0x60] sm:$0xf]  ;;  %v4356_v22 = vsel %vm7922_vm2, %v4348_v0, %v4355_v34  ;;  %v4597_v53 = vsel %vm8046_vm10, %v4357_v29, %v4596_v40  ;;  %v4091_v56 = vpack.c.bf16 %v4059_v38, %v4059_v38  ;;  %v3828_v35 = vadd.f32 %v3827_v55, %v3739_v41  ;;  %5911 = vrot.lane.b32.xlu1 %v10558_v61, %s7857_s7  ;;  %v4147_v61 = vld [vmem:[#allocation3 + $0x84] sm:$0x1]  ;;  %v10645_v0 = vpop.f32.mrf.mxu3 }
 0x319   : > { %4725 = vst.msk [vmem:[#allocation4 + $0x140] sm:$0xf] %vm750_vm9, %v10623_v39  ;;  %v10633_v32 = vpop.permute.xlu2 %5550  ;;  %v10647_v40 = vpop.permute.xlu1 %6111  ;;  %v10661_v21 = vsel %vm8369_vm4, %v4869_v7, %v4873_v45  ;;  %v4881_v34 = vshll.u32 %v10618_v4, 16  ;;  %v4148_v29 = vsel %vm8046_vm10, 0, %v4147_v61  ;;  %v3742_v38 = vadd.f32 %v10506_v46, %v3653_v42 }
 0x31a   : > { %4595 = vst.msk [vmem:[#allocation3 + $0x64] sm:$0xf] %vm750_vm9, %v4356_v22  ;;  %v4359_v59 = vshrl.u32 %v4091_v56, 16  ;;  %v3917_v18 = vadd.f32 %v10499_v15, %v3828_v35  ;;  %v4362_v10 = vshll.u32 %v4091_v56, 16  ;;  %5145 = vrot.lane.b32.xlu2 %v10661_v21, %s7855_s27  ;;  %v4878_v12 = vor.u32 %v4877_v2, %v4873_v45  ;;  %v4201_v45 = vld [vmem:[#allocation3 + $0x8c] sm:$0xf] }
 0x31b   : > { %4598 = vst [vmem:[#allocation3 + $0x68] sm:$0x1] %v4597_v53  ;;  %v4883_v35 = vrot.slane %v4881_v34, 5  ;;  %v4202_v61 = vsel %vm8066_vm11, 0, %v4201_v45 }
 0x31c   : > { %v4361_v15 = vrot.slane %v4359_v59, 7  ;;  %v4006_v41 = vadd.f32 %v10511_v47, %v3917_v18  ;;  %6226 = vst.msk [vmem:[#allocation4 + $0x94] sm:$0xf] %vm750_vm9, %v10637_v30  ;;  %v4879_v56 = vrot.slane %v4878_v12, 4  ;;  %v11967_v59 = vld [vmem:[#allocation6_spill] sm:$0xff] }
 0x31d   : > { %5737 = vst.msk [vmem:[#allocation4 + $0xa4] sm:$0xf] %vm750_vm9, %v10661_v21  ;;  %5564 = vrot.lane.b32.xlu0 %v10606_v37, %s7858_s24  ;;  %v3655_v18 = vadd.f32 %v10440_v19, %v11967_v59  ;;  %v4606_v59 = vld [vmem:[#allocation3 + $0x78] sm:$0xf] }
 0x31e   : > { %v4364_v13 = vor.u32 %v4362_v10, %v4361_v15  ;;  %v4060_v47 = vmax.f32 %v4006_v41, 0.0  ;;  %v5547_v55 = vpop.permute.xlu0 %5546  ;;  %4149 = vst [vmem:[#allocation3 + $0x84] sm:$0x1] %v4148_v29  ;;  %v4603_v10 = vld [vmem:[#allocation3 + $0x74] sm:$0x1]  ;;  %v4365_v41 = vrot.slane %v4361_v15, 4 }
 0x31f   : > { %v3830_v25 = vpop.f32.mrf.mxu2  ;;  %5642 = vst.msk [vmem:[#allocation4 + $0x14] sm:$0xf] %vm5640_vm6, %v5547_v55  ;;  %v3744_v9 = vadd.f32 %v10545_v49, %v3655_v18 }
 0x320   : > { %v4600_v4 = vsel %vm8066_vm11, %v4364_v13, %v4599_v14  ;;  %v4092_v11 = vpack.c.bf16 %v4060_v47, %v4060_v47  ;;  %v3831_v22 = vadd.f32 %v3830_v25, %v3742_v38  ;;  %5143 = vrot.lane.b32.xlu1 %v10579_v57, %s7855_s27  ;;  %v10688_v57 = vsel %vm8369_vm4, %v4879_v56, %v4883_v35  ;;  %v10695_v42 = vpop.f32.mrf.mxu3  ;;  %v10699_v14 = vpop.f32.mrf.mxu1  ;;  %v10728_v56 = vld [vmem:[#allocation3 + $0x58] sm:$0xf]  ;;  %v11968_v35 = vld [vmem:[#allocation7_spill] sm:$0xff] }
 0x321   : > { %v10674_v46 = vld [vmem:[#allocation3 + $0x64] sm:$0xf]  ;;  %4601 = vst [vmem:[#allocation3 + $0x6c] sm:$0xf] %v4600_v4  ;;  %v5134_v53 = vpop.permute.xlu2 %5133  ;;  %v10703_v38 = vpop.f32.mrf.mxu0 }
 0x322   : > { %4726 = vst.msk [vmem:[#allocation4 + $0x154] sm:$0xf] %vm750_vm9, %v10674_v46  ;;  %v4367_v6 = vshrl.u32 %v4092_v11, 16  ;;  %v3920_v60 = vadd.f32 %v10542_v36, %v3831_v22  ;;  %v5770_v44 = vpop.permute.xlu1 %5769  ;;  %v4370_v24 = vshll.u32 %v4092_v11, 16  ;;  %5435 = vrot.lane.b32.xlu2 %v10637_v30, %s7857_s7  ;;  %v10724_v22 = vld [vmem:[#allocation3 + $0x4c] sm:$0xf] }
 0x323   : > { %5225 = vst.msk [vmem:[#allocation4 + $0x50] sm:$0xf] %vm1315_vm14, %v5134_v53  ;;  %v10726_v53 = vld [vmem:[#allocation3 + $0x54] sm:$0xf] }
 0x324   : > { %v4369_v7 = vrot.slane %v4367_v6, 7  ;;  %v4009_v36 = vadd.f32 %v10551_v3, %v3920_v60  ;;  %5865 = vst.msk [vmem:[#allocation4 + $0x4] sm:$0xf] %vm1315_vm14, %v5770_v44  ;;  %v7385_v18 = vrot.slane %v10726_v53, 9  ;;  %v5352_v44 = vrot.slane %v10728_v56, 5 }
 0x325   : > { %5738 = vst.msk [vmem:[#allocation4 + $0xb8] sm:$0xf] %vm750_vm9, %v10688_v57  ;;  %5147 = vrot.lane.b32.xlu0 %v10688_v57, %s7855_s27 }
 0x326   : > { %v4372_v2 = vor.u32 %v4370_v24, %v4369_v7  ;;  %v4374_v34 = vrot.slane %v4369_v7, 4  ;;  %v4061_v29 = vmax.f32 %v4009_v36, 0.0  ;;  %v5130_v3 = vpop.permute.xlu0 %5129  ;;  %4203 = vst [vmem:[#allocation3 + $0x8c] sm:$0xf] %v4202_v61 }
 0x327   : > { %v3832_v49 = vpop.f32.mrf.mxu2  ;;  %5223 = vst.msk [vmem:[#allocation4 + $0x28] sm:$0xf] %vm1315_vm14, %v5130_v3  ;;  %v11969_v3 = vld [vmem:[#allocation8_spill] sm:$0xff] }
 0x328   : > { %v10706_v13 = vld [vmem:[#allocation3 + $0x6c] sm:$0xf]  ;;  %v4373_v47 = vsel %vm7922_vm2, %v4365_v41, %v4372_v2  ;;  %v4604_v15 = vsel %vm8046_vm10, %v4374_v34, %v4603_v10  ;;  %v4093_v55 = vpack.c.bf16 %v4061_v29, %v4061_v29  ;;  %v3833_v25 = vadd.f32 %v3832_v49, %v3744_v9  ;;  %5512 = vst.msk [vmem:[#allocation4 + $0x28] sm:$0xf] %vm5509_vm3, %v10555_v63  ;;  %v10748_v36 = vpop.f32.mrf.mxu3  ;;  %v10757_v2 = vpop.f32.mrf.mxu1 }
 0x329   : > { %4727 = vst.msk [vmem:[#allocation4 + $0x168] sm:$0xf] %vm750_vm9, %v10706_v13  ;;  %5433 = vrot.lane.b32.xlu1 %v10611_v16, %s7857_s7  ;;  %v10718_v12 = vpop.permute.xlu2 %5423  ;;  %v3658_v16 = vadd.f32 %v10440_v19, %v11968_v35  ;;  %v10752_v10 = vsel %vm9284_vm13, %v7385_v18, %v5352_v44  ;;  %v5354_v41 = vrot.slane %v5352_v44, 4  ;;  %v3660_v49 = vadd.f32 %v10440_v19, %v11969_v3  ;;  %v4150_v35 = vld [vmem:[#allocation3 + $0x90] sm:$0x1] }
 0x32a   : > { %4602 = vst.msk [vmem:[#allocation3 + $0x70] sm:$0xf] %vm750_vm9, %v4373_v47  ;;  %v4376_v4 = vshrl.u32 %v4093_v55, 16  ;;  %v3922_v11 = vadd.f32 %v10575_v62, %v3833_v25  ;;  %v5549_v63 = vpop.permute.xlu1 %5548  ;;  %v4379_v60 = vshll.u32 %v4093_v55, 16  ;;  %v10736_v62 = vld [vmem:[#allocation3 + $0x5c] sm:$0xf]  ;;  %6063 = vrot.lane.b32.xlu2 %v10661_v21, %s7858_s24  ;;  %v10765_v47 = vpop.f32.mrf.mxu0 }
 0x32b   : > { %4605 = vst [vmem:[#allocation3 + $0x74] sm:$0x1] %v4604_v15  ;;  %v3747_v61 = vadd.f32 %v10587_v8, %v3658_v16  ;;  %v5355_v8 = vrot.slane %v10736_v62, 5  ;;  %v5345_v3 = vrot.slane %v10724_v22, 5 }
 0x32c   : > { %v10732_v6 = vrot.slane %v4376_v4, 7  ;;  %v4011_v45 = vadd.f32 %v10596_v28, %v3922_v11  ;;  %5643 = vst.msk [vmem:[#allocation4 + $0x28] sm:$0xf] %vm5640_vm6, %v5549_v63 }
 0x32d   : > { %4722 = vst.msk [vmem:[#allocation4 + $0x104] sm:$0xf] %vm750_vm9, %v10724_v22  ;;  %v10775_v25 = vsel %vm9284_vm13, %v5354_v41, %v5355_v8  ;;  %6065 = vrot.lane.b32.xlu0 %v10688_v57, %s7858_s24  ;;  %v4889_v57 = vshll.u32 %v10606_v37, 16 }
 0x32e   : > { %v4381_v7 = vor.u32 %v4379_v60, %v10732_v6  ;;  %v4062_v24 = vmax.f32 %v4011_v45, 0.0  ;;  %v5420_v28 = vpop.permute.xlu0 %5419  ;;  %4723 = vst.msk [vmem:[#allocation4 + $0x118] sm:$0xf] %vm750_vm9, %v10726_v53  ;;  %v4382_v4 = vrot.slane %v10732_v6, 4  ;;  %v4610_v60 = vld [vmem:[#allocation3 + $0x80] sm:$0x1] }
 0x32f   : > { %v3835_v9 = vpop.f32.mrf.mxu2  ;;  %4724 = vst.msk [vmem:[#allocation4 + $0x12c] sm:$0xf] %vm750_vm9, %v10728_v56 }
 0x330   : > { %v4607_v21 = vsel %vm8066_vm11, %v4381_v7, %v4606_v59  ;;  %v4094_v34 = vpack.c.bf16 %v4062_v24, %v4062_v24  ;;  %v3836_v29 = vadd.f32 %v3835_v9, %v3747_v61  ;;  %6229 = vst.msk [vmem:[#allocation4 + $0xd0] sm:$0xf] %vm750_vm9, %v10752_v10  ;;  %v7387_v61 = vrot.slane %v10706_v13, 9 }
 0x331   : > { %v10767_v15 = vld [vmem:[#allocation3 + $0x70] sm:$0xf]  ;;  %4608 = vst [vmem:[#allocation3 + $0x78] sm:$0xf] %v4607_v21  ;;  %5787 = vrot.lane.b32.xlu1 %v10637_v30, %s7855_s27  ;;  %v10771_v55 = vpop.permute.xlu2 %5905  ;;  %v3749_v30 = vadd.f32 %v10652_v51, %v3660_v49  ;;  %v4151_v51 = vsel %vm8046_vm10, 0, %v4150_v35  ;;  %v4895_v24 = vshll.u32 %v10724_v22, 16 }
 0x332   : > { %4728 = vst.msk [vmem:[#allocation4 + $0x17c] sm:$0xf] %vm750_vm9, %v10767_v15  ;;  %v4384_v11 = vshrl.u32 %v4094_v34, 16  ;;  %v3925_v63 = vadd.f32 %v10645_v0, %v3836_v29  ;;  %v4387_v16 = vshll.u32 %v4094_v34, 16  ;;  %v5132_v45 = vpop.permute.xlu1 %5131  ;;  %v10786_v59 = vld [vmem:[#allocation3 + $0x74] sm:$0xf]  ;;  %5915 = vrot.lane.b32.xlu2 %v10606_v37, %s7857_s7 }
 0x333   : > { %6230 = vst.msk [vmem:[#allocation4 + $0xe4] sm:$0xf] %vm750_vm9, %v10775_v25  ;;  %v5366_v18 = vrot.slane %v10767_v15, 5  ;;  %v4886_v0 = vshrl.u32 %v10606_v37, 16  ;;  %v5369_v29 = vrot.slane %v10786_v59, 5  ;;  %v4891_v49 = vrot.slane %v4889_v57, 5  ;;  %v10832_v57 = vpop.f32.mrf.mxu0 }
 0x334   : > { %v4386_v6 = vrot.slane %v4384_v11, 7  ;;  %v4014_v44 = vadd.f32 %v10657_v52, %v3925_v63  ;;  %5224 = vst.msk [vmem:[#allocation4 + $0x3c] sm:$0xf] %vm1315_vm14, %v5132_v45 }
 0x335   : > { %5513 = vst.msk [vmem:[#allocation4 + $0x3c] sm:$0xf] %vm5509_vm3, %v5420_v28  ;;  %v5368_v7 = vrot.slane %v5366_v18, 4  ;;  %v4888_v21 = vrot.slane %v4886_v0, 4  ;;  %v10805_v34 = vsel %vm9284_vm13, %v7387_v61, %v5366_v18  ;;  %v7384_v18 = vrot.slane %v10606_v37, 9  ;;  %5917 = vrot.lane.b32.xlu0 %v10724_v22, %s7857_s7 }
 0x336   : > { %v4389_v9 = vor.u32 %v4387_v16, %v4386_v6  ;;  %v4391_v41 = vrot.slane %v4386_v6, 4  ;;  %v4063_v8 = vmax.f32 %v4014_v44, 0.0  ;;  %5644 = vst.msk [vmem:[#allocation4 + $0x3c] sm:$0xf] %vm5640_vm6, %v10633_v32  ;;  %v5774_v52 = vpop.permute.xlu0 %5773  ;;  %v10813_v16 = vpop.f32.mrf.mxu3  ;;  %v10821_v44 = vrot.slane %v4895_v24, 5  ;;  %v11972_v24 = vld [vmem:[#allocation9_spill] sm:$0xff] }
 0x337   : > { %v3837_v28 = vpop.f32.mrf.mxu2  ;;  %5867 = vst.msk [vmem:[#allocation4 + $0x2c] sm:$0xf] %vm1315_vm14, %v5774_v52  ;;  %v4892_v6 = vor.u32 %v4891_v49, %v4888_v21  ;;  %v10830_v0 = vsel %vm9284_vm13, %v5368_v7, %v5369_v29  ;;  %v10840_v37 = vsel %vm9284_vm13, %v7384_v18, %v5345_v3  ;;  %v5359_v61 = vrot.slane %v10674_v46, 5  ;;  %v4204_v52 = vld [vmem:[#allocation3 + $0x98] sm:$0xf] }
 0x338   : > { %11970 = vst [vmem:[#allocation14_spill] sm:$0xff] %v10805_v34  ;;  %v4390_v11 = vsel %vm7922_vm2, %v4382_v4, %v4389_v9  ;;  %v4611_v32 = vsel %vm8046_vm10, %v4391_v41, %v4610_v60  ;;  %v4095_v63 = vpack.c.bf16 %v4063_v8, %v4063_v8  ;;  %v3838_v35 = vadd.f32 %v3837_v28, %v3749_v30  ;;  %v10823_v4 = vpop.f32.mrf.mxu1  ;;  %v4613_v21 = vld [vmem:[#allocation3 + $0x84] sm:$0xf]  ;;  %v10866_v18 = vld [vmem:[#allocation3 + $0x68] sm:$0xf] }
 0x339   : > { %4152 = vst [vmem:[#allocation3 + $0x90] sm:$0x1] %v4151_v51  ;;  %5566 = vrot.lane.b32.xlu1 %v10724_v22, %s7858_s24  ;;  %v10818_v45 = vpop.permute.xlu2 %5556  ;;  %v3663_v9 = vadd.f32 %v10440_v19, %v11972_v24 }
 0x33a   : > { %4609 = vst.msk [vmem:[#allocation3 + $0x7c] sm:$0xf] %vm750_vm9, %v4390_v11  ;;  %v4393_v60 = vshrl.u32 %v4095_v63, 16  ;;  %v3927_v30 = vadd.f32 %v10695_v42, %v3838_v35  ;;  %v5422_v51 = vpop.permute.xlu1 %5421  ;;  %v4893_v42 = vrot.slane %v4892_v6, 4  ;;  %v4396_v41 = vshll.u32 %v4095_v63, 16  ;;  %5568 = vrot.lane.b32.xlu2 %v10726_v53, %s7858_s24 }
 0x33b   : > { %4612 = vst [vmem:[#allocation3 + $0x80] sm:$0x1] %v4611_v32  ;;  %v3752_v29 = vadd.f32 %v10699_v14, %v3663_v9  ;;  %v4899_v32 = vshrl.u32 %v10724_v22, 16  ;;  %v4205_v35 = vsel %vm8066_vm11, 0, %v4204_v52  ;;  %v5361_v14 = vrot.slane %v5359_v61, 4 }
 0x33c   : > { %11971 = vst [vmem:[#allocation16_spill] sm:$0xff] %v10830_v0  ;;  %v10845_v7 = vrot.slane %v4393_v60, 7  ;;  %v4016_v8 = vadd.f32 %v10703_v38, %v3927_v30  ;;  %v10854_v28 = vsel %vm8369_vm4, %v4893_v42, %v10821_v44  ;;  %v11973_v42 = vld [vmem:[#allocation12_spill] sm:$0xff] }
 0x33d   : > { %6233 = vst.msk [vmem:[#allocation4 + $0x120] sm:$0xf] %vm750_vm9, %v10805_v34  ;;  %v3665_v24 = vadd.f32 %v10440_v19, %v11973_v42  ;;  %5437 = vrot.lane.b32.xlu0 %v10840_v37, %s7857_s7 }
 0x33e   : > { %5514 = vst.msk [vmem:[#allocation4 + $0x50] sm:$0xf] %vm5509_vm3, %v5422_v51  ;;  %v4398_v49 = vor.u32 %v4396_v41, %v10845_v7  ;;  %v4064_v11 = vmax.f32 %v4016_v8, 0.0  ;;  %v5553_v38 = vpop.permute.xlu0 %5552  ;;  %v4901_v51 = vrot.slane %v4899_v32, 4  ;;  %v7386_v41 = vrot.slane %v10623_v39, 9 }
 0x33f   : > { %6234 = vst.msk [vmem:[#allocation4 + $0x134] sm:$0xf] %vm750_vm9, %v10830_v0  ;;  %v3840_v63 = vpop.f32.mrf.mxu2 }
 0x340   : > { %6227 = vst.msk [vmem:[#allocation4 + $0xa8] sm:$0xf] %vm750_vm9, %v10840_v37  ;;  %v4614_v6 = vsel %vm8066_vm11, %v4398_v49, %v4613_v21  ;;  %v4096_v60 = vpack.c.bf16 %v4064_v11, %v4064_v11  ;;  %v3841_v30 = vadd.f32 %v3840_v63, %v3752_v29  ;;  %v5362_v21 = vrot.slane %v10866_v18, 5  ;;  %v4675_v29 = vld [vmem:[#allocation3 + $0x50] sm:$0xf]  ;;  %v10883_v11 = vpop.f32.mrf.mxu3  ;;  %v10892_v42 = vpop.f32.mrf.mxu1 }
 0x341   : > { %5645 = vst.msk [vmem:[#allocation4 + $0x50] sm:$0xf] %vm5640_vm6, %v5553_v38  ;;  %5149 = vrot.lane.b32.xlu1 %v10854_v28, %s7855_s27  ;;  %v5140_v9 = vpop.permute.xlu2 %5139  ;;  %v3754_v49 = vadd.f32 %v10757_v2, %v3665_v24  ;;  %v4617_v38 = vld [vmem:[#allocation3 + $0x8c] sm:$0x1]  ;;  %v5348_v22 = vrot.slane %v4675_v29, 5 }
 0x342   : > { %5739 = vst.msk [vmem:[#allocation4 + $0xcc] sm:$0xf] %vm750_vm9, %v10854_v28  ;;  %v4401_v8 = vshrl.u32 %v4096_v60, 16  ;;  %v3930_v52 = vadd.f32 %v10748_v36, %v3841_v30  ;;  %v5776_v63 = vpop.permute.xlu1 %5775  ;;  %v5347_v36 = vrot.slane %v5345_v3, 4  ;;  %v4902_v30 = vor.u32 %v4901_v51, %v10821_v44  ;;  %5919 = vrot.lane.b32.xlu2 %v10726_v53, %s7857_s7 }
 0x343   : > { %4615 = vst [vmem:[#allocation3 + $0x84] sm:$0xf] %v4614_v6  ;;  %v10887_v6 = vsel %vm9284_vm13, %v7386_v41, %v5359_v61  ;;  %v4404_v50 = vshll.u32 %v4096_v60, 16  ;;  %v10900_v61 = vpop.f32.mrf.mxu0  ;;  %v4905_v3 = vshll.u32 %v4675_v29, 16  ;;  %v4399_v44 = vrot.slane %v10845_v7, 4 }
 0x344   : > { %5228 = vst.msk [vmem:[#allocation4 + $0x8c] sm:$0xf] %vm1315_vm14, %v5140_v9  ;;  %v7514_v32 = vld [vmem:[#allocation4 + $0x120] sm:$0xf]  ;;  %v4403_v9 = vrot.slane %v4401_v8, 7  ;;  %v4019_v2 = vadd.f32 %v10765_v47, %v3930_v52  ;;  %v4903_v7 = vrot.slane %v4902_v30, 4 }
 0x345   : > { %4206 = vst [vmem:[#allocation3 + $0x98] sm:$0xf] %v4205_v35  ;;  %v10898_v35 = vsel %vm9284_vm13, %v5361_v14, %v5362_v21  ;;  %5789 = vrot.lane.b32.xlu0 %v10840_v37, %s7855_s27  ;;  %v4153_v30 = vld [vmem:[#allocation3 + $0x9c] sm:$0x1] }
 0x346   : > { %v7760_v24 = vld [vmem:[#allocation4 + $0x130] sm:$0xf0]  ;;  %5868 = vst.msk [vmem:[#allocation4 + $0x40] sm:$0xf] %vm1315_vm14, %v5776_v63  ;;  %v4406_v60 = vor.u32 %v4404_v50, %v4403_v9  ;;  %v4408_v47 = vrot.slane %v4403_v9, 4  ;;  %v4065_v51 = vmax.f32 %v4019_v2, 0.0  ;;  %v5136_v14 = vpop.permute.xlu0 %5135 }
 0x347   : > { %v7515_v41 = vor.u32 %v7760_v24, %v7514_v32  ;;  %5998 = vst.msk [vmem:[#allocation4 + $0x40] sm:$0xf] %vm5509_vm3, %v10771_v55  ;;  %v3842_v52 = vpop.f32.mrf.mxu2  ;;  %v5349_v55 = vsel %vm9284_vm13, %v5347_v36, %v5348_v22  ;;  %v4907_v63 = vrot.slane %v4905_v3, 5  ;;  %v4620_v24 = vld [vmem:[#allocation3 + $0x90] sm:$0xf] }
 0x348   : > { %6231 = vst.msk [vmem:[#allocation4 + $0xf8] sm:$0xf] %vm750_vm9, %v10887_v6  ;;  %v4407_v50 = vsel %vm7922_vm2, %v4399_v44, %v4406_v60  ;;  %v4618_v21 = vsel %vm8046_vm10, %v4408_v47, %v4617_v38  ;;  %v4097_v29 = vpack.c.bf16 %v4065_v51, %v4065_v51  ;;  %v3843_v32 = vadd.f32 %v3842_v52, %v3754_v49  ;;  %v10933_v37 = vpop.f32.mrf.mxu3 }
 0x349   : > { %v6646_v8 = vsel %vm6617_vm7, %v7515_v41, 0  ;;  %6232 = vst.msk [vmem:[#allocation4 + $0x10c] sm:$0xf] %vm750_vm9, %v10898_v35  ;;  %5439 = vrot.lane.b32.xlu1 %v5349_v55, %s7857_s7  ;;  %v10920_v9 = vpop.permute.xlu2 %5909  ;;  %v4908_v49 = vsel %vm8369_vm4, %v4903_v7, %v4907_v63  ;;  %v11974_v41 = vld [vmem:[#allocation18_spill] sm:$0xff]  ;;  %v4154_v51 = vsel %vm8046_vm10, 0, %v4153_v30 }
 0x34a   : > { %6710 = vmatpush.bf16.xpose.msra.mxu3 %v6646_v8  ;;  %4616 = vst.msk [vmem:[#allocation3 + $0x88] sm:$0xf] %vm750_vm9, %v4407_v50  ;;  %v4410_v2 = vshrl.u32 %v4097_v29, 16  ;;  %v3932_v36 = vadd.f32 %v10813_v16, %v3843_v32  ;;  %v5904_v38 = vpop.permute.xlu1 %5903  ;;  %v3668_v22 = vadd.f32 %v10440_v19, %v11974_v41  ;;  %v4413_v44 = vshll.u32 %v4097_v29, 16  ;;  %v4207_v16 = vld [vmem:[#allocation3 + $0xa4] sm:$0xf]  ;;  %v10939_v8 = vpop.f32.mrf.mxu1  ;;  %5151 = vrot.lane.b32.xlu2 %v4908_v49, %s7855_s27 }
 0x34b   : > { %4619 = vst [vmem:[#allocation3 + $0x8c] sm:$0x1] %v4618_v21 }
 0x34c   : > { %5226 = vst.msk [vmem:[#allocation4 + $0x64] sm:$0xf] %vm1315_vm14, %v5136_v14  ;;  %v4412_v3 = vrot.slane %v4410_v2, 7  ;;  %v4021_v60 = vadd.f32 %v10832_v57, %v3932_v36  ;;  %v3757_v14 = vadd.f32 %v10823_v4, %v3668_v22  ;;  %v10945_v57 = vpop.f32.mrf.mxu0  ;;  %v4208_v4 = vsel %vm8066_vm11, 0, %v4207_v16  ;;  %v11975_v22 = vld [vmem:[#allocation19_spill] sm:$0xff] }
 0x34d   : > { %5515 = vst.msk [vmem:[#allocation4 + $0x64] sm:$0xf] %vm5509_vm3, %v10718_v12  ;;  %5570 = vrot.lane.b32.xlu0 %v10728_v56, %s7858_s24  ;;  %v4156_v16 = vld [vmem:[#allocation3 + $0xa8] sm:$0x1] }
 0x34e   : > { %6228 = vst.msk [vmem:[#allocation4 + $0xbc] sm:$0xf] %vm750_vm9, %v5349_v55  ;;  %v4415_v19 = vor.u32 %v4413_v44, %v4412_v3  ;;  %v4066_v52 = vmax.f32 %v4021_v60, 0.0  ;;  %v10943_v12 = vpop.permute.xlu0 %5425 }
 0x34f   : > { %v7502_v47 = vld [vmem:[#allocation4 + $0xf8] sm:$0xf]  ;;  %5740 = vst.msk [vmem:[#allocation4 + $0xe0] sm:$0xf] %vm750_vm9, %v4908_v49  ;;  %v3845_v21 = vpop.f32.mrf.mxu2 }
 0x350   : > { %v7757_v7 = vld [vmem:[#allocation4 + $0x108] sm:$0xf0]  ;;  %5997 = vst.msk [vmem:[#allocation4 + $0x2c] sm:$0xf] %vm5509_vm3, %v5904_v38  ;;  %v4621_v29 = vsel %vm8066_vm11, %v4415_v19, %v4620_v24  ;;  %v4098_v32 = vpack.c.bf16 %v4066_v52, %v4066_v52  ;;  %v3846_v63 = vadd.f32 %v3845_v21, %v3757_v14  ;;  %v7754_v38 = vld [vmem:[#allocation4 + $0xe0] sm:$0xf0] }
 0x351   : > { %v7503_v50 = vor.u32 %v7757_v7, %v7502_v47  ;;  %4155 = vst [vmem:[#allocation3 + $0x9c] sm:$0x1] %v4154_v51  ;;  %5791 = vrot.lane.b32.xlu1 %v5349_v55, %s7855_s27  ;;  %v10957_v41 = vpop.permute.xlu2 %5429  ;;  %v10962_v24 = vld [vmem:[%s11913_s4] ss:$0 sm:$0xff]  ;;  %v4157_v14 = vsel %vm8046_vm10, 0, %v4156_v16 }
 0x352   : > { %4622 = vst [vmem:[#allocation3 + $0x90] sm:$0xf] %v4621_v29  ;;  %v4418_v36 = vshrl.u32 %v4098_v32, 16  ;;  %v3935_v30 = vadd.f32 %v10883_v11, %v3846_v63  ;;  %v3670_v44 = vadd.f32 %v10962_v24, %v11975_v22  ;;  %v7490_v55 = vld [vmem:[#allocation4 + $0xd0] sm:$0xf]  ;;  %v5555_v60 = vpop.permute.xlu1 %5554  ;;  %v4421_v11 = vshll.u32 %v4098_v32, 16  ;;  %6069 = vrot.lane.b32.xlu2 %v4908_v49, %s7858_s24  ;;  %v3939_v32 = vpop.f32.mrf.mxu3 }
 0x353   : > { %v6643_v2 = vsel %vm6617_vm7, %v7503_v50, 0  ;;  %4209 = vst [vmem:[#allocation3 + $0xa4] sm:$0xf] %v4208_v4  ;;  %v4624_v52 = vld [vmem:[#allocation3 + $0x98] sm:$0x1]  ;;  %v7491_v7 = vor.u32 %v7754_v38, %v7490_v55  ;;  %v4416_v50 = vrot.slane %v4412_v3, 4 }
 0x354   : > { %6711 = vmatpush.bf16.xpose.msra.mxu3 %v6643_v2  ;;  %v4420_v47 = vrot.slane %v4418_v36, 7  ;;  %v4024_v51 = vadd.f32 %v10900_v61, %v3935_v30  ;;  %5646 = vst.msk [vmem:[#allocation4 + $0x64] sm:$0xf] %vm5640_vm6, %v5555_v60  ;;  %v3759_v19 = vadd.f32 %v10892_v42, %v3670_v44  ;;  %v3763_v61 = vpop.f32.mrf.mxu1  ;;  %v4028_v3 = vpop.f32.mrf.mxu0  ;;  %v11976_v60 = vld [vmem:[#allocation20_spill] sm:$0xff] }
 0x355   : > { %4158 = vst [vmem:[#allocation3 + $0xa8] sm:$0x1] %v4157_v14  ;;  %v6640_v22 = vsel %vm6617_vm7, %v7491_v7, 0  ;;  %v7751_v55 = vld [vmem:[#allocation4 + $0xb8] sm:$0xf0]  ;;  %5921 = vrot.lane.b32.xlu0 %v10728_v56, %s7857_s7  ;;  %v3673_v16 = vadd.f32 %v10962_v24, %v11976_v60 }
 0x356   : > { %v4423_v21 = vor.u32 %v4421_v11, %v4420_v47  ;;  %v4425_v4 = vrot.slane %v4420_v47, 4  ;;  %v4067_v29 = vmax.f32 %v4024_v51, 0.0  ;;  %v5778_v63 = vpop.permute.xlu0 %5777  ;;  %v7478_v47 = vld [vmem:[#allocation4 + $0xa8] sm:$0xf]  ;;  %v4210_v51 = vld [vmem:[#allocation3 + $0xb0] sm:$0xf] }
 0x357   : > { %v3847_v2 = vpop.f32.mrf.mxu2  ;;  %5869 = vst.msk [vmem:[#allocation4 + $0x54] sm:$0xf] %vm1315_vm14, %v5778_v63 }
 0x358   : > { %v4424_v36 = vsel %vm7922_vm2, %v4416_v50, %v4423_v21  ;;  %v4625_v42 = vsel %vm8046_vm10, %v4425_v4, %v4624_v52  ;;  %v4099_v30 = vpack.c.bf16 %v4067_v29, %v4067_v29  ;;  %v3848_v38 = vadd.f32 %v3847_v2, %v3759_v19  ;;  %v4627_v7 = vld [vmem:[#allocation3 + $0x9c] sm:$0xf] }
 0x359   : > { %4623 = vst.msk [vmem:[#allocation3 + $0x94] sm:$0xf] %vm750_vm9, %v4424_v36  ;;  %6067 = vrot.lane.b32.xlu1 %v10854_v28, %s7858_s24  ;;  %v10990_v52 = vpop.permute.xlu2 %6059  ;;  %v7479_v50 = vor.u32 %v7751_v55, %v7478_v47  ;;  %v3762_v21 = vadd.f32 %v10939_v8, %v3673_v16  ;;  %v11977_v2 = vld [vmem:[#allocation21_spill] sm:$0xff] }
 0x35a   : > { %4626 = vst [vmem:[#allocation3 + $0x98] sm:$0x1] %v4625_v42  ;;  %v4427_v49 = vshrl.u32 %v4099_v30, 16  ;;  %v3937_v44 = vadd.f32 %v10933_v37, %v3848_v38  ;;  %v5138_v11 = vpop.permute.xlu1 %5137  ;;  %v4430_v19 = vshll.u32 %v4099_v30, 16  ;;  %v4211_v37 = vsel %vm8066_vm11, 0, %v4210_v51  ;;  %5441 = vrot.lane.b32.xlu2 %v10752_v10, %s7857_s7  ;;  %v3941_v30 = vpop.f32.mrf.mxu3 }
 0x35b   : > { %5227 = vst.msk [vmem:[#allocation4 + $0x78] sm:$0xf] %vm1315_vm14, %v5138_v11  ;;  %v3675_v36 = vadd.f32 %v10962_v24, %v11977_v2  ;;  %v6637_v38 = vsel %vm6617_vm7, %v7479_v50, 0  ;;  %v4631_v47 = vld [vmem:[#allocation3 + $0xa4] sm:$0x1] }
 0x35c   : > { %6712 = vmatpush.bf16.xpose.msra.mxu3 %v6640_v22  ;;  %v10986_v14 = vrot.slane %v4427_v49, 7  ;;  %v4026_v28 = vadd.f32 %v10945_v57, %v3937_v44  ;;  %5516 = vst.msk [vmem:[#allocation4 + $0x78] sm:$0xf] %vm5509_vm3, %v10943_v12  ;;  %v7748_v22 = vld [vmem:[#allocation4 + $0x90] sm:$0xf0]  ;;  %v11009_v49 = vpop.f32.mrf.mxu1  ;;  %v4030_v60 = vpop.f32.mrf.mxu0 }
 0x35d   : > { %5647 = vst.msk [vmem:[#allocation4 + $0x78] sm:$0xf] %vm5640_vm6, %v10818_v45  ;;  %v3764_v45 = vadd.f32 %v3763_v61, %v3675_v36  ;;  %5793 = vrot.lane.b32.xlu0 %v10752_v10, %s7855_s27  ;;  %v7466_v11 = vld [vmem:[#allocation4 + $0x80] sm:$0xf]  ;;  %v4923_v10 = vshrl.u32 %v10728_v56, 16 }
 0x35e   : > { %v4432_v4 = vor.u32 %v4430_v19, %v10986_v14  ;;  %v4068_v29 = vmax.f32 %v4026_v28, 0.0  ;;  %v5559_v57 = vpop.permute.xlu0 %5558  ;;  %4212 = vst [vmem:[#allocation3 + $0xb0] sm:$0xf] %v4211_v37  ;;  %v4910_v19 = vshrl.u32 %v10726_v53, 16  ;;  %v4913_v28 = vshll.u32 %v10726_v53, 16 }
 0x35f   : > { %v3850_v63 = vpop.f32.mrf.mxu2  ;;  %v4919_v37 = vshll.u32 %v10728_v56, 16  ;;  %v7467_v50 = vor.u32 %v7748_v22, %v7466_v11  ;;  %v4929_v56 = vshll.u32 %v10736_v62, 16  ;;  %v7745_v62 = vld [vmem:[#allocation4 + $0x68] sm:$0xf0] }
 0x360   : > { %v4628_v12 = vsel %vm8066_vm11, %v4432_v4, %v4627_v7  ;;  %v4100_v42 = vpack.c.bf16 %v4068_v29, %v4068_v29  ;;  %v3851_v8 = vadd.f32 %v3850_v63, %v3762_v21  ;;  %v4159_v21 = vld [vmem:[#allocation3 + $0xb4] sm:$0x1]  ;;  %v4433_v4 = vrot.slane %v10986_v14, 4 }
 0x361   : > { %4629 = vst [vmem:[#allocation3 + $0x9c] sm:$0xf] %v4628_v12  ;;  %5795 = vrot.lane.b32.xlu1 %v10775_v25, %s7855_s27  ;;  %v4912_v29 = vrot.slane %v4910_v19, 4  ;;  %v4915_v63 = vrot.slane %v4913_v28, 5  ;;  %v4921_v2 = vrot.slane %v4919_v37, 5  ;;  %v4160_v14 = vsel %vm8046_vm10, 0, %v4159_v21 }
 0x362   : > { %v4435_v44 = vshrl.u32 %v4100_v42, 16  ;;  %v3940_v55 = vadd.f32 %v3939_v32, %v3851_v8  ;;  %v4438_v16 = vshll.u32 %v4100_v42, 16  ;;  %v5428_v51 = vpop.permute.xlu1 %5427  ;;  %v11017_v32 = vpop.permute.xlu2 %5562  ;;  %5923 = vrot.lane.b32.xlu2 %v10623_v39, %s7857_s7  ;;  %v4925_v42 = vrot.slane %v4923_v10, 4  ;;  %4161 = vst [vmem:[#allocation3 + $0xb4] sm:$0x1] %v4160_v14 }
 0x363   : > { %5517 = vst.msk [vmem:[#allocation4 + $0x8c] sm:$0xf] %vm5509_vm3, %v5428_v51  ;;  %v6634_v11 = vsel %vm6617_vm7, %v7467_v50, 0  ;;  %v4931_v10 = vrot.slane %v4929_v56, 5 }
 0x364   : > { %6713 = vmatpush.bf16.xpose.msra.mxu3 %v6637_v38  ;;  %v4437_v61 = vrot.slane %v4435_v44, 7  ;;  %v4029_v7 = vadd.f32 %v4028_v3, %v3940_v55  ;;  %5648 = vst.msk [vmem:[#allocation4 + $0x8c] sm:$0xf] %vm5640_vm6, %v5559_v57  ;;  %v4916_v38 = vor.u32 %v4915_v63, %v4912_v29  ;;  %v4926_v19 = vor.u32 %v4925_v42, %v4921_v2  ;;  %v3768_v29 = vpop.f32.mrf.mxu1 }
 0x366   : > { %v4440_v53 = vor.u32 %v4438_v16, %v4437_v61  ;;  %v4442_v36 = vrot.slane %v4437_v61, 4  ;;  %v4069_v12 = vmax.f32 %v4029_v7, 0.0  ;;  %v5782_v3 = vpop.permute.xlu0 %5781  ;;  %v4917_v51 = vrot.slane %v4916_v38, 4  ;;  %v4213_v61 = vld [vmem:[#allocation3 + $0xbc] sm:$0xf]  ;;  %v3944_v7 = vpop.f32.mrf.mxu3 }
 0x367   : > { %v3852_v8 = vpop.f32.mrf.mxu2  ;;  %5871 = vst.msk [vmem:[#allocation4 + $0x7c] sm:$0xf] %vm1315_vm14, %v5782_v3 }
 0x368   : > { %v11028_v57 = vld [vmem:[#allocation3 + $0x9c] sm:$0xf]  ;;  %v4441_v22 = vsel %vm7922_vm2, %v4433_v4, %v4440_v53  ;;  %v4632_v44 = vsel %vm8046_vm10, %v4442_v36, %v4631_v47  ;;  %v4101_v55 = vpack.c.bf16 %v4069_v12, %v4069_v12  ;;  %v3853_v16 = vadd.f32 %v3852_v8, %v3764_v45  ;;  %v11978_v4 = vld [vmem:[#allocation10_spill] sm:$0xff]  ;;  %v7454_v12 = vld [vmem:[#allocation4 + $0x58] sm:$0xf] }
 0x369   : > { %4735 = vst.msk [vmem:[#allocation4 + $0x208] sm:$0xf] %vm750_vm9, %v11028_v57  ;;  %v4922_v45 = vsel %vm8369_vm4, %v4917_v51, %v4921_v2  ;;  %v4927_v47 = vrot.slane %v4926_v19, 4  ;;  %v3678_v50 = vadd.f32 %v10962_v24, %v11978_v4  ;;  %v4634_v2 = vld [vmem:[#allocation3 + $0xa8] sm:$0xf]  ;;  %v7455_v3 = vor.u32 %v7745_v62, %v7454_v12 }
 0x36a   : > { %4630 = vst.msk [vmem:[#allocation3 + $0xa0] sm:$0xf] %vm750_vm9, %v4441_v22  ;;  %v4444_v28 = vshrl.u32 %v4101_v55, 16  ;;  %v3942_v37 = vadd.f32 %v3941_v30, %v3853_v16  ;;  %v5780_v21 = vpop.permute.xlu1 %5779  ;;  %v4447_v53 = vshll.u32 %v4101_v55, 16  ;;  %5153 = vrot.lane.b32.xlu0 %v4922_v45, %s7855_s27  ;;  %6071 = vrot.lane.b32.xlu1 %v4922_v45, %s7858_s24  ;;  %v4033_v30 = vpop.f32.mrf.mxu0  ;;  %v4214_v8 = vsel %vm8066_vm11, 0, %v4213_v61 }
 0x36b   : > { %4633 = vst [vmem:[#allocation3 + $0xa4] sm:$0x1] %v4632_v44  ;;  %v11049_v42 = vsel %vm8369_vm4, %v4927_v47, %v4931_v10  ;;  %v11060_v14 = vpop.permute.xlu2 %5913  ;;  %v7742_v19 = vld [vmem:[#allocation4 + $0x40] sm:$0xf0]  ;;  %v7442_v61 = vld [vmem:[#allocation4 + $0x30] sm:$0xf] }
 0x36c   : > { %6714 = vmatpush.bf16.xpose.msra.mxu3 %v6634_v11  ;;  %v11042_v63 = vrot.slane %v4444_v28, 7  ;;  %v4031_v36 = vadd.f32 %v4030_v60, %v3942_v37  ;;  %5741 = vst.msk [vmem:[#allocation4 + $0xf4] sm:$0xf] %vm750_vm9, %v4922_v45  ;;  %v3767_v60 = vadd.f32 %v11009_v49, %v3678_v50  ;;  %6073 = vrot.lane.b32.xlu2 %v11049_v42, %s7858_s24  ;;  %v6631_v11 = vsel %vm6617_vm7, %v7455_v3, 0  ;;  %v11979_v28 = vld [vmem:[#allocation13_spill] sm:$0xff] }
 0x36d   : > { %5870 = vst.msk [vmem:[#allocation4 + $0x68] sm:$0xf] %vm1315_vm14, %v5780_v21  ;;  %v3680_v37 = vadd.f32 %v10962_v24, %v11979_v28  ;;  %v4937_v47 = vshll.u32 %v10623_v39, 16  ;;  %v4943_v10 = vshll.u32 %v10674_v46, 16  ;;  %v4162_v21 = vld [vmem:[#allocation3 + $0xc0] sm:$0x1] }
 0x36e   : > { %v4449_v38 = vor.u32 %v4447_v53, %v11042_v63  ;;  %v4070_v56 = vmax.f32 %v4031_v36, 0.0  ;;  %5742 = vst.msk [vmem:[#allocation4 + $0x108] sm:$0xf] %vm750_vm9, %v11049_v42  ;;  %v4638_v3 = vld [vmem:[#allocation3 + $0xb0] sm:$0x1] }
 0x36f   : > { %6000 = vst.msk [vmem:[#allocation4 + $0x68] sm:$0xf] %vm5509_vm3, %v10920_v9  ;;  %v3855_v22 = vpop.f32.mrf.mxu2  ;;  %v4934_v9 = vshrl.u32 %v10623_v39, 16  ;;  %v3769_v12 = vadd.f32 %v3768_v29, %v3680_v37 }
 0x370   : > { %v4635_v44 = vsel %vm8066_vm11, %v4449_v38, %v4634_v2  ;;  %v4102_v55 = vpack.c.bf16 %v4070_v56, %v4070_v56  ;;  %v3856_v49 = vadd.f32 %v3855_v22, %v3767_v60  ;;  %4215 = vst [vmem:[#allocation3 + $0xbc] sm:$0xf] %v4214_v8  ;;  %v3946_v2 = vpop.f32.mrf.mxu3  ;;  %v7443_v8 = vor.u32 %v7742_v19, %v7442_v61  ;;  %v3771_v38 = vpop.f32.mrf.mxu1 }
 0x371   : > { %v11066_v16 = vld [vmem:[#allocation3 + $0xa0] sm:$0xf]  ;;  %4636 = vst [vmem:[#allocation3 + $0xa8] sm:$0xf] %v4635_v44  ;;  %v4936_v36 = vrot.slane %v4934_v9, 4  ;;  %v4939_v60 = vrot.slane %v4937_v47, 5 }
 0x372   : > { %4736 = vst.msk [vmem:[#allocation4 + $0x21c] sm:$0xf] %vm750_vm9, %v11066_v16  ;;  %v4452_v62 = vshrl.u32 %v4102_v55, 16  ;;  %v3945_v51 = vadd.f32 %v3944_v7, %v3856_v49  ;;  %v5908_v45 = vpop.permute.xlu1 %5907  ;;  %v4455_v50 = vshll.u32 %v4102_v55, 16  ;;  %5443 = vrot.lane.b32.xlu0 %v10775_v25, %s7857_s7  ;;  %v5142_v7 = vpop.permute.xlu0 %5141  ;;  %5572 = vrot.lane.b32.xlu1 %v10623_v39, %s7858_s24  ;;  %v4450_v25 = vrot.slane %v11042_v63, 4 }
 0x373   : > { %5999 = vst.msk [vmem:[#allocation4 + $0x54] sm:$0xf] %vm5509_vm3, %v5908_v45  ;;  %v4035_v39 = vpop.f32.mrf.mxu0  ;;  %v4940_v55 = vor.u32 %v4939_v60, %v4936_v36  ;;  %v11091_v49 = vrot.slane %v4943_v10, 5  ;;  %v7739_v9 = vld [vmem:[#allocation4 + $0x18] sm:$0xf0] }
 0x374   : > { %6715 = vmatpush.bf16.xpose.msra.mxu3 %v6631_v11  ;;  %v4454_v4 = vrot.slane %v4452_v62, 7  ;;  %v4034_v53 = vadd.f32 %v4033_v30, %v3945_v51  ;;  %5229 = vst.msk [vmem:[#allocation4 + $0xa0] sm:$0xf] %vm1315_vm14, %v5142_v7  ;;  %v4163_v30 = vsel %vm8046_vm10, 0, %v4162_v21  ;;  %5574 = vrot.lane.b32.xlu2 %v10674_v46, %s7858_s24  ;;  %v5146_v51 = vpop.permute.xlu2 %5145  ;;  %v4216_v45 = vld [vmem:[#allocation3 + $0xc8] sm:$0xf] }
 0x375   : > { %5518 = vst.msk [vmem:[#allocation4 + $0xa0] sm:$0xf] %vm5509_vm3, %v10957_v41  ;;  %v4941_v28 = vrot.slane %v4940_v55, 4  ;;  %v11980_v21 = vld [vmem:[#allocation15_spill] sm:$0xff]  ;;  %v7430_v36 = vld [vmem:[#allocation4 + $0x8] sm:$0xf] }
 0x376   : > { %v4457_v56 = vor.u32 %v4455_v50, %v4454_v4  ;;  %v4459_v22 = vrot.slane %v4454_v4, 4  ;;  %v4071_v44 = vmax.f32 %v4034_v53, 0.0  ;;  %6151 = vst.msk [vmem:[#allocation4 + $0x54] sm:$0xf] %vm5640_vm6, %v10990_v52  ;;  %v6628_v52 = vsel %vm6617_vm7, %v7443_v8, 0 }
 0x377   : > { %v3857_v29 = vpop.f32.mrf.mxu2  ;;  %4164 = vst [vmem:[#allocation3 + $0xc0] sm:$0x1] %v4163_v30  ;;  %v11106_v47 = vsel %vm8369_vm4, %v4941_v28, %v11091_v49  ;;  %v3683_v4 = vadd.f32 %v10962_v24, %v11980_v21  ;;  %v4217_v60 = vsel %vm8066_vm11, 0, %v4216_v45  ;;  %v4953_v45 = vshll.u32 %v10866_v18, 16  ;;  %v4645_v21 = vld [vmem:[#allocation3 + $0xbc] sm:$0x1] }
 0x378   : > { %v11093_v11 = vld [vmem:[#allocation3 + $0xa8] sm:$0xf]  ;;  %v4458_v63 = vsel %vm7922_vm2, %v4450_v25, %v4457_v56  ;;  %v4639_v62 = vsel %vm8046_vm10, %v4459_v22, %v4638_v3  ;;  %v4103_v41 = vpack.c.bf16 %v4071_v44, %v4071_v44  ;;  %v3858_v19 = vadd.f32 %v3857_v29, %v3769_v12  ;;  %5231 = vst.msk [vmem:[#allocation4 + $0xc8] sm:$0xf] %vm1315_vm14, %v5146_v51  ;;  %v3949_v8 = vpop.f32.mrf.mxu3  ;;  %v3773_v44 = vpop.f32.mrf.mxu1 }
 0x379   : > { %4737 = vst.msk [vmem:[#allocation4 + $0x230] sm:$0xf] %vm750_vm9, %v11093_v11  ;;  %v7431_v3 = vor.u32 %v7739_v9, %v7430_v36  ;;  %v3772_v30 = vadd.f32 %v3771_v38, %v3683_v4  ;;  %v4958_v18 = vshrl.u32 %v10706_v13, 16  ;;  %v4967_v36 = vshll.u32 %v10767_v15, 16 }
 0x37a   : > { %4637 = vst.msk [vmem:[#allocation3 + $0xac] sm:$0xf] %vm750_vm9, %v4458_v63  ;;  %v4461_v37 = vshrl.u32 %v4103_v41, 16  ;;  %v3947_v61 = vadd.f32 %v3946_v2, %v3858_v19  ;;  %v5784_v10 = vpop.permute.xlu1 %5783  ;;  %v4464_v53 = vshll.u32 %v4103_v41, 16  ;;  %5925 = vrot.lane.b32.xlu0 %v10674_v46, %s7857_s7  ;;  %v11115_v12 = vpop.permute.xlu0 %5431  ;;  %5155 = vrot.lane.b32.xlu1 %v11049_v42, %s7855_s27  ;;  %v4641_v2 = vld [vmem:[#allocation3 + $0xb4] sm:$0xf] }
 0x37b   : > { %4640 = vst [vmem:[#allocation3 + $0xb0] sm:$0x1] %v4639_v62  ;;  %v4038_v22 = vpop.f32.mrf.mxu0  ;;  %v4947_v63 = vshrl.u32 %v10674_v46, 16  ;;  %v11134_v62 = vld [vmem:[#allocation3 + $0x78] sm:$0xf] }
 0x37c   : > { %6716 = vmatpush.bf16.xpose.msra.mxu3 %v6628_v52  ;;  %v11110_v50 = vrot.slane %v4461_v37, 7  ;;  %v4036_v7 = vadd.f32 %v4035_v39, %v3947_v61  ;;  %5743 = vst.msk [vmem:[#allocation4 + $0x11c] sm:$0xf] %vm750_vm9, %v11106_v47  ;;  %5157 = vrot.lane.b32.xlu2 %v11106_v47, %s7855_s27  ;;  %v11131_v55 = vpop.permute.xlu2 %5435  ;;  %v11982_v41 = vld [vmem:[#allocation17_spill] sm:$0xff]  ;;  %v7388_v43 = vrot.slane %v11134_v62, 9 }
 0x37d   : > { %5872 = vst.msk [vmem:[#allocation4 + $0x90] sm:$0xf] %vm1315_vm14, %v5784_v10  ;;  %v3685_v51 = vadd.f32 %v10962_v24, %v11982_v41  ;;  %v4949_v28 = vrot.slane %v4947_v63, 4 }
 0x37e   : > { %v4466_v25 = vor.u32 %v4464_v53, %v11110_v50  ;;  %v4072_v56 = vmax.f32 %v4036_v7, 0.0  ;;  %6002 = vst.msk [vmem:[#allocation4 + $0x90] sm:$0xf] %vm5509_vm3, %v11060_v14  ;;  %v6625_v14 = vsel %vm6617_vm7, %v7431_v3, 0  ;;  %v4467_v46 = vrot.slane %v11110_v50, 4 }
 0x37f   : > { %v3860_v42 = vpop.f32.mrf.mxu2  ;;  %4218 = vst [vmem:[#allocation3 + $0xc8] sm:$0xf] %v4217_v60  ;;  %v3774_v37 = vadd.f32 %v3773_v44, %v3685_v51  ;;  %v4950_v50 = vor.u32 %v4949_v28, %v11091_v49  ;;  %v4961_v7 = vshll.u32 %v10706_v13, 16  ;;  %v4960_v49 = vrot.slane %v4958_v18, 4 }
 0x380   : > { %v4642_v39 = vsel %vm8066_vm11, %v4466_v25, %v4641_v2  ;;  %v4104_v29 = vpack.c.bf16 %v4072_v56, %v4072_v56  ;;  %v3861_v38 = vadd.f32 %v3860_v42, %v3772_v30  ;;  %11981 = vst [vmem:[#allocation5_spill] sm:$0xff] %v11134_v62  ;;  %v4971_v2 = vshrl.u32 %v10767_v15, 16  ;;  %v3951_v25 = vpop.f32.mrf.mxu3 }
 0x381   : > { %v11138_v19 = vld [vmem:[#allocation3 + $0xac] sm:$0xf]  ;;  %4643 = vst [vmem:[#allocation3 + $0xb4] sm:$0xf] %v4642_v39  ;;  %v4963_v56 = vrot.slane %v4961_v7, 5  ;;  %v4969_v42 = vrot.slane %v4967_v36, 5 }
 0x382   : > { %4738 = vst.msk [vmem:[#allocation4 + $0x244] sm:$0xf] %vm750_vm9, %v11138_v19  ;;  %v4469_v52 = vshrl.u32 %v4104_v29, 16  ;;  %v3950_v9 = vadd.f32 %v3949_v8, %v3861_v38  ;;  %v5561_v61 = vpop.permute.xlu1 %5560  ;;  %v4472_v10 = vshll.u32 %v4104_v29, 16  ;;  %5797 = vrot.lane.b32.xlu0 %v10887_v6, %s7855_s27  ;;  %v6062_v53 = vpop.permute.xlu0 %6061  ;;  %5445 = vrot.lane.b32.xlu1 %v10887_v6, %s7857_s7  ;;  %v4951_v6 = vrot.slane %v4950_v50, 4 }
 0x383   : > { %4729 = vst.msk [vmem:[#allocation4 + $0x190] sm:$0xf] %vm750_vm9, %v11134_v62  ;;  %v4040_v51 = vpop.f32.mrf.mxu0  ;;  %v4648_v50 = vld [vmem:[#allocation3 + $0xc0] sm:$0xf]  ;;  %v7784_v7 = vld [vmem:[#allocation4 + $0x270] sm:$0xf0] }
 0x384   : > { %6717 = vmatpush.bf16.xpose.msra.mxu3 %v6625_v14  ;;  %v4471_v24 = vrot.slane %v4469_v52, 7  ;;  %v4039_v4 = vadd.f32 %v4038_v22, %v3950_v9  ;;  %5649 = vst.msk [vmem:[#allocation4 + $0xa0] sm:$0xf] %vm5640_vm6, %v5561_v61  ;;  %5447 = vrot.lane.b32.xlu2 %v10898_v35, %s7857_s7  ;;  %v4973_v22 = vrot.slane %v4971_v2, 4  ;;  %v6064_v63 = vpop.permute.xlu2 %6063  ;;  %v4955_v14 = vrot.slane %v4953_v45, 5 }
 0x385   : > { %6152 = vst.msk [vmem:[#allocation4 + $0x68] sm:$0xf] %vm5640_vm6, %v6062_v53  ;;  %v4964_v52 = vor.u32 %v4963_v56, %v4960_v49  ;;  %v7610_v53 = vld [vmem:[#allocation4 + $0x260] sm:$0xf]  ;;  %v4985_v56 = vshll.u32 %v11134_v62, 16 }
 0x386   : > { %v4474_v3 = vor.u32 %v4472_v10, %v4471_v24  ;;  %v4476_v8 = vrot.slane %v4471_v24, 4  ;;  %v4073_v60 = vmax.f32 %v4039_v4, 0.0  ;;  %v4974_v45 = vor.u32 %v4973_v22, %v4969_v42 }
 0x387   : > { %v3862_v30 = vpop.f32.mrf.mxu2  ;;  %v4965_v24 = vrot.slane %v4964_v52, 4  ;;  %v4652_v52 = vld [vmem:[#allocation3 + $0xc8] sm:$0x1] }
 0x388   : > { %v11160_v44 = vld [vmem:[#allocation3 + $0xb4] sm:$0xf]  ;;  %v4475_v39 = vsel %vm7922_vm2, %v4467_v46, %v4474_v3  ;;  %v4646_v29 = vsel %vm8046_vm10, %v4476_v8, %v4645_v21  ;;  %v4105_v38 = vpack.c.bf16 %v4073_v60, %v4073_v60  ;;  %v3863_v41 = vadd.f32 %v3862_v30, %v3774_v37  ;;  %v11186_v8 = vld [vmem:[#allocation3 + $0x7c] sm:$0xf] }
 0x389   : > { %4739 = vst.msk [vmem:[#allocation4 + $0x258] sm:$0xf] %vm750_vm9, %v11160_v44  ;;  %v4956_v46 = vsel %vm8369_vm4, %v4951_v6, %v4955_v14  ;;  %v11179_v18 = vsel %vm8369_vm4, %v4965_v24, %v4969_v42  ;;  %v7611_v3 = vor.u32 %v7784_v7, %v7610_v53  ;;  %v4991_v22 = vshll.u32 %v11186_v8, 16 }
 0x38a   : > { %4644 = vst.msk [vmem:[#allocation3 + $0xb8] sm:$0xf] %vm750_vm9, %v4475_v39  ;;  %v4478_v9 = vshrl.u32 %v4105_v38, 16  ;;  %v3952_v28 = vadd.f32 %v3951_v25, %v3863_v41  ;;  %v5912_v61 = vpop.permute.xlu1 %5911  ;;  %v4481_v21 = vshll.u32 %v4105_v38, 16  ;;  %5576 = vrot.lane.b32.xlu0 %v10706_v13, %s7858_s24  ;;  %v5786_v4 = vpop.permute.xlu0 %5785  ;;  %5799 = vrot.lane.b32.xlu1 %v10898_v35, %s7855_s27  ;;  %v4977_v35 = vshll.u32 %v10786_v59, 16 }
 0x38b   : > { %4647 = vst [vmem:[#allocation3 + $0xbc] sm:$0x1] %v4646_v29  ;;  %v4975_v25 = vrot.slane %v4974_v45, 4  ;;  %v4982_v59 = vshrl.u32 %v11134_v62, 16  ;;  %v4987_v38 = vrot.slane %v4985_v56, 5 }
 0x38c   : > { %v4480_v10 = vrot.slane %v4478_v9, 7  ;;  %v4041_v37 = vadd.f32 %v4040_v51, %v3952_v28  ;;  %6001 = vst.msk [vmem:[#allocation4 + $0x7c] sm:$0xf] %vm5509_vm3, %v5912_v61  ;;  %5927 = vrot.lane.b32.xlu2 %v10706_v13, %s7857_s7  ;;  %v5916_v30 = vpop.permute.xlu2 %5915  ;;  %v6670_v13 = vsel %vm6617_vm7, %v7611_v3, 0  ;;  %v4979_v42 = vrot.slane %v4977_v35, 5 }
 0x38d   : > { %5873 = vst.msk [vmem:[#allocation4 + $0xa4] sm:$0xf] %vm1315_vm14, %v5786_v4  ;;  %6767 = vmatpush.bf16.xpose.msrb.mxu3 %v6670_v13  ;;  %v4984_v29 = vrot.slane %v4982_v59, 4  ;;  %v11211_v28 = vrot.slane %v4991_v22, 5  ;;  %v7393_v35 = vrot.slane %v11160_v44, 9 }
 0x38e   : > { %v4483_v36 = vor.u32 %v4481_v21, %v4480_v10  ;;  %v4074_v2 = vmax.f32 %v4041_v37, 0.0  ;;  %6153 = vst.msk [vmem:[#allocation4 + $0x7c] sm:$0xf] %vm5640_vm6, %v6064_v63  ;;  %v11207_v14 = vsel %vm8369_vm4, %v4975_v25, %v4979_v42  ;;  %v4484_v61 = vrot.slane %v4480_v10, 4 }
 0x38f   : > { %5744 = vst.msk [vmem:[#allocation4 + $0x130] sm:$0xf] %vm750_vm9, %v4956_v46  ;;  %v4988_v9 = vor.u32 %v4987_v38, %v4984_v29  ;;  %v11294_v38 = vld [vmem:[#allocation3 + $0x84] sm:$0xf] }
 0x390   : > { %11983 = vst [vmem:[#allocation6_spill] sm:$0xff] %v11186_v8  ;;  %v4649_v60 = vsel %vm8066_vm11, %v4483_v36, %v4648_v50  ;;  %v4106_v6 = vpack.c.bf16 %v4074_v2, %v4074_v2 }
 0x391   : > { %5745 = vst.msk [vmem:[#allocation4 + $0x144] sm:$0xf] %vm750_vm9, %v11179_v18  ;;  %v11193_v49 = vld [vmem:[#allocation3 + $0xb8] sm:$0xf]  ;;  %v4989_v37 = vrot.slane %v4988_v9, 4  ;;  %v4995_v9 = vshrl.u32 %v11186_v8, 16 }
 0x392   : > { %4650 = vst [vmem:[#allocation3 + $0xc0] sm:$0xf] %v4649_v60  ;;  %v4486_v58 = vshrl.u32 %v4106_v6, 16  ;;  %v5144_v39 = vpop.permute.xlu1 %5143  ;;  %v4489_v41 = vshll.u32 %v4106_v6, 16  ;;  %5159 = vrot.lane.b32.xlu0 %v4956_v46, %s7855_s27  ;;  %v5565_v51 = vpop.permute.xlu0 %5564  ;;  %6075 = vrot.lane.b32.xlu1 %v11106_v47, %s7858_s24  ;;  %v5373_v47 = vrot.slane %v11186_v8, 5  ;;  %v5408_v36 = vrot.slane %v11193_v49, 5 }
 0x393   : > { %4740 = vst.msk [vmem:[#allocation4 + $0x26c] sm:$0xf] %vm750_vm9, %v11193_v49  ;;  %v11244_v7 = vld [vmem:[#allocation3 + $0xbc] sm:$0xf] }
 0x394   : > { %6003 = vst.msk [vmem:[#allocation4 + $0xa4] sm:$0xf] %vm5509_vm3, %v5916_v30  ;;  %v4488_v63 = vrot.slane %v4486_v58, 7  ;;  %6077 = vrot.lane.b32.xlu2 %v4956_v46, %s7858_s24  ;;  %v11223_v10 = vpop.permute.xlu2 %5568  ;;  %v11233_v46 = vld [vmem:[#allocation3 + $0x80] sm:$0xf]  ;;  %v5375_v26 = vrot.slane %v5373_v47, 4  ;;  %v11250_v2 = vsel %vm9284_vm13, %v7388_v43, %v5373_v47  ;;  %v11267_v30 = vsel %vm9284_vm13, %v7393_v35, %v5408_v36 }
 0x395   : > { %5230 = vst.msk [vmem:[#allocation4 + $0xb4] sm:$0xf] %vm1315_vm14, %v5144_v39  ;;  %v5376_v50 = vrot.slane %v11233_v46, 5  ;;  %v5410_v60 = vrot.slane %v5408_v36, 4  ;;  %v5411_v6 = vrot.slane %v11244_v7, 5  ;;  %v5009_v47 = vshll.u32 %v11294_v38, 16 }
 0x396   : > { %5519 = vst.msk [vmem:[#allocation4 + $0xb4] sm:$0xf] %vm5509_vm3, %v11115_v12  ;;  %v4491_v24 = vor.u32 %v4489_v41, %v4488_v63  ;;  %v4493_v21 = vrot.slane %v4488_v63, 4  ;;  %v11301_v41 = vld [vmem:[#allocation3 + $0x88] sm:$0xf]  ;;  %v7392_v36 = vrot.slane %v11093_v11, 9 }
 0x397   : > { %5650 = vst.msk [vmem:[#allocation4 + $0xb4] sm:$0xf] %vm5640_vm6, %v11017_v32  ;;  %v11231_v32 = vsel %vm8369_vm4, %v4989_v37, %v11211_v28 }
 0x398   : > { %5746 = vst.msk [vmem:[#allocation4 + $0x158] sm:$0xf] %vm750_vm9, %v11207_v14  ;;  %v4492_v12 = vsel %vm7922_vm2, %v4484_v61, %v4491_v24  ;;  %v4653_v4 = vsel %vm8046_vm10, %v4493_v21, %v4652_v52  ;;  %v11314_v61 = vld [vmem:[#allocation3 + $0x90] sm:$0xf]  ;;  %v5006_v21 = vshrl.u32 %v11294_v38, 16 }
 0x399   : > { %4730 = vst.msk [vmem:[#allocation4 + $0x1a4] sm:$0xf] %vm750_vm9, %v11186_v8  ;;  %v11253_v3 = vld [vmem:[#allocation3 + $0xc0] sm:$0xf]  ;;  %v11316_v24 = vld [vmem:[#allocation3 + $0xb0] sm:$0xf] }
 0x39a   : > { %4651 = vst.msk [vmem:[#allocation3 + $0xc4] sm:$0xf] %vm750_vm9, %v4492_v12  ;;  %5929 = vrot.lane.b32.xlu0 %v10767_v15, %s7857_s7  ;;  %v5148_v53 = vpop.permute.xlu0 %5147  ;;  %5578 = vrot.lane.b32.xlu1 %v10767_v15, %s7858_s24  ;;  %v11261_v15 = vsel %vm9284_vm13, %v5375_v26, %v5376_v50  ;;  %v7394_v56 = vrot.slane %v11253_v3, 9  ;;  %v4997_v12 = vrot.slane %v4995_v9, 4  ;;  %v5015_v26 = vshll.u32 %v11301_v41, 16 }
 0x39b   : > { %11984 = vst [vmem:[#allocation7_spill] sm:$0xff] %v11231_v32  ;;  %v5434_v45 = vpop.permute.xlu1 %5433  ;;  %v5008_v43 = vrot.slane %v5006_v21, 4  ;;  %v11326_v50 = vld [vmem:[#allocation3 + $0x8c] sm:$0xf]  ;;  %v5030_v48 = vshrl.u32 %v11314_v61, 16 }
 0x39c   : > { %4654 = vst [vmem:[#allocation3 + $0xc8] sm:$0x1] %v4653_v4  ;;  %5580 = vrot.lane.b32.xlu2 %v11134_v62, %s7858_s24  ;;  %v11271_v13 = vpop.permute.xlu2 %5919  ;;  %v5001_v4 = vshll.u32 %v11233_v46, 16  ;;  %v4998_v35 = vor.u32 %v4997_v12, %v11211_v28  ;;  %v5404_v46 = vrot.slane %v11316_v24, 5 }
 0x39d   : > { %5747 = vst.msk [vmem:[#allocation4 + $0x16c] sm:$0xf] %vm750_vm9, %v11231_v32 }
 0x39e   : > { %5520 = vst.msk [vmem:[#allocation4 + $0xc8] sm:$0xf] %vm5509_vm3, %v5434_v45  ;;  %v4999_v28 = vrot.slane %v4998_v35, 4  ;;  %v5380_v35 = vrot.slane %v11301_v41, 5 }
 0x39f   : > { %5232 = vst.msk [vmem:[#allocation4 + $0xdc] sm:$0xf] %vm1315_vm14, %v5148_v53  ;;  %v5011_v53 = vrot.slane %v5009_v47, 5 }
 0x3a0   : > { %5521 = vst.msk [vmem:[#allocation4 + $0xdc] sm:$0xf] %vm5509_vm3, %v11131_v55  ;;  %v11277_v55 = vsel %vm9284_vm13, %v5410_v60, %v5411_v6  ;;  %v5017_v60 = vrot.slane %v5015_v26, 5  ;;  %v5019_v6 = vshrl.u32 %v11301_v41, 16 }
 0x3a1   : > { %5651 = vst.msk [vmem:[#allocation4 + $0xc8] sm:$0xf] %vm5640_vm6, %v5565_v51  ;;  %v11269_v25 = vld [vmem:[#allocation3 + $0xc4] sm:$0xf]  ;;  %v5401_v51 = vrot.slane %v11138_v19, 5 }
 0x3a2   : > { %6235 = vst.msk [vmem:[#allocation4 + $0x148] sm:$0xf] %vm750_vm9, %v11250_v2  ;;  %v5764_v58 = vrot.slane %v11269_v25, 5  ;;  %5449 = vrot.lane.b32.xlu0 %v10805_v34, %s7857_s7  ;;  %v6066_v63 = vpop.permute.xlu0 %6065  ;;  %5161 = vrot.lane.b32.xlu1 %v11179_v18, %s7855_s27 }
 0x3a3   : > { %v11279_v59 = vld [vmem:[#allocation3 + $0xc8] sm:$0xf]  ;;  %6236 = vst.msk [vmem:[#allocation4 + $0x15c] sm:$0xf] %vm750_vm9, %v11261_v15  ;;  %v5788_v42 = vpop.permute.xlu1 %5787  ;;  %v5403_v37 = vrot.slane %v5401_v51, 4 }
 0x3a4   : > { %6245 = vst.msk [vmem:[#allocation4 + $0x210] sm:$0xf] %vm750_vm9, %v11267_v30  ;;  %v11289_v22 = vsel %vm9284_vm13, %v7394_v56, %v5764_v58  ;;  %v5766_v39 = vrot.slane %v5764_v58, 4  ;;  %v5767_v29 = vrot.slane %v11279_v59, 5  ;;  %5163 = vrot.lane.b32.xlu2 %v11207_v14, %s7855_s27  ;;  %v5152_v45 = vpop.permute.xlu2 %5151  ;;  %v5012_v56 = vor.u32 %v5011_v53, %v5008_v43 }
 0x3a5   : > { %6246 = vst.msk [vmem:[#allocation4 + $0x224] sm:$0xf] %vm750_vm9, %v11277_v55  ;;  %v5025_v58 = vshll.u32 %v11326_v50, 16  ;;  %v11349_v21 = vsel %vm9284_vm13, %v5403_v37, %v5404_v46  ;;  %v5394_v37 = vrot.slane %v11066_v16, 5 }
 0x3a6   : > { %5874 = vst.msk [vmem:[#allocation4 + $0xb8] sm:$0xf] %vm1315_vm14, %v5788_v42  ;;  %v11307_v52 = vsel %vm9284_vm13, %v5766_v39, %v5767_v29  ;;  %v11340_v39 = vsel %vm9284_vm13, %v7392_v36, %v5401_v51  ;;  %v5003_v29 = vrot.slane %v5001_v4, 5  ;;  %v5013_v12 = vrot.slane %v5012_v56, 4 }
 0x3a7   : > { %6154 = vst.msk [vmem:[#allocation4 + $0x90] sm:$0xf] %vm5640_vm6, %v6066_v63  ;;  %v5021_v63 = vrot.slane %v5019_v6, 4 }
 0x3a8   : > { %6247 = vst.msk [vmem:[#allocation4 + $0x238] sm:$0xf] %vm750_vm9, %v11289_v22  ;;  %v11354_v47 = vsel %vm8369_vm4, %v4999_v28, %v5003_v29  ;;  %v11365_v53 = vsel %vm8369_vm4, %v5013_v12, %v5017_v60  ;;  %v7391_v28 = vrot.slane %v11028_v57, 9 }
 0x3a9   : > { %6248 = vst.msk [vmem:[#allocation4 + $0x24c] sm:$0xf] %vm750_vm9, %v11307_v52  ;;  %v5022_v4 = vor.u32 %v5021_v63, %v5017_v60  ;;  %v11378_v60 = vld [vmem:[#allocation3 + $0x94] sm:$0xf] }
 0x3aa   : > { %4731 = vst.msk [vmem:[#allocation4 + $0x1b8] sm:$0xf] %vm750_vm9, %v11294_v38  ;;  %5582 = vrot.lane.b32.xlu0 %v11186_v8, %s7858_s24  ;;  %v5918_v9 = vpop.permute.xlu0 %5917  ;;  %5451 = vrot.lane.b32.xlu1 %v10830_v0, %s7857_s7 }
 0x3ab   : > { %5234 = vst.msk [vmem:[#allocation4 + $0x104] sm:$0xf] %vm1315_vm14, %v5152_v45  ;;  %v5567_v42 = vpop.permute.xlu1 %5566  ;;  %v5027_v45 = vrot.slane %v5025_v58, 5  ;;  %v5023_v36 = vrot.slane %v5022_v4, 4  ;;  %v5396_v58 = vrot.slane %v5394_v37, 4  ;;  %v11393_v4 = vsel %vm9284_vm13, %v7391_v28, %v5394_v37 }
 0x3ac   : > { %4732 = vst.msk [vmem:[#allocation4 + $0x1cc] sm:$0xf] %vm750_vm9, %v11301_v41  ;;  %6081 = vrot.lane.b32.xlu2 %v11207_v14, %s7858_s24  ;;  %v6070_v6 = vpop.permute.xlu2 %6069  ;;  %v11370_v14 = vld [vmem:[#allocation3 + $0xa4] sm:$0xf]  ;;  %v7586_v12 = vld [vmem:[#allocation4 + $0x210] sm:$0xf] }
 0x3ad   : > { %4733 = vst.msk [vmem:[#allocation4 + $0x1e0] sm:$0xf] %vm750_vm9, %v11314_v61  ;;  %v11376_v56 = vsel %vm8369_vm4, %v5023_v36, %v5027_v45  ;;  %v5397_v63 = vrot.slane %v11370_v14, 5  ;;  %v5387_v45 = vrot.slane %v11378_v60, 5 }
 0x3ae   : > { %5652 = vst.msk [vmem:[#allocation4 + $0xdc] sm:$0xf] %vm5640_vm6, %v5567_v42  ;;  %v7778_v42 = vld [vmem:[#allocation4 + $0x220] sm:$0xf0] }
 0x3af   : > { %6004 = vst.msk [vmem:[#allocation4 + $0xb8] sm:$0xf] %vm5509_vm3, %v5918_v9  ;;  %v7598_v51 = vld [vmem:[#allocation4 + $0x238] sm:$0xf]  ;;  %v5382_v9 = vrot.slane %v5380_v35, 4  ;;  %v11400_v36 = vsel %vm9284_vm13, %v5396_v58, %v5397_v63 }
 0x3b0   : > { %11985 = vst [vmem:[#allocation8_spill] sm:$0xff] %v11354_v47  ;;  %v7781_v26 = vld [vmem:[#allocation4 + $0x248] sm:$0xf0] }
 0x3b1   : > { %6243 = vst.msk [vmem:[#allocation4 + $0x1e8] sm:$0xf] %vm750_vm9, %v11340_v39  ;;  %v7599_v43 = vor.u32 %v7781_v26, %v7598_v51  ;;  %v7389_v26 = vrot.slane %v11294_v38, 9 }
 0x3b2   : > { %6244 = vst.msk [vmem:[#allocation4 + $0x1fc] sm:$0xf] %vm750_vm9, %v11349_v21  ;;  %5165 = vrot.lane.b32.xlu0 %v11231_v32, %s7855_s27  ;;  %v5438_v51 = vpop.permute.xlu0 %5437  ;;  %6079 = vrot.lane.b32.xlu1 %v11179_v18, %s7858_s24  ;;  %v5383_v18 = vrot.slane %v11326_v50, 5  ;;  %v4693_v50 = vld [vmem:[#allocation3 + $0x98] sm:$0xf] }
 0x3b3   : > { %5748 = vst.msk [vmem:[#allocation4 + $0x180] sm:$0xf] %vm750_vm9, %v11354_v47  ;;  %v6667_v46 = vsel %vm6617_vm7, %v7599_v43, 0  ;;  %v5150_v29 = vpop.permute.xlu1 %5149  ;;  %v7587_v43 = vor.u32 %v7778_v42, %v7586_v12  ;;  %v11409_v37 = vsel %vm9284_vm13, %v7389_v26, %v5380_v35  ;;  %v5389_v35 = vrot.slane %v5387_v45, 4 }
 0x3b4   : > { %6156 = vst.msk [vmem:[#allocation4 + $0xb8] sm:$0xf] %vm5640_vm6, %v6070_v6  ;;  %6768 = vmatpush.bf16.xpose.msrb.mxu3 %v6667_v46  ;;  %5453 = vrot.lane.b32.xlu2 %v11250_v2, %s7857_s7  ;;  %v7390_v6 = vrot.slane %v11314_v61, 9  ;;  %v11416_v46 = vsel %vm9284_vm13, %v5382_v9, %v5383_v18  ;;  %v11418_v58 = vpop.permute.xlu2 %5441  ;;  %v5049_v32 = vshll.u32 %v4693_v50, 16 }
 0x3b5   : > { %5749 = vst.msk [vmem:[#allocation4 + $0x194] sm:$0xf] %vm750_vm9, %v11365_v53  ;;  %v6664_v42 = vsel %vm6617_vm7, %v7587_v43, 0  ;;  %v5033_v43 = vshll.u32 %v11314_v61, 16 }
 0x3b6   : > { %5750 = vst.msk [vmem:[#allocation4 + $0x1a8] sm:$0xf] %vm750_vm9, %v11376_v56  ;;  %v5051_v34 = vrot.slane %v5049_v32, 5 }
 0x3b7   : > { %5233 = vst.msk [vmem:[#allocation4 + $0xf0] sm:$0xf] %vm1315_vm14, %v5150_v29  ;;  %v5390_v29 = vrot.slane %v4693_v50, 5 }
 0x3b8   : > { %5522 = vst.msk [vmem:[#allocation4 + $0xf0] sm:$0xf] %vm5509_vm3, %v5438_v51  ;;  %v7574_v51 = vld [vmem:[#allocation4 + $0x1e8] sm:$0xf] }
 0x3b9   : > { %5653 = vst.msk [vmem:[#allocation4 + $0xf0] sm:$0xf] %vm5640_vm6, %v11223_v10  ;;  %v11424_v10 = vsel %vm9284_vm13, %v7390_v6, %v5387_v45  ;;  %v7775_v28 = vld [vmem:[#allocation4 + $0x1f8] sm:$0xf0]  ;;  %v11440_v12 = vsel %vm9284_vm13, %v5389_v35, %v5390_v29  ;;  %v5039_v6 = vshll.u32 %v11378_v60, 16  ;;  %v5054_v35 = vshrl.u32 %v11028_v57, 16 }
 0x3ba   : > { %6241 = vst.msk [vmem:[#allocation4 + $0x1c0] sm:$0xf] %vm750_vm9, %v11393_v4  ;;  %5455 = vrot.lane.b32.xlu0 %v11261_v15, %s7857_s7  ;;  %v5790_v9 = vpop.permute.xlu0 %5789  ;;  %5584 = vrot.lane.b32.xlu1 %v11294_v38, %s7858_s24  ;;  %v7575_v26 = vor.u32 %v7775_v28, %v7574_v51  ;;  %v5032_v28 = vrot.slane %v5030_v48, 4  ;;  %v5035_v29 = vrot.slane %v5033_v43, 5  ;;  %v5063_v48 = vshll.u32 %v11066_v16, 16 }
 0x3bb   : > { %6242 = vst.msk [vmem:[#allocation4 + $0x1d4] sm:$0xf] %vm750_vm9, %v11400_v36  ;;  %v5440_v63 = vpop.permute.xlu1 %5439  ;;  %v5041_v51 = vrot.slane %v5039_v6, 5  ;;  %v5056_v0 = vrot.slane %v5054_v35, 4 }
 0x3bc   : > { %6237 = vst.msk [vmem:[#allocation4 + $0x170] sm:$0xf] %vm750_vm9, %v11409_v37  ;;  %6769 = vmatpush.bf16.xpose.msrb.mxu3 %v6664_v42  ;;  %5586 = vrot.lane.b32.xlu2 %v11301_v41, %s7858_s24  ;;  %v11449_v45 = vpop.permute.xlu2 %5923  ;;  %v6661_v18 = vsel %vm6617_vm7, %v7575_v26, 0  ;;  %v5036_v26 = vor.u32 %v5035_v29, %v5032_v28  ;;  %v5065_v29 = vrot.slane %v5063_v48, 5 }
 0x3bd   : > { %6238 = vst.msk [vmem:[#allocation4 + $0x184] sm:$0xf] %vm750_vm9, %v11416_v46 }
 0x3be   : > { %6239 = vst.msk [vmem:[#allocation4 + $0x198] sm:$0xf] %vm750_vm9, %v11424_v10  ;;  %v5037_v50 = vrot.slane %v5036_v26, 4 }
 0x3bf   : > { %5523 = vst.msk [vmem:[#allocation4 + $0x104] sm:$0xf] %vm5509_vm3, %v5440_v63 }
 0x3c0   : > { %5875 = vst.msk [vmem:[#allocation4 + $0xcc] sm:$0xf] %vm1315_vm14, %v5790_v9  ;;  %v11471_v28 = vsel %vm8369_vm4, %v5037_v50, %v5041_v51 }
 0x3c1   : > { %6005 = vst.msk [vmem:[#allocation4 + $0xcc] sm:$0xf] %vm5509_vm3, %v11271_v13  ;;  %v5043_v13 = vshrl.u32 %v11378_v60, 16  ;;  %v7562_v9 = vld [vmem:[#allocation4 + $0x1c0] sm:$0xf] }
 0x3c2   : > { %6240 = vst.msk [vmem:[#allocation4 + $0x1ac] sm:$0xf] %vm750_vm9, %v11440_v12  ;;  %v7772_v42 = vld [vmem:[#allocation4 + $0x1d0] sm:$0xf0]  ;;  %5588 = vrot.lane.b32.xlu0 %v11314_v61, %s7858_s24  ;;  %v5571_v62 = vpop.permute.xlu0 %5570  ;;  %5167 = vrot.lane.b32.xlu1 %v11354_v47, %s7855_s27 }
 0x3c3   : > { %4734 = vst.msk [vmem:[#allocation4 + $0x1f4] sm:$0xf] %vm750_vm9, %v11378_v60  ;;  %v5792_v63 = vpop.permute.xlu1 %5791  ;;  %v5045_v54 = vrot.slane %v5043_v13, 4  ;;  %v7563_v43 = vor.u32 %v7772_v42, %v7562_v9 }
 0x3c4   : > { %6770 = vmatpush.bf16.xpose.msrb.mxu3 %v6661_v18  ;;  %5876 = vst.msk [vmem:[#allocation4 + $0xe0] sm:$0xf] %vm1315_vm14, %v5792_v63  ;;  %v5057_v18 = vshll.u32 %v11028_v57, 16  ;;  %5169 = vrot.lane.b32.xlu2 %v11365_v53, %s7855_s27 }
 0x3c5   : > { %5654 = vst.msk [vmem:[#allocation4 + $0x104] sm:$0xf] %vm5640_vm6, %v5571_v62  ;;  %v5046_v6 = vor.u32 %v5045_v54, %v5041_v51  ;;  %v6658_v63 = vsel %vm6617_vm7, %v7563_v43, 0  ;;  %v7550_v9 = vld [vmem:[#allocation4 + $0x198] sm:$0xf] }
 0x3c6   : > { %v5059_v13 = vrot.slane %v5057_v18, 5  ;;  %v6074_v47 = vpop.permute.xlu2 %6073  ;;  %5751 = vst.msk [vmem:[#allocation4 + $0x1bc] sm:$0xf] %vm750_vm9, %v11471_v28  ;;  %v7766_v18 = vld [vmem:[#allocation4 + $0x180] sm:$0xf0] }
 0x3c7   : > { %v5047_v8 = vrot.slane %v5046_v6, 4 }
 0x3c8   : > { %v5060_v35 = vor.u32 %v5059_v13, %v5056_v0  ;;  %v5067_v13 = vshrl.u32 %v11066_v16, 16 }
 0x3c9   : > { %v11478_v54 = vsel %vm8369_vm4, %v5047_v8, %v5051_v34  ;;  %v7769_v62 = vld [vmem:[#allocation4 + $0x1a8] sm:$0xf0] }
 0x3ca   : > { %5752 = vst.msk [vmem:[#allocation4 + $0x1d0] sm:$0xf] %vm750_vm9, %v11478_v54  ;;  %v5061_v32 = vrot.slane %v5060_v35, 4  ;;  %5171 = vrot.lane.b32.xlu0 %v11376_v56, %s7855_s27  ;;  %v5922_v0 = vpop.permute.xlu0 %5921  ;;  %5457 = vrot.lane.b32.xlu1 %v11409_v37, %s7857_s7  ;;  %v7551_v8 = vor.u32 %v7769_v62, %v7550_v9  ;;  %v5069_v62 = vrot.slane %v5067_v13, 4 }
 0x3cb   : > { %v6068_v42 = vpop.permute.xlu1 %6067  ;;  %6006 = vst.msk [vmem:[#allocation4 + $0xe0] sm:$0xf] %vm5509_vm3, %v5922_v0 }
 0x3cc   : > { %6771 = vmatpush.bf16.xpose.msrb.mxu3 %v6658_v63  ;;  %6155 = vst.msk [vmem:[#allocation4 + $0xa4] sm:$0xf] %vm5640_vm6, %v6068_v42  ;;  %v11489_v34 = vsel %vm8369_vm4, %v5061_v32, %v5065_v29  ;;  %5459 = vrot.lane.b32.xlu2 %v11416_v46, %s7857_s7  ;;  %v6655_v26 = vsel %vm6617_vm7, %v7551_v8, 0  ;;  %v7763_v63 = vld [vmem:[#allocation4 + $0x158] sm:$0xf0]  ;;  %v5073_v32 = vshll.u32 %v11370_v14, 16  ;;  %v5070_v0 = vor.u32 %v5069_v62, %v5065_v29 }
 0x3cd   : > { %6158 = vst.msk [vmem:[#allocation4 + $0xe0] sm:$0xf] %vm5640_vm6, %v6074_v47  ;;  %v7538_v47 = vld [vmem:[#allocation4 + $0x170] sm:$0xf]  ;;  %v7526_v42 = vld [vmem:[#allocation4 + $0x148] sm:$0xf] }
 0x3ce   : > { %5753 = vst.msk [vmem:[#allocation4 + $0x1e4] sm:$0xf] %vm750_vm9, %v11489_v34  ;;  %v11497_v51 = vpop.permute.xlu2 %5574  ;;  %v7539_v6 = vor.u32 %v7766_v18, %v7538_v47  ;;  %v5075_v18 = vrot.slane %v5073_v32, 5  ;;  %v5078_v14 = vshrl.u32 %v11093_v11, 16  ;;  %v5097_v32 = vshll.u32 %v11316_v24, 16 }
 0x3d0   : > { %v6652_v35 = vsel %vm6617_vm7, %v7539_v6, 0 }
 0x3d2   : > { %5461 = vrot.lane.b32.xlu0 %v11424_v10, %s7857_s7  ;;  %v5794_v43 = vpop.permute.xlu0 %5793  ;;  %5590 = vrot.lane.b32.xlu1 %v11378_v60, %s7858_s24 }
 0x3d3   : > { %v5796_v48 = vpop.permute.xlu1 %5795  ;;  %5877 = vst.msk [vmem:[#allocation4 + $0xf4] sm:$0xf] %vm1315_vm14, %v5794_v43  ;;  %v5087_v43 = vshll.u32 %v11138_v19, 16 }
 0x3d4   : > { %6772 = vmatpush.bf16.xpose.msrb.mxu3 %v6655_v26  ;;  %5878 = vst.msk [vmem:[#allocation4 + $0x108] sm:$0xf] %vm1315_vm14, %v5796_v48  ;;  %5592 = vrot.lane.b32.xlu2 %v11028_v57, %s7858_s24  ;;  %v5071_v26 = vrot.slane %v5070_v0, 4  ;;  %v5081_v48 = vshll.u32 %v11093_v11, 16 }
 0x3d5   : > { %6007 = vst.msk [vmem:[#allocation4 + $0xf4] sm:$0xf] %vm5509_vm3, %v11449_v45  ;;  %v7527_v45 = vor.u32 %v7763_v63, %v7526_v42  ;;  %v5091_v63 = vshrl.u32 %v11138_v19, 16 }
 0x3d6   : > { %v5158_v50 = vpop.permute.xlu2 %5157  ;;  %v11531_v6 = vsel %vm8369_vm4, %v5071_v26, %v5075_v18  ;;  %v5083_v13 = vrot.slane %v5081_v48, 5  ;;  %v5099_v26 = vrot.slane %v5097_v32, 5 }
 0x3d7   : > { %5237 = vst.msk [vmem:[#allocation4 + $0x140] sm:$0xf] %vm1315_vm14, %v5158_v50  ;;  %v6649_v29 = vsel %vm6617_vm7, %v7527_v45, 0  ;;  %v5080_v50 = vrot.slane %v5078_v14, 4  ;;  %v5093_v62 = vrot.slane %v5091_v63, 4 }
 0x3d8   : > { %5754 = vst.msk [vmem:[#allocation4 + $0x1f8] sm:$0xf] %vm750_vm9, %v11531_v6 }
 0x3da   : > { %5594 = vrot.lane.b32.xlu0 %v11066_v16, %s7858_s24  ;;  %5173 = vrot.lane.b32.xlu1 %v11471_v28, %s7855_s27 }
 0x3dc   : > { %6773 = vmatpush.bf16.xpose.msrb.mxu3 %v6652_v35  ;;  %v5154_v9 = vpop.permute.xlu0 %5153  ;;  %5175 = vrot.lane.b32.xlu2 %v11478_v54, %s7855_s27  ;;  %v6072_v8 = vpop.permute.xlu1 %6071  ;;  %v5089_v35 = vrot.slane %v5087_v43, 5 }
 0x3dd   : > { %5235 = vst.msk [vmem:[#allocation4 + $0x118] sm:$0xf] %vm1315_vm14, %v5154_v9 }
 0x3de   : > { %5524 = vst.msk [vmem:[#allocation4 + $0x118] sm:$0xf] %vm5509_vm3, %v11418_v58  ;;  %v11526_v47 = vpop.permute.xlu2 %5447  ;;  %v5084_v58 = vor.u32 %v5083_v13, %v5080_v50  ;;  %v5094_v45 = vor.u32 %v5093_v62, %v5089_v35  ;;  %v5102_v50 = vshrl.u32 %v11160_v44, 16  ;;  %v5105_v13 = vshll.u32 %v11160_v44, 16 }
 0x3df   : > { %6157 = vst.msk [vmem:[#allocation4 + $0xcc] sm:$0xf] %vm5640_vm6, %v6072_v8 }
 0x3e0   : > { %v5085_v42 = vrot.slane %v5084_v58, 4  ;;  %v5095_v24 = vrot.slane %v5094_v45, 4  ;;  %v5104_v63 = vrot.slane %v5102_v50, 4  ;;  %v5107_v58 = vrot.slane %v5105_v13, 5  ;;  %v7756_v50 = vld [vmem:[#allocation4 + $0x100] sm:$0xf0] }
 0x3e2   : > { %5177 = vrot.lane.b32.xlu0 %v11489_v34, %s7855_s27  ;;  %5463 = vrot.lane.b32.xlu1 %v11440_v12, %s7857_s7  ;;  %v11547_v8 = vsel %vm8369_vm4, %v5085_v42, %v5089_v35  ;;  %v11553_v14 = vsel %vm8369_vm4, %v5095_v24, %v5099_v26  ;;  %v5111_v35 = vshll.u32 %v11193_v49, 16  ;;  %v5108_v62 = vor.u32 %v5107_v58, %v5104_v63  ;;  %v7494_v63 = vld [vmem:[#allocation4 + $0xf0] sm:$0xf] }
 0x3e3   : > { %5755 = vst.msk [vmem:[#allocation4 + $0x20c] sm:$0xf] %vm750_vm9, %v11547_v8  ;;  %v5121_v58 = vshll.u32 %v11244_v7, 16 }
 0x3e4   : > { %6774 = vmatpush.bf16.xpose.msrb.mxu3 %v6649_v29  ;;  %v5444_v0 = vpop.permute.xlu0 %5443  ;;  %5465 = vrot.lane.b32.xlu2 %v11393_v4, %s7857_s7  ;;  %v5573_v9 = vpop.permute.xlu1 %5572  ;;  %5756 = vst.msk [vmem:[#allocation4 + $0x220] sm:$0xf] %vm750_vm9, %v11553_v14  ;;  %v5113_v32 = vrot.slane %v5111_v35, 5 }
 0x3e5   : > { %5655 = vst.msk [vmem:[#allocation4 + $0x118] sm:$0xf] %vm5640_vm6, %v5573_v9 }
 0x3e6   : > { %v5928_v18 = vpop.permute.xlu2 %5927 }
 0x3ea   : > { %5467 = vrot.lane.b32.xlu0 %v11400_v36, %s7857_s7  ;;  %5596 = vrot.lane.b32.xlu1 %v11093_v11, %s7858_s24 }
 0x3ec   : > { %v5926_v48 = vpop.permute.xlu0 %5925  ;;  %5598 = vrot.lane.b32.xlu2 %v11138_v19, %s7858_s24  ;;  %v5156_v43 = vpop.permute.xlu1 %5155  ;;  %v7506_v9 = vld [vmem:[#allocation4 + $0x118] sm:$0xf] }
 0x3ed   : > { %6008 = vst.msk [vmem:[#allocation4 + $0x108] sm:$0xf] %vm5509_vm3, %v5926_v48 }
 0x3ee   : > { %5236 = vst.msk [vmem:[#allocation4 + $0x12c] sm:$0xf] %vm1315_vm14, %v5156_v43  ;;  %v6078_v29 = vpop.permute.xlu2 %6077 }
 0x3ef   : > { %5525 = vst.msk [vmem:[#allocation4 + $0x12c] sm:$0xf] %vm5509_vm3, %v5444_v0 }
 0x3f0   : > { %5656 = vst.msk [vmem:[#allocation4 + $0x12c] sm:$0xf] %vm5640_vm6, %v11497_v51  ;;  %v5109_v51 = vrot.slane %v5108_v62, 4 }
 0x3f1   : > { %6160 = vst.msk [vmem:[#allocation4 + $0x108] sm:$0xf] %vm5640_vm6, %v6078_v29  ;;  %v5115_v29 = vshrl.u32 %v11193_v49, 16 }
 0x3f2   : > { %5823 = vrot.lane.b32.xlu0 %v11349_v21, %s7855_s27  ;;  %5179 = vrot.lane.b32.xlu1 %v11531_v6, %s7855_s27  ;;  %v11585_v26 = vsel %vm8369_vm4, %v5109_v51, %v5113_v32 }
 0x3f3   : > { %5757 = vst.msk [vmem:[#allocation4 + $0x234] sm:$0xf] %vm750_vm9, %v11585_v26  ;;  %v5117_v35 = vrot.slane %v5115_v29, 4 }
 0x3f4   : > { %v5798_v42 = vpop.permute.xlu0 %5797  ;;  %5821 = vrot.lane.b32.xlu2 %v11340_v39, %s7855_s27  ;;  %v5446_v45 = vpop.permute.xlu1 %5445 }
 0x3f5   : > { %5879 = vst.msk [vmem:[#allocation4 + $0x11c] sm:$0xf] %vm1315_vm14, %v5798_v42  ;;  %v5118_v62 = vor.u32 %v5117_v35, %v5113_v32 }
 0x3f6   : > { %6009 = vst.msk [vmem:[#allocation4 + $0x11c] sm:$0xf] %vm5509_vm3, %v5928_v18  ;;  %v11580_v0 = vpop.permute.xlu2 %5580 }
 0x3f7   : > { %5526 = vst.msk [vmem:[#allocation4 + $0x140] sm:$0xf] %vm5509_vm3, %v5446_v45  ;;  %v7759_v24 = vld [vmem:[#allocation4 + $0x128] sm:$0xf0]  ;;  %v5119_v42 = vrot.slane %v5118_v62, 4  ;;  %v5123_v45 = vrot.slane %v5121_v58, 5 }
 0x3f8   : > { %v7507_v48 = vor.u32 %v7759_v24, %v7506_v9  ;;  %v7753_v24 = vld [vmem:[#allocation4 + $0xd8] sm:$0xf0]  ;;  %v7750_v62 = vld [vmem:[#allocation4 + $0xb0] sm:$0xf0] }
 0x3f9   : > { %v11609_v7 = vsel %vm8369_vm4, %v5119_v42, %v5123_v45 }
 0x3fa   : > { %5600 = vrot.lane.b32.xlu0 %v11160_v44, %s7858_s24  ;;  %6672 = vmatpush.bf16.xpose.msra.mxu1 %v7507_v48  ;;  %v5674_v48 = vshrl.u32 %v11253_v3, 16  ;;  %5758 = vst.msk [vmem:[#allocation4 + $0x248] sm:$0xf] %vm750_vm9, %v11609_v7 }
 0x3fb   : > { %5469 = vrot.lane.b32.xlu1 %v11340_v39, %s7857_s7  ;;  %v7495_v39 = vor.u32 %v7756_v50, %v7494_v63 }
 0x3fc   : > { %v5577_v18 = vpop.permute.xlu0 %5576  ;;  %5181 = vrot.lane.b32.xlu2 %v11547_v8, %s7855_s27  ;;  %v5800_v43 = vpop.permute.xlu1 %5799  ;;  %v5676_v50 = vrot.slane %v5674_v48, 4  ;;  %v7747_v48 = vld [vmem:[#allocation4 + $0x88] sm:$0xf0] }
 0x3fd   : > { %5657 = vst.msk [vmem:[#allocation4 + $0x140] sm:$0xf] %vm5640_vm6, %v5577_v18  ;;  %v5677_v18 = vshll.u32 %v11253_v3, 16 }
 0x3fe   : > { %5880 = vst.msk [vmem:[#allocation4 + $0x130] sm:$0xf] %vm1315_vm14, %v5800_v43  ;;  %v5164_v13 = vpop.permute.xlu2 %5163  ;;  %v5683_v43 = vshll.u32 %v11269_v25, 16 }
 0x3ff   : > { %5240 = vst.msk [vmem:[#allocation4 + $0x17c] sm:$0xf] %vm1315_vm14, %v5164_v13  ;;  %v5679_v13 = vrot.slane %v5677_v18, 5 }
 0x400   : > { %v5685_v35 = vrot.slane %v5683_v43, 5 }
 0x402   : > { %5183 = vrot.lane.b32.xlu0 %v11553_v14, %s7855_s27  ;;  %6673 = vmatpush.bf16.xpose.msra.mxu1 %v7495_v39 }
 0x403   : > { %5602 = vrot.lane.b32.xlu1 %v11193_v49, %s7858_s24 }
 0x404   : > { %v5160_v51 = vpop.permute.xlu0 %5159  ;;  %5471 = vrot.lane.b32.xlu2 %v11349_v21, %s7857_s7  ;;  %v6076_v9 = vpop.permute.xlu1 %6075  ;;  %v7482_v21 = vld [vmem:[#allocation4 + $0xc8] sm:$0xf] }
 0x405   : > { %5238 = vst.msk [vmem:[#allocation4 + $0x154] sm:$0xf] %vm1315_vm14, %v5160_v51  ;;  %v7483_v29 = vor.u32 %v7753_v24, %v7482_v21  ;;  %v7470_v51 = vld [vmem:[#allocation4 + $0xa0] sm:$0xf]  ;;  %v7458_v21 = vld [vmem:[#allocation4 + $0x78] sm:$0xf] }
 0x406   : > { %5527 = vst.msk [vmem:[#allocation4 + $0x154] sm:$0xf] %vm5509_vm3, %v11526_v47  ;;  %v6082_v32 = vpop.permute.xlu2 %6081  ;;  %v5680_v47 = vor.u32 %v5679_v13, %v5676_v50 }
 0x407   : > { %6159 = vst.msk [vmem:[#allocation4 + $0xf4] sm:$0xf] %vm5640_vm6, %v6076_v9  ;;  %v7471_v9 = vor.u32 %v7750_v62, %v7470_v51  ;;  %v7741_v51 = vld [vmem:[#allocation4 + $0x38] sm:$0xf0] }
 0x408   : > { %v5681_v39 = vrot.slane %v5680_v47, 4 }
 0x40a   : > { %5473 = vrot.lane.b32.xlu0 %v11267_v30, %s7857_s7  ;;  %6674 = vmatpush.bf16.xpose.msra.mxu1 %v7483_v29  ;;  %v5686_v45 = vsel %vm8369_vm4, %v5681_v39, %v5685_v35  ;;  %v7459_v29 = vor.u32 %v7747_v48, %v7458_v21  ;;  %v7422_v21 = vld [vmem:[#allocation4] sm:$0xf] }
 0x40b   : > { %5185 = vrot.lane.b32.xlu1 %v11585_v26, %s7855_s27  ;;  %5759 = vst.msk [vmem:[#allocation4 + $0x25c] sm:$0xf] %vm750_vm9, %v5686_v45 }
 0x40c   : > { %v5930_v63 = vpop.permute.xlu0 %5929  ;;  %5825 = vrot.lane.b32.xlu2 %v11267_v30, %s7855_s27  ;;  %v5579_v58 = vpop.permute.xlu1 %5578 }
 0x40d   : > { %6010 = vst.msk [vmem:[#allocation4 + $0x130] sm:$0xf] %vm5509_vm3, %v5930_v63 }
 0x40e   : > { %6162 = vst.msk [vmem:[#allocation4 + $0x130] sm:$0xf] %vm5640_vm6, %v6082_v32  ;;  %v5454_v42 = vpop.permute.xlu2 %5453  ;;  %v5687_v32 = vshrl.u32 %v11269_v25, 16 }
 0x40f   : > { %5658 = vst.msk [vmem:[#allocation4 + $0x154] sm:$0xf] %vm5640_vm6, %v5579_v58 }
 0x410   : > { %v5689_v43 = vrot.slane %v5687_v32, 4 }
 0x412   : > { %5827 = vrot.lane.b32.xlu0 %v11277_v55, %s7855_s27  ;;  %6675 = vmatpush.bf16.xpose.msra.mxu1 %v7471_v9  ;;  %v5690_v50 = vor.u32 %v5689_v43, %v5685_v35  ;;  %v7446_v35 = vld [vmem:[#allocation4 + $0x50] sm:$0xf] }
 0x413   : > { %5475 = vrot.lane.b32.xlu1 %v11277_v55, %s7857_s7  ;;  %v5693_v55 = vshll.u32 %v11279_v59, 16 }
 0x414   : > { %v5450_v30 = vpop.permute.xlu0 %5449  ;;  %5604 = vrot.lane.b32.xlu2 %v11253_v3, %s7858_s24  ;;  %v5162_v24 = vpop.permute.xlu1 %5161  ;;  %v5691_v13 = vrot.slane %v5690_v50, 4  ;;  %v7496_v50 = vld [vmem:[#allocation4 + $0x104] sm:$0xf0] }
 0x415   : > { %5239 = vst.msk [vmem:[#allocation4 + $0x168] sm:$0xf] %vm1315_vm14, %v5162_v24  ;;  %v5695_v47 = vrot.slane %v5693_v55, 5  ;;  %v7508_v48 = vld [vmem:[#allocation4 + $0x12c] sm:$0xf0] }
 0x416   : > { %5528 = vst.msk [vmem:[#allocation4 + $0x168] sm:$0xf] %vm5509_vm3, %v5450_v30  ;;  %v11640_v18 = vpop.permute.xlu2 %5586  ;;  %v7434_v30 = vld [vmem:[#allocation4 + $0x28] sm:$0xf] }
 0x417   : > { %5659 = vst.msk [vmem:[#allocation4 + $0x168] sm:$0xf] %vm5640_vm6, %v11580_v0  ;;  %v7744_v0 = vld [vmem:[#allocation4 + $0x60] sm:$0xf0]  ;;  %v5696_v59 = vsel %vm8369_vm4, %v5691_v13, %v5695_v47  ;;  %v7435_v24 = vor.u32 %v7741_v51, %v7434_v30  ;;  %v7752_v47 = vld [vmem:[#allocation4 + $0xcc] sm:$0xf] }
 0x418   : > { %v7447_v39 = vor.u32 %v7744_v0, %v7446_v35  ;;  %5760 = vst.msk [vmem:[#allocation4 + $0x270] sm:$0xf] %vm750_vm9, %v5696_v59  ;;  %v7743_v51 = vld [vmem:[#allocation4 + $0x54] sm:$0xf] }
 0x41a   : > { %5955 = vrot.lane.b32.xlu0 %v11253_v3, %s7857_s7  ;;  %6676 = vmatpush.bf16.xpose.msra.mxu1 %v7459_v29 }
 0x41b   : > { %5957 = vrot.lane.b32.xlu1 %v11269_v25, %s7857_s7 }
 0x41c   : > { %v5583_v63 = vpop.permute.xlu0 %5582  ;;  %5187 = vrot.lane.b32.xlu2 %v11609_v7, %s7855_s27  ;;  %v5452_v58 = vpop.permute.xlu1 %5451 }
 0x41d   : > { %5529 = vst.msk [vmem:[#allocation4 + $0x17c] sm:$0xf] %vm5509_vm3, %v5452_v58 }
 0x41e   : > { %5660 = vst.msk [vmem:[#allocation4 + $0x17c] sm:$0xf] %vm5640_vm6, %v5583_v63  ;;  %v5170_v3 = vpop.permute.xlu2 %5169  ;;  %v7484_v63 = vld [vmem:[#allocation4 + $0xdc] sm:$0xf0] }
 0x41f   : > { %5243 = vst.msk [vmem:[#allocation4 + $0x1b8] sm:$0xf] %vm1315_vm14, %v5170_v3  ;;  %v7487_v58 = vor.u32 %v7752_v47, %v7484_v63 }
 0x422   : > { %5606 = vrot.lane.b32.xlu0 %v11269_v25, %s7858_s24  ;;  %6677 = vmatpush.bf16.xpose.msra.mxu1 %v7447_v39  ;;  %v7746_v39 = vld [vmem:[#allocation4 + $0x7c] sm:$0xf] }
 0x423   : > { %6107 = vrot.lane.b32.xlu1 %v5686_v45, %s7858_s24 }
 0x424   : > { %v5166_v62 = vpop.permute.xlu0 %5165  ;;  %5829 = vrot.lane.b32.xlu2 %v11289_v22, %s7855_s27  ;;  %v6080_v31 = vpop.permute.xlu1 %6079 }
 0x425   : > { %5241 = vst.msk [vmem:[#allocation4 + $0x190] sm:$0xf] %vm1315_vm14, %v5166_v62 }
 0x426   : > { %5530 = vst.msk [vmem:[#allocation4 + $0x190] sm:$0xf] %vm5509_vm3, %v5454_v42  ;;  %v5460_v9 = vpop.permute.xlu2 %5459  ;;  %v7738_v42 = vld [vmem:[#allocation4 + $0x10] sm:$0xf0] }
 0x427   : > { %6161 = vst.msk [vmem:[#allocation4 + $0x11c] sm:$0xf] %vm5640_vm6, %v6080_v31  ;;  %v7423_v55 = vor.u32 %v7738_v42, %v7422_v21 }
 0x42a   : > { %5831 = vrot.lane.b32.xlu0 %v11307_v52, %s7855_s27  ;;  %6678 = vmatpush.bf16.xpose.msra.mxu1 %v7435_v24  ;;  %v7755_v52 = vld [vmem:[#allocation4 + $0xf4] sm:$0xf] }
 0x42b   : > { %5953 = vrot.lane.b32.xlu1 %v11193_v49, %s7857_s7  ;;  %v7499_v13 = vor.u32 %v7755_v52, %v7496_v50 }
 0x42c   : > { %v5456_v25 = vpop.permute.xlu0 %5455  ;;  %6055 = vrot.lane.b32.xlu2 %v10389_v33, %s7858_s24  ;;  %v5585_v22 = vpop.permute.xlu1 %5584 }
 0x42d   : > { %5661 = vst.msk [vmem:[#allocation4 + $0x190] sm:$0xf] %vm5640_vm6, %v5585_v22 }
 0x42e   : > { %v5593_v45 = vpop.permute.xlu2 %5592  ;;  %v7758_v32 = vld [vmem:[#allocation4 + $0x11c] sm:$0xf] }
 0x42f   : > { %v7511_v43 = vor.u32 %v7758_v32, %v7508_v48  ;;  %v11991_v32 = vld [vmem:[#allocation8_spill] sm:$0xff] }
 0x431   : > { %6691 = vmatpush.bf16.xpose.msra.mxu2 %v7511_v43 }
 0x432   : > { %5951 = vrot.lane.b32.xlu0 %v11160_v44, %s7857_s7  ;;  %6679 = vmatpush.bf16.xpose.msra.mxu1 %v7423_v55 }
 0x433   : > { %6103 = vrot.lane.b32.xlu1 %v11585_v26, %s7858_s24 }
 0x434   : > { %v5589_v49 = vpop.permute.xlu0 %5588  ;;  %6109 = vrot.lane.b32.xlu2 %v5696_v59, %s7858_s24  ;;  %v5168_v33 = vpop.permute.xlu1 %5167  ;;  %v7472_v59 = vld [vmem:[#allocation4 + $0xb4] sm:$0xf0] }
 0x435   : > { %5242 = vst.msk [vmem:[#allocation4 + $0x1a4] sm:$0xf] %vm1315_vm14, %v5168_v33  ;;  %v11992_v33 = vld [vmem:[#allocation11_spill] sm:$0xff] }
 0x436   : > { %5531 = vst.msk [vmem:[#allocation4 + $0x1a4] sm:$0xf] %vm5509_vm3, %v5456_v25  ;;  %v5176_v29 = vpop.permute.xlu2 %5175  ;;  %v11989_v25 = vld [vmem:[#allocation5_spill] sm:$0xff] }
 0x437   : > { %5662 = vst.msk [vmem:[#allocation4 + $0x1a4] sm:$0xf] %vm5640_vm6, %v11640_v18 }
 0x438   : > { %5246 = vst.msk [vmem:[#allocation4 + $0x1f4] sm:$0xf] %vm1315_vm14, %v5176_v29  ;;  %v11993_v29 = vld [vmem:[#allocation22_spill] sm:$0xff] }
 0x439   : > { %6692 = vmatpush.bf16.xpose.msra.mxu2 %v7499_v13 }
 0x43a   : > { %6057 = vrot.lane.b32.xlu0 %v10402_v20, %s7858_s24 }
 0x43b   : > { %5819 = vrot.lane.b32.xlu1 %v11400_v36, %s7855_s27 }
 0x43c   : > { %v5172_v44 = vpop.permute.xlu0 %5171  ;;  %6105 = vrot.lane.b32.xlu2 %v11609_v7, %s7858_s24  ;;  %v5458_v26 = vpop.permute.xlu1 %5457  ;;  %v7749_v7 = vld [vmem:[#allocation4 + $0xa4] sm:$0xf] }
 0x43d   : > { %5244 = vst.msk [vmem:[#allocation4 + $0x1cc] sm:$0xf] %vm1315_vm14, %v5172_v44  ;;  %v7475_v3 = vor.u32 %v7749_v7, %v7472_v59 }
 0x43e   : > { %5533 = vst.msk [vmem:[#allocation4 + $0x1cc] sm:$0xf] %vm5509_vm3, %v5460_v9  ;;  %v5466_v18 = vpop.permute.xlu2 %5465 }
 0x43f   : > { %5532 = vst.msk [vmem:[#allocation4 + $0x1b8] sm:$0xf] %vm5509_vm3, %v5458_v26 }
 0x440   : > { %5663 = vst.msk [vmem:[#allocation4 + $0x1b8] sm:$0xf] %vm5640_vm6, %v5589_v49 }
 0x441   : > { %6693 = vmatpush.bf16.xpose.msra.mxu2 %v7487_v58 }
 0x442   : > { %5817 = vrot.lane.b32.xlu0 %v11393_v4, %s7855_s27 }
 0x443   : > { %5947 = vrot.lane.b32.xlu1 %v11093_v11, %s7857_s7 }
 0x444   : > { %v5462_v20 = vpop.permute.xlu0 %5461  ;;  %5899 = vrot.lane.b32.xlu2 %v10183_v5, %s7857_s7  ;;  %v5591_v36 = vpop.permute.xlu1 %5590  ;;  %v7460_v5 = vld [vmem:[#allocation4 + $0x8c] sm:$0xf0] }
 0x445   : > { %5664 = vst.msk [vmem:[#allocation4 + $0x1cc] sm:$0xf] %vm5640_vm6, %v5591_v36  ;;  %v7463_v62 = vor.u32 %v7746_v39, %v7460_v5 }
 0x446   : > { %v5599_v0 = vpop.permute.xlu2 %5598 }
 0x449   : > { %6694 = vmatpush.bf16.xpose.msra.mxu2 %v7475_v3 }
 0x44a   : > { %5901 = vrot.lane.b32.xlu0 %v10212_v23, %s7857_s7 }
 0x44b   : > { %6053 = vrot.lane.b32.xlu1 %v10313_v27, %s7858_s24 }
 0x44c   : > { %v5595_v4 = vpop.permute.xlu0 %5594  ;;  %5949 = vrot.lane.b32.xlu2 %v11138_v19, %s7857_s7  ;;  %v5174_v11 = vpop.permute.xlu1 %5173  ;;  %v7448_v19 = vld [vmem:[#allocation4 + $0x64] sm:$0xf0] }
 0x44d   : > { %5245 = vst.msk [vmem:[#allocation4 + $0x1e0] sm:$0xf] %vm1315_vm14, %v5174_v11  ;;  %v7451_v9 = vor.u32 %v7743_v51, %v7448_v19 }
 0x44e   : > { %5534 = vst.msk [vmem:[#allocation4 + $0x1e0] sm:$0xf] %vm5509_vm3, %v5462_v20  ;;  %v5822_v35 = vpop.permute.xlu2 %5821 }
 0x44f   : > { %5665 = vst.msk [vmem:[#allocation4 + $0x1e0] sm:$0xf] %vm5640_vm6, %v5593_v45 }
 0x450   : > { %5891 = vst.msk [vmem:[#allocation4 + $0x20c] sm:$0xf] %vm1315_vm14, %v5822_v35 }
 0x451   : > { %6695 = vmatpush.bf16.xpose.msra.mxu2 %v7463_v62 }
 0x452   : > { %6051 = vrot.lane.b32.xlu0 %v10260_v17, %s7858_s24 }
 0x453   : > { %5813 = vrot.lane.b32.xlu1 %v11424_v10, %s7855_s27 }
 0x454   : > { %v5178_v23 = vpop.permute.xlu0 %5177  ;;  %6099 = vrot.lane.b32.xlu2 %v11547_v8, %s7858_s24  ;;  %v5464_v27 = vpop.permute.xlu1 %5463 }
 0x455   : > { %5247 = vst.msk [vmem:[#allocation4 + $0x208] sm:$0xf] %vm1315_vm14, %v5178_v23 }
 0x456   : > { %5536 = vst.msk [vmem:[#allocation4 + $0x208] sm:$0xf] %vm5509_vm3, %v5466_v18  ;;  %v5182_v31 = vpop.permute.xlu2 %5181  ;;  %v7566_v5 = vld [vmem:[#allocation4 + $0x1e0] sm:$0xf] }
 0x457   : > { %5535 = vst.msk [vmem:[#allocation4 + $0x1f4] sm:$0xf] %vm5509_vm3, %v5464_v27  ;;  %v7771_v27 = vld [vmem:[#allocation4 + $0x1c8] sm:$0xf0] }
 0x458   : > { %5666 = vst.msk [vmem:[#allocation4 + $0x1f4] sm:$0xf] %vm5640_vm6, %v5595_v4 }
 0x459   : > { %5249 = vst.msk [vmem:[#allocation4 + $0x230] sm:$0xf] %vm1315_vm14, %v5182_v31  ;;  %6696 = vmatpush.bf16.xpose.msra.mxu2 %v7451_v9  ;;  %v7554_v31 = vld [vmem:[#allocation4 + $0x1b8] sm:$0xf] }
 0x45a   : > { %6101 = vrot.lane.b32.xlu0 %v11553_v14, %s7858_s24  ;;  %v7555_v9 = vor.u32 %v7771_v27, %v7554_v31  ;;  %v6323_v27 = vld [vmem:[%s11914_s5] sm:$0xff] }
 0x45b   : > { %5945 = vrot.lane.b32.xlu1 %v11066_v16, %s7857_s7 }
 0x45c   : > { %v5468_v17 = vpop.permute.xlu0 %5467  ;;  %5815 = vrot.lane.b32.xlu2 %v11440_v12, %s7855_s27  ;;  %v5597_v10 = vpop.permute.xlu1 %5596 }
 0x45d   : > { %5667 = vst.msk [vmem:[#allocation4 + $0x208] sm:$0xf] %vm5640_vm6, %v5597_v10  ;;  %v7768_v10 = vld [vmem:[#allocation4 + $0x1a0] sm:$0xf0] }
 0x45e   : > { %v5472_v8 = vpop.permute.xlu2 %5471 }
 0x45f   : > { %v7774_v59 = vld [vmem:[#allocation4 + $0x1f0] sm:$0xf0] }
 0x460   : > { %v7567_v62 = vor.u32 %v7774_v59, %v7566_v5  ;;  %v7785_v59 = vld [vmem:[%s11912_s3 + $0x4] sm:$0xf]  ;;  %v7787_v5 = vld [vmem:[%s11912_s3 + $0x10] sm:$0xf0] }
 0x462   : > { %5943 = vrot.lane.b32.xlu0 %v11028_v57, %s7857_s7 }
 0x463   : > { %5809 = vrot.lane.b32.xlu1 %v11409_v37, %s7855_s27 }
 0x464   : > { %v5824_v30 = vpop.permute.xlu0 %5823  ;;  %6095 = vrot.lane.b32.xlu2 %v11489_v34, %s7858_s24  ;;  %v5180_v14 = vpop.permute.xlu1 %5179  ;;  %v7578_v20 = vld [vmem:[#allocation4 + $0x208] sm:$0xf] }
 0x465   : > { %5892 = vst.msk [vmem:[#allocation4 + $0x220] sm:$0xf] %vm1315_vm14, %v5824_v30  ;;  %v7542_v30 = vld [vmem:[#allocation4 + $0x190] sm:$0xf] }
 0x466   : > { %5248 = vst.msk [vmem:[#allocation4 + $0x21c] sm:$0xf] %vm1315_vm14, %v5180_v14  ;;  %v5826_v16 = vpop.permute.xlu2 %5825 }
 0x467   : > { %5537 = vst.msk [vmem:[#allocation4 + $0x21c] sm:$0xf] %vm5509_vm3, %v5468_v17 }
 0x468   : > { %5668 = vst.msk [vmem:[#allocation4 + $0x21c] sm:$0xf] %vm5640_vm6, %v5599_v0 }
 0x469   : > { %5893 = vst.msk [vmem:[#allocation4 + $0x234] sm:$0xf] %vm1315_vm14, %v5826_v16  ;;  %v7543_v16 = vor.u32 %v7768_v10, %v7542_v30  ;;  %v7788_v10 = vld [vmem:[%s11912_s3 + $0x1c] sm:$0xf]  ;;  %v7418_v30 = vld [vmem:[%s11912_s3 + $0x20] sm:$0xf] }
 0x46a   : > { %6097 = vrot.lane.b32.xlu0 %v11531_v6, %s7858_s24 }
 0x46b   : > { %5941 = vrot.lane.b32.xlu1 %v11378_v60, %s7857_s7 }
 0x46c   : > { %v5601_v57 = vpop.permute.xlu0 %5600  ;;  %5811 = vrot.lane.b32.xlu2 %v11416_v46, %s7855_s27 }
 0x46d   : > { %v5470_v37 = vpop.permute.xlu1 %5469 }
 0x46e   : > { %5538 = vst.msk [vmem:[#allocation4 + $0x230] sm:$0xf] %vm5509_vm3, %v5470_v37  ;;  %v5605_v12 = vpop.permute.xlu2 %5604  ;;  %v7765_v37 = vld [vmem:[#allocation4 + $0x178] sm:$0xf0] }
 0x46f   : > { %5669 = vst.msk [vmem:[#allocation4 + $0x230] sm:$0xf] %vm5640_vm6, %v5601_v57  ;;  %v7777_v63 = vld [vmem:[#allocation4 + $0x218] sm:$0xf0] }
 0x470   : > { %v7579_v7 = vor.u32 %v7777_v63, %v7578_v20 }
 0x472   : > { %5939 = vrot.lane.b32.xlu0 %v11314_v61, %s7857_s7 }
 0x473   : > { %5805 = vrot.lane.b32.xlu1 %v11250_v2, %s7855_s27 }
 0x474   : > { %v5184_v34 = vpop.permute.xlu0 %5183  ;;  %6091 = vrot.lane.b32.xlu2 %v11471_v28, %s7858_s24 }
 0x475   : > { %5250 = vst.msk [vmem:[#allocation4 + $0x244] sm:$0xf] %vm1315_vm14, %v5184_v34  ;;  %v5603_v60 = vpop.permute.xlu1 %5602 }
 0x476   : > { %5539 = vst.msk [vmem:[#allocation4 + $0x244] sm:$0xf] %vm5509_vm3, %v5472_v8  ;;  %v5188_v46 = vpop.permute.xlu2 %5187  ;;  %v7590_v44 = vld [vmem:[#allocation4 + $0x230] sm:$0xf] }
 0x477   : > { %5670 = vst.msk [vmem:[#allocation4 + $0x244] sm:$0xf] %vm5640_vm6, %v5603_v60 }
 0x478   : > { %5252 = vst.msk [vmem:[#allocation4 + $0x26c] sm:$0xf] %vm1315_vm14, %v5188_v46 }
 0x47a   : > { %6093 = vrot.lane.b32.xlu0 %v11478_v54, %s7858_s24 }
 0x47b   : > { %5937 = vrot.lane.b32.xlu1 %v11301_v41, %s7857_s7 }
 0x47c   : > { %v5474_v2 = vpop.permute.xlu0 %5473  ;;  %5807 = vrot.lane.b32.xlu2 %v11261_v15, %s7855_s27  ;;  %v11986_v15 = vld [vmem:[#allocation14_spill] sm:$0xff] }
 0x47d   : > { %v5186_v61 = vpop.permute.xlu1 %5185 }
 0x47e   : > { %5251 = vst.msk [vmem:[#allocation4 + $0x258] sm:$0xf] %vm1315_vm14, %v5186_v61  ;;  %v5830_v28 = vpop.permute.xlu2 %5829  ;;  %v7780_v50 = vld [vmem:[#allocation4 + $0x240] sm:$0xf0] }
 0x47f   : > { %5540 = vst.msk [vmem:[#allocation4 + $0x258] sm:$0xf] %vm5509_vm3, %v5474_v2  ;;  %v7591_v47 = vor.u32 %v7780_v50, %v7590_v44  ;;  %v7530_v2 = vld [vmem:[#allocation4 + $0x168] sm:$0xf] }
 0x480   : > { %5671 = vst.msk [vmem:[#allocation4 + $0x258] sm:$0xf] %vm5640_vm6, %v5605_v12 }
 0x481   : > { %5895 = vst.msk [vmem:[#allocation4 + $0x25c] sm:$0xf] %vm1315_vm14, %v5830_v28 }
 0x482   : > { %6025 = vst.msk [vmem:[#allocation4 + $0x25c] sm:$0xf] %vm5509_vm3, %v10602_v1  ;;  %5935 = vrot.lane.b32.xlu0 %v11294_v38, %s7857_s7  ;;  %v11987_v1 = vld [vmem:[#allocation6_spill] sm:$0xff]  ;;  %v11988_v38 = vld [vmem:[#allocation16_spill] sm:$0xff] }
 0x483   : > { %6177 = vst.msk [vmem:[#allocation4 + $0x25c] sm:$0xf] %vm5640_vm6, %v10647_v40  ;;  %5801 = vrot.lane.b32.xlu1 %v11986_v15, %s7855_s27  ;;  %v7531_v15 = vor.u32 %v7765_v37, %v7530_v2  ;;  %v7790_v37 = vld [vmem:[%s11912_s3 + $0x28] sm:$0xf0] }
 0x484   : > { %v5828_v41 = vpop.permute.xlu0 %5827  ;;  %6087 = vrot.lane.b32.xlu2 %v11365_v53, %s7858_s24 }
 0x485   : > { %5894 = vst.msk [vmem:[#allocation4 + $0x248] sm:$0xf] %vm1315_vm14, %v5828_v41  ;;  %v5476_v54 = vpop.permute.xlu1 %5475 }
 0x486   : > { %5541 = vst.msk [vmem:[#allocation4 + $0x26c] sm:$0xf] %vm5509_vm3, %v5476_v54  ;;  %v6056_v6 = vpop.permute.xlu2 %6055 }
 0x487   : > { %6149 = vst.msk [vmem:[#allocation4 + $0x2c] sm:$0xf] %vm5640_vm6, %v6056_v6  ;;  %v7602_v43 = vld [vmem:[#allocation4 + $0x258] sm:$0xf] }
 0x48a   : > { %6089 = vrot.lane.b32.xlu0 %v11376_v56, %s7858_s24  ;;  %v11990_v56 = vld [vmem:[#allocation7_spill] sm:$0xff]  ;;  %v7782_v41 = vld [vmem:[#allocation4 + $0x25c] sm:$0xf] }
 0x48b   : > { %5933 = vrot.lane.b32.xlu1 %v11987_v1, %s7857_s7  ;;  %v7762_v1 = vld [vmem:[#allocation4 + $0x150] sm:$0xf0] }
 0x48c   : > { %v5956_v40 = vpop.permute.xlu0 %5955  ;;  %5803 = vrot.lane.b32.xlu2 %v11988_v38, %s7855_s27 }
 0x48d   : > { %6023 = vst.msk [vmem:[#allocation4 + $0x234] sm:$0xf] %vm5509_vm3, %v5956_v40  ;;  %v5958_v53 = vpop.permute.xlu1 %5957 }
 0x48e   : > { %6024 = vst.msk [vmem:[#allocation4 + $0x248] sm:$0xf] %vm5509_vm3, %v5958_v53  ;;  %v6110_v24 = vpop.permute.xlu2 %6109  ;;  %v7740_v4 = vld [vmem:[#allocation4 + $0x2c] sm:$0xf]  ;;  %v7518_v53 = vld [vmem:[#allocation4 + $0x140] sm:$0xf] }
 0x48f   : > { %6176 = vst.msk [vmem:[#allocation4 + $0x248] sm:$0xf] %vm5640_vm6, %v6110_v24 }
 0x492   : > { %5931 = vrot.lane.b32.xlu0 %v11989_v25, %s7857_s7  ;;  %v7519_v25 = vor.u32 %v7762_v1, %v7518_v53 }
 0x493   : > { %6329 = vperm.xlu1 %7827, %v6323_v27  }
 0x494   : > { %v5607_v22 = vpop.permute.xlu0 %5606  ;;  %6083 = vrot.lane.b32.xlu2 %v11990_v56, %s7858_s24 }
 0x495   : > { %5672 = vst.msk [vmem:[#allocation4 + $0x26c] sm:$0xf] %vm5640_vm6, %v5607_v22  ;;  %v6108_v42 = vpop.permute.xlu1 %6107 }
 0x496   : > { %6175 = vst.msk [vmem:[#allocation4 + $0x234] sm:$0xf] %vm5640_vm6, %v6108_v42  ;;  %v6106_v45 = vpop.permute.xlu2 %6105  ;;  %v7592_v22 = vld [vmem:[#allocation4 + $0x244] sm:$0xf0] }
 0x49a   : > { %6085 = vrot.lane.b32.xlu0 %v11991_v32, %s7858_s24 }
 0x49c   : > { %v5832_v48 = vpop.permute.xlu0 %5831  ;;  %v7783_v21 = vld [vmem:[#allocation4 + $0x268] sm:$0xf0] }
 0x49d   : > { %5896 = vst.msk [vmem:[#allocation4 + $0x270] sm:$0xf] %vm1315_vm14, %v5832_v48  ;;  %v5954_v55 = vpop.permute.xlu1 %5953  ;;  %v7603_v49 = vor.u32 %v7783_v21, %v7602_v43  ;;  %v7779_v40 = vld [vmem:[#allocation4 + $0x234] sm:$0xf] }
 0x49e   : > { %6026 = vst.msk [vmem:[#allocation4 + $0x270] sm:$0xf] %vm5509_vm3, %v11992_v33  ;;  %v5900_v52 = vpop.permute.xlu2 %5899  ;;  %v7595_v42 = vor.u32 %v7779_v40, %v7592_v22 }
 0x49f   : > { %6178 = vst.msk [vmem:[#allocation4 + $0x270] sm:$0xf] %vm5640_vm6, %v11993_v29  ;;  %6729 = vmatpush.bf16.xpose.msrb.mxu1 %v7603_v49 }
 0x4a0   : > { %6022 = vst.msk [vmem:[#allocation4 + $0x220] sm:$0xf] %vm5509_vm3, %v5954_v55 }
 0x4a1   : > { %6174 = vst.msk [vmem:[#allocation4 + $0x220] sm:$0xf] %vm5640_vm6, %v6106_v45 }
 0x4a2   : > { %5995 = vst.msk [vmem:[#allocation4 + $0x4] sm:$0xf] %vm5509_vm3, %v5900_v52 }
 0x4a4   : > { %v5952_v13 = vpop.permute.xlu0 %5951 }
 0x4a5   : > { %6021 = vst.msk [vmem:[#allocation4 + $0x20c] sm:$0xf] %vm5509_vm3, %v5952_v13  ;;  %v6104_v26 = vpop.permute.xlu1 %6103 }
 0x4a6   : > { %6173 = vst.msk [vmem:[#allocation4 + $0x20c] sm:$0xf] %vm5640_vm6, %v6104_v26  ;;  %v5950_v18 = vpop.permute.xlu2 %5949  ;;  %v7604_v12 = vld [vmem:[#allocation4 + $0x26c] sm:$0xf0] }
 0x4a7   : > { %6730 = vmatpush.bf16.xpose.msrb.mxu1 %v7591_v47  ;;  %v7607_v6 = vor.u32 %v7782_v41, %v7604_v12 }
 0x4a8   : > { %v7580_v43 = vld [vmem:[#allocation4 + $0x21c] sm:$0xf0] }
 0x4ac   : > { %v6058_v58 = vpop.permute.xlu0 %6057 }
 0x4ad   : > { %6150 = vst.msk [vmem:[#allocation4 + $0x40] sm:$0xf] %vm5640_vm6, %v6058_v58  ;;  %v5820_v36 = vpop.permute.xlu1 %5819  ;;  %v7776_v45 = vld [vmem:[#allocation4 + $0x20c] sm:$0xf] }
 0x4ae   : > { %5890 = vst.msk [vmem:[#allocation4 + $0x1f8] sm:$0xf] %vm1315_vm14, %v5820_v36  ;;  %v6100_v0 = vpop.permute.xlu2 %6099  ;;  %v7583_v55 = vor.u32 %v7776_v45, %v7580_v43 }
 0x4af   : > { %6020 = vst.msk [vmem:[#allocation4 + $0x1f8] sm:$0xf] %vm5509_vm3, %v5950_v18  ;;  %6731 = vmatpush.bf16.xpose.msrb.mxu1 %v7579_v7 }
 0x4b4   : > { %v5818_v3 = vpop.permute.xlu0 %5817  ;;  %v7436_v11 = vld [vmem:[#allocation4 + $0x3c] sm:$0xf0] }
 0x4b5   : > { %5889 = vst.msk [vmem:[#allocation4 + $0x1e4] sm:$0xf] %vm1315_vm14, %v5818_v3  ;;  %v5948_v35 = vpop.permute.xlu1 %5947  ;;  %v7439_v39 = vor.u32 %v7740_v4, %v7436_v11  ;;  %v7400_v3 = vld [vmem:[%s11912_s3 + $0xc] sm:$0xf0]  ;;  %v7406_v11 = vld [vmem:[%s11912_s3 + $0x8] sm:$0xf] }
 0x4b6   : > { %6019 = vst.msk [vmem:[#allocation4 + $0x1e4] sm:$0xf] %vm5509_vm3, %v5948_v35  ;;  %v5816_v23 = vpop.permute.xlu2 %5815  ;;  %v7403_v4 = vor.u32 %v7785_v59, %v7400_v3  ;;  %v7398_v35 = vld [vmem:[%s11912_s3] sm:$0xf] }
 0x4b7   : > { %6171 = vst.msk [vmem:[#allocation4 + $0x1e4] sm:$0xf] %vm5640_vm6, %v6100_v0  ;;  %6697 = vmatpush.bf16.xpose.msra.mxu2 %v7439_v39  ;;  %6732 = vmatpush.bf16.xpose.msrb.mxu1 %v7567_v62  ;;  %v7407_v39 = vor.u32 %v7787_v5, %v7406_v11  ;;  %v7786_v62 = vld [vmem:[%s11912_s3 + $0x8] sm:$0xf0] }
 0x4b8   : > { %5888 = vst.msk [vmem:[#allocation4 + $0x1d0] sm:$0xf] %vm1315_vm14, %v5816_v23  ;;  %v7399_v23 = vor.u32 %v7786_v62, %v7398_v35 }
 0x4b9   : > { %7612 = vmatmul.msk.bf16.vlgmr.msra.gmra.mxu3 %vm6617_vm7, %v7407_v39 }
 0x4ba   : > { %6680 = vmatmul.bf16.vlgmr.msra.gmra.mxu1 %v7399_v23 }
 0x4bc   : > { %v5902_v19 = vpop.permute.xlu0 %5901 }
 0x4bd   : > { %5996 = vst.msk [vmem:[#allocation4 + $0x18] sm:$0xf] %vm5509_vm3, %v5902_v19  ;;  %v6054_v51 = vpop.permute.xlu1 %6053 }
 0x4be   : > { %6148 = vst.msk [vmem:[#allocation4 + $0x18] sm:$0xf] %vm5640_vm6, %v6054_v51  ;;  %v6096_v17 = vpop.permute.xlu2 %6095  ;;  %v7773_v29 = vld [vmem:[#allocation4 + $0x1e4] sm:$0xf] }
 0x4bf   : > { %6733 = vmatpush.bf16.xpose.msrb.mxu1 %v7555_v9  ;;  %v6325_v51 = vld [vmem:[%s11914_s5 + $0x10] sm:$0xff]  ;;  %v6324_v9 = vld [vmem:[%s11914_s5 + $0x8] sm:$0xff] }
 0x4c0   : > { %6339 = vperm.xlu0 %7829, %v6325_v51   ;;  %6334 = vperm.xlu2 %7828, %v6324_v9  }
 0x4c4   : > { %v6052_v8 = vpop.permute.xlu0 %6051 }
 0x4c5   : > { %6147 = vst.msk [vmem:[#allocation4 + $0x4] sm:$0xf] %vm5640_vm6, %v6052_v8  ;;  %v5814_v14 = vpop.permute.xlu1 %5813  ;;  %v7424_v46 = vld [vmem:[#allocation4 + $0x14] sm:$0xf0] }
 0x4c6   : > { %5887 = vst.msk [vmem:[#allocation4 + $0x1bc] sm:$0xf] %vm1315_vm14, %v5814_v14  ;;  %v5812_v57 = vpop.permute.xlu2 %5811  ;;  %v7412_v8 = vld [vmem:[%s11912_s3 + $0x24] sm:$0xf0] }
 0x4c7   : > { %5886 = vst.msk [vmem:[#allocation4 + $0x1a8] sm:$0xf] %vm1315_vm14, %v5812_v57  ;;  %6734 = vmatpush.bf16.xpose.msrb.mxu1 %v7543_v16  ;;  %v7415_v2 = vor.u32 %v7788_v10, %v7412_v8 }
 0x4cc   : > { %v6102_v34 = vpop.permute.xlu0 %6101  ;;  %v7737_v60 = vld [vmem:[#allocation4 + $0x4] sm:$0xf] }
 0x4cd   : > { %6172 = vst.msk [vmem:[#allocation4 + $0x1f8] sm:$0xf] %vm5640_vm6, %v6102_v34  ;;  %v5946_v61 = vpop.permute.xlu1 %5945  ;;  %v7427_v28 = vor.u32 %v7737_v60, %v7424_v46  ;;  %v7410_v60 = vld [vmem:[%s11912_s3 + $0x18] sm:$0xf]  ;;  %v7789_v46 = vld [vmem:[%s11912_s3 + $0x20] sm:$0xf0] }
 0x4ce   : > { %6018 = vst.msk [vmem:[#allocation4 + $0x1d0] sm:$0xf] %vm5509_vm3, %v5946_v61  ;;  %v6092_v54 = vpop.permute.xlu2 %6091  ;;  %v7419_v61 = vor.u32 %v7790_v37, %v7418_v30 }
 0x4cf   : > { %6698 = vmatpush.bf16.xpose.msra.mxu2 %v7427_v28  ;;  %6735 = vmatpush.bf16.xpose.msrb.mxu1 %v7531_v15  ;;  %v7411_v28 = vor.u32 %v7789_v46, %v7410_v60 }
 0x4d0   : > { %7613 = vmatmul.msk.bf16.gmra.mxu3 %vm6617_vm7, %v7419_v61 }
 0x4d1   : > { %6685 = vmatmul.bf16.gmra.mxu1 %v7411_v28 }
 0x4d4   : > { %v5944_v38 = vpop.permute.xlu0 %5943  ;;  %v7568_v49 = vld [vmem:[#allocation4 + $0x1f4] sm:$0xf0] }
 0x4d5   : > { %6017 = vst.msk [vmem:[#allocation4 + $0x1bc] sm:$0xf] %vm5509_vm3, %v5944_v38  ;;  %v5810_v24 = vpop.permute.xlu1 %5809  ;;  %v7571_v13 = vor.u32 %v7773_v29, %v7568_v49 }
 0x4d6   : > { %6169 = vst.msk [vmem:[#allocation4 + $0x1bc] sm:$0xf] %vm5640_vm6, %v6096_v17  ;;  %v5808_v56 = vpop.permute.xlu2 %5807  ;;  %6699 = vmatmul.bf16.vlgmr.msra.gmra.mxu2 %v7403_v4  ;;  %v6326_v17 = vld [vmem:[%s11914_s5 + $0x18] sm:$0xff] }
 0x4d7   : > { %6748 = vmatpush.bf16.xpose.msrb.mxu2 %v7607_v6  ;;  %5885 = vst.msk [vmem:[#allocation4 + $0x194] sm:$0xf] %vm1315_vm14, %v5810_v24  ;;  %6736 = vmatpush.bf16.xpose.msrb.mxu1 %v7519_v25 }
 0x4d8   : > { %5884 = vst.msk [vmem:[#allocation4 + $0x180] sm:$0xf] %vm1315_vm14, %v5808_v56  ;;  %6344 = vperm.xlu1 %7827, %v6326_v17  }
 0x4dc   : > { %v6098_v32 = vpop.permute.xlu0 %6097 }
 0x4dd   : > { %6170 = vst.msk [vmem:[#allocation4 + $0x1d0] sm:$0xf] %vm5640_vm6, %v6098_v32  ;;  %v5942_v48 = vpop.permute.xlu1 %5941  ;;  %v7770_v18 = vld [vmem:[#allocation4 + $0x1bc] sm:$0xf] }
 0x4de   : > { %6016 = vst.msk [vmem:[#allocation4 + $0x1a8] sm:$0xf] %vm5509_vm3, %v5942_v48  ;;  %v6088_v21 = vpop.permute.xlu2 %6087 }
 0x4df   : > { %6749 = vmatpush.bf16.xpose.msrb.mxu2 %v7595_v42 }
 0x4e0   : > { %7614 = vmatmul.msk.bf16.vlgmr.msrb.gmra.mxu3 %vm6617_vm7, %v7407_v39 }
 0x4e1   : > { %6737 = vmatmul.bf16.vlgmr.msrb.gmra.mxu1 %v7399_v23 }
 0x4e4   : > { %v5940_v33 = vpop.permute.xlu0 %5939  ;;  %v7556_v44 = vld [vmem:[#allocation4 + $0x1cc] sm:$0xf0] }
 0x4e5   : > { %6015 = vst.msk [vmem:[#allocation4 + $0x194] sm:$0xf] %vm5509_vm3, %v5940_v33  ;;  %v5806_v52 = vpop.permute.xlu1 %5805  ;;  %v7559_v63 = vor.u32 %v7770_v18, %v7556_v44 }
 0x4e6   : > { %6167 = vst.msk [vmem:[#allocation4 + $0x194] sm:$0xf] %vm5640_vm6, %v6092_v54  ;;  %v5804_v50 = vpop.permute.xlu2 %5803  ;;  %6704 = vmatmul.bf16.gmra.mxu2 %v7415_v2 }
 0x4e7   : > { %6750 = vmatpush.bf16.xpose.msrb.mxu2 %v7583_v55  ;;  %5883 = vst.msk [vmem:[#allocation4 + $0x16c] sm:$0xf] %vm1315_vm14, %v5806_v52 }
 0x4e8   : > { %5882 = vst.msk [vmem:[#allocation4 + $0x158] sm:$0xf] %vm1315_vm14, %v5804_v50 }
 0x4ec   : > { %v6094_v26 = vpop.permute.xlu0 %6093 }
 0x4ed   : > { %6168 = vst.msk [vmem:[#allocation4 + $0x1a8] sm:$0xf] %vm5640_vm6, %v6094_v26  ;;  %v5938_v47 = vpop.permute.xlu1 %5937  ;;  %v7767_v20 = vld [vmem:[#allocation4 + $0x194] sm:$0xf] }
 0x4ee   : > { %6014 = vst.msk [vmem:[#allocation4 + $0x180] sm:$0xf] %vm5509_vm3, %v5938_v47  ;;  %v6084_v12 = vpop.permute.xlu2 %6083 }
 0x4ef   : > { %6751 = vmatpush.bf16.xpose.msrb.mxu2 %v7571_v13 }
 0x4f0   : > { %7615 = vmatmul.msk.bf16.gmra.mxu3 %vm6617_vm7, %v7419_v61 }
 0x4f1   : > { %6742 = vmatmul.bf16.gmra.mxu1 %v7411_v28 }
 0x4f4   : > { %v5936_v58 = vpop.permute.xlu0 %5935  ;;  %v7544_v36 = vld [vmem:[#allocation4 + $0x1a4] sm:$0xf0] }
 0x4f5   : > { %6013 = vst.msk [vmem:[#allocation4 + $0x16c] sm:$0xf] %vm5509_vm3, %v5936_v58  ;;  %v5802_v7 = vpop.permute.xlu1 %5801  ;;  %v7547_v0 = vor.u32 %v7767_v20, %v7544_v36 }
 0x4f6   : > { %6165 = vst.msk [vmem:[#allocation4 + $0x16c] sm:$0xf] %vm5640_vm6, %v6088_v21 }
 0x4f7   : > { %6752 = vmatpush.bf16.xpose.msrb.mxu2 %v7559_v63  ;;  %5881 = vst.msk [vmem:[#allocation4 + $0x144] sm:$0xf] %vm1315_vm14, %v5802_v7 }
 0x4fc   : > { %v6090_v19 = vpop.permute.xlu0 %6089 }
 0x4fd   : > { %6166 = vst.msk [vmem:[#allocation4 + $0x180] sm:$0xf] %vm5640_vm6, %v6090_v19  ;;  %v5934_v31 = vpop.permute.xlu1 %5933  ;;  %v7764_v16 = vld [vmem:[#allocation4 + $0x16c] sm:$0xf] }
 0x4fe   : > { %6012 = vst.msk [vmem:[#allocation4 + $0x158] sm:$0xf] %vm5509_vm3, %v5934_v31 }
 0x4ff   : > { %6753 = vmatpush.bf16.xpose.msrb.mxu2 %v7547_v0 }
 0x504   : > { %v5932_v14 = vpop.permute.xlu0 %5931  ;;  %v7532_v57 = vld [vmem:[#allocation4 + $0x17c] sm:$0xf0] }
 0x505   : > { %6011 = vst.msk [vmem:[#allocation4 + $0x144] sm:$0xf] %vm5509_vm3, %v5932_v14  ;;  %v7535_v34 = vor.u32 %v7764_v16, %v7532_v57  ;;  %v6330_v1 = vpop.permute.xlu1 %6329 }
 0x506   : > { %6163 = vst.msk [vmem:[#allocation4 + $0x144] sm:$0xf] %vm5640_vm6, %v6084_v12 }
 0x507   : > { %6754 = vmatpush.bf16.xpose.msrb.mxu2 %v7535_v34 }
 0x50c   : > { %v6086_v15 = vpop.permute.xlu0 %6085 }
 0x50d   : > { %6164 = vst.msk [vmem:[#allocation4 + $0x158] sm:$0xf] %vm5640_vm6, %v6086_v15  ;;  %v7761_v41 = vld [vmem:[#allocation4 + $0x144] sm:$0xf] }
 0x514   : > { %v7520_v54 = vld [vmem:[#allocation4 + $0x154] sm:$0xf0] }
 0x515   : > { %v7523_v6 = vor.u32 %v7761_v41, %v7520_v54 }
 0x517   : > { %6755 = vmatpush.bf16.xpose.msrb.mxu2 %v7523_v6 }
 0x51a   : > { %v6335_v22 = vpop.permute.xlu2 %6334 }
 0x51e   : > { %6756 = vmatmul.bf16.vlgmr.msrb.gmra.mxu2 %v7403_v4 }
 0x52e   : > { %6761 = vmatmul.bf16.gmra.mxu2 %v7415_v2 }
 0x532   : > { %v6340_v55 = vpop.permute.xlu0 %6339 }
 0x537   : > { %v6681_v40 = vpop.f32.mrf.mxu1 }
 0x538   : > { %v6682_v38 = vadd.f32 %v6681_v40, %v6330_v1 }
 0x53c   : > { %v6719_v24 = vpop.f32.mrf.mxu3 }
 0x53f   : > { %v6683_v42 = vpop.f32.mrf.mxu1 }
 0x540   : > { %v6684_v32 = vadd.f32 %v6683_v42, %v6335_v22 }
 0x544   : > { %v6721_v21 = vpop.f32.mrf.mxu3 }
 0x54a   : > { %v6345_v26 = vpop.permute.xlu1 %6344 }
 0x54e   : > { %v6686_v33 = vpop.f32.mrf.mxu1 }
 0x54f   : > { %v6687_v29 = vadd.f32 %v6686_v33, %v6340_v55 }
 0x553   : > { %v6724_v13 = vpop.f32.mrf.mxu3 }
 0x556   : > { %v6688_v18 = vpop.f32.mrf.mxu1 }
 0x557   : > { %v6689_v58 = vadd.f32 %v6688_v18, %v6345_v26 }
 0x559   : > { %v6700_v53 = vpop.f32.mrf.mxu2 }
 0x55a   : > { %v6701_v25 = vadd.f32 %v6700_v53, %v6682_v38 }
 0x55b   : > { %v6726_v7 = vpop.f32.mrf.mxu3 }
 0x55c   : > { %v6720_v56 = vadd.f32 %v6719_v24, %v6701_v25 }
 0x55e   : > { %v6786_v45 = vmax.f32 %v6720_v56, 0.0  ;;  %v6738_v59 = vpop.f32.mrf.mxu1 }
 0x55f   : > { %v6739_v4 = vadd.f32 %v6738_v59, %v6330_v1 }
 0x560   : > { %6794 = vst [vmem:[%s11896_s18] sm:$0xff] %v6786_v45 }
 0x561   : > { %v6702_v48 = vpop.f32.mrf.mxu2 }
 0x562   : > { %v6703_v43 = vadd.f32 %v6702_v48, %v6684_v32 }
 0x563   : > { %v6776_v11 = vpop.f32.mrf.mxu3 }
 0x564   : > { %v6722_v49 = vadd.f32 %v6721_v21, %v6703_v43 }
 0x566   : > { %v6788_v52 = vmax.f32 %v6722_v49, 0.0  ;;  %v6740_v35 = vpop.f32.mrf.mxu1 }
 0x567   : > { %v6741_v19 = vadd.f32 %v6740_v35, %v6335_v22 }
 0x568   : > { %6796 = vst [vmem:[%s11896_s18 + $0x10] sm:$0xff] %v6788_v52 }
 0x569   : > { %v6705_v50 = vpop.f32.mrf.mxu2 }
 0x56a   : > { %v6706_v44 = vadd.f32 %v6705_v50, %v6687_v29 }
 0x56b   : > { %v6778_v27 = vpop.f32.mrf.mxu3 }
 0x56c   : > { %v6725_v47 = vadd.f32 %v6724_v13, %v6706_v44 }
 0x56e   : > { %v6790_v63 = vmax.f32 %v6725_v47, 0.0  ;;  %v6743_v9 = vpop.f32.mrf.mxu1 }
 0x56f   : > { %v6744_v8 = vadd.f32 %v6743_v9, %v6340_v55 }
 0x570   : > { %6798 = vst [vmem:[%s11896_s18 + $0x20] sm:$0xff] %v6790_v63 }
 0x571   : > { %v6707_v20 = vpop.f32.mrf.mxu2 }
 0x572   : > { %v6708_v36 = vadd.f32 %v6707_v20, %v6689_v58 }
 0x573   : > { %v6781_v14 = vpop.f32.mrf.mxu3 }
 0x574   : > { %v6727_v0 = vadd.f32 %v6726_v7, %v6708_v36 }
 0x576   : > { %v6792_v3 = vmax.f32 %v6727_v0, 0.0  ;;  %v6745_v37 = vpop.f32.mrf.mxu1 }
 0x577   : > { %v6746_v34 = vadd.f32 %v6745_v37, %v6345_v26 }
 0x578   : > { %6800 = vst [vmem:[%s11896_s18 + $0x30] sm:$0xff] %v6792_v3 }
 0x57b   : > { %v6783_v2 = vpop.f32.mrf.mxu3 }
 0x5a1   : > { %v6757_v5 = vpop.f32.mrf.mxu2 }
 0x5a2   : > { %v6758_v39 = vadd.f32 %v6757_v5, %v6739_v4 }
 0x5a4   : > { %v6777_v62 = vadd.f32 %v6776_v11, %v6758_v39 }
 0x5a6   : > { %v6787_v23 = vmax.f32 %v6777_v62, 0.0 }
 0x5a8   : > { %6795 = vst [vmem:[%s11896_s18 + $0x8] sm:$0xff] %v6787_v23 }
 0x5a9   : > { %v6759_v31 = vpop.f32.mrf.mxu2 }
 0x5aa   : > { %v6760_v51 = vadd.f32 %v6759_v31, %v6741_v19 }
 0x5ac   : > { %v6779_v17 = vadd.f32 %v6778_v27, %v6760_v51 }
 0x5ae   : > { %v6789_v10 = vmax.f32 %v6779_v17, 0.0 }
 0x5b0   : > { %6797 = vst [vmem:[%s11896_s18 + $0x18] sm:$0xff] %v6789_v10 }
 0x5b1   : > { %v6762_v30 = vpop.f32.mrf.mxu2 }
 0x5b2   : > { %v6763_v16 = vadd.f32 %v6762_v30, %v6744_v8 }
 0x5b4   : > { %v6782_v57 = vadd.f32 %v6781_v14, %v6763_v16 }
 0x5b6   : > { %v6791_v12 = vmax.f32 %v6782_v57, 0.0 }
 0x5b8   : > { %6799 = vst [vmem:[%s11896_s18 + $0x28] sm:$0xff] %v6791_v12 }
 0x5b9   : > { %v6764_v60 = vpop.f32.mrf.mxu2 }
 0x5ba   : > { %v6765_v46 = vadd.f32 %v6764_v60, %v6746_v34 }
 0x5bc   : > { %v6784_v61 = vadd.f32 %v6783_v2, %v6765_v46 }
 0x5be   : > { %v6793_v28 = vmax.f32 %v6784_v61, 0.0 }
 0x5c0   : > { %6801 = vst [vmem:[%s11896_s18 + $0x38] sm:$0xff] %v6793_v28 }
 0x5c1 PF: > { %s16_s21 = sadd.s32 1, %s7853_s21  }
 0x5c2   : > { %p13_p4 = scmp.ge.s32.totalorder %s16_s21, 4  }
 0x5c4   :  { %15 = sbr.rel (!%p13_p4) target bundleno = 1 (0x1), region = 81 }

</bundles_post_ra>
